<compile_context>
chip_gen: v7x
topology: tpu7x:2x2x1
jax: 0.10.0
libtpu: 0.0.40
codegen_flags: <defaults>
</compile_context>

<pallas_src>
from functools import partial

import jax
import jax.numpy as jnp
from jax.experimental import pallas as pl
from jax.experimental.pallas import tpu as pltpu

DIM = 512
HIDDEN = 2048
VOCAB = 100
VOCAB_PAD = 128          # lane-dense padded output head
EMB_ROWS = 128           # vocab rows padded for an aligned one-hot gather matmul
LN_EPS = 1e-5
SCALE = 1.0 / (DIM ** 0.5)   # matches PyTorch: attn / dim**0.5


# ----------------------------------------------------------------------------
# Launch 1: x = onehot(tok) @ emb ; h = relu(x @ W1 + b1)
#           {K,Q,V}[:, half n] = (h @ Wj_int8[:, half n]) * scale_j + bias_j
# Grid (3 projections, 2 N-halves); x/W1/emb resident (constant index_maps).
# ----------------------------------------------------------------------------
def _embed_w1_kqv_kernel(tok_ref, emb_ref, w1_ref, b1_ref,
                         wq_ref, sq_ref, bq_ref, o_ref):
    m = tok_ref.shape[0]
    nv = emb_ref.shape[0]
    # Embedding gather as a tiny one-hot matmul (tokens arrive as an (M,1) column).
    oneh = (tok_ref[...] ==
            jax.lax.broadcasted_iota(jnp.int32, (m, nv), 1)).astype(jnp.bfloat16)
    x = jnp.dot(oneh, emb_ref[...].astype(jnp.bfloat16),
                preferred_element_type=jnp.float32)                  # (M, D)
    h = jnp.dot(x.astype(jnp.bfloat16), w1_ref[...],
                preferred_element_type=jnp.float32)
    h = jnp.maximum(h + b1_ref[...], 0.0).astype(jnp.bfloat16)       # (M, H)
    # Weight-only int8 dequant: values -> bf16 on the VPU (hides under next DMA),
    # per-output-channel scale applied to the small (M, H/2) accumulator instead.
    w = wq_ref[0].astype(jnp.float32).astype(jnp.bfloat16)           # (H, H/2)
    y = jnp.dot(h, w, preferred_element_type=jnp.float32)
    y = y * sq_ref[0] + bq_ref[0]
    o_ref[0] = y.astype(o_ref.dtype)


def embed_w1_kqv(tok2d, emb, w1, b1, wkqv_q, skqv, bkqv):
    M = tok2d.shape[0]
    D, H = w1.shape
    HN = H // 2
    return pl.pallas_call(
        _embed_w1_kqv_kernel,
        out_shape=jax.ShapeDtypeStruct((3, M, H), jnp.bfloat16),
        grid_spec=pltpu.PrefetchScalarGridSpec(
            num_scalar_prefetch=0,
            grid=(3, 2),
            in_specs=[
                pl.BlockSpec((M, 1), lambda j, n: (0, 0)),           # tokens (resident)
                pl.BlockSpec((EMB_ROWS, D), lambda j, n: (0, 0)),    # emb    (resident)
                pl.BlockSpec((D, H), lambda j, n: (0, 0)),           # W1     (resident)
                pl.BlockSpec((1, H), lambda j, n: (0, 0)),           # b1
                pl.BlockSpec((1, H, HN), lambda j, n: (j, 0, n)),    # Wk/Wq/Wv int8 half
                pl.BlockSpec((1, 1, HN), lambda j, n: (j, 0, n)),    # per-col scales
                pl.BlockSpec((1, 1, HN), lambda j, n: (j, 0, n)),    # bk/bq/bv half
            ],
            out_specs=pl.BlockSpec((1, M, HN), lambda j, n: (j, 0, n)),
        ),
        compiler_params=pltpu.CompilerParams(
            dimension_semantics=("parallel", "parallel"),
            vmem_limit_bytes=48 * 1024 * 1024,   # > v5e 16 MiB default, < v7x 64 MiB physical
        ),
    )(tok2d, emb, w1, b1, wkqv_q, skqv, bkqv)


# ----------------------------------------------------------------------------
# Launch 2 (fused tail, grid over batch):
#   scores -> mask(tril diag=+1) -> exact softmax -> attn @ V
#   -> W2 + b2 + residual (embedding recomputed exactly in f32)
#   -> layer_norm over (S, D)  -> padded 128-lane output head.
# ----------------------------------------------------------------------------
def _attn_tail_kernel(kqv_ref, tok_ref, emb_ref, w2_ref, b2_ref,
                      wo_ref, bo_ref, o_ref, *, scale, eps):
    k = kqv_ref[0]                                # (S, H) bf16
    q = kqv_ref[1]
    v = kqv_ref[2]
    seq = q.shape[0]
    # Contract last dims directly (no explicit .T / XLU transpose).
    s = jax.lax.dot_general(q, k, (((1,), (1,)), ((), ())),
                            preferred_element_type=jnp.float32) * scale
    row = jax.lax.broadcasted_iota(jnp.int32, (seq, seq), 0)
    col = jax.lax.broadcasted_iota(jnp.int32, (seq, seq), 1)
    s = jnp.where(col <= row + 1, s, -jnp.inf)    # tril(ones, diagonal=1)
    p = jnp.exp(s - jnp.max(s, axis=-1, keepdims=True))
    p = p / jnp.sum(p, axis=-1, keepdims=True)    # exact softmax
    a = jnp.dot(p.astype(v.dtype), v, preferred_element_type=jnp.float32)
    z = jnp.dot(a.astype(jnp.bfloat16), w2_ref[...],
                preferred_element_type=jnp.float32) + b2_ref[...]
    # Residual = embedding rows, recomputed exactly in f32 (one-hot select).
    nv = emb_ref.shape[0]
    oneh = (tok_ref[...] ==
            jax.lax.broadcasted_iota(jnp.int32, (seq, nv), 1)).astype(jnp.float32)
    residual = jnp.dot(oneh, emb_ref[...], preferred_element_type=jnp.float32)
    x = z + residual                              # (S, D) f32
    mu = jnp.mean(x)
    xc = x - mu
    var = jnp.mean(xc * xc)
    xn = (xc * jax.lax.rsqrt(var + eps)).astype(jnp.bfloat16)
    logits = jnp.dot(xn, wo_ref[...], preferred_element_type=jnp.float32) + bo_ref[...]
    o_ref[0] = logits


def attn_tail(kqv, tok2d, emb, w2, b2, wo, bo, B, S):
    _, M, H = kqv.shape
    D = w2.shape[1]
    NP = wo.shape[1]
    return pl.pallas_call(
        partial(_attn_tail_kernel, scale=SCALE, eps=LN_EPS),
        out_shape=jax.ShapeDtypeStruct((B, S, NP), jnp.float32),
        grid_spec=pltpu.PrefetchScalarGridSpec(
            num_scalar_prefetch=0,
            grid=(B,),
            in_specs=[
                pl.BlockSpec((3, S, H), lambda b: (0, b, 0)),        # K/Q/V for batch b
                pl.BlockSpec((S, 1), lambda b: (b, 0)),              # tokens for batch b
                pl.BlockSpec((EMB_ROWS, D), lambda b: (0, 0)),       # emb (resident)
                pl.BlockSpec((H, D), lambda b: (0, 0)),              # W2  (resident)
                pl.BlockSpec((1, D), lambda b: (0, 0)),              # b2
                pl.BlockSpec((D, NP), lambda b: (0, 0)),             # Wo (padded, resident)
                pl.BlockSpec((1, NP), lambda b: (0, 0)),             # bo (padded)
            ],
            out_specs=pl.BlockSpec((1, S, NP), lambda b: (b, 0, 0)),
        ),
        compiler_params=pltpu.CompilerParams(
            dimension_semantics=("parallel",),
            vmem_limit_bytes=32 * 1024 * 1024,
        ),
    )(kqv, tok2d, emb, w2, b2, wo, bo)


# ----------------------------------------------------------------------------
# Parameter init: deterministic, PyTorch-style bounds; all packing/quantization
# done once here, outside the jitted forward.
# ----------------------------------------------------------------------------
def _quantize_cols(w):
    """Symmetric per-output-channel int8 quantization: w ~= q * scale."""
    amax = jnp.max(jnp.abs(w), axis=0, keepdims=True)
    scale = jnp.maximum(amax, 1e-8) / 127.0
    q = jnp.clip(jnp.round(w / scale), -127.0, 127.0).astype(jnp.int8)
    return q, scale.astype(jnp.float32)


def init_params(key):
    ks = jax.random.split(key, 13)

    def lin(kw, kb, fan_in, fan_out):
        bound = 1.0 / (fan_in ** 0.5)
        w = jax.random.uniform(kw, (fan_in, fan_out), jnp.float32, -bound, bound)
        b = jax.random.uniform(kb, (fan_out,), jnp.float32, -bound, bound)
        return w, b

    emb = jax.random.normal(ks[0], (VOCAB, DIM), jnp.float32)
    w1, b1 = lin(ks[1], ks[2], DIM, HIDDEN)
    wk, bk = lin(ks[3], ks[4], HIDDEN, HIDDEN)
    wq, bq = lin(ks[5], ks[6], HIDDEN, HIDDEN)
    wv, bv = lin(ks[7], ks[8], HIDDEN, HIDDEN)
    w2, b2 = lin(ks[9], ks[10], HIDDEN, DIM)
    wo, bo = lin(ks[11], ks[12], DIM, VOCAB)

    emb_pad = jnp.zeros((EMB_ROWS, DIM), jnp.float32).at[:VOCAB].set(emb)
    wo_pad = jnp.zeros((DIM, VOCAB_PAD), jnp.float32).at[:, :VOCAB].set(wo)
    bo_pad = jnp.zeros((VOCAB_PAD,), jnp.float32).at[:VOCAB].set(bo)

    qk, sk = _quantize_cols(wk)
    qq, sq = _quantize_cols(wq)
    qv, sv = _quantize_cols(wv)

    return {
        "emb": emb_pad,                                           # (128, D) f32
        "w1": w1.astype(jnp.bfloat16),
        "b1": b1.reshape(1, HIDDEN),
        "wkqv_q": jnp.stack([qk, qq, qv]),                        # (3, H, H) int8
        "skqv": jnp.stack([sk, sq, sv]).reshape(3, 1, HIDDEN),    # per-col f32 scales
        "bkqv": jnp.stack([bk, bq, bv]).reshape(3, 1, HIDDEN),    # f32 biases
        "w2": w2.astype(jnp.bfloat16),
        "b2": b2.reshape(1, DIM),
        "wo": wo_pad.astype(jnp.bfloat16),
        "bo": bo_pad.reshape(1, VOCAB_PAD),
    }


# ----------------------------------------------------------------------------
# Full forward pass: 2 pallas_calls + final zero-lane slice.
# ----------------------------------------------------------------------------
@jax.jit
def model_forward(tokens, params):
    B, S = tokens.shape
    M = B * S
    tok2d = tokens.reshape(M, 1).astype(jnp.int32)
    kqv = embed_w1_kqv(tok2d, params["emb"], params["w1"], params["b1"],
                       params["wkqv_q"], params["skqv"], params["bkqv"])  # (3, M, H) bf16
    logits_pad = attn_tail(kqv, tok2d, params["emb"], params["w2"], params["b2"],
                           params["wo"], params["bo"], B, S)              # (B, S, 128) f32
    return logits_pad[:, :, :VOCAB]


if __name__ == "__main__":
    key = jax.random.PRNGKey(0)
    pkey, tkey = jax.random.split(key)
    params = init_params(pkey)

    B, S = 2, 8
    tokens = jax.random.randint(tkey, (B, S), 0, VOCAB, dtype=jnp.int32)

    out = model_forward(tokens, params)
    out = jax.block_until_ready(out)
    assert out.shape == (B, S, VOCAB)
    assert bool(jnp.all(jnp.isfinite(out)))
    print("KERNEL_OK")
</pallas_src>

<mosaic_0001>
module attributes {stable_mosaic.version = 11 : i64} {
  func.func @_embed_w1_kqv_kernel(%arg0: i32, %arg1: i32, %arg2: memref<16x1xi32, #tpu.memory_space<vmem>>, %arg3: memref<128x512xf32, #tpu.memory_space<vmem>>, %arg4: memref<512x2048xbf16, #tpu.memory_space<vmem>>, %arg5: memref<1x2048xf32, #tpu.memory_space<vmem>>, %arg6: memref<1x2048x1024xi8, #tpu.memory_space<vmem>>, %arg7: memref<1x1x1024xf32, #tpu.memory_space<vmem>>, %arg8: memref<1x1x1024xf32, #tpu.memory_space<vmem>>, %arg9: memref<1x16x1024xbf16, #tpu.memory_space<vmem>>) attributes {dimension_semantics = [#tpu.dimension_semantics<parallel>, #tpu.dimension_semantics<parallel>], iteration_bounds = array<i64: 3, 2>, scalar_prefetch = 0 : i64, scratch_operands = 0 : i64, tpu.core_type = #tpu.core_type<tc>, window_params = [{pipeline_mode = #tpu.pipeline_mode<synchronous>, transform_indices = @transform_0, window_bounds = array<i64: 16, 1>}, {pipeline_mode = #tpu.pipeline_mode<synchronous>, transform_indices = @transform_1, window_bounds = array<i64: 128, 512>}, {pipeline_mode = #tpu.pipeline_mode<synchronous>, transform_indices = @transform_2, window_bounds = array<i64: 512, 2048>}, {pipeline_mode = #tpu.pipeline_mode<synchronous>, transform_indices = @transform_3, window_bounds = array<i64: 1, 2048>}, {transform_indices = @transform_4, window_bounds = array<i64: 1, 2048, 1024>}, {transform_indices = @transform_5, window_bounds = array<i64: 1, 1, 1024>}, {transform_indices = @transform_6, window_bounds = array<i64: 1, 1, 1024>}, {transform_indices = @transform_7, window_bounds = array<i64: 1, 16, 1024>}]} {
    %c0 = arith.constant 0 : index
    %c0_0 = arith.constant 0 : index
    %0 = vector.load %arg2[%c0, %c0_0] : memref<16x1xi32, #tpu.memory_space<vmem>>, vector<16x1xi32>
    %1 = tpu.iota {dimensions = array<i32: 1>} : vector<16x128xi32>
    %2 = vector.broadcast %0 : vector<16x1xi32> to vector<16x128xi32>
    %3 = arith.cmpi eq, %2, %1 : vector<16x128xi32>
    %4 = arith.extui %3 : vector<16x128xi1> to vector<16x128xi32>
    %5 = arith.sitofp %4 : vector<16x128xi32> to vector<16x128xf32>
    %6 = arith.truncf %5 : vector<16x128xf32> to vector<16x128xbf16>
    %c0_1 = arith.constant 0 : index
    %c0_2 = arith.constant 0 : index
    %7 = vector.load %arg3[%c0_1, %c0_2] : memref<128x512xf32, #tpu.memory_space<vmem>>, vector<128x512xf32>
    %8 = arith.truncf %7 : vector<128x512xf32> to vector<128x512xbf16>
    %cst = arith.constant dense<0.000000e+00> : vector<16x512xf32>
    %9 = tpu.matmul %6, %8, %cst {dimension_numbers = #tpu.dot_dimension_numbers<[1], [0], [0], [1], [0, 0, 1, 1], [], []>} : vector<16x128xbf16>, vector<128x512xbf16>, vector<16x512xf32> -> vector<16x512xf32>
    %10 = arith.truncf %9 : vector<16x512xf32> to vector<16x512xbf16>
    %c0_3 = arith.constant 0 : index
    %c0_4 = arith.constant 0 : index
    %11 = vector.load %arg4[%c0_3, %c0_4] : memref<512x2048xbf16, #tpu.memory_space<vmem>>, vector<512x2048xbf16>
    %cst_5 = arith.constant dense<0.000000e+00> : vector<16x2048xf32>
    %12 = tpu.matmul %10, %11, %cst_5 {dimension_numbers = #tpu.dot_dimension_numbers<[1], [0], [0], [1], [0, 0, 1, 1], [], []>} : vector<16x512xbf16>, vector<512x2048xbf16>, vector<16x2048xf32> -> vector<16x2048xf32>
    %c0_6 = arith.constant 0 : index
    %c0_7 = arith.constant 0 : index
    %13 = vector.load %arg5[%c0_6, %c0_7] : memref<1x2048xf32, #tpu.memory_space<vmem>>, vector<1x2048xf32>
    %14 = vector.broadcast %13 : vector<1x2048xf32> to vector<16x2048xf32>
    %15 = arith.addf %12, %14 : vector<16x2048xf32>
    %cst_8 = arith.constant 0.000000e+00 : f32
    %16 = vector.broadcast %cst_8 : f32 to vector<16x2048xf32>
    %17 = arith.maximumf %15, %16 : vector<16x2048xf32>
    %18 = arith.truncf %17 : vector<16x2048xf32> to vector<16x2048xbf16>
    %c0_9 = arith.constant 0 : index
    %c0_10 = arith.constant 0 : index
    %c0_11 = arith.constant 0 : index
    %19 = vector.load %arg6[%c0_9, %c0_10, %c0_11] : memref<1x2048x1024xi8, #tpu.memory_space<vmem>>, vector<1x2048x1024xi8>
    %20 = vector.shape_cast %19 : vector<1x2048x1024xi8> to vector<2048x1024xi8>
    %21 = arith.sitofp %20 : vector<2048x1024xi8> to vector<2048x1024xf32>
    %22 = arith.truncf %21 : vector<2048x1024xf32> to vector<2048x1024xbf16>
    %cst_12 = arith.constant dense<0.000000e+00> : vector<16x1024xf32>
    %23 = tpu.matmul %18, %22, %cst_12 {dimension_numbers = #tpu.dot_dimension_numbers<[1], [0], [0], [1], [0, 0, 1, 1], [], []>} : vector<16x2048xbf16>, vector<2048x1024xbf16>, vector<16x1024xf32> -> vector<16x1024xf32>
    %c0_13 = arith.constant 0 : index
    %c0_14 = arith.constant 0 : index
    %c0_15 = arith.constant 0 : index
    %24 = vector.load %arg7[%c0_13, %c0_14, %c0_15] : memref<1x1x1024xf32, #tpu.memory_space<vmem>>, vector<1x1x1024xf32>
    %25 = vector.shape_cast %24 : vector<1x1x1024xf32> to vector<1x1024xf32>
    %26 = vector.broadcast %25 : vector<1x1024xf32> to vector<16x1024xf32>
    %27 = arith.mulf %23, %26 : vector<16x1024xf32>
    %c0_16 = arith.constant 0 : index
    %c0_17 = arith.constant 0 : index
    %c0_18 = arith.constant 0 : index
    %28 = vector.load %arg8[%c0_16, %c0_17, %c0_18] : memref<1x1x1024xf32, #tpu.memory_space<vmem>>, vector<1x1x1024xf32>
    %29 = vector.shape_cast %28 : vector<1x1x1024xf32> to vector<1x1024xf32>
    %30 = vector.broadcast %29 : vector<1x1024xf32> to vector<16x1024xf32>
    %31 = arith.addf %27, %30 : vector<16x1024xf32>
    %32 = arith.truncf %31 : vector<16x1024xf32> to vector<16x1024xbf16>
    %c0_19 = arith.constant 0 : index
    %c0_20 = arith.constant 0 : index
    %c0_21 = arith.constant 0 : index
    %33 = vector.load %arg9[%c0_19, %c0_20, %c0_21] : memref<1x16x1024xbf16, #tpu.memory_space<vmem>>, vector<1x16x1024xbf16>
    %34 = vector.shape_cast %33 : vector<1x16x1024xbf16> to vector<16x1024xbf16>
    %35 = vector.shape_cast %32 : vector<16x1024xbf16> to vector<1x16x1024xbf16>
    tpu.vector_store %arg9[%c0_19, %c0_20, %c0_21], %35 {strides = array<i32>} : memref<1x16x1024xbf16, #tpu.memory_space<vmem>>, vector<1x16x1024xbf16>,
    return
  }
  func.func @transform_0(%arg0: i32, %arg1: i32) -> (i32, i32) {
    %c0_i32 = arith.constant 0 : i32
    %c0_i32_0 = arith.constant 0 : i32
    %c0_i32_1 = arith.constant 0 : i32
    return %c0_i32, %c0_i32_0 : i32, i32
  }
  func.func @transform_1(%arg0: i32, %arg1: i32) -> (i32, i32) {
    %c0_i32 = arith.constant 0 : i32
    %c0_i32_0 = arith.constant 0 : i32
    %c0_i32_1 = arith.constant 0 : i32
    return %c0_i32, %c0_i32_0 : i32, i32
  }
  func.func @transform_2(%arg0: i32, %arg1: i32) -> (i32, i32) {
    %c0_i32 = arith.constant 0 : i32
    %c0_i32_0 = arith.constant 0 : i32
    %c0_i32_1 = arith.constant 0 : i32
    return %c0_i32, %c0_i32_0 : i32, i32
  }
  func.func @transform_3(%arg0: i32, %arg1: i32) -> (i32, i32) {
    %c0_i32 = arith.constant 0 : i32
    %c0_i32_0 = arith.constant 0 : i32
    %c0_i32_1 = arith.constant 0 : i32
    return %c0_i32, %c0_i32_0 : i32, i32
  }
  func.func @transform_4(%arg0: i32, %arg1: i32) -> (i32, i32, i32) {
    %c0_i32 = arith.constant 0 : i32
    %c0_i32_0 = arith.constant 0 : i32
    return %arg0, %c0_i32, %arg1 : i32, i32, i32
  }
  func.func @transform_5(%arg0: i32, %arg1: i32) -> (i32, i32, i32) {
    %c0_i32 = arith.constant 0 : i32
    %c0_i32_0 = arith.constant 0 : i32
    return %arg0, %c0_i32, %arg1 : i32, i32, i32
  }
  func.func @transform_6(%arg0: i32, %arg1: i32) -> (i32, i32, i32) {
    %c0_i32 = arith.constant 0 : i32
    %c0_i32_0 = arith.constant 0 : i32
    return %arg0, %c0_i32, %arg1 : i32, i32, i32
  }
  func.func @transform_7(%arg0: i32, %arg1: i32) -> (i32, i32, i32) {
    %c0_i32 = arith.constant 0 : i32
    %c0_i32_0 = arith.constant 0 : i32
    return %arg0, %c0_i32, %arg1 : i32, i32, i32
  }
}

module attributes {stable_mosaic.version = 11 : i64} {
  func.func @_attn_tail_kernel(%arg0: i32, %arg1: memref<3x8x2048xbf16, #tpu.memory_space<vmem>>, %arg2: memref<8x1xi32, #tpu.memory_space<vmem>>, %arg3: memref<128x512xf32, #tpu.memory_space<vmem>>, %arg4: memref<2048x512xbf16, #tpu.memory_space<vmem>>, %arg5: memref<1x512xf32, #tpu.memory_space<vmem>>, %arg6: memref<512x128xbf16, #tpu.memory_space<vmem>>, %arg7: memref<1x128xf32, #tpu.memory_space<vmem>>, %arg8: memref<1x8x128xf32, #tpu.memory_space<vmem>>) attributes {dimension_semantics = [#tpu.dimension_semantics<parallel>], iteration_bounds = array<i64: 2>, scalar_prefetch = 0 : i64, scratch_operands = 0 : i64, tpu.core_type = #tpu.core_type<tc>, window_params = [{transform_indices = @transform_0, window_bounds = array<i64: 3, 8, 2048>}, {transform_indices = @transform_1, window_bounds = array<i64: 8, 1>}, {pipeline_mode = #tpu.pipeline_mode<synchronous>, transform_indices = @transform_2, window_bounds = array<i64: 128, 512>}, {pipeline_mode = #tpu.pipeline_mode<synchronous>, transform_indices = @transform_3, window_bounds = array<i64: 2048, 512>}, {pipeline_mode = #tpu.pipeline_mode<synchronous>, transform_indices = @transform_4, window_bounds = array<i64: 1, 512>}, {pipeline_mode = #tpu.pipeline_mode<synchronous>, transform_indices = @transform_5, window_bounds = array<i64: 512, 128>}, {pipeline_mode = #tpu.pipeline_mode<synchronous>, transform_indices = @transform_6, window_bounds = array<i64: 1, 128>}, {transform_indices = @transform_7, window_bounds = array<i64: 1, 8, 128>}]} {
    %c0 = arith.constant 0 : index
    %c0_0 = arith.constant 0 : index
    %c0_1 = arith.constant 0 : index
    %0 = vector.load %arg1[%c0, %c0_0, %c0_1] : memref<3x8x2048xbf16, #tpu.memory_space<vmem>>, vector<1x8x2048xbf16>
    %1 = vector.shape_cast %0 : vector<1x8x2048xbf16> to vector<8x2048xbf16>
    %c1 = arith.constant 1 : index
    %c0_2 = arith.constant 0 : index
    %c0_3 = arith.constant 0 : index
    %2 = vector.load %arg1[%c1, %c0_2, %c0_3] : memref<3x8x2048xbf16, #tpu.memory_space<vmem>>, vector<1x8x2048xbf16>
    %3 = vector.shape_cast %2 : vector<1x8x2048xbf16> to vector<8x2048xbf16>
    %c2 = arith.constant 2 : index
    %c0_4 = arith.constant 0 : index
    %c0_5 = arith.constant 0 : index
    %4 = vector.load %arg1[%c2, %c0_4, %c0_5] : memref<3x8x2048xbf16, #tpu.memory_space<vmem>>, vector<1x8x2048xbf16>
    %5 = vector.shape_cast %4 : vector<1x8x2048xbf16> to vector<8x2048xbf16>
    %cst = arith.constant dense<0.000000e+00> : vector<8x8xf32>
    %6 = tpu.matmul %3, %1, %cst {dimension_numbers = #tpu.dot_dimension_numbers<[1], [1], [0], [0], [0, 0, 1, 0], [], []>} : vector<8x2048xbf16>, vector<8x2048xbf16>, vector<8x8xf32> -> vector<8x8xf32>
    %cst_6 = arith.constant 0.0441941731 : f32
    %7 = vector.broadcast %cst_6 : f32 to vector<8x8xf32>
    %8 = arith.mulf %6, %7 : vector<8x8xf32>
    %9 = tpu.iota {dimensions = array<i32: 0>} : vector<8x8xi32>
    %10 = tpu.iota {dimensions = array<i32: 1>} : vector<8x8xi32>
    %c1_i32 = arith.constant 1 : i32
    %11 = vector.broadcast %c1_i32 : i32 to vector<8x8xi32>
    %12 = arith.addi %9, %11 : vector<8x8xi32>
    %13 = arith.cmpi sle, %10, %12 : vector<8x8xi32>
    %cst_7 = arith.constant 0xFF800000 : f32
    %14 = vector.broadcast %cst_7 : f32 to vector<8x8xf32>
    %15 = arith.select %13, %8, %14 : vector<8x8xi1>, vector<8x8xf32>
    %cst_8 = arith.constant dense<0xFF800000> : vector<8xf32>
    %16 = vector.multi_reduction <maximumf>, %15, %cst_8 [1] : vector<8x8xf32> to vector<8xf32>
    %17 = vector.shape_cast %16 : vector<8xf32> to vector<8x1xf32>
    %18 = vector.broadcast %17 : vector<8x1xf32> to vector<8x8xf32>
    %19 = arith.subf %15, %18 : vector<8x8xf32>
    %20 = math.exp %19 : vector<8x8xf32>
    %cst_9 = arith.constant dense<0.000000e+00> : vector<8xf32>
    %21 = vector.multi_reduction <add>, %20, %cst_9 [1] : vector<8x8xf32> to vector<8xf32>
    %22 = vector.shape_cast %21 : vector<8xf32> to vector<8x1xf32>
    %23 = vector.broadcast %22 : vector<8x1xf32> to vector<8x8xf32>
    %24 = arith.divf %20, %23 : vector<8x8xf32>
    %25 = arith.truncf %24 : vector<8x8xf32> to vector<8x8xbf16>
    %cst_10 = arith.constant dense<0.000000e+00> : vector<8x2048xf32>
    %26 = tpu.matmul %25, %5, %cst_10 {dimension_numbers = #tpu.dot_dimension_numbers<[1], [0], [0], [1], [0, 0, 1, 1], [], []>} : vector<8x8xbf16>, vector<8x2048xbf16>, vector<8x2048xf32> -> vector<8x2048xf32>
    %27 = arith.truncf %26 : vector<8x2048xf32> to vector<8x2048xbf16>
    %c0_11 = arith.constant 0 : index
    %c0_12 = arith.constant 0 : index
    %28 = vector.load %arg4[%c0_11, %c0_12] : memref<2048x512xbf16, #tpu.memory_space<vmem>>, vector<2048x512xbf16>
    %cst_13 = arith.constant dense<0.000000e+00> : vector<8x512xf32>
    %29 = tpu.matmul %27, %28, %cst_13 {dimension_numbers = #tpu.dot_dimension_numbers<[1], [0], [0], [1], [0, 0, 1, 1], [], []>} : vector<8x2048xbf16>, vector<2048x512xbf16>, vector<8x512xf32> -> vector<8x512xf32>
    %c0_14 = arith.constant 0 : index
    %c0_15 = arith.constant 0 : index
    %30 = vector.load %arg5[%c0_14, %c0_15] : memref<1x512xf32, #tpu.memory_space<vmem>>, vector<1x512xf32>
    %31 = vector.broadcast %30 : vector<1x512xf32> to vector<8x512xf32>
    %32 = arith.addf %29, %31 : vector<8x512xf32>
    %c0_16 = arith.constant 0 : index
    %c0_17 = arith.constant 0 : index
    %33 = vector.load %arg2[%c0_16, %c0_17] : memref<8x1xi32, #tpu.memory_space<vmem>>, vector<8x1xi32>
    %34 = tpu.iota {dimensions = array<i32: 1>} : vector<8x128xi32>
    %35 = vector.broadcast %33 : vector<8x1xi32> to vector<8x128xi32>
    %36 = arith.cmpi eq, %35, %34 : vector<8x128xi32>
    %37 = arith.extui %36 : vector<8x128xi1> to vector<8x128xi32>
    %38 = arith.sitofp %37 : vector<8x128xi32> to vector<8x128xf32>
    %c0_18 = arith.constant 0 : index
    %c0_19 = arith.constant 0 : index
    %39 = vector.load %arg3[%c0_18, %c0_19] : memref<128x512xf32, #tpu.memory_space<vmem>>, vector<128x512xf32>
    %cst_20 = arith.constant dense<0.000000e+00> : vector<8x512xf32>
    %40 = tpu.matmul %38, %39, %cst_20 {dimension_numbers = #tpu.dot_dimension_numbers<[1], [0], [0], [1], [0, 0, 1, 1], [], []>} : vector<8x128xf32>, vector<128x512xf32>, vector<8x512xf32> -> vector<8x512xf32>
    %41 = arith.addf %32, %40 : vector<8x512xf32>
    %42 = vector.shape_cast %41 : vector<8x512xf32> to vector<1x8x512xf32>
    %cst_21 = arith.constant dense<0.000000e+00> : vector<1xf32>
    %43 = vector.multi_reduction <add>, %42, %cst_21 [1, 2] : vector<1x8x512xf32> to vector<1xf32>
    %44 = vector.shape_cast %43 : vector<1xf32> to vector<1x1x1xf32>
    %45 = vector.extract %44[0, 0, 0] : f32 from vector<1x1x1xf32>
    %cst_22 = arith.constant 4.096000e+03 : f32
    %46 = arith.divf %45, %cst_22 : f32
    %47 = vector.broadcast %46 : f32 to vector<8x512xf32>
    %48 = arith.subf %41, %47 : vector<8x512xf32>
    %49 = arith.mulf %48, %48 : vector<8x512xf32>
    %50 = vector.shape_cast %49 : vector<8x512xf32> to vector<1x8x512xf32>
    %cst_23 = arith.constant dense<0.000000e+00> : vector<1xf32>
    %51 = vector.multi_reduction <add>, %50, %cst_23 [1, 2] : vector<1x8x512xf32> to vector<1xf32>
    %52 = vector.shape_cast %51 : vector<1xf32> to vector<1x1x1xf32>
    %53 = vector.extract %52[0, 0, 0] : f32 from vector<1x1x1xf32>
    %cst_24 = arith.constant 4.096000e+03 : f32
    %54 = arith.divf %53, %cst_24 : f32
    %cst_25 = arith.constant 9.99999974E-6 : f32
    %55 = arith.addf %54, %cst_25 : f32
    %56 = math.rsqrt %55 : f32
    %57 = vector.broadcast %56 : f32 to vector<8x512xf32>
    %58 = arith.mulf %48, %57 : vector<8x512xf32>
    %59 = arith.truncf %58 : vector<8x512xf32> to vector<8x512xbf16>
    %c0_26 = arith.constant 0 : index
    %c0_27 = arith.constant 0 : index
    %60 = vector.load %arg6[%c0_26, %c0_27] : memref<512x128xbf16, #tpu.memory_space<vmem>>, vector<512x128xbf16>
    %cst_28 = arith.constant dense<0.000000e+00> : vector<8x128xf32>
    %61 = tpu.matmul %59, %60, %cst_28 {dimension_numbers = #tpu.dot_dimension_numbers<[1], [0], [0], [1], [0, 0, 1, 1], [], []>} : vector<8x512xbf16>, vector<512x128xbf16>, vector<8x128xf32> -> vector<8x128xf32>
    %c0_29 = arith.constant 0 : index
    %c0_30 = arith.constant 0 : index
    %62 = vector.load %arg7[%c0_29, %c0_30] : memref<1x128xf32, #tpu.memory_space<vmem>>, vector<1x128xf32>
    %63 = vector.broadcast %62 : vector<1x128xf32> to vector<8x128xf32>
    %64 = arith.addf %61, %63 : vector<8x128xf32>
    %c0_31 = arith.constant 0 : index
    %c0_32 = arith.constant 0 : index
    %c0_33 = arith.constant 0 : index
    %65 = vector.load %arg8[%c0_31, %c0_32, %c0_33] : memref<1x8x128xf32, #tpu.memory_space<vmem>>, vector<1x8x128xf32>
    %66 = vector.shape_cast %65 : vector<1x8x128xf32> to vector<8x128xf32>
    %67 = vector.shape_cast %64 : vector<8x128xf32> to vector<1x8x128xf32>
    tpu.vector_store %arg8[%c0_31, %c0_32, %c0_33], %67 {strides = array<i32>} : memref<1x8x128xf32, #tpu.memory_space<vmem>>, vector<1x8x128xf32>,
    return
  }
  func.func @transform_0(%arg0: i32) -> (i32, i32, i32) {
    %c0_i32 = arith.constant 0 : i32
    %c0_i32_0 = arith.constant 0 : i32
    %c0_i32_1 = arith.constant 0 : i32
    return %c0_i32, %arg0, %c0_i32_0 : i32, i32, i32
  }
  func.func @transform_1(%arg0: i32) -> (i32, i32) {
    %c0_i32 = arith.constant 0 : i32
    %c0_i32_0 = arith.constant 0 : i32
    return %arg0, %c0_i32 : i32, i32
  }
  func.func @transform_2(%arg0: i32) -> (i32, i32) {
    %c0_i32 = arith.constant 0 : i32
    %c0_i32_0 = arith.constant 0 : i32
    %c0_i32_1 = arith.constant 0 : i32
    return %c0_i32, %c0_i32_0 : i32, i32
  }
  func.func @transform_3(%arg0: i32) -> (i32, i32) {
    %c0_i32 = arith.constant 0 : i32
    %c0_i32_0 = arith.constant 0 : i32
    %c0_i32_1 = arith.constant 0 : i32
    return %c0_i32, %c0_i32_0 : i32, i32
  }
  func.func @transform_4(%arg0: i32) -> (i32, i32) {
    %c0_i32 = arith.constant 0 : i32
    %c0_i32_0 = arith.constant 0 : i32
    %c0_i32_1 = arith.constant 0 : i32
    return %c0_i32, %c0_i32_0 : i32, i32
  }
  func.func @transform_5(%arg0: i32) -> (i32, i32) {
    %c0_i32 = arith.constant 0 : i32
    %c0_i32_0 = arith.constant 0 : i32
    %c0_i32_1 = arith.constant 0 : i32
    return %c0_i32, %c0_i32_0 : i32, i32
  }
  func.func @transform_6(%arg0: i32) -> (i32, i32) {
    %c0_i32 = arith.constant 0 : i32
    %c0_i32_0 = arith.constant 0 : i32
    %c0_i32_1 = arith.constant 0 : i32
    return %c0_i32, %c0_i32_0 : i32, i32
  }
  func.func @transform_7(%arg0: i32) -> (i32, i32, i32) {
    %c0_i32 = arith.constant 0 : i32
    %c0_i32_0 = arith.constant 0 : i32
    %c0_i32_1 = arith.constant 0 : i32
    return %arg0, %c0_i32, %c0_i32_0 : i32, i32, i32
  }
}

</mosaic_0001>

<bundles_post_ra>
// kernel: model_forward.3
= control target key start
LH: loop header
LB: loop body
LE: loop exit
PB: predicated region body
PF: predicated region fallthrough
CT: control target
= control target key end

     0   :  { %12 = vsyncpa [#allocation4], 0  ;;  %s9733_s0 = inlined_call_operand.vmem [shape: bf16[3,16,2048], index: 0, kind: input, shape index: {}]   ;;  %s9734_s1 = inlined_call_operand.vmem [shape: s32[16,1], index: 1, kind: input, shape index: {}]   ;;  %s9735_s2 = inlined_call_operand.vmem [shape: f32[128,512], index: 2, kind: input, shape index: {}]   ;;  %s9736_s3 = inlined_call_operand.vmem [shape: bf16[2048,512], index: 3, kind: input, shape index: {}]   ;;  %s9737_s4 = inlined_call_operand.vmem [shape: f32[1,512], index: 4, kind: input, shape index: {}]   ;;  %s9738_s5 = inlined_call_operand.vmem [shape: bf16[512,128], index: 5, kind: input, shape index: {}]   ;;  %s9739_s6 = inlined_call_operand.vmem [shape: f32[1,128], index: 6, kind: input, shape index: {}]   ;;  %s9740_s7 = inlined_call_operand.hbm [shape: f32[2,8,128], index: 7, kind: output, shape index: {}]  }
   0x1   :  { %14 = vsyncpa [#allocation4 + $0x1], 0  ;;  %s7581_s24 = smov 0   ;;  %s7583_s25 = smov 0  }
   0x2   :  { %s7585_s26 = smov 0   ;;  %s7587_s27 = smov 0  }
   0x3 LB: > { %s7602_s28 = sadd.s32 4294967295, %s7535_s27   ;;  %s5730_s29 = sadd.s32 4294967294, %s7535_s27   ;;  %s7535_s27 = sphi %s7587_s27, %s9746_s27   ;;  %s7531_s26 = sphi %s7585_s26, %s9745_s26   ;;  %s7527_s25 = sphi %s7583_s25, %s9744_s25   ;;  %s7523_s24 = sphi %s7581_s24, %s9743_s24  }
   0x4   : > { %s7606_s30 = sadd.s32 1, %s7535_s27   ;;  %s27_s8 = sadd.s32 1, %s7531_s26 }
   0x5   : > { %s24_s9 = ssub.s32 %s7535_s27, %s7606_s30  ;;  %p34_p0 = scmp.ne.s32.totalorder %s7531_s26, %s7527_s25 }
   0x6   : > { %p25_p1 = scmp.eq.s32.totalorder %s24_s9, 0  ;;  %p35_p2 = scmp.eq.s32.totalorder %s7535_s27, 0 }
   0x7   : > { %p195_p3 = scmp.eq.s32.totalorder %s7602_s28, 1  ;;  %p200_p4 = scmp.ne.s32.totalorder %s7527_s25, %s7523_s24 }
   0x8   : > { %s7618_s10 = scalar_select %p25_p1, %s7531_s26, %s27_s8  }
   0x9   : > { %p36_p5 = por %p35_p2, %p34_p0  ;;  %p7620_p6 = por %p195_p3, %p34_p0 }
   0xa   : > { %p201_p7 = scmp.eq.s32.totalorder %s5730_s29, 1  ;;  %p5732_p9 = scmp.ge.s32.totalorder %s7535_s27, 2 }
   0xc   : > { %p7624_p8 = por %p201_p7, %p200_p4  ;;  %232 = sbr.rel (%p5732_p9) target bundleno = 36 (0x24), region = 36 }
  0x13   : > { %235 = sbr.rel (!%p36_p5) target bundleno = 36 (0x24), region = 40  ;;  %s237_s13 = sand.u32 (%p36_p5), 1, %s7531_s26  }
  0x14   : > { %s6370_s14 = sshll.u32 (%p36_p5), %s7535_s27, 6  ;;  %s6567_s15 = smul.u32 (%p36_p5), 192, %s237_s13 }
  0x15   : > { %s7636_s18 = scalar_lea.vmem (%p36_p5), %s9733_s0, %s6370_s14 }
  0x16   : > { %v255_v0 = vld [vmem:[%s7636_s18] sm:$0xff] (%p36_p5)  ;;  %v257_v1 = vld [vmem:[%s7636_s18 + $0x8] sm:$0xff] (%p36_p5)  ;;  %v259_v2 = vld [vmem:[%s7636_s18 + $0x10] sm:$0xff] (%p36_p5)  ;;  %s7644_s19 = scalar_lea.vmem (%p36_p5), [#allocation2], %s6567_s15 }
  0x17   : > { %v261_v3 = vld [vmem:[%s7636_s18 + $0x18] sm:$0xff] (%p36_p5)  ;;  %v263_v4 = vld [vmem:[%s7636_s18 + $0x20] sm:$0xff] (%p36_p5)  ;;  %v265_v5 = vld [vmem:[%s7636_s18 + $0x28] sm:$0xff] (%p36_p5)  ;;  %256 = vst [vmem:[%s7644_s19] sm:$0xff] (%p36_p5), %v255_v0 }
  0x18   : > { %258 = vst [vmem:[%s7644_s19 + $0x8] sm:$0xff] (%p36_p5), %v257_v1  ;;  %260 = vst [vmem:[%s7644_s19 + $0x10] sm:$0xff] (%p36_p5), %v259_v2  ;;  %v267_v6 = vld [vmem:[%s7636_s18 + $0x30] sm:$0xff] (%p36_p5)  ;;  %v269_v7 = vld [vmem:[%s7636_s18 + $0x38] sm:$0xff] (%p36_p5) }
  0x19   : > { %262 = vst [vmem:[%s7644_s19 + $0x18] sm:$0xff] (%p36_p5), %v261_v3  ;;  %264 = vst [vmem:[%s7644_s19 + $0x20] sm:$0xff] (%p36_p5), %v263_v4  ;;  %v271_v8 = vld [vmem:[%s7636_s18 + $0x80] sm:$0xff] (%p36_p5)  ;;  %v273_v9 = vld [vmem:[%s7636_s18 + $0x88] sm:$0xff] (%p36_p5) }
  0x1a   : > { %266 = vst [vmem:[%s7644_s19 + $0x28] sm:$0xff] %v265_v5  ;;  %268 = vst [vmem:[%s7644_s19 + $0x30] sm:$0xff] %v267_v6  ;;  %v275_v10 = vld [vmem:[%s7636_s18 + $0x90] sm:$0xff]  ;;  %v277_v11 = vld [vmem:[%s7636_s18 + $0x98] sm:$0xff] }
  0x1b   : > { %270 = vst [vmem:[%s7644_s19 + $0x38] sm:$0xff] %v269_v7  ;;  %272 = vst [vmem:[%s7644_s19 + $0x40] sm:$0xff] %v271_v8  ;;  %v279_v12 = vld [vmem:[%s7636_s18 + $0xa0] sm:$0xff]  ;;  %v281_v13 = vld [vmem:[%s7636_s18 + $0xa8] sm:$0xff] }
  0x1c   : > { %274 = vst [vmem:[%s7644_s19 + $0x48] sm:$0xff] %v273_v9  ;;  %276 = vst [vmem:[%s7644_s19 + $0x50] sm:$0xff] %v275_v10  ;;  %v283_v14 = vld [vmem:[%s7636_s18 + $0xb0] sm:$0xff]  ;;  %v285_v15 = vld [vmem:[%s7636_s18 + $0xb8] sm:$0xff] }
  0x1d   : > { %278 = vst [vmem:[%s7644_s19 + $0x58] sm:$0xff] %v277_v11  ;;  %280 = vst [vmem:[%s7644_s19 + $0x60] sm:$0xff] %v279_v12  ;;  %v287_v16 = vld [vmem:[%s7636_s18 + $0x100] sm:$0xff]  ;;  %v289_v17 = vld [vmem:[%s7636_s18 + $0x108] sm:$0xff] }
  0x1e   : > { %282 = vst [vmem:[%s7644_s19 + $0x68] sm:$0xff] %v281_v13  ;;  %284 = vst [vmem:[%s7644_s19 + $0x70] sm:$0xff] %v283_v14  ;;  %v291_v18 = vld [vmem:[%s7636_s18 + $0x110] sm:$0xff]  ;;  %v293_v19 = vld [vmem:[%s7636_s18 + $0x118] sm:$0xff] }
  0x1f   : > { %286 = vst [vmem:[%s7644_s19 + $0x78] sm:$0xff] %v285_v15  ;;  %288 = vst [vmem:[%s7644_s19 + $0x80] sm:$0xff] %v287_v16  ;;  %v295_v20 = vld [vmem:[%s7636_s18 + $0x120] sm:$0xff]  ;;  %v297_v21 = vld [vmem:[%s7636_s18 + $0x128] sm:$0xff] }
  0x20   : > { %290 = vst [vmem:[%s7644_s19 + $0x88] sm:$0xff] %v289_v17  ;;  %292 = vst [vmem:[%s7644_s19 + $0x90] sm:$0xff] %v291_v18  ;;  %v299_v22 = vld [vmem:[%s7636_s18 + $0x130] sm:$0xff]  ;;  %v301_v23 = vld [vmem:[%s7636_s18 + $0x138] sm:$0xff] }
  0x21   : > { %294 = vst [vmem:[%s7644_s19 + $0x98] sm:$0xff] %v293_v19  ;;  %296 = vst [vmem:[%s7644_s19 + $0xa0] sm:$0xff] %v295_v20 }
  0x22   : > { %298 = vst [vmem:[%s7644_s19 + $0xa8] sm:$0xff] %v297_v21  ;;  %300 = vst [vmem:[%s7644_s19 + $0xb0] sm:$0xff] %v299_v22 }
  0x23   : > { %302 = vst [vmem:[%s7644_s19 + $0xb8] sm:$0xff] %v301_v23 }
  0x24 PF: > { %p5735_p10 = scmp.ge.s32.totalorder %s7535_s27, 1  ;;  %p314_p11 = scmp.lt.s32.totalorder %s7535_s27, 3 }
  0x26   : > { %p315_p12 = pnand %p5735_p10, %p314_p11 }
  0x27   : > { %s7691_s20 = sand.u32 (!%p315_p12), 1, %s7527_s25   ;;  %v820_v8 = vlaneseq (!%p315_p12)  ;;  %vm827_vm1 = vcmask (!%p315_p12), 64512   ;;  %vm883_vm2 = vcmask (!%p315_p12), 1043456   ;;  %p356_p13 = scmp.lt.s32.totalorder (!%p315_p12), %s7602_s28, 1 }
  0x28   : > { %318 = sbr.rel (%p315_p12) target bundleno = 2313 (0x909), region = 67  ;;  %s6367_s8 = sshll.u32 (!%p315_p12), %s7602_s28, 7 }
  0x29   : > { %s6568_s21 = smul.u32 (!%p315_p12), 192, %s7691_s20  ;;  %v7712_v9 = vshrl.u32 (!%p315_p12), %v820_v8, 7  ;;  %v7714_v10 = vand.u32 (!%p315_p12), 127, %v820_v8 }
  0x2b   : > { %s7694_s22 = scalar_lea.vmem (!%p315_p12), [#allocation2], %s6568_s21  ;;  %v824_v11 = vadd.s32 (!%p315_p12), 1, %v7712_v9 }
  0x2c   : > { %v361_v24 = vld [vmem:[%s7694_s22] sm:$0xff] (!%p315_p12)  ;;  %v362_v26 = vld [vmem:[%s7694_s22 + $0x8] sm:$0xff] (!%p315_p12)  ;;  %v363_v32 = vld [vmem:[%s7694_s22 + $0x10] sm:$0xff] (!%p315_p12) }
  0x2d   : > { %v5738_v25 = vld [vmem:[%s7694_s22 + $0x40] sm:$0xff] (!%p315_p12)  ;;  %v5771_v27 = vcombine.high (!%p315_p12), %v361_v24, %v361_v24  ;;  %v5770_v28 = vcombine.low (!%p315_p12), %v361_v24, %v361_v24  ;;  %v5773_v30 = vcombine.high (!%p315_p12), %v362_v26, %v362_v26  ;;  %v5739_v31 = vld [vmem:[%s7694_s22 + $0x48] sm:$0xff] (!%p315_p12)  ;;  %v5772_v34 = vcombine.low (!%p315_p12), %v362_v26, %v362_v26  ;;  %v5740_v37 = vld [vmem:[%s7694_s22 + $0x50] sm:$0xff] (!%p315_p12) }
  0x2e   : > { %v5755_v29 = vcombine.high (!%p315_p12), %v5738_v25, %v5738_v25  ;;  %v5754_v33 = vcombine.low (!%p315_p12), %v5738_v25, %v5738_v25  ;;  %v5757_v35 = vcombine.high (!%p315_p12), %v5739_v31, %v5739_v31  ;;  %v5775_v36 = vcombine.high (!%p315_p12), %v363_v32, %v363_v32  ;;  %v364_v38 = vld [vmem:[%s7694_s22 + $0x18] sm:$0xff] (!%p315_p12)  ;;  %v365_v44 = vld [vmem:[%s7694_s22 + $0x20] sm:$0xff] (!%p315_p12)  ;;  %v366_v50 = vld [vmem:[%s7694_s22 + $0x28] sm:$0xff] (!%p315_p12) }
  0x2f   : > { %499 = vmatprep.subr.bf16.mxu0 %v5771_v27  ;;  %v5756_v39 = vcombine.low %v5739_v31, %v5739_v31  ;;  %v5774_v40 = vcombine.low %v363_v32, %v363_v32  ;;  %v5759_v41 = vcombine.high %v5740_v37, %v5740_v37  ;;  %v5777_v42 = vcombine.high %v364_v38, %v364_v38  ;;  %v5741_v43 = vld [vmem:[%s7694_s22 + $0x58] sm:$0xff]  ;;  %v5742_v49 = vld [vmem:[%s7694_s22 + $0x60] sm:$0xff]  ;;  %v5743_v55 = vld [vmem:[%s7694_s22 + $0x68] sm:$0xff] }
  0x30   : > { %531 = vmatprep.mubr.bf16.mxu0 %v5755_v29  ;;  %500 = vmatpush1.bf16.xpose.msra.mxu0 %v5770_v28  ;;  %v5758_v45 = vcombine.low %v5740_v37, %v5740_v37  ;;  %v5776_v46 = vcombine.low %v364_v38, %v364_v38  ;;  %v5761_v47 = vcombine.high %v5741_v43, %v5741_v43  ;;  %v367_v56 = vld [vmem:[%s7694_s22 + $0x30] sm:$0xff]  ;;  %v368_v62 = vld [vmem:[%s7694_s22 + $0x38] sm:$0xff]  ;;  %v5746_v24 = vld [vmem:[%s7694_s22 + $0x80] sm:$0xff]  ;;  %v7537_v28 = vmov 0  }
  0x31   : > { %539 = vmatprep.subr.bf16.mxu0 %v5773_v30  ;;  %v5779_v48 = vcombine.high %v365_v44, %v365_v44  ;;  %v5760_v51 = vcombine.low %v5741_v43, %v5741_v43  ;;  %v5778_v52 = vcombine.low %v365_v44, %v365_v44  ;;  %v5763_v53 = vcombine.high %v5742_v49, %v5742_v49  ;;  %v5744_v61 = vld [vmem:[%s7694_s22 + $0x70] sm:$0xff]  ;;  %v5745_v3 = vld [vmem:[%s7694_s22 + $0x78] sm:$0xff]  ;;  %v7729_v29 = vld [vmem:[%s7694_s22 + $0x88] sm:$0xff] }
  0x32   : > { %v5781_v54 = vcombine.high %v366_v50, %v366_v50  ;;  %v5762_v57 = vcombine.low %v5742_v49, %v5742_v49  ;;  %v5780_v58 = vcombine.low %v366_v50, %v366_v50  ;;  %v5765_v59 = vcombine.high %v5743_v55, %v5743_v55  ;;  %964 = vmatprep.mubr.bf16.mxu1 %v7537_v28  ;;  %v6670_v31 = vld [vmem:[%s9736_s3 + $0x8] ss:$16 sps:$4 sm:$0xff]   ;;  %v6672_v32 = vld [vmem:[%s9736_s3 + $0xc] ss:$16 sps:$4 sm:$0xff]  }
  0x33   : > { %v5783_v60 = vcombine.high %v367_v56, %v367_v56  ;;  %v5764_v63 = vcombine.low %v5743_v55, %v5743_v55  ;;  %v5782_v0 = vcombine.low %v367_v56, %v367_v56  ;;  %v5767_v1 = vcombine.high %v5744_v61, %v5744_v61  ;;  %6617 = vset.pattern.permute.xlu1 %v7537_v28  ;;  %v6690_v37 = vld [vmem:[%s9736_s3 + $0x6c] ss:$16 sps:$4 sm:$0xff]   ;;  %v6688_v38 = vld [vmem:[%s9736_s3 + $0x68] ss:$16 sps:$4 sm:$0xff]  }
  0x34   : > { %v5785_v2 = vcombine.high %v368_v62, %v368_v62  ;;  %v5766_v4 = vcombine.low %v5744_v61, %v5744_v61  ;;  %v5784_v5 = vcombine.low %v368_v62, %v368_v62  ;;  %v5769_v6 = vcombine.high %v5745_v3, %v5745_v3  ;;  %6618 = vset.pattern.permute.xlu0 %v7537_v28  ;;  %v6708_v43 = vld [vmem:[%s9736_s3 + $0xcc] ss:$16 sps:$4 sm:$0xff]   ;;  %v6706_v44 = vld [vmem:[%s9736_s3 + $0xc8] ss:$16 sps:$4 sm:$0xff]  }
  0x35   : > { %v5768_v7 = vcombine.low %v5745_v3, %v5745_v3  ;;  %vm825_vm0 = vcmp.le.s32.totalorder %v7714_v10, %v824_v11  ;;  %v5787_v25 = vcombine.high %v5746_v24, %v5746_v24  ;;  %v5786_v26 = vcombine.low %v5746_v24, %v5746_v24  ;;  %v6726_v49 = vld [vmem:[%s9736_s3 + $0x12c] ss:$16 sps:$4 sm:$0xff]   ;;  %v6724_v50 = vld [vmem:[%s9736_s3 + $0x128] ss:$16 sps:$4 sm:$0xff]  }
  0x36   : > { %v5789_v30 = vcombine.high %v7729_v29, %v7729_v29  ;;  %v6744_v55 = vld [vmem:[%s9736_s3 + $0x18c] ss:$16 sps:$4 sm:$0xff]   ;;  %v6742_v56 = vld [vmem:[%s9736_s3 + $0x188] ss:$16 sps:$4 sm:$0xff]   ;;  %v5788_v62 = vcombine.low %v7729_v29, %v7729_v29 }
  0x37   : > { %532 = vmatmul.mubr.bf16.vlgmr.msra.gmra.mrb[0].mxu0 %v5754_v33  ;;  %5802 = vmatprep.subr.msk.bf16.mxu1 %vm883_vm2, %v5787_v25  ;;  %v885_v27 = vsel %vm883_vm2, %v5786_v26, 0  ;;  %v6678_v33 = vld [vmem:[%s9736_s3 + $0x2c] ss:$16 sps:$4 sm:$0xff]   ;;  %v6754_v61 = vld [vmem:[%s9736_s3 + $0x1c8] ss:$16 sps:$4 sm:$0xff]  }
  0x38   : > { %540 = vmatpush1.bf16.xpose.msra.mxu0 %v5772_v34  ;;  %571 = vmatprep.mubr.bf16.mxu0 %v5757_v35  ;;  %v6676_v34 = vld [vmem:[%s9736_s3 + $0x28] ss:$16 sps:$4 sm:$0xff]   ;;  %v6684_v35 = vld [vmem:[%s9736_s3 + $0x4c] ss:$16 sps:$4 sm:$0xff]   ;;  %v891_v3 = vsel %vm883_vm2, %v5788_v62, 0 }
  0x39   : > { %579 = vmatprep.subr.bf16.mxu0 %v5775_v36  ;;  %933 = vmatpush1.bf16.msra.mxu1 %v885_v27  ;;  %v6682_v36 = vld [vmem:[%s9736_s3 + $0x48] ss:$16 sps:$4 sm:$0xff]   ;;  %v6759_v62 = vld [vmem:[%s9736_s3 + $0x1e4] ss:$16 sps:$4 sm:$0xff]  }
  0x3a   : > { %5804 = vmatprep.subr.msk.bf16.mxu1 %vm883_vm2, %v5789_v30  ;;  %v5753_v24 = vld [vmem:[%s7694_s22 + $0xb8] sm:$0xff]  ;;  %v6669_v30 = vld [vmem:[%s9736_s3 + $0x4] ss:$16 sps:$4 sm:$0xff]  }
  0x3b   : > { %v5801_v26 = vcombine.high %v5753_v24, %v5753_v24  ;;  %v5800_v27 = vcombine.low %v5753_v24, %v5753_v24  ;;  %v6783_v24 = vld [vmem:[%s9736_s3 + $0x264] ss:$16 sps:$4 sm:$0xff]  }
  0x3d   : > { %v927_v29 = vsel %vm883_vm2, %v5800_v27, 0  ;;  %v6784_v27 = vld [vmem:[%s9736_s3 + $0x268] ss:$16 sps:$4 sm:$0xff]  }
  0x43   : > { %572 = vmatmul.mubr.bf16.vlgmr.msra.gmra.mrb[0].mxu0 %v5756_v39  ;;  %v6696_v39 = vld [vmem:[%s9736_s3 + $0x8c] ss:$16 sps:$4 sm:$0xff]  }
  0x44   : > { %580 = vmatpush1.bf16.xpose.msra.mxu0 %v5774_v40  ;;  %611 = vmatprep.mubr.bf16.mxu0 %v5759_v41  ;;  %v6694_v40 = vld [vmem:[%s9736_s3 + $0x88] ss:$16 sps:$4 sm:$0xff]   ;;  %v6702_v41 = vld [vmem:[%s9736_s3 + $0xac] ss:$16 sps:$4 sm:$0xff]  }
  0x45   : > { %619 = vmatprep.subr.bf16.mxu0 %v5777_v42  ;;  %v6700_v42 = vld [vmem:[%s9736_s3 + $0xa8] ss:$16 sps:$4 sm:$0xff]  }
  0x4f   : > { %612 = vmatmul.mubr.bf16.vlgmr.msra.gmra.mrb[0].mxu0 %v5758_v45  ;;  %v6714_v45 = vld [vmem:[%s9736_s3 + $0xec] ss:$16 sps:$4 sm:$0xff]  }
  0x50   : > { %620 = vmatpush1.bf16.xpose.msra.mxu0 %v5776_v46  ;;  %651 = vmatprep.mubr.bf16.mxu0 %v5761_v47  ;;  %v6712_v46 = vld [vmem:[%s9736_s3 + $0xe8] ss:$16 sps:$4 sm:$0xff]   ;;  %v6720_v47 = vld [vmem:[%s9736_s3 + $0x10c] ss:$16 sps:$4 sm:$0xff]  }
  0x51   : > { %659 = vmatprep.subr.bf16.mxu0 %v5779_v48  ;;  %v6718_v48 = vld [vmem:[%s9736_s3 + $0x108] ss:$16 sps:$4 sm:$0xff]  }
  0x5b   : > { %652 = vmatmul.mubr.bf16.vlgmr.msra.gmra.mrb[0].mxu0 %v5760_v51  ;;  %v6732_v51 = vld [vmem:[%s9736_s3 + $0x14c] ss:$16 sps:$4 sm:$0xff]  }
  0x5c   : > { %660 = vmatpush1.bf16.xpose.msra.mxu0 %v5778_v52  ;;  %691 = vmatprep.mubr.bf16.mxu0 %v5763_v53  ;;  %v6730_v52 = vld [vmem:[%s9736_s3 + $0x148] ss:$16 sps:$4 sm:$0xff]   ;;  %v6738_v53 = vld [vmem:[%s9736_s3 + $0x16c] ss:$16 sps:$4 sm:$0xff]  }
  0x5d   : > { %699 = vmatprep.subr.bf16.mxu0 %v5781_v54  ;;  %v6736_v54 = vld [vmem:[%s9736_s3 + $0x168] ss:$16 sps:$4 sm:$0xff]  }
  0x67   : > { %692 = vmatmul.mubr.bf16.vlgmr.msra.gmra.mrb[0].mxu0 %v5762_v57  ;;  %v6750_v57 = vld [vmem:[%s9736_s3 + $0x1ac] ss:$16 sps:$4 sm:$0xff]  }
  0x68   : > { %700 = vmatpush1.bf16.xpose.msra.mxu0 %v5780_v58  ;;  %731 = vmatprep.mubr.bf16.mxu0 %v5765_v59  ;;  %v6748_v58 = vld [vmem:[%s9736_s3 + $0x1a8] ss:$16 sps:$4 sm:$0xff]   ;;  %v6756_v59 = vld [vmem:[%s9736_s3 + $0x1cc] ss:$16 sps:$4 sm:$0xff]  }
  0x69   : > { %739 = vmatprep.subr.bf16.mxu0 %v5783_v60 }
  0x73   : > { %732 = vmatmul.mubr.bf16.vlgmr.msra.gmra.mrb[0].mxu0 %v5764_v63 }
  0x74   : > { %740 = vmatpush1.bf16.xpose.msra.mxu0 %v5782_v0  ;;  %771 = vmatprep.mubr.bf16.mxu0 %v5767_v1  ;;  %v5748_v0 = vld [vmem:[%s7694_s22 + $0x90] sm:$0xff] }
  0x75   : > { %779 = vmatprep.subr.bf16.mxu0 %v5785_v2 }
  0x7f   : > { %772 = vmatmul.mubr.bf16.vlgmr.msra.gmra.mrb[0].mxu0 %v5766_v4  ;;  %v5791_v4 = vcombine.high %v5748_v0, %v5748_v0 }
  0x80   : > { %780 = vmatpush1.bf16.xpose.msra.mxu0 %v5784_v5  ;;  %811 = vmatprep.mubr.bf16.mxu0 %v5769_v6  ;;  %v5790_v5 = vcombine.low %v5748_v0, %v5748_v0  ;;  %v5749_v6 = vld [vmem:[%s7694_s22 + $0x98] sm:$0xff]  ;;  %v6765_v0 = vld [vmem:[%s9736_s3 + $0x204] ss:$16 sps:$4 sm:$0xff]  }
  0x81   : > { %4698 = vmatprep.subr.bf16.mxu0 %v6672_v32  ;;  %v5793_v8 = vcombine.high %v5749_v6, %v5749_v6  ;;  %v5792_v11 = vcombine.low %v5749_v6, %v5749_v6  ;;  %v6675_v32 = vld [vmem:[%s9736_s3 + $0x24] ss:$16 sps:$4 sm:$0xff]   ;;  %v6766_v6 = vld [vmem:[%s9736_s3 + $0x208] ss:$16 sps:$4 sm:$0xff]  }
  0x8b   : > { %812 = vmatmul.mubr.bf16.vlgmr.msra.gmra.mrb[0].mxu0 %v5768_v7  ;;  %v897_v7 = vsel %vm883_vm2, %v5790_v5, 0  ;;  %v6763_v5 = vld [vmem:[%s9736_s3 + $0x200] ss:$16 sps:$4 sm:$0xff]  }
  0x8c   : > { %4699 = vmatpush1.bf16.msra.mxu0 %v6670_v31  ;;  %v6667_v31 = vld [vmem:[%s9736_s3] ss:$16 sps:$4 sm:$0xff]  }
  0x8d   : > { %4700 = vmatprep.subr.bf16.mxu0 %v6678_v33  ;;  %v6673_v33 = vld [vmem:[%s9736_s3 + $0x20] ss:$16 sps:$4 sm:$0xff]  }
  0x90   : > { %4701 = vmatpush1.bf16.msra.mxu0 %v6676_v34  ;;  %v6679_v34 = vld [vmem:[%s9736_s3 + $0x40] ss:$16 sps:$4 sm:$0xff]  }
  0x91   : > { %4702 = vmatprep.subr.bf16.mxu0 %v6684_v35  ;;  %v6687_v35 = vld [vmem:[%s9736_s3 + $0x64] ss:$16 sps:$4 sm:$0xff]  }
  0x94   : > { %4703 = vmatpush1.bf16.msra.mxu0 %v6682_v36  ;;  %v6685_v36 = vld [vmem:[%s9736_s3 + $0x60] ss:$16 sps:$4 sm:$0xff]  }
  0x95   : > { %4704 = vmatprep.subr.bf16.mxu0 %v6690_v37  ;;  %v6693_v37 = vld [vmem:[%s9736_s3 + $0x84] ss:$16 sps:$4 sm:$0xff]  }
  0x98   : > { %4705 = vmatpush1.bf16.msra.mxu0 %v6688_v38  ;;  %v6691_v38 = vld [vmem:[%s9736_s3 + $0x80] ss:$16 sps:$4 sm:$0xff]  }
  0x99   : > { %4706 = vmatprep.subr.bf16.mxu0 %v6696_v39  ;;  %v6699_v39 = vld [vmem:[%s9736_s3 + $0xa4] ss:$16 sps:$4 sm:$0xff]  }
  0x9c   : > { %4707 = vmatpush1.bf16.msra.mxu0 %v6694_v40  ;;  %v6697_v40 = vld [vmem:[%s9736_s3 + $0xa0] ss:$16 sps:$4 sm:$0xff]  }
  0x9d   : > { %4708 = vmatprep.subr.bf16.mxu0 %v6702_v41  ;;  %v6705_v41 = vld [vmem:[%s9736_s3 + $0xc4] ss:$16 sps:$4 sm:$0xff]  }
  0xa0   : > { %4709 = vmatpush1.bf16.msra.mxu0 %v6700_v42  ;;  %v6703_v42 = vld [vmem:[%s9736_s3 + $0xc0] ss:$16 sps:$4 sm:$0xff]  }
  0xa1   : > { %4710 = vmatprep.subr.bf16.mxu0 %v6708_v43  ;;  %v6711_v43 = vld [vmem:[%s9736_s3 + $0xe4] ss:$16 sps:$4 sm:$0xff]  }
  0xa4   : > { %4711 = vmatpush1.bf16.msra.mxu0 %v6706_v44  ;;  %v6709_v44 = vld [vmem:[%s9736_s3 + $0xe0] ss:$16 sps:$4 sm:$0xff]  }
  0xa5   : > { %4712 = vmatprep.subr.bf16.mxu0 %v6714_v45  ;;  %v6762_v45 = vld [vmem:[%s9736_s3 + $0x1ec] ss:$16 sps:$4 sm:$0xff]  }
  0xa8   : > { %4713 = vmatpush1.bf16.msra.mxu0 %v6712_v46  ;;  %v6717_v46 = vld [vmem:[%s9736_s3 + $0x104] ss:$16 sps:$4 sm:$0xff]  }
  0xa9   : > { %4714 = vmatprep.subr.bf16.mxu0 %v6720_v47  ;;  %v6760_v47 = vld [vmem:[%s9736_s3 + $0x1e8] ss:$16 sps:$4 sm:$0xff]  }
  0xac   : > { %4715 = vmatpush1.bf16.msra.mxu0 %v6718_v48  ;;  %v6715_v48 = vld [vmem:[%s9736_s3 + $0x100] ss:$16 sps:$4 sm:$0xff]  }
  0xad   : > { %4716 = vmatprep.subr.bf16.mxu0 %v6726_v49  ;;  %v6768_v49 = vld [vmem:[%s9736_s3 + $0x20c] ss:$16 sps:$4 sm:$0xff]  }
  0xb0   : > { %4717 = vmatpush1.bf16.msra.mxu0 %v6724_v50  ;;  %v6723_v50 = vld [vmem:[%s9736_s3 + $0x124] ss:$16 sps:$4 sm:$0xff]  }
  0xb1   : > { %4718 = vmatprep.subr.bf16.mxu0 %v6732_v51  ;;  %v6721_v51 = vld [vmem:[%s9736_s3 + $0x120] ss:$16 sps:$4 sm:$0xff]  }
  0xb4   : > { %4719 = vmatpush1.bf16.msra.mxu0 %v6730_v52  ;;  %v6729_v52 = vld [vmem:[%s9736_s3 + $0x144] ss:$16 sps:$4 sm:$0xff]  }
  0xb5   : > { %4720 = vmatprep.subr.bf16.mxu0 %v6738_v53  ;;  %v6727_v53 = vld [vmem:[%s9736_s3 + $0x140] ss:$16 sps:$4 sm:$0xff]  }
  0xb8   : > { %4721 = vmatpush1.bf16.msra.mxu0 %v6736_v54  ;;  %v6735_v54 = vld [vmem:[%s9736_s3 + $0x164] ss:$16 sps:$4 sm:$0xff]  }
  0xb9   : > { %4722 = vmatprep.subr.bf16.mxu0 %v6744_v55  ;;  %v6733_v55 = vld [vmem:[%s9736_s3 + $0x160] ss:$16 sps:$4 sm:$0xff]  }
  0xbc   : > { %4723 = vmatpush1.bf16.msra.mxu0 %v6742_v56  ;;  %v6741_v56 = vld [vmem:[%s9736_s3 + $0x184] ss:$16 sps:$4 sm:$0xff]  }
  0xbd   : > { %4724 = vmatprep.subr.bf16.mxu0 %v6750_v57  ;;  %v6739_v57 = vld [vmem:[%s9736_s3 + $0x180] ss:$16 sps:$4 sm:$0xff]  }
  0xc0   : > { %4725 = vmatpush1.bf16.msra.mxu0 %v6748_v58  ;;  %v6747_v58 = vld [vmem:[%s9736_s3 + $0x1a4] ss:$16 sps:$4 sm:$0xff]  }
  0xc1   : > { %4726 = vmatprep.subr.bf16.mxu0 %v6756_v59  ;;  %v6745_v59 = vld [vmem:[%s9736_s3 + $0x1a0] ss:$16 sps:$4 sm:$0xff]  }
  0xc4   : > { %4727 = vmatpush1.bf16.msra.mxu0 %v6754_v61  ;;  %v6751_v61 = vld [vmem:[%s9736_s3 + $0x1c0] ss:$16 sps:$4 sm:$0xff]  }
  0xc5   : > { %4728 = vmatprep.subr.bf16.mxu0 %v6762_v45  ;;  %v6799_v45 = vld [vmem:[%s9736_s3 + $0x2c0] ss:$16 sps:$4 sm:$0xff]  }
  0xc8   : > { %4729 = vmatpush1.bf16.msra.mxu0 %v6760_v47 }
  0xc9   : > { %4739 = vmatprep.subr.bf16.mxu0 %v6768_v49  ;;  %v6810_v49 = vld [vmem:[%s9736_s3 + $0x2ec] ss:$16 sps:$4 sm:$0xff]  }
 0x15e   : > { %v813_v12 = vpop.f32.mrb[0].mxu0 }
 0x15f   : > { %v819_v13 = vmul.f32 0.044194173, %v813_v12  ;;  %v815_v14 = vpop.f32.mrb[1].mxu0  ;;  %v5750_v12 = vld [vmem:[%s7694_s22 + $0xa0] sm:$0xff] }
 0x160   : > { %v816_v15 = vpop.f32.mrb[2].mxu0  ;;  %v5795_v14 = vcombine.high %v5750_v12, %v5750_v12 }
 0x161   : > { %v817_v16 = vpop.f32.mrb[3].mxu0  ;;  %v826_v17 = vsel %vm825_vm0, %v819_v13, -inf  ;;  %v903_v13 = vsel %vm883_vm2, %v5792_v11, 0  ;;  %v5794_v15 = vcombine.low %v5750_v12, %v5750_v12  ;;  %v6771_v11 = vld [vmem:[%s9736_s3 + $0x224] ss:$16 sps:$4 sm:$0xff]  }
 0x162   : > { %v828_v18 = vsel %vm827_vm1, %v826_v17, -inf  ;;  %v5751_v16 = vld [vmem:[%s7694_s22 + $0xa8] sm:$0xff] }
 0x163   : > { %829 = vmax.xlane.f32.xlu0 %v828_v18  ;;  %v5797_v18 = vcombine.high %v5751_v16, %v5751_v16  ;;  %v6774_v12 = vld [vmem:[%s9736_s3 + $0x22c] ss:$16 sps:$4 sm:$0xff]  }
 0x1f0   : > { %v830_v19 = vpop.xlane.xlu0 %829 }
 0x1f1   : > { %v831_v20 = vsub.f32 %v826_v17, %v830_v19  ;;  %v909_v17 = vsel %vm883_vm2, %v5794_v15, 0  ;;  %v5796_v19 = vcombine.low %v5751_v16, %v5751_v16  ;;  %v6777_v15 = vld [vmem:[%s9736_s3 + $0x244] ss:$16 sps:$4 sm:$0xff]   ;;  %v6780_v16 = vld [vmem:[%s9736_s3 + $0x24c] ss:$16 sps:$4 sm:$0xff]  }
 0x1f3   : > { %v832_v21 = vmul.f32 1.442695, %v831_v20  ;;  %v5752_v20 = vld [vmem:[%s7694_s22 + $0xb0] sm:$0xff]  ;;  %s357_s22 = scalar_select %p356_p13, %s7602_s28, 1 }
 0x1f4   : > { %s7540_s28 = smov [#allocation3]  }
 0x1f5   : > { %7467 = vpow2.f32 %v832_v21  ;;  %v915_v21 = vsel %vm883_vm2, %v5796_v19, 0  ;;  %s5737_s17 = sshll.u32 %s357_s22, 3 }
 0x1f6   : > { %s359_s21 = scalar_lea.vmem %s9734_s1, %s5737_s17 }
 0x1ff   : > { %v7719_v22 = vpop.eup %7467 }
 0x200   : > { %v834_v23 = vsel %vm827_vm1, %v7719_v22, 0.0 }
 0x201   : > { %835 = vadd.xlane.f32.xlu0 %v834_v23  ;;  %v5798_v23 = vcombine.low %v5752_v20, %v5752_v20 }
 0x203   : > { %v921_v25 = vsel %vm883_vm2, %v5798_v23, 0 }
 0x28e   : > { %v836_v60 = vpop.xlane.xlu0 %835 }
 0x28f   : > { %7469 = vrcp.f32 %v836_v60  ;;  %v6753_v60 = vld [vmem:[%s9736_s3 + $0x1c4] ss:$16 sps:$4 sm:$0xff]  }
 0x299   : > { %v7470_v63 = vpop.eup %7469 }
 0x29a   : > { %v838_v1 = vmul.f32 %v7470_v63, %v7719_v22  ;;  %v5799_v22 = vcombine.high %v5752_v20, %v5752_v20  ;;  %v6757_v63 = vld [vmem:[%s9736_s3 + $0x1e0] ss:$16 sps:$4 sm:$0xff]  }
 0x29c   : > { %v839_v2 = vpack.c.bf16 %v838_v1, %v838_v1 }
 0x29e   : > { %5803 = vmatmul.mubr.msk.bf16.vlgmr.msra.gmra.mrb[0].mxu1 %vm827_vm1, %v839_v2 }
 0x29f   : > { %974 = vmatpush1.bf16.msra.mxu1 %v891_v3  ;;  %1005 = vmatprep.mubr.bf16.mxu1 %v7537_v28 }
 0x2a0   : > { %5806 = vmatprep.subr.msk.bf16.mxu1 %vm883_vm2, %v5791_v4 }
 0x2a6   : > { %5805 = vmatmul.mubr.msk.bf16.vlgmr.msra.gmra.mrb[4].mxu1 %vm827_vm1, %v839_v2 }
 0x2a7   : > { %1015 = vmatpush1.bf16.msra.mxu1 %v897_v7  ;;  %1046 = vmatprep.mubr.bf16.mxu1 %v7537_v28 }
 0x2a8   : > { %5808 = vmatprep.subr.msk.bf16.mxu1 %vm883_vm2, %v5793_v8 }
 0x2ae   : > { %5807 = vmatmul.mubr.msk.bf16.vlgmr.msra.gmra.mrb[8].mxu1 %vm827_vm1, %v839_v2 }
 0x2af   : > { %1056 = vmatpush1.bf16.msra.mxu1 %v903_v13  ;;  %1087 = vmatprep.mubr.bf16.mxu1 %v7537_v28  ;;  %v6769_v13 = vld [vmem:[%s9736_s3 + $0x220] ss:$16 sps:$4 sm:$0xff]  }
 0x2b0   : > { %5810 = vmatprep.subr.msk.bf16.mxu1 %vm883_vm2, %v5795_v14  ;;  %v6772_v14 = vld [vmem:[%s9736_s3 + $0x228] ss:$16 sps:$4 sm:$0xff]  }
 0x2b6   : > { %5809 = vmatmul.mubr.msk.bf16.vlgmr.msra.gmra.mrb[12].mxu1 %vm827_vm1, %v839_v2 }
 0x2b7   : > { %1097 = vmatpush1.bf16.msra.mxu1 %v909_v17  ;;  %1128 = vmatprep.mubr.bf16.mxu1 %v7537_v28 }
 0x2b8   : > { %5812 = vmatprep.subr.msk.bf16.mxu1 %vm883_vm2, %v5797_v18 }
 0x2be   : > { %5811 = vmatmul.mubr.msk.bf16.vlgmr.msra.gmra.mrb[16].mxu1 %vm827_vm1, %v839_v2 }
 0x2bf   : > { %1138 = vmatpush1.bf16.msra.mxu1 %v915_v21  ;;  %1169 = vmatprep.mubr.bf16.mxu1 %v7537_v28  ;;  %v6775_v21 = vld [vmem:[%s9736_s3 + $0x240] ss:$16 sps:$4 sm:$0xff]  }
 0x2c0   : > { %5814 = vmatprep.subr.msk.bf16.mxu1 %vm883_vm2, %v5799_v22  ;;  %v6778_v22 = vld [vmem:[%s9736_s3 + $0x248] ss:$16 sps:$4 sm:$0xff]  }
 0x2c6   : > { %5813 = vmatmul.mubr.msk.bf16.vlgmr.msra.gmra.mrb[20].mxu1 %vm827_vm1, %v839_v2 }
 0x2c7   : > { %1179 = vmatpush1.bf16.msra.mxu1 %v921_v25  ;;  %1210 = vmatprep.mubr.bf16.mxu1 %v7537_v28  ;;  %v6786_v25 = vld [vmem:[%s9736_s3 + $0x26c] ss:$16 sps:$4 sm:$0xff]  }
 0x2c8   : > { %5816 = vmatprep.subr.msk.bf16.mxu1 %vm883_vm2, %v5801_v26  ;;  %v6781_v26 = vld [vmem:[%s9736_s3 + $0x260] ss:$16 sps:$4 sm:$0xff]  }
 0x2ce   : > { %5815 = vmatmul.mubr.msk.bf16.vlgmr.msra.gmra.mrb[24].mxu1 %vm827_vm1, %v839_v2 }
 0x2cf   : > { %1220 = vmatpush1.bf16.msra.mxu1 %v927_v29  ;;  %1251 = vmatprep.mubr.bf16.mxu1 %v7537_v28  ;;  %v6681_v28 = vld [vmem:[%s9736_s3 + $0x44] ss:$16 sps:$4 sm:$0xff]  }
 0x2d0   : > { %4370 = vmatprep.subr.bf16.mxu1 %v6669_v30  ;;  %v6789_v29 = vld [vmem:[%s9736_s3 + $0x284] ss:$16 sps:$4 sm:$0xff]   ;;  %v6792_v30 = vld [vmem:[%s9736_s3 + $0x28c] ss:$16 sps:$4 sm:$0xff]  }
 0x2d6   : > { %5817 = vmatmul.mubr.msk.bf16.vlgmr.msra.gmra.mrb[28].mxu1 %vm827_vm1, %v839_v2 }
 0x2d7   : > { %4371 = vmatpush1.bf16.msra.mxu1 %v6667_v31 }
 0x2d8   : > { %4372 = vmatprep.subr.bf16.mxu1 %v6675_v32 }
 0x2db   : > { %4373 = vmatpush1.bf16.msra.mxu1 %v6673_v33 }
 0x2dc   : > { %4374 = vmatprep.subr.bf16.mxu1 %v6681_v28  ;;  %v6787_v28 = vld [vmem:[%s9736_s3 + $0x280] ss:$16 sps:$4 sm:$0xff]  }
 0x2df   : > { %4375 = vmatpush1.bf16.msra.mxu1 %v6679_v34  ;;  %v6790_v34 = vld [vmem:[%s9736_s3 + $0x288] ss:$16 sps:$4 sm:$0xff]  }
 0x2e0   : > { %4376 = vmatprep.subr.bf16.mxu1 %v6687_v35 }
 0x2e3   : > { %4377 = vmatpush1.bf16.msra.mxu1 %v6685_v36  ;;  %v6795_v36 = vld [vmem:[%s9736_s3 + $0x2a4] ss:$16 sps:$4 sm:$0xff]  }
 0x2e4   : > { %4378 = vmatprep.subr.bf16.mxu1 %v6693_v37  ;;  %v6798_v37 = vld [vmem:[%s9736_s3 + $0x2ac] ss:$16 sps:$4 sm:$0xff]  }
 0x2e7   : > { %4379 = vmatpush1.bf16.msra.mxu1 %v6691_v38  ;;  %v6793_v38 = vld [vmem:[%s9736_s3 + $0x2a0] ss:$16 sps:$4 sm:$0xff]  }
 0x2e8   : > { %4380 = vmatprep.subr.bf16.mxu1 %v6699_v39  ;;  %v6796_v39 = vld [vmem:[%s9736_s3 + $0x2a8] ss:$16 sps:$4 sm:$0xff]  }
 0x2eb   : > { %4381 = vmatpush1.bf16.msra.mxu1 %v6697_v40  ;;  %v6801_v40 = vld [vmem:[%s9736_s3 + $0x2c4] ss:$16 sps:$4 sm:$0xff]  }
 0x2ec   : > { %4382 = vmatprep.subr.bf16.mxu1 %v6705_v41  ;;  %v6804_v41 = vld [vmem:[%s9736_s3 + $0x2cc] ss:$16 sps:$4 sm:$0xff]  }
 0x2ef   : > { %4383 = vmatpush1.bf16.msra.mxu1 %v6703_v42 }
 0x2f0   : > { %4384 = vmatprep.subr.bf16.mxu1 %v6711_v43 }
 0x2f3   : > { %4385 = vmatpush1.bf16.msra.mxu1 %v6709_v44 }
 0x2f4   : > { %4386 = vmatprep.subr.bf16.mxu1 %v6717_v46  ;;  %v6802_v46 = vld [vmem:[%s9736_s3 + $0x2c8] ss:$16 sps:$4 sm:$0xff]  }
 0x2f7   : > { %4387 = vmatpush1.bf16.msra.mxu1 %v6715_v48  ;;  %v6807_v48 = vld [vmem:[%s9736_s3 + $0x2e4] ss:$16 sps:$4 sm:$0xff]  }
 0x2f8   : > { %4388 = vmatprep.subr.bf16.mxu1 %v6723_v50  ;;  %v6805_v50 = vld [vmem:[%s9736_s3 + $0x2e0] ss:$16 sps:$4 sm:$0xff]  }
 0x2fb   : > { %4389 = vmatpush1.bf16.msra.mxu1 %v6721_v51  ;;  %v6808_v51 = vld [vmem:[%s9736_s3 + $0x2e8] ss:$16 sps:$4 sm:$0xff]  }
 0x2fc   : > { %4390 = vmatprep.subr.bf16.mxu1 %v6729_v52  ;;  %v6813_v52 = vld [vmem:[%s9736_s3 + $0x304] ss:$16 sps:$4 sm:$0xff]  }
 0x2ff   : > { %4391 = vmatpush1.bf16.msra.mxu1 %v6727_v53  ;;  %v6816_v53 = vld [vmem:[%s9736_s3 + $0x30c] ss:$16 sps:$4 sm:$0xff]  }
 0x300   : > { %4392 = vmatprep.subr.bf16.mxu1 %v6735_v54 }
 0x303   : > { %4393 = vmatpush1.bf16.msra.mxu1 %v6733_v55 }
 0x304   : > { %4394 = vmatprep.subr.bf16.mxu1 %v6741_v56 }
 0x307   : > { %4395 = vmatpush1.bf16.msra.mxu1 %v6739_v57  ;;  %v6811_v57 = vld [vmem:[%s9736_s3 + $0x300] ss:$16 sps:$4 sm:$0xff]  }
 0x308   : > { %4396 = vmatprep.subr.bf16.mxu1 %v6747_v58  ;;  %v6814_v58 = vld [vmem:[%s9736_s3 + $0x308] ss:$16 sps:$4 sm:$0xff]  }
 0x30b   : > { %4397 = vmatpush1.bf16.msra.mxu1 %v6745_v59 }
 0x30c   : > { %4398 = vmatprep.subr.bf16.mxu1 %v6753_v60  ;;  %v6819_v60 = vld [vmem:[%s9736_s3 + $0x324] ss:$16 sps:$4 sm:$0xff]  }
 0x30f   : > { %4399 = vmatpush1.bf16.msra.mxu1 %v6751_v61  ;;  %v6822_v61 = vld [vmem:[%s9736_s3 + $0x32c] ss:$16 sps:$4 sm:$0xff]  }
 0x310   : > { %4400 = vmatprep.subr.bf16.mxu1 %v6759_v62  ;;  %v6817_v62 = vld [vmem:[%s9736_s3 + $0x320] ss:$16 sps:$4 sm:$0xff]  }
 0x313   : > { %4401 = vmatpush1.bf16.msra.mxu1 %v6757_v63  ;;  %v6820_v63 = vld [vmem:[%s9736_s3 + $0x328] ss:$16 sps:$4 sm:$0xff]  }
 0x314   : > { %4411 = vmatprep.subr.bf16.mxu1 %v6765_v0  ;;  %v6825_v0 = vld [vmem:[%s9736_s3 + $0x344] ss:$16 sps:$4 sm:$0xff]  }
 0x371   : > { %v966_v1 = vpop.f32.mrb[0].mxu1 }
 0x372   : > { %v968_v2 = vpop.f32.mrb[1].mxu1  ;;  %v1260_v7 = vpack.c.bf16 %v966_v1, %v966_v1  ;;  %v6828_v1 = vld [vmem:[%s9736_s3 + $0x34c] ss:$16 sps:$4 sm:$0xff]  }
 0x373   : > { %v1261_v3 = vpack.c.bf16 %v968_v2, %v968_v2  ;;  %v970_v4 = vpop.f32.mrb[2].mxu1 }
 0x374   : > { %v971_v8 = vpop.f32.mrb[3].mxu1 }
 0x375   : > { %4402 = vmatprep.mubr.bf16.mxu1 %v1261_v3  ;;  %4730 = vmatprep.mubr.bf16.mxu0 %v1261_v3  ;;  %v6831_v8 = vld [vmem:[%s9736_s3 + $0x364] ss:$16 sps:$4 sm:$0xff]  }
 0x376   : > { %4403 = vmatmul.mubr.bf16.vlgmr.msra.gmra.mrb[32].mxu1 %v1260_v7  ;;  %4731 = vmatmul.mubr.bf16.vlgmr.msra.gmra.mrb[4].mxu0 %v1260_v7 }
 0x377   : > { %4412 = vmatpush1.bf16.msra.mxu1 %v6763_v5  ;;  %4740 = vmatpush1.bf16.msra.mxu0 %v6766_v6  ;;  %v6823_v5 = vld [vmem:[%s9736_s3 + $0x340] ss:$16 sps:$4 sm:$0xff]   ;;  %v6826_v6 = vld [vmem:[%s9736_s3 + $0x348] ss:$16 sps:$4 sm:$0xff]  }
 0x378   : > { %4413 = vmatprep.subr.bf16.mxu1 %v6771_v11  ;;  %4741 = vmatprep.subr.bf16.mxu0 %v6774_v12  ;;  %v6834_v11 = vld [vmem:[%s9736_s3 + $0x36c] ss:$16 sps:$4 sm:$0xff]   ;;  %v6829_v12 = vld [vmem:[%s9736_s3 + $0x360] ss:$16 sps:$4 sm:$0xff]  }
 0x379   : > { %v7994_v17 = vpop.f32.mrb[4].mxu1 }
 0x37a   : > { %v1009_v18 = vpop.f32.mrb[5].mxu1 }
 0x37b   : > { %v1263_v19 = vpack.c.bf16 %v1009_v18, %v1009_v18  ;;  %4414 = vmatpush1.bf16.msra.mxu1 %v6769_v13  ;;  %4742 = vmatpush1.bf16.msra.mxu0 %v6772_v14  ;;  %v1011_v20 = vpop.f32.mrb[6].mxu1  ;;  %v6832_v13 = vld [vmem:[%s9736_s3 + $0x368] ss:$16 sps:$4 sm:$0xff]   ;;  %v6837_v14 = vld [vmem:[%s9736_s3 + $0x384] ss:$16 sps:$4 sm:$0xff]  }
 0x37c   : > { %v1012_v23 = vpop.f32.mrb[7].mxu1  ;;  %4415 = vmatprep.subr.bf16.mxu1 %v6777_v15  ;;  %4743 = vmatprep.subr.bf16.mxu0 %v6780_v16  ;;  %v6840_v15 = vld [vmem:[%s9736_s3 + $0x38c] ss:$16 sps:$4 sm:$0xff]   ;;  %v6835_v20 = vld [vmem:[%s9736_s3 + $0x380] ss:$16 sps:$4 sm:$0xff]  }
 0x37d   : > { %4443 = vmatprep.mubr.bf16.mxu1 %v1263_v19  ;;  %4771 = vmatprep.mubr.bf16.mxu0 %v1263_v19  ;;  %v6843_v23 = vld [vmem:[%s9736_s3 + $0x3a4] ss:$16 sps:$4 sm:$0xff]  }
 0x37f   : > { %4416 = vmatpush1.bf16.msra.mxu1 %v6775_v21  ;;  %4744 = vmatpush1.bf16.msra.mxu0 %v6778_v22  ;;  %v6838_v21 = vld [vmem:[%s9736_s3 + $0x388] ss:$16 sps:$4 sm:$0xff]  }
 0x380   : > { %4417 = vmatprep.subr.bf16.mxu1 %v6783_v24  ;;  %4745 = vmatprep.subr.bf16.mxu0 %v6786_v25  ;;  %v6846_v24 = vld [vmem:[%s9736_s3 + $0x3ac] ss:$16 sps:$4 sm:$0xff]   ;;  %v6841_v25 = vld [vmem:[%s9736_s3 + $0x3a0] ss:$16 sps:$4 sm:$0xff]  }
 0x381   : > { %v8020_v31 = vpop.f32.mrb[8].mxu1 }
 0x382   : > { %v8022_v32 = vpop.f32.mrb[9].mxu1 }
 0x383   : > { %4418 = vmatpush1.bf16.msra.mxu1 %v6781_v26  ;;  %4746 = vmatpush1.bf16.msra.mxu0 %v6784_v27  ;;  %v1052_v33 = vpop.f32.mrb[10].mxu1  ;;  %v6844_v26 = vld [vmem:[%s9736_s3 + $0x3a8] ss:$16 sps:$4 sm:$0xff]   ;;  %v6849_v27 = vld [vmem:[%s9736_s3 + $0x3c4] ss:$16 sps:$4 sm:$0xff]  }
 0x384   : > { %v1053_v35 = vpop.f32.mrb[11].mxu1  ;;  %4419 = vmatprep.subr.bf16.mxu1 %v6789_v29  ;;  %4747 = vmatprep.subr.bf16.mxu0 %v6792_v30  ;;  %v6852_v29 = vld [vmem:[%s9736_s3 + $0x3cc] ss:$16 sps:$4 sm:$0xff]  }
 0x385   : > { %v6850_v35 = vld [vmem:[%s9736_s3 + $0x3c8] ss:$16 sps:$4 sm:$0xff]  }
 0x387   : > { %4420 = vmatpush1.bf16.msra.mxu1 %v6787_v28  ;;  %4748 = vmatpush1.bf16.msra.mxu0 %v6790_v34  ;;  %v6847_v34 = vld [vmem:[%s9736_s3 + $0x3c0] ss:$16 sps:$4 sm:$0xff]  }
 0x388   : > { %4421 = vmatprep.subr.bf16.mxu1 %v6795_v36  ;;  %4749 = vmatprep.subr.bf16.mxu0 %v6798_v37  ;;  %v6855_v37 = vld [vmem:[%s9736_s3 + $0x3e4] ss:$16 sps:$4 sm:$0xff]  }
 0x389   : > { %v8048_v42 = vpop.f32.mrb[12].mxu1 }
 0x38a   : > { %v8050_v43 = vpop.f32.mrb[13].mxu1 }
 0x38b   : > { %4422 = vmatpush1.bf16.msra.mxu1 %v6793_v38  ;;  %4750 = vmatpush1.bf16.msra.mxu0 %v6796_v39  ;;  %v1093_v44 = vpop.f32.mrb[14].mxu1  ;;  %v6858_v38 = vld [vmem:[%s9736_s3 + $0x3ec] ss:$16 sps:$4 sm:$0xff]   ;;  %v6853_v39 = vld [vmem:[%s9736_s3 + $0x3e0] ss:$16 sps:$4 sm:$0xff]  }
 0x38c   : > { %v1094_v47 = vpop.f32.mrb[15].mxu1  ;;  %4423 = vmatprep.subr.bf16.mxu1 %v6801_v40  ;;  %4751 = vmatprep.subr.bf16.mxu0 %v6804_v41  ;;  %v6856_v40 = vld [vmem:[%s9736_s3 + $0x3e8] ss:$16 sps:$4 sm:$0xff]   ;;  %v6861_v41 = vld [vmem:[%s9736_s3 + $0x404] ss:$16 sps:$4 sm:$0xff]  }
 0x38d   : > { %v6864_v44 = vld [vmem:[%s9736_s3 + $0x40c] ss:$16 sps:$4 sm:$0xff]   ;;  %v6862_v47 = vld [vmem:[%s9736_s3 + $0x408] ss:$16 sps:$4 sm:$0xff]  }
 0x38f   : > { %4424 = vmatpush1.bf16.msra.mxu1 %v6799_v45  ;;  %4752 = vmatpush1.bf16.msra.mxu0 %v6802_v46  ;;  %v6859_v45 = vld [vmem:[%s9736_s3 + $0x400] ss:$16 sps:$4 sm:$0xff]   ;;  %v1262_v46 = vpack.c.bf16 %v7994_v17, %v7994_v17 }
 0x390   : > { %4425 = vmatprep.subr.bf16.mxu1 %v6807_v48  ;;  %4753 = vmatprep.subr.bf16.mxu0 %v6810_v49  ;;  %v1265_v48 = vpack.c.bf16 %v8022_v32, %v8022_v32  ;;  %v6867_v49 = vld [vmem:[%s9736_s3 + $0x424] ss:$16 sps:$4 sm:$0xff]   ;;  %v6865_v17 = vld [vmem:[%s9736_s3 + $0x420] ss:$16 sps:$4 sm:$0xff]   ;;  %v6868_v32 = vld [vmem:[%s9736_s3 + $0x428] ss:$16 sps:$4 sm:$0xff]  }
 0x391   : > { %v8076_v54 = vpop.f32.mrb[16].mxu1 }
 0x392   : > { %v8078_v55 = vpop.f32.mrb[17].mxu1 }
 0x393   : > { %4426 = vmatpush1.bf16.msra.mxu1 %v6805_v50  ;;  %4754 = vmatpush1.bf16.msra.mxu0 %v6808_v51  ;;  %v1134_v56 = vpop.f32.mrb[18].mxu1  ;;  %v6870_v50 = vld [vmem:[%s9736_s3 + $0x42c] ss:$16 sps:$4 sm:$0xff]   ;;  %v6873_v51 = vld [vmem:[%s9736_s3 + $0x444] ss:$16 sps:$4 sm:$0xff]  }
 0x394   : > { %v1135_v59 = vpop.f32.mrb[19].mxu1  ;;  %4427 = vmatprep.subr.bf16.mxu1 %v6813_v52  ;;  %4755 = vmatprep.subr.bf16.mxu0 %v6816_v53  ;;  %v6876_v52 = vld [vmem:[%s9736_s3 + $0x44c] ss:$16 sps:$4 sm:$0xff]   ;;  %v6871_v53 = vld [vmem:[%s9736_s3 + $0x440] ss:$16 sps:$4 sm:$0xff]  }
 0x395   : > { %v6874_v56 = vld [vmem:[%s9736_s3 + $0x448] ss:$16 sps:$4 sm:$0xff]   ;;  %v6877_v59 = vld [vmem:[%s9736_s3 + $0x460] ss:$16 sps:$4 sm:$0xff]  }
 0x397   : > { %4428 = vmatpush1.bf16.msra.mxu1 %v6811_v57  ;;  %4756 = vmatpush1.bf16.msra.mxu0 %v6814_v58  ;;  %v6879_v57 = vld [vmem:[%s9736_s3 + $0x464] ss:$16 sps:$4 sm:$0xff]   ;;  %v6882_v58 = vld [vmem:[%s9736_s3 + $0x46c] ss:$16 sps:$4 sm:$0xff]  }
 0x398   : > { %4429 = vmatprep.subr.bf16.mxu1 %v6819_v60  ;;  %4757 = vmatprep.subr.bf16.mxu0 %v6822_v61  ;;  %v6880_v60 = vld [vmem:[%s9736_s3 + $0x468] ss:$16 sps:$4 sm:$0xff]   ;;  %v6885_v61 = vld [vmem:[%s9736_s3 + $0x484] ss:$16 sps:$4 sm:$0xff]  }
 0x399   : > { %v8104_v2 = vpop.f32.mrb[20].mxu1 }
 0x39a   : > { %v8106_v3 = vpop.f32.mrb[21].mxu1 }
 0x39b   : > { %4430 = vmatpush1.bf16.msra.mxu1 %v6817_v62  ;;  %4758 = vmatpush1.bf16.msra.mxu0 %v6820_v63  ;;  %v1175_v4 = vpop.f32.mrb[22].mxu1  ;;  %v6888_v62 = vld [vmem:[%s9736_s3 + $0x48c] ss:$16 sps:$4 sm:$0xff]   ;;  %v6883_v63 = vld [vmem:[%s9736_s3 + $0x480] ss:$16 sps:$4 sm:$0xff]  }
 0x39c   : > { %v1176_v7 = vpop.f32.mrb[23].mxu1  ;;  %4431 = vmatprep.subr.bf16.mxu1 %v6825_v0  ;;  %4759 = vmatprep.subr.bf16.mxu0 %v6828_v1  ;;  %v6886_v0 = vld [vmem:[%s9736_s3 + $0x488] ss:$16 sps:$4 sm:$0xff]   ;;  %v6891_v1 = vld [vmem:[%s9736_s3 + $0x4a4] ss:$16 sps:$4 sm:$0xff]  }
 0x39d   : > { %v6894_v4 = vld [vmem:[%s9736_s3 + $0x4ac] ss:$16 sps:$4 sm:$0xff]   ;;  %v6897_v7 = vld [vmem:[%s9736_s3 + $0x4c4] ss:$16 sps:$4 sm:$0xff]  }
 0x39f   : > { %4432 = vmatpush1.bf16.msra.mxu1 %v6823_v5  ;;  %4760 = vmatpush1.bf16.msra.mxu0 %v6826_v6  ;;  %v6889_v5 = vld [vmem:[%s9736_s3 + $0x4a0] ss:$16 sps:$4 sm:$0xff]   ;;  %v6892_v6 = vld [vmem:[%s9736_s3 + $0x4a8] ss:$16 sps:$4 sm:$0xff]  }
 0x3a0   : > { %4433 = vmatprep.subr.bf16.mxu1 %v6831_v8  ;;  %4761 = vmatprep.subr.bf16.mxu0 %v6834_v11  ;;  %v6900_v8 = vld [vmem:[%s9736_s3 + $0x4cc] ss:$16 sps:$4 sm:$0xff]   ;;  %v6895_v11 = vld [vmem:[%s9736_s3 + $0x4c0] ss:$16 sps:$4 sm:$0xff]  }
 0x3a1   : > { %v8132_v16 = vpop.f32.mrb[24].mxu1 }
 0x3a2   : > { %v8134_v18 = vpop.f32.mrb[25].mxu1 }
 0x3a3   : > { %4434 = vmatpush1.bf16.msra.mxu1 %v6829_v12  ;;  %4762 = vmatpush1.bf16.msra.mxu0 %v6832_v13  ;;  %v1216_v19 = vpop.f32.mrb[26].mxu1  ;;  %v6898_v12 = vld [vmem:[%s9736_s3 + $0x4c8] ss:$16 sps:$4 sm:$0xff]   ;;  %v6903_v13 = vld [vmem:[%s9736_s3 + $0x4e4] ss:$16 sps:$4 sm:$0xff]  }
 0x3a4   : > { %v1217_v22 = vpop.f32.mrb[27].mxu1  ;;  %4435 = vmatprep.subr.bf16.mxu1 %v6837_v14  ;;  %4763 = vmatprep.subr.bf16.mxu0 %v6840_v15  ;;  %v6906_v14 = vld [vmem:[%s9736_s3 + $0x4ec] ss:$16 sps:$4 sm:$0xff]   ;;  %v6901_v15 = vld [vmem:[%s9736_s3 + $0x4e0] ss:$16 sps:$4 sm:$0xff]  }
 0x3a5   : > { %v6904_v19 = vld [vmem:[%s9736_s3 + $0x4e8] ss:$16 sps:$4 sm:$0xff]   ;;  %v6907_v22 = vld [vmem:[%s9736_s3 + $0x500] ss:$16 sps:$4 sm:$0xff]  }
 0x3a7   : > { %4436 = vmatpush1.bf16.msra.mxu1 %v6835_v20  ;;  %4764 = vmatpush1.bf16.msra.mxu0 %v6838_v21  ;;  %v6909_v20 = vld [vmem:[%s9736_s3 + $0x504] ss:$16 sps:$4 sm:$0xff]   ;;  %v6912_v21 = vld [vmem:[%s9736_s3 + $0x50c] ss:$16 sps:$4 sm:$0xff]  }
 0x3a8   : > { %4437 = vmatprep.subr.bf16.mxu1 %v6843_v23  ;;  %4765 = vmatprep.subr.bf16.mxu0 %v6846_v24  ;;  %v6910_v23 = vld [vmem:[%s9736_s3 + $0x508] ss:$16 sps:$4 sm:$0xff]   ;;  %v6915_v24 = vld [vmem:[%s9736_s3 + $0x524] ss:$16 sps:$4 sm:$0xff]  }
 0x3a9   : > { %v8160_v30 = vpop.f32.mrb[28].mxu1 }
 0x3aa   : > { %v8162_v33 = vpop.f32.mrb[29].mxu1 }
 0x3ab   : > { %4438 = vmatpush1.bf16.msra.mxu1 %v6841_v25  ;;  %4766 = vmatpush1.bf16.msra.mxu0 %v6844_v26  ;;  %v1257_v28 = vpop.f32.mrb[30].mxu1  ;;  %v6918_v25 = vld [vmem:[%s9736_s3 + $0x52c] ss:$16 sps:$4 sm:$0xff]   ;;  %v6913_v26 = vld [vmem:[%s9736_s3 + $0x520] ss:$16 sps:$4 sm:$0xff]  }
 0x3ac   : > { %v1258_v36 = vpop.f32.mrb[31].mxu1  ;;  %4439 = vmatprep.subr.bf16.mxu1 %v6849_v27  ;;  %4767 = vmatprep.subr.bf16.mxu0 %v6852_v29  ;;  %v6916_v27 = vld [vmem:[%s9736_s3 + $0x528] ss:$16 sps:$4 sm:$0xff]   ;;  %v6921_v29 = vld [vmem:[%s9736_s3 + $0x544] ss:$16 sps:$4 sm:$0xff]  }
 0x3ad   : > { %v6924_v28 = vld [vmem:[%s9736_s3 + $0x54c] ss:$16 sps:$4 sm:$0xff]   ;;  %v6927_v36 = vld [vmem:[%s9736_s3 + $0x564] ss:$16 sps:$4 sm:$0xff]  }
 0x3af   : > { %4440 = vmatpush1.bf16.msra.mxu1 %v6847_v34  ;;  %4768 = vmatpush1.bf16.msra.mxu0 %v6850_v35  ;;  %v6919_v34 = vld [vmem:[%s9736_s3 + $0x540] ss:$16 sps:$4 sm:$0xff]   ;;  %v6922_v35 = vld [vmem:[%s9736_s3 + $0x548] ss:$16 sps:$4 sm:$0xff]  }
 0x3b0   : > { %4441 = vmatprep.subr.bf16.mxu1 %v6855_v37  ;;  %4769 = vmatprep.subr.bf16.mxu0 %v6858_v38  ;;  %v6930_v37 = vld [vmem:[%s9736_s3 + $0x56c] ss:$16 sps:$4 sm:$0xff]   ;;  %v6925_v38 = vld [vmem:[%s9736_s3 + $0x560] ss:$16 sps:$4 sm:$0xff]  }
 0x3b3   : > { %4442 = vmatpush1.bf16.msra.mxu1 %v6853_v39  ;;  %4770 = vmatpush1.bf16.msra.mxu0 %v6856_v40  ;;  %v6928_v39 = vld [vmem:[%s9736_s3 + $0x568] ss:$16 sps:$4 sm:$0xff]   ;;  %v6933_v40 = vld [vmem:[%s9736_s3 + $0x584] ss:$16 sps:$4 sm:$0xff]  }
 0x3b4   : > { %4452 = vmatprep.subr.bf16.mxu1 %v6861_v41  ;;  %4780 = vmatprep.subr.bf16.mxu0 %v6864_v44  ;;  %v6936_v41 = vld [vmem:[%s9736_s3 + $0x58c] ss:$16 sps:$4 sm:$0xff]   ;;  %v6931_v44 = vld [vmem:[%s9736_s3 + $0x580] ss:$16 sps:$4 sm:$0xff]  }
 0x3b6   : > { %4444 = vmatmul.mubr.bf16.vlgmr.msra.gmra.mrb[32].mxu1 %v1262_v46  ;;  %4772 = vmatmul.mubr.bf16.vlgmr.msra.gmra.mrb[4].mxu0 %v1262_v46  ;;  %v6939_v46 = vld [vmem:[%s9736_s3 + $0x5a4] ss:$16 sps:$4 sm:$0xff]  }
 0x3b7   : > { %4453 = vmatpush1.bf16.msra.mxu1 %v6859_v45  ;;  %4484 = vmatprep.mubr.bf16.mxu1 %v1265_v48  ;;  %v6934_v45 = vld [vmem:[%s9736_s3 + $0x588] ss:$16 sps:$4 sm:$0xff]  }
 0x3b8   : > { %4781 = vmatpush1.bf16.msra.mxu0 %v6862_v47  ;;  %4812 = vmatprep.mubr.bf16.mxu0 %v1265_v48  ;;  %v6942_v47 = vld [vmem:[%s9736_s3 + $0x5ac] ss:$16 sps:$4 sm:$0xff]   ;;  %v6937_v48 = vld [vmem:[%s9736_s3 + $0x5a0] ss:$16 sps:$4 sm:$0xff]  }
 0x3b9   : > { %4454 = vmatprep.subr.bf16.mxu1 %v6867_v49  ;;  %4782 = vmatprep.subr.bf16.mxu0 %v6870_v50  ;;  %v6940_v49 = vld [vmem:[%s9736_s3 + $0x5a8] ss:$16 sps:$4 sm:$0xff]   ;;  %v6945_v50 = vld [vmem:[%s9736_s3 + $0x5c4] ss:$16 sps:$4 sm:$0xff]  }
 0x3bb   : > { %4455 = vmatpush1.bf16.msra.mxu1 %v6865_v17  ;;  %v6948_v17 = vld [vmem:[%s9736_s3 + $0x5cc] ss:$16 sps:$4 sm:$0xff]  }
 0x3bc   : > { %4783 = vmatpush1.bf16.msra.mxu0 %v6868_v32  ;;  %4456 = vmatprep.subr.bf16.mxu1 %v6873_v51  ;;  %v6943_v32 = vld [vmem:[%s9736_s3 + $0x5c0] ss:$16 sps:$4 sm:$0xff]   ;;  %v6946_v51 = vld [vmem:[%s9736_s3 + $0x5c8] ss:$16 sps:$4 sm:$0xff]  }
 0x3bd   : > { %4784 = vmatprep.subr.bf16.mxu0 %v6876_v52  ;;  %v6951_v52 = vld [vmem:[%s9736_s3 + $0x5e4] ss:$16 sps:$4 sm:$0xff]  }
 0x3bf   : > { %4457 = vmatpush1.bf16.msra.mxu1 %v6871_v53  ;;  %v6954_v53 = vld [vmem:[%s9736_s3 + $0x5ec] ss:$16 sps:$4 sm:$0xff]  }
 0x3c0   : > { %4785 = vmatpush1.bf16.msra.mxu0 %v6874_v56  ;;  %4458 = vmatprep.subr.bf16.mxu1 %v6879_v57  ;;  %v6949_v56 = vld [vmem:[%s9736_s3 + $0x5e0] ss:$16 sps:$4 sm:$0xff]   ;;  %v6952_v57 = vld [vmem:[%s9736_s3 + $0x5e8] ss:$16 sps:$4 sm:$0xff]  }
 0x3c1   : > { %4786 = vmatprep.subr.bf16.mxu0 %v6882_v58  ;;  %v6957_v58 = vld [vmem:[%s9736_s3 + $0x604] ss:$16 sps:$4 sm:$0xff]  }
 0x3c3   : > { %4459 = vmatpush1.bf16.msra.mxu1 %v6877_v59  ;;  %v6960_v59 = vld [vmem:[%s9736_s3 + $0x60c] ss:$16 sps:$4 sm:$0xff]  }
 0x3c4   : > { %4787 = vmatpush1.bf16.msra.mxu0 %v6880_v60  ;;  %4460 = vmatprep.subr.bf16.mxu1 %v6885_v61  ;;  %v6955_v60 = vld [vmem:[%s9736_s3 + $0x600] ss:$16 sps:$4 sm:$0xff]   ;;  %v1264_v61 = vpack.c.bf16 %v8020_v31, %v8020_v31 }
 0x3c5   : > { %4788 = vmatprep.subr.bf16.mxu0 %v6888_v62  ;;  %v6958_v62 = vld [vmem:[%s9736_s3 + $0x608] ss:$16 sps:$4 sm:$0xff]   ;;  %v6961_v31 = vld [vmem:[%s9736_s3 + $0x620] ss:$16 sps:$4 sm:$0xff]  }
 0x3c7   : > { %4461 = vmatpush1.bf16.msra.mxu1 %v6883_v63  ;;  %v6963_v63 = vld [vmem:[%s9736_s3 + $0x624] ss:$16 sps:$4 sm:$0xff]  }
 0x3c8   : > { %4789 = vmatpush1.bf16.msra.mxu0 %v6886_v0  ;;  %4462 = vmatprep.subr.bf16.mxu1 %v6891_v1  ;;  %v1267_v0 = vpack.c.bf16 %v8050_v43, %v8050_v43  ;;  %v6966_v1 = vld [vmem:[%s9736_s3 + $0x62c] ss:$16 sps:$4 sm:$0xff]   ;;  %v6969_v43 = vld [vmem:[%s9736_s3 + $0x644] ss:$16 sps:$4 sm:$0xff]  }
 0x3c9   : > { %4790 = vmatprep.subr.bf16.mxu0 %v6894_v4  ;;  %v6964_v4 = vld [vmem:[%s9736_s3 + $0x628] ss:$16 sps:$4 sm:$0xff]  }
 0x3cb   : > { %4463 = vmatpush1.bf16.msra.mxu1 %v6889_v5  ;;  %v6972_v5 = vld [vmem:[%s9736_s3 + $0x64c] ss:$16 sps:$4 sm:$0xff]  }
 0x3cc   : > { %4791 = vmatpush1.bf16.msra.mxu0 %v6892_v6  ;;  %4464 = vmatprep.subr.bf16.mxu1 %v6897_v7  ;;  %v6967_v6 = vld [vmem:[%s9736_s3 + $0x640] ss:$16 sps:$4 sm:$0xff]   ;;  %v6970_v7 = vld [vmem:[%s9736_s3 + $0x648] ss:$16 sps:$4 sm:$0xff]  }
 0x3cd   : > { %4792 = vmatprep.subr.bf16.mxu0 %v6900_v8  ;;  %v6975_v8 = vld [vmem:[%s9736_s3 + $0x664] ss:$16 sps:$4 sm:$0xff]  }
 0x3cf   : > { %4465 = vmatpush1.bf16.msra.mxu1 %v6895_v11  ;;  %v6978_v11 = vld [vmem:[%s9736_s3 + $0x66c] ss:$16 sps:$4 sm:$0xff]  }
 0x3d0   : > { %4793 = vmatpush1.bf16.msra.mxu0 %v6898_v12  ;;  %4466 = vmatprep.subr.bf16.mxu1 %v6903_v13  ;;  %v6973_v12 = vld [vmem:[%s9736_s3 + $0x660] ss:$16 sps:$4 sm:$0xff]   ;;  %v6976_v13 = vld [vmem:[%s9736_s3 + $0x668] ss:$16 sps:$4 sm:$0xff]  }
 0x3d1   : > { %4794 = vmatprep.subr.bf16.mxu0 %v6906_v14  ;;  %v6981_v14 = vld [vmem:[%s9736_s3 + $0x684] ss:$16 sps:$4 sm:$0xff]  }
 0x3d3   : > { %4467 = vmatpush1.bf16.msra.mxu1 %v6901_v15  ;;  %v6984_v15 = vld [vmem:[%s9736_s3 + $0x68c] ss:$16 sps:$4 sm:$0xff]  }
 0x3d4   : > { %4795 = vmatpush1.bf16.msra.mxu0 %v6904_v19  ;;  %4468 = vmatprep.subr.bf16.mxu1 %v6909_v20  ;;  %v6979_v19 = vld [vmem:[%s9736_s3 + $0x680] ss:$16 sps:$4 sm:$0xff]   ;;  %v6982_v20 = vld [vmem:[%s9736_s3 + $0x688] ss:$16 sps:$4 sm:$0xff]  }
 0x3d5   : > { %4796 = vmatprep.subr.bf16.mxu0 %v6912_v21  ;;  %v6987_v21 = vld [vmem:[%s9736_s3 + $0x6a4] ss:$16 sps:$4 sm:$0xff]  }
 0x3d7   : > { %4469 = vmatpush1.bf16.msra.mxu1 %v6907_v22  ;;  %v6990_v22 = vld [vmem:[%s9736_s3 + $0x6ac] ss:$16 sps:$4 sm:$0xff]  }
 0x3d8   : > { %4797 = vmatpush1.bf16.msra.mxu0 %v6910_v23  ;;  %4470 = vmatprep.subr.bf16.mxu1 %v6915_v24  ;;  %v6985_v23 = vld [vmem:[%s9736_s3 + $0x6a0] ss:$16 sps:$4 sm:$0xff]   ;;  %v6988_v24 = vld [vmem:[%s9736_s3 + $0x6a8] ss:$16 sps:$4 sm:$0xff]  }
 0x3d9   : > { %4798 = vmatprep.subr.bf16.mxu0 %v6918_v25  ;;  %v6993_v25 = vld [vmem:[%s9736_s3 + $0x6c4] ss:$16 sps:$4 sm:$0xff]  }
 0x3db   : > { %4471 = vmatpush1.bf16.msra.mxu1 %v6913_v26  ;;  %v6996_v26 = vld [vmem:[%s9736_s3 + $0x6cc] ss:$16 sps:$4 sm:$0xff]  }
 0x3dc   : > { %4799 = vmatpush1.bf16.msra.mxu0 %v6916_v27  ;;  %4472 = vmatprep.subr.bf16.mxu1 %v6921_v29  ;;  %v6991_v27 = vld [vmem:[%s9736_s3 + $0x6c0] ss:$16 sps:$4 sm:$0xff]   ;;  %v6994_v29 = vld [vmem:[%s9736_s3 + $0x6c8] ss:$16 sps:$4 sm:$0xff]  }
 0x3dd   : > { %4800 = vmatprep.subr.bf16.mxu0 %v6924_v28  ;;  %v6999_v28 = vld [vmem:[%s9736_s3 + $0x6e4] ss:$16 sps:$4 sm:$0xff]  }
 0x3df   : > { %4473 = vmatpush1.bf16.msra.mxu1 %v6919_v34  ;;  %v7002_v34 = vld [vmem:[%s9736_s3 + $0x6ec] ss:$16 sps:$4 sm:$0xff]  }
 0x3e0   : > { %4801 = vmatpush1.bf16.msra.mxu0 %v6922_v35  ;;  %4474 = vmatprep.subr.bf16.mxu1 %v6927_v36  ;;  %v6997_v35 = vld [vmem:[%s9736_s3 + $0x6e0] ss:$16 sps:$4 sm:$0xff]   ;;  %v7000_v36 = vld [vmem:[%s9736_s3 + $0x6e8] ss:$16 sps:$4 sm:$0xff]  }
 0x3e1   : > { %4802 = vmatprep.subr.bf16.mxu0 %v6930_v37  ;;  %v7005_v37 = vld [vmem:[%s9736_s3 + $0x704] ss:$16 sps:$4 sm:$0xff]  }
 0x3e3   : > { %4475 = vmatpush1.bf16.msra.mxu1 %v6925_v38  ;;  %v7008_v38 = vld [vmem:[%s9736_s3 + $0x70c] ss:$16 sps:$4 sm:$0xff]  }
 0x3e4   : > { %4803 = vmatpush1.bf16.msra.mxu0 %v6928_v39  ;;  %4476 = vmatprep.subr.bf16.mxu1 %v6933_v40  ;;  %v7003_v39 = vld [vmem:[%s9736_s3 + $0x700] ss:$16 sps:$4 sm:$0xff]   ;;  %v7006_v40 = vld [vmem:[%s9736_s3 + $0x708] ss:$16 sps:$4 sm:$0xff]  }
 0x3e5   : > { %4804 = vmatprep.subr.bf16.mxu0 %v6936_v41  ;;  %v7011_v41 = vld [vmem:[%s9736_s3 + $0x724] ss:$16 sps:$4 sm:$0xff]  }
 0x3e7   : > { %4477 = vmatpush1.bf16.msra.mxu1 %v6931_v44  ;;  %v7014_v44 = vld [vmem:[%s9736_s3 + $0x72c] ss:$16 sps:$4 sm:$0xff]  }
 0x3e8   : > { %4805 = vmatpush1.bf16.msra.mxu0 %v6934_v45  ;;  %4478 = vmatprep.subr.bf16.mxu1 %v6939_v46  ;;  %v7009_v45 = vld [vmem:[%s9736_s3 + $0x720] ss:$16 sps:$4 sm:$0xff]   ;;  %v7012_v46 = vld [vmem:[%s9736_s3 + $0x728] ss:$16 sps:$4 sm:$0xff]  }
 0x3e9   : > { %4806 = vmatprep.subr.bf16.mxu0 %v6942_v47  ;;  %v7017_v47 = vld [vmem:[%s9736_s3 + $0x744] ss:$16 sps:$4 sm:$0xff]  }
 0x3eb   : > { %4479 = vmatpush1.bf16.msra.mxu1 %v6937_v48  ;;  %v7020_v48 = vld [vmem:[%s9736_s3 + $0x74c] ss:$16 sps:$4 sm:$0xff]  }
 0x3ec   : > { %4807 = vmatpush1.bf16.msra.mxu0 %v6940_v49  ;;  %4480 = vmatprep.subr.bf16.mxu1 %v6945_v50  ;;  %v7015_v49 = vld [vmem:[%s9736_s3 + $0x740] ss:$16 sps:$4 sm:$0xff]   ;;  %v7018_v50 = vld [vmem:[%s9736_s3 + $0x748] ss:$16 sps:$4 sm:$0xff]  }
 0x3ed   : > { %4808 = vmatprep.subr.bf16.mxu0 %v6948_v17  ;;  %v7023_v17 = vld [vmem:[%s9736_s3 + $0x764] ss:$16 sps:$4 sm:$0xff]  }
 0x3ef   : > { %4481 = vmatpush1.bf16.msra.mxu1 %v6943_v32  ;;  %v7026_v32 = vld [vmem:[%s9736_s3 + $0x76c] ss:$16 sps:$4 sm:$0xff]  }
 0x3f0   : > { %4809 = vmatpush1.bf16.msra.mxu0 %v6946_v51  ;;  %4482 = vmatprep.subr.bf16.mxu1 %v6951_v52  ;;  %v7021_v51 = vld [vmem:[%s9736_s3 + $0x760] ss:$16 sps:$4 sm:$0xff]   ;;  %v7024_v52 = vld [vmem:[%s9736_s3 + $0x768] ss:$16 sps:$4 sm:$0xff]  }
 0x3f1   : > { %4810 = vmatprep.subr.bf16.mxu0 %v6954_v53  ;;  %v7029_v53 = vld [vmem:[%s9736_s3 + $0x784] ss:$16 sps:$4 sm:$0xff]  }
 0x3f3   : > { %4483 = vmatpush1.bf16.msra.mxu1 %v6949_v56  ;;  %v7032_v56 = vld [vmem:[%s9736_s3 + $0x78c] ss:$16 sps:$4 sm:$0xff]  }
 0x3f4   : > { %4811 = vmatpush1.bf16.msra.mxu0 %v6952_v57  ;;  %4493 = vmatprep.subr.bf16.mxu1 %v6957_v58  ;;  %v7027_v57 = vld [vmem:[%s9736_s3 + $0x780] ss:$16 sps:$4 sm:$0xff]   ;;  %v7030_v58 = vld [vmem:[%s9736_s3 + $0x788] ss:$16 sps:$4 sm:$0xff]  }
 0x3f5   : > { %4821 = vmatprep.subr.bf16.mxu0 %v6960_v59  ;;  %v7035_v59 = vld [vmem:[%s9736_s3 + $0x7a4] ss:$16 sps:$4 sm:$0xff]  }
 0x3f6   : > { %4485 = vmatmul.mubr.bf16.vlgmr.msra.gmra.mrb[32].mxu1 %v1264_v61 }
 0x3f7   : > { %4813 = vmatmul.mubr.bf16.vlgmr.msra.gmra.mrb[4].mxu0 %v1264_v61  ;;  %4494 = vmatpush1.bf16.msra.mxu1 %v6955_v60  ;;  %v7038_v60 = vld [vmem:[%s9736_s3 + $0x7ac] ss:$16 sps:$4 sm:$0xff]   ;;  %v7033_v61 = vld [vmem:[%s9736_s3 + $0x7a0] ss:$16 sps:$4 sm:$0xff]  }
 0x3f8   : > { %4525 = vmatprep.mubr.bf16.mxu1 %v1267_v0  ;;  %4822 = vmatpush1.bf16.msra.mxu0 %v6958_v62  ;;  %v7036_v62 = vld [vmem:[%s9736_s3 + $0x7a8] ss:$16 sps:$4 sm:$0xff]  }
 0x3f9   : > { %4853 = vmatprep.mubr.bf16.mxu0 %v1267_v0  ;;  %4495 = vmatprep.subr.bf16.mxu1 %v6963_v63  ;;  %v7041_v63 = vld [vmem:[%s9736_s3 + $0x7c4] ss:$16 sps:$4 sm:$0xff]   ;;  %v7044_v0 = vld [vmem:[%s9736_s3 + $0x7cc] ss:$16 sps:$4 sm:$0xff]  }
 0x3fa   : > { %4823 = vmatprep.subr.bf16.mxu0 %v6966_v1  ;;  %v7039_v1 = vld [vmem:[%s9736_s3 + $0x7c0] ss:$16 sps:$4 sm:$0xff]  }
 0x3fb   : > { %4496 = vmatpush1.bf16.msra.mxu1 %v6961_v31  ;;  %v7042_v31 = vld [vmem:[%s9736_s3 + $0x7c8] ss:$16 sps:$4 sm:$0xff]  }
 0x3fc   : > { %4824 = vmatpush1.bf16.msra.mxu0 %v6964_v4  ;;  %4497 = vmatprep.subr.bf16.mxu1 %v6969_v43  ;;  %v7047_v4 = vld [vmem:[%s9736_s3 + $0x7e4] ss:$16 sps:$4 sm:$0xff]   ;;  %v7050_v43 = vld [vmem:[%s9736_s3 + $0x7ec] ss:$16 sps:$4 sm:$0xff]  }
 0x3fd   : > { %4825 = vmatprep.subr.bf16.mxu0 %v6972_v5  ;;  %v7045_v5 = vld [vmem:[%s9736_s3 + $0x7e0] ss:$16 sps:$4 sm:$0xff]  }
 0x3ff   : > { %4498 = vmatpush1.bf16.msra.mxu1 %v6967_v6  ;;  %v7048_v6 = vld [vmem:[%s9736_s3 + $0x7e8] ss:$16 sps:$4 sm:$0xff]  }
 0x400   : > { %4826 = vmatpush1.bf16.msra.mxu0 %v6970_v7  ;;  %4499 = vmatprep.subr.bf16.mxu1 %v6975_v8  ;;  %v7053_v7 = vld [vmem:[%s9736_s3 + $0x804] ss:$16 sps:$4 sm:$0xff]   ;;  %v7056_v8 = vld [vmem:[%s9736_s3 + $0x80c] ss:$16 sps:$4 sm:$0xff]  }
 0x401   : > { %4827 = vmatprep.subr.bf16.mxu0 %v6978_v11  ;;  %v7051_v11 = vld [vmem:[%s9736_s3 + $0x800] ss:$16 sps:$4 sm:$0xff]  }
 0x403   : > { %4500 = vmatpush1.bf16.msra.mxu1 %v6973_v12  ;;  %v1266_v12 = vpack.c.bf16 %v8048_v42, %v8048_v42  ;;  %v7057_v42 = vld [vmem:[%s9736_s3 + $0x820] ss:$16 sps:$4 sm:$0xff]  }
 0x404   : > { %4828 = vmatpush1.bf16.msra.mxu0 %v6976_v13  ;;  %4501 = vmatprep.subr.bf16.mxu1 %v6981_v14  ;;  %v7054_v13 = vld [vmem:[%s9736_s3 + $0x808] ss:$16 sps:$4 sm:$0xff]   ;;  %v7059_v14 = vld [vmem:[%s9736_s3 + $0x824] ss:$16 sps:$4 sm:$0xff]  }
 0x405   : > { %4829 = vmatprep.subr.bf16.mxu0 %v6984_v15  ;;  %v1269_v15 = vpack.c.bf16 %v8078_v55, %v8078_v55  ;;  %v7065_v55 = vld [vmem:[%s9736_s3 + $0x844] ss:$16 sps:$4 sm:$0xff]  }
 0x407   : > { %4502 = vmatpush1.bf16.msra.mxu1 %v6979_v19  ;;  %v7062_v19 = vld [vmem:[%s9736_s3 + $0x82c] ss:$16 sps:$4 sm:$0xff]  }
 0x408   : > { %4830 = vmatpush1.bf16.msra.mxu0 %v6982_v20  ;;  %4503 = vmatprep.subr.bf16.mxu1 %v6987_v21  ;;  %v7060_v20 = vld [vmem:[%s9736_s3 + $0x828] ss:$16 sps:$4 sm:$0xff]   ;;  %v7068_v21 = vld [vmem:[%s9736_s3 + $0x84c] ss:$16 sps:$4 sm:$0xff]  }
 0x409   : > { %4831 = vmatprep.subr.bf16.mxu0 %v6990_v22  ;;  %v7063_v22 = vld [vmem:[%s9736_s3 + $0x840] ss:$16 sps:$4 sm:$0xff]  }
 0x40b   : > { %4504 = vmatpush1.bf16.msra.mxu1 %v6985_v23  ;;  %v7066_v23 = vld [vmem:[%s9736_s3 + $0x848] ss:$16 sps:$4 sm:$0xff]  }
 0x40c   : > { %4832 = vmatpush1.bf16.msra.mxu0 %v6988_v24  ;;  %4505 = vmatprep.subr.bf16.mxu1 %v6993_v25  ;;  %v7071_v24 = vld [vmem:[%s9736_s3 + $0x864] ss:$16 sps:$4 sm:$0xff]   ;;  %v7074_v25 = vld [vmem:[%s9736_s3 + $0x86c] ss:$16 sps:$4 sm:$0xff]  }
 0x40d   : > { %4833 = vmatprep.subr.bf16.mxu0 %v6996_v26  ;;  %v7069_v26 = vld [vmem:[%s9736_s3 + $0x860] ss:$16 sps:$4 sm:$0xff]  }
 0x40f   : > { %4506 = vmatpush1.bf16.msra.mxu1 %v6991_v27  ;;  %v7072_v27 = vld [vmem:[%s9736_s3 + $0x868] ss:$16 sps:$4 sm:$0xff]  }
 0x410   : > { %4834 = vmatpush1.bf16.msra.mxu0 %v6994_v29  ;;  %4507 = vmatprep.subr.bf16.mxu1 %v6999_v28  ;;  %v7077_v29 = vld [vmem:[%s9736_s3 + $0x884] ss:$16 sps:$4 sm:$0xff]   ;;  %v7080_v28 = vld [vmem:[%s9736_s3 + $0x88c] ss:$16 sps:$4 sm:$0xff]  }
 0x411   : > { %4835 = vmatprep.subr.bf16.mxu0 %v7002_v34  ;;  %v7075_v34 = vld [vmem:[%s9736_s3 + $0x880] ss:$16 sps:$4 sm:$0xff]  }
 0x413   : > { %4508 = vmatpush1.bf16.msra.mxu1 %v6997_v35  ;;  %v7078_v35 = vld [vmem:[%s9736_s3 + $0x888] ss:$16 sps:$4 sm:$0xff]  }
 0x414   : > { %4836 = vmatpush1.bf16.msra.mxu0 %v7000_v36  ;;  %4509 = vmatprep.subr.bf16.mxu1 %v7005_v37  ;;  %v7083_v36 = vld [vmem:[%s9736_s3 + $0x8a4] ss:$16 sps:$4 sm:$0xff]   ;;  %v7086_v37 = vld [vmem:[%s9736_s3 + $0x8ac] ss:$16 sps:$4 sm:$0xff]  }
 0x415   : > { %4837 = vmatprep.subr.bf16.mxu0 %v7008_v38  ;;  %v7081_v38 = vld [vmem:[%s9736_s3 + $0x8a0] ss:$16 sps:$4 sm:$0xff]  }
 0x417   : > { %4510 = vmatpush1.bf16.msra.mxu1 %v7003_v39  ;;  %v7084_v39 = vld [vmem:[%s9736_s3 + $0x8a8] ss:$16 sps:$4 sm:$0xff]  }
 0x418   : > { %4838 = vmatpush1.bf16.msra.mxu0 %v7006_v40  ;;  %4511 = vmatprep.subr.bf16.mxu1 %v7011_v41  ;;  %v7089_v40 = vld [vmem:[%s9736_s3 + $0x8c4] ss:$16 sps:$4 sm:$0xff]   ;;  %v7092_v41 = vld [vmem:[%s9736_s3 + $0x8cc] ss:$16 sps:$4 sm:$0xff]  }
 0x419   : > { %4839 = vmatprep.subr.bf16.mxu0 %v7014_v44  ;;  %v7087_v44 = vld [vmem:[%s9736_s3 + $0x8c0] ss:$16 sps:$4 sm:$0xff]  }
 0x41b   : > { %4512 = vmatpush1.bf16.msra.mxu1 %v7009_v45  ;;  %v7090_v45 = vld [vmem:[%s9736_s3 + $0x8c8] ss:$16 sps:$4 sm:$0xff]  }
 0x41c   : > { %4840 = vmatpush1.bf16.msra.mxu0 %v7012_v46  ;;  %4513 = vmatprep.subr.bf16.mxu1 %v7017_v47  ;;  %v7095_v46 = vld [vmem:[%s9736_s3 + $0x8e4] ss:$16 sps:$4 sm:$0xff]   ;;  %v7098_v47 = vld [vmem:[%s9736_s3 + $0x8ec] ss:$16 sps:$4 sm:$0xff]  }
 0x41d   : > { %4841 = vmatprep.subr.bf16.mxu0 %v7020_v48  ;;  %v7093_v48 = vld [vmem:[%s9736_s3 + $0x8e0] ss:$16 sps:$4 sm:$0xff]  }
 0x41f   : > { %4514 = vmatpush1.bf16.msra.mxu1 %v7015_v49  ;;  %v7096_v49 = vld [vmem:[%s9736_s3 + $0x8e8] ss:$16 sps:$4 sm:$0xff]  }
 0x420   : > { %4842 = vmatpush1.bf16.msra.mxu0 %v7018_v50  ;;  %4515 = vmatprep.subr.bf16.mxu1 %v7023_v17  ;;  %v7101_v50 = vld [vmem:[%s9736_s3 + $0x904] ss:$16 sps:$4 sm:$0xff]   ;;  %v7104_v17 = vld [vmem:[%s9736_s3 + $0x90c] ss:$16 sps:$4 sm:$0xff]  }
 0x421   : > { %4843 = vmatprep.subr.bf16.mxu0 %v7026_v32  ;;  %v7099_v32 = vld [vmem:[%s9736_s3 + $0x900] ss:$16 sps:$4 sm:$0xff]  }
 0x423   : > { %4516 = vmatpush1.bf16.msra.mxu1 %v7021_v51  ;;  %v7102_v51 = vld [vmem:[%s9736_s3 + $0x908] ss:$16 sps:$4 sm:$0xff]  }
 0x424   : > { %4844 = vmatpush1.bf16.msra.mxu0 %v7024_v52  ;;  %4517 = vmatprep.subr.bf16.mxu1 %v7029_v53  ;;  %v7107_v52 = vld [vmem:[%s9736_s3 + $0x924] ss:$16 sps:$4 sm:$0xff]   ;;  %v7110_v53 = vld [vmem:[%s9736_s3 + $0x92c] ss:$16 sps:$4 sm:$0xff]  }
 0x425   : > { %4845 = vmatprep.subr.bf16.mxu0 %v7032_v56  ;;  %v7105_v56 = vld [vmem:[%s9736_s3 + $0x920] ss:$16 sps:$4 sm:$0xff]  }
 0x427   : > { %4518 = vmatpush1.bf16.msra.mxu1 %v7027_v57  ;;  %v5026_v57 = vld [vmem:[%s359_s21] sm:$0xff]  ;;  %s5736_s21 = sshll.u32 %s7691_s20, 3 }
 0x428   : > { %4846 = vmatpush1.bf16.msra.mxu0 %v7030_v58  ;;  %4519 = vmatprep.subr.bf16.mxu1 %v7035_v59  ;;  %v7108_v58 = vld [vmem:[%s9736_s3 + $0x928] ss:$16 sps:$4 sm:$0xff]   ;;  %v7113_v59 = vld [vmem:[%s9736_s3 + $0x944] ss:$16 sps:$4 sm:$0xff]   ;;  %s355_s9 = scalar_lea.vmem [#allocation3], %s5736_s21 }
 0x429   : > { %4847 = vmatprep.subr.bf16.mxu0 %v7038_v60  ;;  %v7116_v60 = vld [vmem:[%s9736_s3 + $0x94c] ss:$16 sps:$4 sm:$0xff]   ;;  %5028 = vperm.xlu1 %6617, %v5026_v57   ;;  %s5653_s13 = sshll.u32 %s355_s9, 4  ;;  %s9691_s13 = int_to_ptr.vmem [resolvable:$true] %s5653_s13 }
 0x42a   : > { %v7194_v57 = vld [vmem:[%s9736_s3 + $0xaec] ss:$16 sps:$4 sm:$0xff]  }
 0x42b   : > { %4520 = vmatpush1.bf16.msra.mxu1 %v7033_v61  ;;  %v7111_v61 = vld [vmem:[%s9736_s3 + $0x940] ss:$16 sps:$4 sm:$0xff]  }
 0x42c   : > { %4848 = vmatpush1.bf16.msra.mxu0 %v7036_v62  ;;  %4521 = vmatprep.subr.bf16.mxu1 %v7041_v63  ;;  %v7114_v62 = vld [vmem:[%s9736_s3 + $0x948] ss:$16 sps:$4 sm:$0xff]   ;;  %v7119_v63 = vld [vmem:[%s9736_s3 + $0x964] ss:$16 sps:$4 sm:$0xff]  }
 0x42d   : > { %4849 = vmatprep.subr.bf16.mxu0 %v7044_v0  ;;  %v7122_v0 = vld [vmem:[%s9736_s3 + $0x96c] ss:$16 sps:$4 sm:$0xff]  }
 0x42f   : > { %4522 = vmatpush1.bf16.msra.mxu1 %v7039_v1  ;;  %v7117_v1 = vld [vmem:[%s9736_s3 + $0x960] ss:$16 sps:$4 sm:$0xff]  }
 0x430   : > { %4850 = vmatpush1.bf16.msra.mxu0 %v7042_v31  ;;  %4523 = vmatprep.subr.bf16.mxu1 %v7047_v4  ;;  %v7120_v31 = vld [vmem:[%s9736_s3 + $0x968] ss:$16 sps:$4 sm:$0xff]   ;;  %v7125_v4 = vld [vmem:[%s9736_s3 + $0x984] ss:$16 sps:$4 sm:$0xff]  }
 0x431   : > { %4851 = vmatprep.subr.bf16.mxu0 %v7050_v43  ;;  %v7128_v43 = vld [vmem:[%s9736_s3 + $0x98c] ss:$16 sps:$4 sm:$0xff]  }
 0x433   : > { %4524 = vmatpush1.bf16.msra.mxu1 %v7045_v5  ;;  %v7123_v5 = vld [vmem:[%s9736_s3 + $0x980] ss:$16 sps:$4 sm:$0xff]  }
 0x434   : > { %4852 = vmatpush1.bf16.msra.mxu0 %v7048_v6  ;;  %4534 = vmatprep.subr.bf16.mxu1 %v7053_v7  ;;  %v7126_v6 = vld [vmem:[%s9736_s3 + $0x988] ss:$16 sps:$4 sm:$0xff]   ;;  %v7131_v7 = vld [vmem:[%s9736_s3 + $0x9a4] ss:$16 sps:$4 sm:$0xff]  }
 0x435   : > { %4862 = vmatprep.subr.bf16.mxu0 %v7056_v8  ;;  %v7134_v8 = vld [vmem:[%s9736_s3 + $0x9ac] ss:$16 sps:$4 sm:$0xff]  }
 0x436   : > { %4526 = vmatmul.mubr.bf16.vlgmr.msra.gmra.mrb[32].mxu1 %v1266_v12 }
 0x437   : > { %4854 = vmatmul.mubr.bf16.vlgmr.msra.gmra.mrb[4].mxu0 %v1266_v12  ;;  %4535 = vmatpush1.bf16.msra.mxu1 %v7051_v11  ;;  %v7129_v11 = vld [vmem:[%s9736_s3 + $0x9a0] ss:$16 sps:$4 sm:$0xff]   ;;  %v7132_v12 = vld [vmem:[%s9736_s3 + $0x9a8] ss:$16 sps:$4 sm:$0xff]  }
 0x438   : > { %4566 = vmatprep.mubr.bf16.mxu1 %v1269_v15  ;;  %4863 = vmatpush1.bf16.msra.mxu0 %v7054_v13  ;;  %v7137_v13 = vld [vmem:[%s9736_s3 + $0x9c4] ss:$16 sps:$4 sm:$0xff]  }
 0x439   : > { %4894 = vmatprep.mubr.bf16.mxu0 %v1269_v15  ;;  %4536 = vmatprep.subr.bf16.mxu1 %v7059_v14  ;;  %v7140_v14 = vld [vmem:[%s9736_s3 + $0x9cc] ss:$16 sps:$4 sm:$0xff]   ;;  %v7135_v15 = vld [vmem:[%s9736_s3 + $0x9c0] ss:$16 sps:$4 sm:$0xff]  }
 0x43a   : > { %4864 = vmatprep.subr.bf16.mxu0 %v7062_v19  ;;  %v7138_v19 = vld [vmem:[%s9736_s3 + $0x9c8] ss:$16 sps:$4 sm:$0xff]  }
 0x43b   : > { %4537 = vmatpush1.bf16.msra.mxu1 %v7057_v42  ;;  %v7143_v42 = vld [vmem:[%s9736_s3 + $0x9e4] ss:$16 sps:$4 sm:$0xff]  }
 0x43c   : > { %4865 = vmatpush1.bf16.msra.mxu0 %v7060_v20  ;;  %4538 = vmatprep.subr.bf16.mxu1 %v7065_v55  ;;  %v7146_v20 = vld [vmem:[%s9736_s3 + $0x9ec] ss:$16 sps:$4 sm:$0xff]   ;;  %v7141_v55 = vld [vmem:[%s9736_s3 + $0x9e0] ss:$16 sps:$4 sm:$0xff]  }
 0x43d   : > { %4866 = vmatprep.subr.bf16.mxu0 %v7068_v21  ;;  %v7144_v21 = vld [vmem:[%s9736_s3 + $0x9e8] ss:$16 sps:$4 sm:$0xff]  }
 0x43f   : > { %4539 = vmatpush1.bf16.msra.mxu1 %v7063_v22  ;;  %v7149_v22 = vld [vmem:[%s9736_s3 + $0xa04] ss:$16 sps:$4 sm:$0xff]  }
 0x440   : > { %4867 = vmatpush1.bf16.msra.mxu0 %v7066_v23  ;;  %4540 = vmatprep.subr.bf16.mxu1 %v7071_v24  ;;  %v7152_v23 = vld [vmem:[%s9736_s3 + $0xa0c] ss:$16 sps:$4 sm:$0xff]   ;;  %v7147_v24 = vld [vmem:[%s9736_s3 + $0xa00] ss:$16 sps:$4 sm:$0xff]  }
 0x441   : > { %4868 = vmatprep.subr.bf16.mxu0 %v7074_v25  ;;  %v1268_v25 = vpack.c.bf16 %v8076_v54, %v8076_v54  ;;  %v7153_v54 = vld [vmem:[%s9736_s3 + $0xa20] ss:$16 sps:$4 sm:$0xff]  }
 0x443   : > { %4541 = vmatpush1.bf16.msra.mxu1 %v7069_v26  ;;  %v7150_v26 = vld [vmem:[%s9736_s3 + $0xa08] ss:$16 sps:$4 sm:$0xff]  }
 0x444   : > { %4869 = vmatpush1.bf16.msra.mxu0 %v7072_v27  ;;  %4542 = vmatprep.subr.bf16.mxu1 %v7077_v29  ;;  %v7155_v27 = vld [vmem:[%s9736_s3 + $0xa24] ss:$16 sps:$4 sm:$0xff]   ;;  %v1271_v29 = vpack.c.bf16 %v8106_v3, %v8106_v3 }
 0x445   : > { %4870 = vmatprep.subr.bf16.mxu0 %v7080_v28  ;;  %v7158_v28 = vld [vmem:[%s9736_s3 + $0xa2c] ss:$16 sps:$4 sm:$0xff]   ;;  %v7161_v3 = vld [vmem:[%s9736_s3 + $0xa44] ss:$16 sps:$4 sm:$0xff]  }
 0x447   : > { %4543 = vmatpush1.bf16.msra.mxu1 %v7075_v34  ;;  %v7156_v34 = vld [vmem:[%s9736_s3 + $0xa28] ss:$16 sps:$4 sm:$0xff]  }
 0x448   : > { %4871 = vmatpush1.bf16.msra.mxu0 %v7078_v35  ;;  %4544 = vmatprep.subr.bf16.mxu1 %v7083_v36  ;;  %v7164_v35 = vld [vmem:[%s9736_s3 + $0xa4c] ss:$16 sps:$4 sm:$0xff]   ;;  %v7159_v36 = vld [vmem:[%s9736_s3 + $0xa40] ss:$16 sps:$4 sm:$0xff]  }
 0x449   : > { %4872 = vmatprep.subr.bf16.mxu0 %v7086_v37  ;;  %v7162_v37 = vld [vmem:[%s9736_s3 + $0xa48] ss:$16 sps:$4 sm:$0xff]  }
 0x44b   : > { %4545 = vmatpush1.bf16.msra.mxu1 %v7081_v38  ;;  %v7167_v38 = vld [vmem:[%s9736_s3 + $0xa64] ss:$16 sps:$4 sm:$0xff]  }
 0x44c   : > { %4873 = vmatpush1.bf16.msra.mxu0 %v7084_v39  ;;  %4546 = vmatprep.subr.bf16.mxu1 %v7089_v40  ;;  %v7170_v39 = vld [vmem:[%s9736_s3 + $0xa6c] ss:$16 sps:$4 sm:$0xff]   ;;  %v7165_v40 = vld [vmem:[%s9736_s3 + $0xa60] ss:$16 sps:$4 sm:$0xff]  }
 0x44d   : > { %4874 = vmatprep.subr.bf16.mxu0 %v7092_v41  ;;  %v7168_v41 = vld [vmem:[%s9736_s3 + $0xa68] ss:$16 sps:$4 sm:$0xff]  }
 0x44f   : > { %4547 = vmatpush1.bf16.msra.mxu1 %v7087_v44  ;;  %v7173_v44 = vld [vmem:[%s9736_s3 + $0xa84] ss:$16 sps:$4 sm:$0xff]  }
 0x450   : > { %4875 = vmatpush1.bf16.msra.mxu0 %v7090_v45  ;;  %4548 = vmatprep.subr.bf16.mxu1 %v7095_v46  ;;  %v7176_v45 = vld [vmem:[%s9736_s3 + $0xa8c] ss:$16 sps:$4 sm:$0xff]   ;;  %v7171_v46 = vld [vmem:[%s9736_s3 + $0xa80] ss:$16 sps:$4 sm:$0xff]  }
 0x451   : > { %4876 = vmatprep.subr.bf16.mxu0 %v7098_v47  ;;  %v7174_v47 = vld [vmem:[%s9736_s3 + $0xa88] ss:$16 sps:$4 sm:$0xff]  }
 0x453   : > { %4549 = vmatpush1.bf16.msra.mxu1 %v7093_v48  ;;  %v7179_v48 = vld [vmem:[%s9736_s3 + $0xaa4] ss:$16 sps:$4 sm:$0xff]  }
 0x454   : > { %4877 = vmatpush1.bf16.msra.mxu0 %v7096_v49  ;;  %4550 = vmatprep.subr.bf16.mxu1 %v7101_v50  ;;  %v7182_v49 = vld [vmem:[%s9736_s3 + $0xaac] ss:$16 sps:$4 sm:$0xff]   ;;  %v7177_v50 = vld [vmem:[%s9736_s3 + $0xaa0] ss:$16 sps:$4 sm:$0xff]  }
 0x455   : > { %4878 = vmatprep.subr.bf16.mxu0 %v7104_v17  ;;  %v7180_v17 = vld [vmem:[%s9736_s3 + $0xaa8] ss:$16 sps:$4 sm:$0xff]  }
 0x457   : > { %4551 = vmatpush1.bf16.msra.mxu1 %v7099_v32  ;;  %v7185_v32 = vld [vmem:[%s9736_s3 + $0xac4] ss:$16 sps:$4 sm:$0xff]  }
 0x458   : > { %4879 = vmatpush1.bf16.msra.mxu0 %v7102_v51  ;;  %4552 = vmatprep.subr.bf16.mxu1 %v7107_v52  ;;  %v7188_v51 = vld [vmem:[%s9736_s3 + $0xacc] ss:$16 sps:$4 sm:$0xff]   ;;  %v7183_v52 = vld [vmem:[%s9736_s3 + $0xac0] ss:$16 sps:$4 sm:$0xff]  }
 0x459   : > { %4880 = vmatprep.subr.bf16.mxu0 %v7110_v53  ;;  %v7186_v53 = vld [vmem:[%s9736_s3 + $0xac8] ss:$16 sps:$4 sm:$0xff]  }
 0x45b   : > { %4553 = vmatpush1.bf16.msra.mxu1 %v7105_v56  ;;  %v7191_v56 = vld [vmem:[%s9736_s3 + $0xae4] ss:$16 sps:$4 sm:$0xff]  }
 0x45c   : > { %4881 = vmatpush1.bf16.msra.mxu0 %v7108_v58  ;;  %4554 = vmatprep.subr.bf16.mxu1 %v7113_v59  ;;  %v7189_v58 = vld [vmem:[%s9736_s3 + $0xae0] ss:$16 sps:$4 sm:$0xff]   ;;  %v7192_v59 = vld [vmem:[%s9736_s3 + $0xae8] ss:$16 sps:$4 sm:$0xff]  }
 0x45d   : > { %4882 = vmatprep.subr.bf16.mxu0 %v7116_v60  ;;  %v7197_v60 = vld [vmem:[%s9736_s3 + $0xb04] ss:$16 sps:$4 sm:$0xff]  }
 0x45f   : > { %4555 = vmatpush1.bf16.msra.mxu1 %v7111_v61  ;;  %v7200_v61 = vld [vmem:[%s9736_s3 + $0xb0c] ss:$16 sps:$4 sm:$0xff]  }
 0x460   : > { %4883 = vmatpush1.bf16.msra.mxu0 %v7114_v62  ;;  %4556 = vmatprep.subr.bf16.mxu1 %v7119_v63  ;;  %v7195_v62 = vld [vmem:[%s9736_s3 + $0xb00] ss:$16 sps:$4 sm:$0xff]   ;;  %v7198_v63 = vld [vmem:[%s9736_s3 + $0xb08] ss:$16 sps:$4 sm:$0xff]  }
 0x461   : > { %4884 = vmatprep.subr.bf16.mxu0 %v7122_v0  ;;  %v7203_v0 = vld [vmem:[%s9736_s3 + $0xb24] ss:$16 sps:$4 sm:$0xff]  }
 0x463   : > { %4557 = vmatpush1.bf16.msra.mxu1 %v7117_v1  ;;  %v7206_v1 = vld [vmem:[%s9736_s3 + $0xb2c] ss:$16 sps:$4 sm:$0xff]  }
 0x464   : > { %4885 = vmatpush1.bf16.msra.mxu0 %v7120_v31  ;;  %4558 = vmatprep.subr.bf16.mxu1 %v7125_v4  ;;  %v7201_v31 = vld [vmem:[%s9736_s3 + $0xb20] ss:$16 sps:$4 sm:$0xff]   ;;  %v7204_v4 = vld [vmem:[%s9736_s3 + $0xb28] ss:$16 sps:$4 sm:$0xff]  }
 0x465   : > { %4886 = vmatprep.subr.bf16.mxu0 %v7128_v43  ;;  %v7209_v43 = vld [vmem:[%s9736_s3 + $0xb44] ss:$16 sps:$4 sm:$0xff]  }
 0x467   : > { %4559 = vmatpush1.bf16.msra.mxu1 %v7123_v5  ;;  %v7212_v5 = vld [vmem:[%s9736_s3 + $0xb4c] ss:$16 sps:$4 sm:$0xff]  }
 0x468   : > { %4887 = vmatpush1.bf16.msra.mxu0 %v7126_v6  ;;  %4560 = vmatprep.subr.bf16.mxu1 %v7131_v7  ;;  %v7207_v6 = vld [vmem:[%s9736_s3 + $0xb40] ss:$16 sps:$4 sm:$0xff]   ;;  %v7210_v7 = vld [vmem:[%s9736_s3 + $0xb48] ss:$16 sps:$4 sm:$0xff]  }
 0x469   : > { %4888 = vmatprep.subr.bf16.mxu0 %v7134_v8  ;;  %v7215_v8 = vld [vmem:[%s9736_s3 + $0xb64] ss:$16 sps:$4 sm:$0xff]  }
 0x46b   : > { %4561 = vmatpush1.bf16.msra.mxu1 %v7129_v11  ;;  %v7218_v11 = vld [vmem:[%s9736_s3 + $0xb6c] ss:$16 sps:$4 sm:$0xff]  }
 0x46c   : > { %4889 = vmatpush1.bf16.msra.mxu0 %v7132_v12  ;;  %4562 = vmatprep.subr.bf16.mxu1 %v7137_v13  ;;  %v7213_v12 = vld [vmem:[%s9736_s3 + $0xb60] ss:$16 sps:$4 sm:$0xff]   ;;  %v7216_v13 = vld [vmem:[%s9736_s3 + $0xb68] ss:$16 sps:$4 sm:$0xff]  }
 0x46d   : > { %4890 = vmatprep.subr.bf16.mxu0 %v7140_v14  ;;  %v7221_v14 = vld [vmem:[%s9736_s3 + $0xb84] ss:$16 sps:$4 sm:$0xff]  }
 0x46f   : > { %4563 = vmatpush1.bf16.msra.mxu1 %v7135_v15  ;;  %v7224_v15 = vld [vmem:[%s9736_s3 + $0xb8c] ss:$16 sps:$4 sm:$0xff]  }
 0x470   : > { %4891 = vmatpush1.bf16.msra.mxu0 %v7138_v19  ;;  %4564 = vmatprep.subr.bf16.mxu1 %v7143_v42  ;;  %v7219_v19 = vld [vmem:[%s9736_s3 + $0xb80] ss:$16 sps:$4 sm:$0xff]   ;;  %v7222_v42 = vld [vmem:[%s9736_s3 + $0xb88] ss:$16 sps:$4 sm:$0xff]  }
 0x471   : > { %4892 = vmatprep.subr.bf16.mxu0 %v7146_v20  ;;  %v7227_v20 = vld [vmem:[%s9736_s3 + $0xba4] ss:$16 sps:$4 sm:$0xff]  }
 0x473   : > { %4565 = vmatpush1.bf16.msra.mxu1 %v7141_v55  ;;  %v7230_v55 = vld [vmem:[%s9736_s3 + $0xbac] ss:$16 sps:$4 sm:$0xff]  }
 0x474   : > { %4893 = vmatpush1.bf16.msra.mxu0 %v7144_v21  ;;  %4575 = vmatprep.subr.bf16.mxu1 %v7149_v22  ;;  %v7225_v21 = vld [vmem:[%s9736_s3 + $0xba0] ss:$16 sps:$4 sm:$0xff]   ;;  %v7228_v22 = vld [vmem:[%s9736_s3 + $0xba8] ss:$16 sps:$4 sm:$0xff]  }
 0x475   : > { %4903 = vmatprep.subr.bf16.mxu0 %v7152_v23  ;;  %v7233_v23 = vld [vmem:[%s9736_s3 + $0xbc4] ss:$16 sps:$4 sm:$0xff]  }
 0x476   : > { %4567 = vmatmul.mubr.bf16.vlgmr.msra.gmra.mrb[32].mxu1 %v1268_v25 }
 0x477   : > { %4895 = vmatmul.mubr.bf16.vlgmr.msra.gmra.mrb[4].mxu0 %v1268_v25  ;;  %4576 = vmatpush1.bf16.msra.mxu1 %v7147_v24  ;;  %v7236_v24 = vld [vmem:[%s9736_s3 + $0xbcc] ss:$16 sps:$4 sm:$0xff]   ;;  %v7231_v25 = vld [vmem:[%s9736_s3 + $0xbc0] ss:$16 sps:$4 sm:$0xff]  }
 0x478   : > { %4607 = vmatprep.mubr.bf16.mxu1 %v1271_v29  ;;  %4904 = vmatpush1.bf16.msra.mxu0 %v7150_v26  ;;  %v7234_v26 = vld [vmem:[%s9736_s3 + $0xbc8] ss:$16 sps:$4 sm:$0xff]  }
 0x479   : > { %4935 = vmatprep.mubr.bf16.mxu0 %v1271_v29  ;;  %4577 = vmatprep.subr.bf16.mxu1 %v7155_v27  ;;  %v7239_v27 = vld [vmem:[%s9736_s3 + $0xbe4] ss:$16 sps:$4 sm:$0xff]   ;;  %v7242_v29 = vld [vmem:[%s9736_s3 + $0xbec] ss:$16 sps:$4 sm:$0xff]  }
 0x47a   : > { %4905 = vmatprep.subr.bf16.mxu0 %v7158_v28  ;;  %v7237_v28 = vld [vmem:[%s9736_s3 + $0xbe0] ss:$16 sps:$4 sm:$0xff]  }
 0x47b   : > { %4578 = vmatpush1.bf16.msra.mxu1 %v7153_v54  ;;  %v7240_v54 = vld [vmem:[%s9736_s3 + $0xbe8] ss:$16 sps:$4 sm:$0xff]  }
 0x47c   : > { %4906 = vmatpush1.bf16.msra.mxu0 %v7156_v34  ;;  %4579 = vmatprep.subr.bf16.mxu1 %v7161_v3  ;;  %v7245_v34 = vld [vmem:[%s9736_s3 + $0xc04] ss:$16 sps:$4 sm:$0xff]   ;;  %v7248_v3 = vld [vmem:[%s9736_s3 + $0xc0c] ss:$16 sps:$4 sm:$0xff]  }
 0x47d   : > { %4907 = vmatprep.subr.bf16.mxu0 %v7164_v35  ;;  %v7243_v35 = vld [vmem:[%s9736_s3 + $0xc00] ss:$16 sps:$4 sm:$0xff]  }
 0x47f   : > { %4580 = vmatpush1.bf16.msra.mxu1 %v7159_v36  ;;  %v1270_v36 = vpack.c.bf16 %v8104_v2, %v8104_v2  ;;  %v7249_v2 = vld [vmem:[%s9736_s3 + $0xc20] ss:$16 sps:$4 sm:$0xff]  }
 0x480   : > { %4908 = vmatpush1.bf16.msra.mxu0 %v7162_v37  ;;  %4581 = vmatprep.subr.bf16.mxu1 %v7167_v38  ;;  %v7246_v37 = vld [vmem:[%s9736_s3 + $0xc08] ss:$16 sps:$4 sm:$0xff]   ;;  %v7251_v38 = vld [vmem:[%s9736_s3 + $0xc24] ss:$16 sps:$4 sm:$0xff]  }
 0x481   : > { %4909 = vmatprep.subr.bf16.mxu0 %v7170_v39  ;;  %v1273_v39 = vpack.c.bf16 %v8134_v18, %v8134_v18  ;;  %v7257_v18 = vld [vmem:[%s9736_s3 + $0xc44] ss:$16 sps:$4 sm:$0xff]  }
 0x483   : > { %4582 = vmatpush1.bf16.msra.mxu1 %v7165_v40  ;;  %v7254_v40 = vld [vmem:[%s9736_s3 + $0xc2c] ss:$16 sps:$4 sm:$0xff]  }
 0x484   : > { %4910 = vmatpush1.bf16.msra.mxu0 %v7168_v41  ;;  %4583 = vmatprep.subr.bf16.mxu1 %v7173_v44  ;;  %v7252_v41 = vld [vmem:[%s9736_s3 + $0xc28] ss:$16 sps:$4 sm:$0xff]   ;;  %v7260_v44 = vld [vmem:[%s9736_s3 + $0xc4c] ss:$16 sps:$4 sm:$0xff]  }
 0x485   : > { %4911 = vmatprep.subr.bf16.mxu0 %v7176_v45  ;;  %v7255_v45 = vld [vmem:[%s9736_s3 + $0xc40] ss:$16 sps:$4 sm:$0xff]  }
 0x487   : > { %4584 = vmatpush1.bf16.msra.mxu1 %v7171_v46  ;;  %v7258_v46 = vld [vmem:[%s9736_s3 + $0xc48] ss:$16 sps:$4 sm:$0xff]  }
 0x488   : > { %4912 = vmatpush1.bf16.msra.mxu0 %v7174_v47  ;;  %4585 = vmatprep.subr.bf16.mxu1 %v7179_v48  ;;  %v7263_v47 = vld [vmem:[%s9736_s3 + $0xc64] ss:$16 sps:$4 sm:$0xff]   ;;  %v7266_v48 = vld [vmem:[%s9736_s3 + $0xc6c] ss:$16 sps:$4 sm:$0xff]  }
 0x489   : > { %4913 = vmatprep.subr.bf16.mxu0 %v7182_v49  ;;  %v7261_v49 = vld [vmem:[%s9736_s3 + $0xc60] ss:$16 sps:$4 sm:$0xff]  }
 0x48b   : > { %4586 = vmatpush1.bf16.msra.mxu1 %v7177_v50  ;;  %v7264_v50 = vld [vmem:[%s9736_s3 + $0xc68] ss:$16 sps:$4 sm:$0xff]  }
 0x48c   : > { %4914 = vmatpush1.bf16.msra.mxu0 %v7180_v17  ;;  %4587 = vmatprep.subr.bf16.mxu1 %v7185_v32  ;;  %v7269_v17 = vld [vmem:[%s9736_s3 + $0xc84] ss:$16 sps:$4 sm:$0xff]   ;;  %v7272_v32 = vld [vmem:[%s9736_s3 + $0xc8c] ss:$16 sps:$4 sm:$0xff]  }
 0x48d   : > { %4915 = vmatprep.subr.bf16.mxu0 %v7188_v51  ;;  %v7267_v51 = vld [vmem:[%s9736_s3 + $0xc80] ss:$16 sps:$4 sm:$0xff]  }
 0x48f   : > { %4588 = vmatpush1.bf16.msra.mxu1 %v7183_v52  ;;  %v7270_v52 = vld [vmem:[%s9736_s3 + $0xc88] ss:$16 sps:$4 sm:$0xff]  }
 0x490   : > { %4916 = vmatpush1.bf16.msra.mxu0 %v7186_v53  ;;  %4589 = vmatprep.subr.bf16.mxu1 %v7191_v56  ;;  %v7275_v53 = vld [vmem:[%s9736_s3 + $0xca4] ss:$16 sps:$4 sm:$0xff]   ;;  %v7278_v56 = vld [vmem:[%s9736_s3 + $0xcac] ss:$16 sps:$4 sm:$0xff]  }
 0x491   : > { %4917 = vmatprep.subr.bf16.mxu0 %v7194_v57  ;;  %v7273_v57 = vld [vmem:[%s9736_s3 + $0xca0] ss:$16 sps:$4 sm:$0xff]  }
 0x493   : > { %4590 = vmatpush1.bf16.msra.mxu1 %v7189_v58  ;;  %v7276_v58 = vld [vmem:[%s9736_s3 + $0xca8] ss:$16 sps:$4 sm:$0xff]  }
 0x494   : > { %4918 = vmatpush1.bf16.msra.mxu0 %v7192_v59  ;;  %4591 = vmatprep.subr.bf16.mxu1 %v7197_v60  ;;  %v7281_v59 = vld [vmem:[%s9736_s3 + $0xcc4] ss:$16 sps:$4 sm:$0xff]   ;;  %v7284_v60 = vld [vmem:[%s9736_s3 + $0xccc] ss:$16 sps:$4 sm:$0xff]  }
 0x495   : > { %4919 = vmatprep.subr.bf16.mxu0 %v7200_v61  ;;  %v7279_v61 = vld [vmem:[%s9736_s3 + $0xcc0] ss:$16 sps:$4 sm:$0xff]  }
 0x497   : > { %4592 = vmatpush1.bf16.msra.mxu1 %v7195_v62  ;;  %v7282_v62 = vld [vmem:[%s9736_s3 + $0xcc8] ss:$16 sps:$4 sm:$0xff]  }
 0x498   : > { %4920 = vmatpush1.bf16.msra.mxu0 %v7198_v63  ;;  %4593 = vmatprep.subr.bf16.mxu1 %v7203_v0  ;;  %v7287_v63 = vld [vmem:[%s9736_s3 + $0xce4] ss:$16 sps:$4 sm:$0xff]   ;;  %v7290_v0 = vld [vmem:[%s9736_s3 + $0xcec] ss:$16 sps:$4 sm:$0xff]  }
 0x499   : > { %4921 = vmatprep.subr.bf16.mxu0 %v7206_v1  ;;  %v7285_v1 = vld [vmem:[%s9736_s3 + $0xce0] ss:$16 sps:$4 sm:$0xff]  }
 0x49b   : > { %4594 = vmatpush1.bf16.msra.mxu1 %v7201_v31  ;;  %v7288_v31 = vld [vmem:[%s9736_s3 + $0xce8] ss:$16 sps:$4 sm:$0xff]  }
 0x49c   : > { %4922 = vmatpush1.bf16.msra.mxu0 %v7204_v4  ;;  %4595 = vmatprep.subr.bf16.mxu1 %v7209_v43  ;;  %v7293_v4 = vld [vmem:[%s9736_s3 + $0xd04] ss:$16 sps:$4 sm:$0xff]   ;;  %v7296_v43 = vld [vmem:[%s9736_s3 + $0xd0c] ss:$16 sps:$4 sm:$0xff]  }
 0x49d   : > { %4923 = vmatprep.subr.bf16.mxu0 %v7212_v5  ;;  %v7291_v5 = vld [vmem:[%s9736_s3 + $0xd00] ss:$16 sps:$4 sm:$0xff]  }
 0x49f   : > { %4596 = vmatpush1.bf16.msra.mxu1 %v7207_v6  ;;  %v7294_v6 = vld [vmem:[%s9736_s3 + $0xd08] ss:$16 sps:$4 sm:$0xff]  }
 0x4a0   : > { %4924 = vmatpush1.bf16.msra.mxu0 %v7210_v7  ;;  %4597 = vmatprep.subr.bf16.mxu1 %v7215_v8  ;;  %v7299_v7 = vld [vmem:[%s9736_s3 + $0xd24] ss:$16 sps:$4 sm:$0xff]   ;;  %v7302_v8 = vld [vmem:[%s9736_s3 + $0xd2c] ss:$16 sps:$4 sm:$0xff]  }
 0x4a1   : > { %4925 = vmatprep.subr.bf16.mxu0 %v7218_v11  ;;  %v7297_v11 = vld [vmem:[%s9736_s3 + $0xd20] ss:$16 sps:$4 sm:$0xff]  }
 0x4a3   : > { %4598 = vmatpush1.bf16.msra.mxu1 %v7213_v12  ;;  %v7300_v12 = vld [vmem:[%s9736_s3 + $0xd28] ss:$16 sps:$4 sm:$0xff]  }
 0x4a4   : > { %4926 = vmatpush1.bf16.msra.mxu0 %v7216_v13  ;;  %4599 = vmatprep.subr.bf16.mxu1 %v7221_v14  ;;  %v7305_v13 = vld [vmem:[%s9736_s3 + $0xd44] ss:$16 sps:$4 sm:$0xff]   ;;  %v7308_v14 = vld [vmem:[%s9736_s3 + $0xd4c] ss:$16 sps:$4 sm:$0xff]  }
 0x4a5   : > { %4927 = vmatprep.subr.bf16.mxu0 %v7224_v15  ;;  %v7303_v15 = vld [vmem:[%s9736_s3 + $0xd40] ss:$16 sps:$4 sm:$0xff]  }
 0x4a7   : > { %4600 = vmatpush1.bf16.msra.mxu1 %v7219_v19  ;;  %v7306_v19 = vld [vmem:[%s9736_s3 + $0xd48] ss:$16 sps:$4 sm:$0xff]  }
 0x4a8   : > { %4928 = vmatpush1.bf16.msra.mxu0 %v7222_v42  ;;  %4601 = vmatprep.subr.bf16.mxu1 %v7227_v20  ;;  %v7311_v42 = vld [vmem:[%s9736_s3 + $0xd64] ss:$16 sps:$4 sm:$0xff]   ;;  %v7314_v20 = vld [vmem:[%s9736_s3 + $0xd6c] ss:$16 sps:$4 sm:$0xff]  }
 0x4a9   : > { %4929 = vmatprep.subr.bf16.mxu0 %v7230_v55  ;;  %v7309_v55 = vld [vmem:[%s9736_s3 + $0xd60] ss:$16 sps:$4 sm:$0xff]  }
 0x4ab   : > { %4602 = vmatpush1.bf16.msra.mxu1 %v7225_v21  ;;  %v7312_v21 = vld [vmem:[%s9736_s3 + $0xd68] ss:$16 sps:$4 sm:$0xff]  }
 0x4ac   : > { %4930 = vmatpush1.bf16.msra.mxu0 %v7228_v22  ;;  %4603 = vmatprep.subr.bf16.mxu1 %v7233_v23  ;;  %v7317_v22 = vld [vmem:[%s9736_s3 + $0xd84] ss:$16 sps:$4 sm:$0xff]   ;;  %v7320_v23 = vld [vmem:[%s9736_s3 + $0xd8c] ss:$16 sps:$4 sm:$0xff]  }
 0x4ad   : > { %4931 = vmatprep.subr.bf16.mxu0 %v7236_v24  ;;  %v7315_v24 = vld [vmem:[%s9736_s3 + $0xd80] ss:$16 sps:$4 sm:$0xff]  }
 0x4af   : > { %4604 = vmatpush1.bf16.msra.mxu1 %v7231_v25  ;;  %v7318_v25 = vld [vmem:[%s9736_s3 + $0xd88] ss:$16 sps:$4 sm:$0xff]  }
 0x4b0   : > { %4932 = vmatpush1.bf16.msra.mxu0 %v7234_v26  ;;  %4605 = vmatprep.subr.bf16.mxu1 %v7239_v27  ;;  %v7323_v26 = vld [vmem:[%s9736_s3 + $0xda4] ss:$16 sps:$4 sm:$0xff]   ;;  %v7326_v27 = vld [vmem:[%s9736_s3 + $0xdac] ss:$16 sps:$4 sm:$0xff]  }
 0x4b1   : > { %4933 = vmatprep.subr.bf16.mxu0 %v7242_v29  ;;  %v7321_v29 = vld [vmem:[%s9736_s3 + $0xda0] ss:$16 sps:$4 sm:$0xff]  }
 0x4b3   : > { %4606 = vmatpush1.bf16.msra.mxu1 %v7237_v28  ;;  %v7324_v28 = vld [vmem:[%s9736_s3 + $0xda8] ss:$16 sps:$4 sm:$0xff]  }
 0x4b4   : > { %4934 = vmatpush1.bf16.msra.mxu0 %v7240_v54  ;;  %4616 = vmatprep.subr.bf16.mxu1 %v7245_v34  ;;  %v7329_v54 = vld [vmem:[%s9736_s3 + $0xdc4] ss:$16 sps:$4 sm:$0xff]   ;;  %v7332_v34 = vld [vmem:[%s9736_s3 + $0xdcc] ss:$16 sps:$4 sm:$0xff]  }
 0x4b5   : > { %4944 = vmatprep.subr.bf16.mxu0 %v7248_v3  ;;  %v7327_v3 = vld [vmem:[%s9736_s3 + $0xdc0] ss:$16 sps:$4 sm:$0xff]  }
 0x4b6   : > { %4608 = vmatmul.mubr.bf16.vlgmr.msra.gmra.mrb[32].mxu1 %v1270_v36 }
 0x4b7   : > { %4936 = vmatmul.mubr.bf16.vlgmr.msra.gmra.mrb[4].mxu0 %v1270_v36  ;;  %4617 = vmatpush1.bf16.msra.mxu1 %v7243_v35  ;;  %v7330_v35 = vld [vmem:[%s9736_s3 + $0xdc8] ss:$16 sps:$4 sm:$0xff]   ;;  %v7335_v36 = vld [vmem:[%s9736_s3 + $0xde4] ss:$16 sps:$4 sm:$0xff]  }
 0x4b8   : > { %4648 = vmatprep.mubr.bf16.mxu1 %v1273_v39  ;;  %4945 = vmatpush1.bf16.msra.mxu0 %v7246_v37  ;;  %v7338_v37 = vld [vmem:[%s9736_s3 + $0xdec] ss:$16 sps:$4 sm:$0xff]  }
 0x4b9   : > { %4976 = vmatprep.mubr.bf16.mxu0 %v1273_v39  ;;  %4618 = vmatprep.subr.bf16.mxu1 %v7251_v38  ;;  %v7333_v38 = vld [vmem:[%s9736_s3 + $0xde0] ss:$16 sps:$4 sm:$0xff]   ;;  %v7336_v39 = vld [vmem:[%s9736_s3 + $0xde8] ss:$16 sps:$4 sm:$0xff]  }
 0x4ba   : > { %4946 = vmatprep.subr.bf16.mxu0 %v7254_v40  ;;  %v7341_v40 = vld [vmem:[%s9736_s3 + $0xe04] ss:$16 sps:$4 sm:$0xff]  }
 0x4bb   : > { %4619 = vmatpush1.bf16.msra.mxu1 %v7249_v2  ;;  %v7344_v2 = vld [vmem:[%s9736_s3 + $0xe0c] ss:$16 sps:$4 sm:$0xff]  }
 0x4bc   : > { %4947 = vmatpush1.bf16.msra.mxu0 %v7252_v41  ;;  %4620 = vmatprep.subr.bf16.mxu1 %v7257_v18  ;;  %v7339_v41 = vld [vmem:[%s9736_s3 + $0xe00] ss:$16 sps:$4 sm:$0xff]   ;;  %v1272_v18 = vpack.c.bf16 %v8132_v16, %v8132_v16 }
 0x4bd   : > { %4948 = vmatprep.subr.bf16.mxu0 %v7260_v44  ;;  %v7342_v44 = vld [vmem:[%s9736_s3 + $0xe08] ss:$16 sps:$4 sm:$0xff]   ;;  %v7345_v16 = vld [vmem:[%s9736_s3 + $0xe20] ss:$16 sps:$4 sm:$0xff]  }
 0x4bf   : > { %4621 = vmatpush1.bf16.msra.mxu1 %v7255_v45  ;;  %v7347_v45 = vld [vmem:[%s9736_s3 + $0xe24] ss:$16 sps:$4 sm:$0xff]  }
 0x4c0   : > { %4949 = vmatpush1.bf16.msra.mxu0 %v7258_v46  ;;  %4622 = vmatprep.subr.bf16.mxu1 %v7263_v47  ;;  %v1275_v46 = vpack.c.bf16 %v8162_v33, %v8162_v33  ;;  %v7350_v47 = vld [vmem:[%s9736_s3 + $0xe2c] ss:$16 sps:$4 sm:$0xff]   ;;  %v7353_v33 = vld [vmem:[%s9736_s3 + $0xe44] ss:$16 sps:$4 sm:$0xff]  }
 0x4c1   : > { %4950 = vmatprep.subr.bf16.mxu0 %v7266_v48  ;;  %v7348_v48 = vld [vmem:[%s9736_s3 + $0xe28] ss:$16 sps:$4 sm:$0xff]  }
 0x4c3   : > { %4623 = vmatpush1.bf16.msra.mxu1 %v7261_v49  ;;  %v7356_v49 = vld [vmem:[%s9736_s3 + $0xe4c] ss:$16 sps:$4 sm:$0xff]  }
 0x4c4   : > { %4951 = vmatpush1.bf16.msra.mxu0 %v7264_v50  ;;  %4624 = vmatprep.subr.bf16.mxu1 %v7269_v17  ;;  %v7351_v50 = vld [vmem:[%s9736_s3 + $0xe40] ss:$16 sps:$4 sm:$0xff]   ;;  %v7354_v17 = vld [vmem:[%s9736_s3 + $0xe48] ss:$16 sps:$4 sm:$0xff]  }
 0x4c5   : > { %4952 = vmatprep.subr.bf16.mxu0 %v7272_v32  ;;  %v7359_v32 = vld [vmem:[%s9736_s3 + $0xe64] ss:$16 sps:$4 sm:$0xff]  }
 0x4c7   : > { %4625 = vmatpush1.bf16.msra.mxu1 %v7267_v51  ;;  %v7362_v51 = vld [vmem:[%s9736_s3 + $0xe6c] ss:$16 sps:$4 sm:$0xff]  }
 0x4c8   : > { %4953 = vmatpush1.bf16.msra.mxu0 %v7270_v52  ;;  %4626 = vmatprep.subr.bf16.mxu1 %v7275_v53  ;;  %v7357_v52 = vld [vmem:[%s9736_s3 + $0xe60] ss:$16 sps:$4 sm:$0xff]   ;;  %v7360_v53 = vld [vmem:[%s9736_s3 + $0xe68] ss:$16 sps:$4 sm:$0xff]  }
 0x4c9   : > { %4954 = vmatprep.subr.bf16.mxu0 %v7278_v56  ;;  %v7365_v56 = vld [vmem:[%s9736_s3 + $0xe84] ss:$16 sps:$4 sm:$0xff]  }
 0x4cb   : > { %4627 = vmatpush1.bf16.msra.mxu1 %v7273_v57  ;;  %v7368_v57 = vld [vmem:[%s9736_s3 + $0xe8c] ss:$16 sps:$4 sm:$0xff]  }
 0x4cc   : > { %4955 = vmatpush1.bf16.msra.mxu0 %v7276_v58  ;;  %4628 = vmatprep.subr.bf16.mxu1 %v7281_v59  ;;  %v7363_v58 = vld [vmem:[%s9736_s3 + $0xe80] ss:$16 sps:$4 sm:$0xff]   ;;  %v7366_v59 = vld [vmem:[%s9736_s3 + $0xe88] ss:$16 sps:$4 sm:$0xff]  }
 0x4cd   : > { %4956 = vmatprep.subr.bf16.mxu0 %v7284_v60  ;;  %v7371_v60 = vld [vmem:[%s9736_s3 + $0xea4] ss:$16 sps:$4 sm:$0xff]  }
 0x4cf   : > { %4629 = vmatpush1.bf16.msra.mxu1 %v7279_v61  ;;  %v7374_v61 = vld [vmem:[%s9736_s3 + $0xeac] ss:$16 sps:$4 sm:$0xff]  }
 0x4d0   : > { %4957 = vmatpush1.bf16.msra.mxu0 %v7282_v62  ;;  %4630 = vmatprep.subr.bf16.mxu1 %v7287_v63  ;;  %v7369_v62 = vld [vmem:[%s9736_s3 + $0xea0] ss:$16 sps:$4 sm:$0xff]   ;;  %v7372_v63 = vld [vmem:[%s9736_s3 + $0xea8] ss:$16 sps:$4 sm:$0xff]  }
 0x4d1   : > { %4958 = vmatprep.subr.bf16.mxu0 %v7290_v0  ;;  %v7377_v0 = vld [vmem:[%s9736_s3 + $0xec4] ss:$16 sps:$4 sm:$0xff]  }
 0x4d3   : > { %4631 = vmatpush1.bf16.msra.mxu1 %v7285_v1  ;;  %v7380_v1 = vld [vmem:[%s9736_s3 + $0xecc] ss:$16 sps:$4 sm:$0xff]  }
 0x4d4   : > { %4959 = vmatpush1.bf16.msra.mxu0 %v7288_v31  ;;  %4632 = vmatprep.subr.bf16.mxu1 %v7293_v4  ;;  %v7375_v31 = vld [vmem:[%s9736_s3 + $0xec0] ss:$16 sps:$4 sm:$0xff]   ;;  %v7378_v4 = vld [vmem:[%s9736_s3 + $0xec8] ss:$16 sps:$4 sm:$0xff]  }
 0x4d5   : > { %4960 = vmatprep.subr.bf16.mxu0 %v7296_v43  ;;  %v7383_v43 = vld [vmem:[%s9736_s3 + $0xee4] ss:$16 sps:$4 sm:$0xff]  }
 0x4d7   : > { %4633 = vmatpush1.bf16.msra.mxu1 %v7291_v5  ;;  %v7386_v5 = vld [vmem:[%s9736_s3 + $0xeec] ss:$16 sps:$4 sm:$0xff]  }
 0x4d8   : > { %4961 = vmatpush1.bf16.msra.mxu0 %v7294_v6  ;;  %4634 = vmatprep.subr.bf16.mxu1 %v7299_v7  ;;  %v7381_v6 = vld [vmem:[%s9736_s3 + $0xee0] ss:$16 sps:$4 sm:$0xff]   ;;  %v7384_v7 = vld [vmem:[%s9736_s3 + $0xee8] ss:$16 sps:$4 sm:$0xff]  }
 0x4d9   : > { %4962 = vmatprep.subr.bf16.mxu0 %v7302_v8  ;;  %v7389_v8 = vld [vmem:[%s9736_s3 + $0xf04] ss:$16 sps:$4 sm:$0xff]  }
 0x4db   : > { %4635 = vmatpush1.bf16.msra.mxu1 %v7297_v11  ;;  %v7392_v11 = vld [vmem:[%s9736_s3 + $0xf0c] ss:$16 sps:$4 sm:$0xff]  }
 0x4dc   : > { %4963 = vmatpush1.bf16.msra.mxu0 %v7300_v12  ;;  %4636 = vmatprep.subr.bf16.mxu1 %v7305_v13  ;;  %v7387_v12 = vld [vmem:[%s9736_s3 + $0xf00] ss:$16 sps:$4 sm:$0xff]   ;;  %v7390_v13 = vld [vmem:[%s9736_s3 + $0xf08] ss:$16 sps:$4 sm:$0xff]  }
 0x4dd   : > { %4964 = vmatprep.subr.bf16.mxu0 %v7308_v14  ;;  %v7395_v14 = vld [vmem:[%s9736_s3 + $0xf24] ss:$16 sps:$4 sm:$0xff]  }
 0x4df   : > { %4637 = vmatpush1.bf16.msra.mxu1 %v7303_v15  ;;  %v7398_v15 = vld [vmem:[%s9736_s3 + $0xf2c] ss:$16 sps:$4 sm:$0xff]  }
 0x4e0   : > { %4965 = vmatpush1.bf16.msra.mxu0 %v7306_v19  ;;  %4638 = vmatprep.subr.bf16.mxu1 %v7311_v42  ;;  %v7393_v19 = vld [vmem:[%s9736_s3 + $0xf20] ss:$16 sps:$4 sm:$0xff]   ;;  %v7396_v42 = vld [vmem:[%s9736_s3 + $0xf28] ss:$16 sps:$4 sm:$0xff]  }
 0x4e1   : > { %4966 = vmatprep.subr.bf16.mxu0 %v7314_v20  ;;  %v7401_v20 = vld [vmem:[%s9736_s3 + $0xf44] ss:$16 sps:$4 sm:$0xff]  }
 0x4e3   : > { %4639 = vmatpush1.bf16.msra.mxu1 %v7309_v55  ;;  %v7404_v55 = vld [vmem:[%s9736_s3 + $0xf4c] ss:$16 sps:$4 sm:$0xff]  }
 0x4e4   : > { %4967 = vmatpush1.bf16.msra.mxu0 %v7312_v21  ;;  %4640 = vmatprep.subr.bf16.mxu1 %v7317_v22  ;;  %v7399_v21 = vld [vmem:[%s9736_s3 + $0xf40] ss:$16 sps:$4 sm:$0xff]   ;;  %v7402_v22 = vld [vmem:[%s9736_s3 + $0xf48] ss:$16 sps:$4 sm:$0xff]  }
 0x4e5   : > { %4968 = vmatprep.subr.bf16.mxu0 %v7320_v23  ;;  %v7407_v23 = vld [vmem:[%s9736_s3 + $0xf64] ss:$16 sps:$4 sm:$0xff]  }
 0x4e7   : > { %4641 = vmatpush1.bf16.msra.mxu1 %v7315_v24  ;;  %v7410_v24 = vld [vmem:[%s9736_s3 + $0xf6c] ss:$16 sps:$4 sm:$0xff]  }
 0x4e8   : > { %4969 = vmatpush1.bf16.msra.mxu0 %v7318_v25  ;;  %4642 = vmatprep.subr.bf16.mxu1 %v7323_v26  ;;  %v7405_v25 = vld [vmem:[%s9736_s3 + $0xf60] ss:$16 sps:$4 sm:$0xff]   ;;  %v7408_v26 = vld [vmem:[%s9736_s3 + $0xf68] ss:$16 sps:$4 sm:$0xff]  }
 0x4e9   : > { %4970 = vmatprep.subr.bf16.mxu0 %v7326_v27  ;;  %v7413_v27 = vld [vmem:[%s9736_s3 + $0xf84] ss:$16 sps:$4 sm:$0xff]  }
 0x4eb   : > { %4643 = vmatpush1.bf16.msra.mxu1 %v7321_v29  ;;  %v7416_v29 = vld [vmem:[%s9736_s3 + $0xf8c] ss:$16 sps:$4 sm:$0xff]  }
 0x4ec   : > { %4971 = vmatpush1.bf16.msra.mxu0 %v7324_v28  ;;  %4644 = vmatprep.subr.bf16.mxu1 %v7329_v54  ;;  %v7411_v28 = vld [vmem:[%s9736_s3 + $0xf80] ss:$16 sps:$4 sm:$0xff]   ;;  %v7414_v54 = vld [vmem:[%s9736_s3 + $0xf88] ss:$16 sps:$4 sm:$0xff]  }
 0x4ed   : > { %4972 = vmatprep.subr.bf16.mxu0 %v7332_v34  ;;  %v7419_v34 = vld [vmem:[%s9736_s3 + $0xfa4] ss:$16 sps:$4 sm:$0xff]  }
 0x4ef   : > { %4645 = vmatpush1.bf16.msra.mxu1 %v7327_v3  ;;  %v7422_v3 = vld [vmem:[%s9736_s3 + $0xfac] ss:$16 sps:$4 sm:$0xff]  }
 0x4f0   : > { %4973 = vmatpush1.bf16.msra.mxu0 %v7330_v35  ;;  %4646 = vmatprep.subr.bf16.mxu1 %v7335_v36  ;;  %v7417_v35 = vld [vmem:[%s9736_s3 + $0xfa0] ss:$16 sps:$4 sm:$0xff]   ;;  %v7420_v36 = vld [vmem:[%s9736_s3 + $0xfa8] ss:$16 sps:$4 sm:$0xff]  }
 0x4f1   : > { %4974 = vmatprep.subr.bf16.mxu0 %v7338_v37  ;;  %v7425_v37 = vld [vmem:[%s9736_s3 + $0xfc4] ss:$16 sps:$4 sm:$0xff]  }
 0x4f3   : > { %4647 = vmatpush1.bf16.msra.mxu1 %v7333_v38  ;;  %v7428_v38 = vld [vmem:[%s9736_s3 + $0xfcc] ss:$16 sps:$4 sm:$0xff]  }
 0x4f4   : > { %4975 = vmatpush1.bf16.msra.mxu0 %v7336_v39  ;;  %4657 = vmatprep.subr.bf16.mxu1 %v7341_v40  ;;  %v7423_v39 = vld [vmem:[%s9736_s3 + $0xfc0] ss:$16 sps:$4 sm:$0xff]   ;;  %v7426_v40 = vld [vmem:[%s9736_s3 + $0xfc8] ss:$16 sps:$4 sm:$0xff]  }
 0x4f5   : > { %4985 = vmatprep.subr.bf16.mxu0 %v7344_v2  ;;  %v7431_v2 = vld [vmem:[%s9736_s3 + $0xfe4] ss:$16 sps:$4 sm:$0xff]  }
 0x4f6   : > { %4649 = vmatmul.mubr.bf16.vlgmr.msra.gmra.mrb[32].mxu1 %v1272_v18 }
 0x4f7   : > { %4977 = vmatmul.mubr.bf16.vlgmr.msra.gmra.mrb[4].mxu0 %v1272_v18  ;;  %4658 = vmatpush1.bf16.msra.mxu1 %v7339_v41  ;;  %v7434_v41 = vld [vmem:[%s9736_s3 + $0xfec] ss:$16 sps:$4 sm:$0xff]  }
 0x4f8   : > { %4689 = vmatprep.mubr.bf16.mxu1 %v1275_v46  ;;  %4986 = vmatpush1.bf16.msra.mxu0 %v7342_v44  ;;  %v5034_v18 = vld [vmem:[%s9735_s2 + $0x8] sm:$0xff] }
 0x4f9   : > { %5017 = vmatprep.mubr.bf16.mxu0 %v1275_v46  ;;  %4659 = vmatprep.subr.bf16.mxu1 %v7347_v45  ;;  %v5038_v44 = vld [vmem:[%s9735_s2 + $0x28] sm:$0xff]  ;;  %v5036_v45 = vld [vmem:[%s9735_s2 + $0x18] sm:$0xff] }
 0x4fa   : > { %4987 = vmatprep.subr.bf16.mxu0 %v7350_v47  ;;  %v5040_v46 = vld [vmem:[%s9735_s2 + $0x38] sm:$0xff]  ;;  %v7429_v47 = vld [vmem:[%s9736_s3 + $0xfe0] ss:$16 sps:$4 sm:$0xff]  }
 0x4fb   : > { %4660 = vmatpush1.bf16.msra.mxu1 %v7345_v16  ;;  %v7432_v16 = vld [vmem:[%s9736_s3 + $0xfe8] ss:$16 sps:$4 sm:$0xff]  }
 0x4fc   : > { %4988 = vmatpush1.bf16.msra.mxu0 %v7348_v48  ;;  %4661 = vmatprep.subr.bf16.mxu1 %v7353_v33  ;;  %v6415_v48 = vpack.c.bf16 %v5038_v44, %v5034_v18  ;;  %v5033_v33 = vld [vmem:[%s9735_s2] sm:$0xff]  ;;  %v5074_v18 = vld [vmem:[%s9735_s2 + $0x148] sm:$0xff] }
 0x4fd   : > { %4989 = vmatprep.subr.bf16.mxu0 %v7356_v49  ;;  %v5037_v49 = vld [vmem:[%s9735_s2 + $0x20] sm:$0xff]  ;;  %v5078_v44 = vld [vmem:[%s9735_s2 + $0x168] sm:$0xff] }
 0x4ff   : > { %4662 = vmatpush1.bf16.msra.mxu1 %v7351_v50  ;;  %v5035_v50 = vld [vmem:[%s9735_s2 + $0x10] sm:$0xff] }
 0x500   : > { %4990 = vmatpush1.bf16.msra.mxu0 %v7354_v17  ;;  %4663 = vmatprep.subr.bf16.mxu1 %v7359_v32  ;;  %v6447_v17 = vpack.c.bf16 %v5040_v46, %v5036_v45  ;;  %v5039_v32 = vld [vmem:[%s9735_s2 + $0x30] sm:$0xff]  ;;  %v5076_v45 = vld [vmem:[%s9735_s2 + $0x158] sm:$0xff] }
 0x501   : > { %4991 = vmatprep.subr.bf16.mxu0 %v7362_v51  ;;  %v5042_v51 = vld [vmem:[%s9735_s2 + $0x48] sm:$0xff]  ;;  %v5080_v46 = vld [vmem:[%s9735_s2 + $0x178] sm:$0xff] }
 0x503   : > { %4664 = vmatpush1.bf16.msra.mxu1 %v7357_v52  ;;  %v5046_v52 = vld [vmem:[%s9735_s2 + $0x68] sm:$0xff] }
 0x504   : > { %4992 = vmatpush1.bf16.msra.mxu0 %v7360_v53  ;;  %4665 = vmatprep.subr.bf16.mxu1 %v7365_v56  ;;  %v5044_v53 = vld [vmem:[%s9735_s2 + $0x58] sm:$0xff] }
 0x505   : > { %4993 = vmatprep.subr.bf16.mxu0 %v7368_v57  ;;  %v5048_v56 = vld [vmem:[%s9735_s2 + $0x78] sm:$0xff]  ;;  %v6417_v57 = vpack.c.bf16 %v5037_v49, %v5033_v33  ;;  %v5073_v33 = vld [vmem:[%s9735_s2 + $0x140] sm:$0xff] }
 0x506   : > { %v5077_v49 = vld [vmem:[%s9735_s2 + $0x160] sm:$0xff] }
 0x507   : > { %4666 = vmatpush1.bf16.msra.mxu1 %v7363_v58  ;;  %v1274_v58 = vpack.c.bf16 %v8160_v30, %v8160_v30  ;;  %v5047_v30 = vld [vmem:[%s9735_s2 + $0x70] sm:$0xff] }
 0x508   : > { %4994 = vmatpush1.bf16.msra.mxu0 %v7366_v59  ;;  %4667 = vmatprep.subr.bf16.mxu1 %v7371_v60  ;;  %v6449_v59 = vpack.c.bf16 %v5039_v32, %v5035_v50  ;;  %v6419_v60 = vpack.c.bf16 %v5046_v52, %v5042_v51  ;;  %v5075_v50 = vld [vmem:[%s9735_s2 + $0x150] sm:$0xff]  ;;  %v5082_v51 = vld [vmem:[%s9735_s2 + $0x188] sm:$0xff] }
 0x509   : > { %4995 = vmatprep.subr.bf16.mxu0 %v7374_v61  ;;  %v5041_v61 = vld [vmem:[%s9735_s2 + $0x40] sm:$0xff]  ;;  %v5079_v32 = vld [vmem:[%s9735_s2 + $0x170] sm:$0xff]  ;;  %v5086_v52 = vld [vmem:[%s9735_s2 + $0x1a8] sm:$0xff] }
 0x50b   : > { %4668 = vmatpush1.bf16.msra.mxu1 %v7369_v62  ;;  %v5045_v62 = vld [vmem:[%s9735_s2 + $0x60] sm:$0xff] }
 0x50c   : > { %4996 = vmatpush1.bf16.msra.mxu0 %v7372_v63  ;;  %4669 = vmatprep.subr.bf16.mxu1 %v7377_v0  ;;  %v5043_v63 = vld [vmem:[%s9735_s2 + $0x50] sm:$0xff]  ;;  %v6451_v0 = vpack.c.bf16 %v5048_v56, %v5044_v53  ;;  %v5084_v53 = vld [vmem:[%s9735_s2 + $0x198] sm:$0xff] }
 0x50d   : > { %4997 = vmatprep.subr.bf16.mxu0 %v7380_v1  ;;  %v5050_v1 = vld [vmem:[%s9735_s2 + $0x88] sm:$0xff]  ;;  %v5088_v56 = vld [vmem:[%s9735_s2 + $0x1b8] sm:$0xff] }
 0x50f   : > { %4670 = vmatpush1.bf16.msra.mxu1 %v7375_v31  ;;  %v5054_v31 = vld [vmem:[%s9735_s2 + $0xa8] sm:$0xff] }
 0x510   : > { %4998 = vmatpush1.bf16.msra.mxu0 %v7378_v4  ;;  %4671 = vmatprep.subr.bf16.mxu1 %v7383_v43  ;;  %v5052_v4 = vld [vmem:[%s9735_s2 + $0x98] sm:$0xff] }
 0x511   : > { %4999 = vmatprep.subr.bf16.mxu0 %v7386_v5  ;;  %v5056_v43 = vld [vmem:[%s9735_s2 + $0xb8] sm:$0xff]  ;;  %v6421_v5 = vpack.c.bf16 %v5045_v62, %v5041_v61  ;;  %v5085_v61 = vld [vmem:[%s9735_s2 + $0x1a0] sm:$0xff]  ;;  %v5083_v62 = vld [vmem:[%s9735_s2 + $0x190] sm:$0xff] }
 0x513   : > { %4672 = vmatpush1.bf16.msra.mxu1 %v7381_v6  ;;  %v6453_v6 = vpack.c.bf16 %v5047_v30, %v5043_v63  ;;  %v6471_v63 = vpack.c.bf16 %v5088_v56, %v5084_v53  ;;  %v5090_v30 = vld [vmem:[%s9735_s2 + $0x1c8] sm:$0xff] }
 0x514   : > { %5000 = vmatpush1.bf16.msra.mxu0 %v7384_v7  ;;  %4673 = vmatprep.subr.bf16.mxu1 %v7389_v8  ;;  %v6423_v7 = vpack.c.bf16 %v5054_v31, %v5050_v1  ;;  %v5049_v8 = vld [vmem:[%s9735_s2 + $0x80] sm:$0xff]  ;;  %v5094_v1 = vld [vmem:[%s9735_s2 + $0x1e8] sm:$0xff]  ;;  %v5092_v31 = vld [vmem:[%s9735_s2 + $0x1d8] sm:$0xff] }
 0x515   : > { %5001 = vmatprep.subr.bf16.mxu0 %v7392_v11  ;;  %v5053_v11 = vld [vmem:[%s9735_s2 + $0xa0] sm:$0xff] }
 0x517   : > { %4674 = vmatpush1.bf16.msra.mxu1 %v7387_v12  ;;  %v5051_v12 = vld [vmem:[%s9735_s2 + $0x90] sm:$0xff] }
 0x518   : > { %5002 = vmatpush1.bf16.msra.mxu0 %v7390_v13  ;;  %4675 = vmatprep.subr.bf16.mxu1 %v7395_v14  ;;  %v6455_v13 = vpack.c.bf16 %v5056_v43, %v5052_v4  ;;  %v5055_v14 = vld [vmem:[%s9735_s2 + $0xb0] sm:$0xff]  ;;  %v5096_v4 = vld [vmem:[%s9735_s2 + $0x1f8] sm:$0xff] }
 0x519   : > { %5003 = vmatprep.subr.bf16.mxu0 %v7398_v15  ;;  %v5058_v15 = vld [vmem:[%s9735_s2 + $0xc8] sm:$0xff] }
 0x51b   : > { %4676 = vmatpush1.bf16.msra.mxu1 %v7393_v19  ;;  %v5062_v19 = vld [vmem:[%s9735_s2 + $0xe8] sm:$0xff] }
 0x51c   : > { %5004 = vmatpush1.bf16.msra.mxu0 %v7396_v42  ;;  %4677 = vmatprep.subr.bf16.mxu1 %v7401_v20  ;;  %v7538_v42 = vmov 0.0   ;;  %v5060_v20 = vld [vmem:[%s9735_s2 + $0xd8] sm:$0xff] }
 0x51d   : > { %5005 = vmatprep.subr.bf16.mxu0 %v7404_v55  ;;  %v5064_v55 = vld [vmem:[%s9735_s2 + $0xf8] sm:$0xff] }
 0x51f   : > { %4678 = vmatpush1.bf16.msra.mxu1 %v7399_v21  ;;  %v6425_v21 = vpack.c.bf16 %v5053_v11, %v5049_v8  ;;  %v5093_v8 = vld [vmem:[%s9735_s2 + $0x1e0] sm:$0xff]  ;;  %v6475_v11 = vpack.c.bf16 %v5096_v4, %v5092_v31 }
 0x520   : > { %5006 = vmatpush1.bf16.msra.mxu0 %v7402_v22  ;;  %4679 = vmatprep.subr.bf16.mxu1 %v7407_v23  ;;  %v6457_v22 = vpack.c.bf16 %v5055_v14, %v5051_v12  ;;  %v6427_v23 = vpack.c.bf16 %v5062_v19, %v5058_v15  ;;  %v5091_v12 = vld [vmem:[%s9735_s2 + $0x1d0] sm:$0xff]  ;;  %v5029_v19 = vpop.permute.xlu1 %5028  ;;  %v7435_v4 = vld [vmem:[%s9738_s5 + $0x40] sm:$0xff]  }
 0x521   : > { %5007 = vmatprep.subr.bf16.mxu0 %v7410_v24  ;;  %v5057_v24 = vld [vmem:[%s9735_s2 + $0xc0] sm:$0xff]  ;;  %vm5030_vm3 = vcmp.eq.s32.totalorder %v5029_v19, %v7714_v10  ;;  %v1800_v10 = vsub.s32 2, %v7712_v9  ;;  %v7446_v19 = vld [vmem:[%s9738_s5 + $0x90] sm:$0xff]  }
 0x523   : > { %4680 = vmatpush1.bf16.msra.mxu1 %v7405_v25  ;;  %v5061_v25 = vld [vmem:[%s9735_s2 + $0xe0] sm:$0xff] }
 0x524   : > { %5008 = vmatpush1.bf16.msra.mxu0 %v7408_v26  ;;  %4681 = vmatprep.subr.bf16.mxu1 %v7413_v27  ;;  %v5059_v26 = vld [vmem:[%s9735_s2 + $0xd0] sm:$0xff]  ;;  %v6459_v27 = vpack.c.bf16 %v5064_v55, %v5060_v20 }
 0x525   : > { %5009 = vmatprep.subr.bf16.mxu0 %v7416_v29  ;;  %v5063_v29 = vld [vmem:[%s9735_s2 + $0xf0] sm:$0xff] }
 0x527   : > { %4682 = vmatpush1.bf16.msra.mxu1 %v7411_v28  ;;  %v5066_v28 = vld [vmem:[%s9735_s2 + $0x108] sm:$0xff] }
 0x528   : > { %5010 = vmatpush1.bf16.msra.mxu0 %v7414_v54  ;;  %4683 = vmatprep.subr.bf16.mxu1 %v7419_v34  ;;  %v5070_v54 = vld [vmem:[%s9735_s2 + $0x128] sm:$0xff]  ;;  %v5068_v34 = vld [vmem:[%s9735_s2 + $0x118] sm:$0xff] }
 0x529   : > { %5011 = vmatprep.subr.bf16.mxu0 %v7422_v3  ;;  %v5072_v3 = vld [vmem:[%s9735_s2 + $0x138] sm:$0xff] }
 0x52b   : > { %4684 = vmatpush1.bf16.msra.mxu1 %v7417_v35  ;;  %v6429_v35 = vpack.c.bf16 %v5061_v25, %v5057_v24 }
 0x52c   : > { %5012 = vmatpush1.bf16.msra.mxu0 %v7420_v36  ;;  %4685 = vmatprep.subr.bf16.mxu1 %v7425_v37  ;;  %v6461_v36 = vpack.c.bf16 %v5063_v29, %v5059_v26  ;;  %v6431_v37 = vpack.c.bf16 %v5070_v54, %v5066_v28  ;;  %v1788_v29 = vld [vmem:[%s9737_s4] sm:$0xf]  ;;  %v1796_v28 = vsub.s32 1, %v7712_v9  ;;  %v1804_v54 = vsub.s32 3, %v7712_v9 }
 0x52d   : > { %5013 = vmatprep.subr.bf16.mxu0 %v7428_v38  ;;  %v5065_v38 = vld [vmem:[%s9735_s2 + $0x100] sm:$0xff] }
 0x52f   : > { %4686 = vmatpush1.bf16.msra.mxu1 %v7423_v39  ;;  %v5069_v39 = vld [vmem:[%s9735_s2 + $0x120] sm:$0xff] }
 0x530   : > { %5014 = vmatpush1.bf16.msra.mxu0 %v7426_v40  ;;  %4687 = vmatprep.subr.bf16.mxu1 %v7431_v2  ;;  %v5067_v40 = vld [vmem:[%s9735_s2 + $0x110] sm:$0xff]  ;;  %v6463_v2 = vpack.c.bf16 %v5072_v3, %v5068_v34  ;;  %v1801_v3 = vrot.slane %v1788_v29, %v1800_v10  ;;  %v7458_v10 = vld [vmem:[%s9738_s5 + $0xa8] sm:$0xff]  }
 0x531   : > { %5015 = vmatprep.subr.bf16.mxu0 %v7434_v41  ;;  %v5071_v41 = vld [vmem:[%s9735_s2 + $0x130] sm:$0xff] }
 0x533   : > { %4688 = vmatpush1.bf16.msra.mxu1 %v7429_v47  ;;  %v6433_v47 = vpack.c.bf16 %v5069_v39, %v5065_v38 }
 0x534   : > { %5016 = vmatpush1.bf16.msra.mxu0 %v7432_v16  ;;  %6416 = vmatprep.subr.bf16.mxu1 %v6415_v48  ;;  %v6465_v16 = vpack.c.bf16 %v5071_v41, %v5067_v40  ;;  %v6435_v48 = vpack.c.bf16 %v5078_v44, %v5074_v18 }
 0x535   : > { %6448 = vmatprep.subr.bf16.mxu0 %v6447_v17  ;;  %v6467_v17 = vpack.c.bf16 %v5080_v46, %v5076_v45 }
 0x536   : > { %4690 = vmatmul.mubr.bf16.vlgmr.msra.gmra.mrb[32].mxu1 %v1274_v58 }
 0x537   : > { %5018 = vmatmul.mubr.bf16.vlgmr.msra.gmra.mrb[4].mxu0 %v1274_v58  ;;  %6418 = vmatpush1.bf16.msra.mxu1 %v6417_v57  ;;  %v6437_v57 = vpack.c.bf16 %v5077_v49, %v5073_v33  ;;  %v6469_v58 = vpack.c.bf16 %v5079_v32, %v5075_v50 }
 0x538   : > { %6450 = vmatpush1.bf16.msra.mxu0 %v6449_v59  ;;  %6420 = vmatprep.subr.bf16.mxu1 %v6419_v60  ;;  %v6439_v59 = vpack.c.bf16 %v5086_v52, %v5082_v51  ;;  %v5081_v60 = vld [vmem:[%s9735_s2 + $0x180] sm:$0xff] }
 0x539   : > { %6452 = vmatprep.subr.bf16.mxu0 %v6451_v0  ;;  %5161 = vmatprep.mubr.f32.mxu1 %v7538_v42  ;;  %v5087_v0 = vld [vmem:[%s9735_s2 + $0x1b0] sm:$0xff]  ;;  %v6441_v43 = vpack.c.bf16 %v5085_v61, %v5081_v60 }
 0x53a   : > { %5232 = vmatprep.mubr.f32.mxu0 %v7538_v42  ;;  %v7539_v42 = vmov 1.0  }
 0x53b   : > { %6422 = vmatpush1.bf16.msra.mxu1 %v6421_v5  ;;  %v6473_v5 = vpack.c.bf16 %v5087_v0, %v5083_v62 }
 0x53c   : > { %6454 = vmatpush1.bf16.msra.mxu0 %v6453_v6  ;;  %6424 = vmatprep.subr.bf16.mxu1 %v6423_v7  ;;  %v6443_v6 = vpack.c.bf16 %v5094_v1, %v5090_v30  ;;  %v5089_v7 = vld [vmem:[%s9735_s2 + $0x1c0] sm:$0xff] }
 0x53d   : > { %6456 = vmatprep.subr.bf16.mxu0 %v6455_v13  ;;  %v5095_v13 = vld [vmem:[%s9735_s2 + $0x1f0] sm:$0xff]  ;;  %v6445_v14 = vpack.c.bf16 %v5093_v8, %v5089_v7  ;;  %v7439_v7 = vld [vmem:[%s9738_s5 + $0x48] sm:$0xff]  }
 0x53e   : > { %v6477_v15 = vpack.c.bf16 %v5095_v13, %v5091_v12  ;;  %v7440_v8 = vld [vmem:[%s9738_s5 + $0xc8] sm:$0xff]   ;;  %v7443_v13 = vld [vmem:[%s9738_s5 + $0x50] sm:$0xff]  }
 0x53f   : > { %6426 = vmatpush1.bf16.msra.mxu1 %v6425_v21  ;;  %v7442_v12 = vld [vmem:[%s9738_s5 + $0x88] sm:$0xff]  }
 0x540   : > { %6458 = vmatpush1.bf16.msra.mxu0 %v6457_v22  ;;  %6428 = vmatprep.subr.bf16.mxu1 %v6427_v23 }
 0x541   : > { %6460 = vmatprep.subr.bf16.mxu0 %v6459_v27  ;;  %v1792_v27 = vsub.s32 0, %v7712_v9 }
 0x543   : > { %6430 = vmatpush1.bf16.msra.mxu1 %v6429_v35  ;;  %v1793_v34 = vrot.slane %v1788_v29, %v1792_v27  ;;  %v1797_v35 = vrot.slane %v1788_v29, %v1796_v28  ;;  %v7456_v27 = vld [vmem:[%s9738_s5 + $0xe8] sm:$0xff]   ;;  %v7459_v28 = vld [vmem:[%s9738_s5 + $0x70] sm:$0xff]  }
 0x544   : > { %6462 = vmatpush1.bf16.msra.mxu0 %v6461_v36  ;;  %6432 = vmatprep.subr.bf16.mxu1 %v6431_v37  ;;  %v1805_v36 = vrot.slane %v1788_v29, %v1804_v54  ;;  %v7457_v29 = vld [vmem:[%s9738_s5 + $0x28] sm:$0xff]   ;;  %v7460_v54 = vld [vmem:[%s9738_s5 + $0xf0] sm:$0xff]  }
 0x545   : > { %6464 = vmatprep.subr.bf16.mxu0 %v6463_v2 }
 0x547   : > { %6434 = vmatpush1.bf16.msra.mxu1 %v6433_v47 }
 0x548   : > { %6466 = vmatpush1.bf16.msra.mxu0 %v6465_v16  ;;  %6436 = vmatprep.subr.bf16.mxu1 %v6435_v48 }
 0x549   : > { %6468 = vmatprep.subr.bf16.mxu0 %v6467_v17 }
 0x54b   : > { %6438 = vmatpush1.bf16.msra.mxu1 %v6437_v57 }
 0x54c   : > { %6470 = vmatpush1.bf16.msra.mxu0 %v6469_v58  ;;  %6440 = vmatprep.subr.bf16.mxu1 %v6439_v59 }
 0x54d   : > { %6472 = vmatprep.subr.bf16.mxu0 %v6471_v63 }
 0x54f   : > { %6442 = vmatpush1.bf16.msra.mxu1 %v6441_v43  ;;  %v7436_v43 = vld [vmem:[%s9738_s5 + $0xc0] sm:$0xff]  }
 0x550   : > { %6474 = vmatpush1.bf16.msra.mxu0 %v6473_v5  ;;  %6444 = vmatprep.subr.bf16.mxu1 %v6443_v6  ;;  %v7437_v5 = vld [vmem:[%s9738_s5] sm:$0xff]  }
 0x551   : > { %6476 = vmatprep.subr.bf16.mxu0 %v6475_v11  ;;  %v7438_v6 = vld [vmem:[%s9738_s5 + $0x80] sm:$0xff]   ;;  %v7441_v11 = vld [vmem:[%s9738_s5 + $0x8] sm:$0xff]  }
 0x553   : > { %6446 = vmatpush1.bf16.msra.mxu1 %v6445_v14  ;;  %v7444_v14 = vld [vmem:[%s9738_s5 + $0xd0] sm:$0xff]  }
 0x554   : > { %6478 = vmatpush1.bf16.msra.mxu0 %v6477_v15  ;;  %6371 = vmatprep.subr.bf16.mxu1 %v7435_v4  ;;  %v7445_v15 = vld [vmem:[%s9738_s5 + $0x10] sm:$0xff]  }
 0x555   : > { %6393 = vmatprep.subr.bf16.mxu0 %v7436_v43 }
 0x556   : > { %6331 = vmatmul.mubr.msk.f32.vlgmr.msra.gmra.mrb[36].mxu1 %vm5030_vm3, %v7539_v42 }
 0x557   : > { %6332 = vmatmul.mubr.msk.f32.vlgmr.msra.gmra.mrb[8].mxu0 %vm5030_vm3, %v7539_v42  ;;  %6372 = vmatpush3.bf16.msra.mxu1 %v7437_v5  ;;  %v7447_v42 = vld [vmem:[%s9738_s5 + $0x58] sm:$0xff]  }
 0x558   : > { %6394 = vmatpush3.bf16.msra.mxu0 %v7438_v6  ;;  %6373 = vmatprep.subr.bf16.mxu1 %v7439_v7 }
 0x559   : > { %6395 = vmatprep.subr.bf16.mxu0 %v7440_v8 }
 0x55b   : > { %6374 = vmatpush3.bf16.msra.mxu1 %v7441_v11 }
 0x55c   : > { %6396 = vmatpush3.bf16.msra.mxu0 %v7442_v12  ;;  %6375 = vmatprep.subr.bf16.mxu1 %v7443_v13 }
 0x55d   : > { %6397 = vmatprep.subr.bf16.mxu0 %v7444_v14 }
 0x55f   : > { %6376 = vmatpush3.bf16.msra.mxu1 %v7445_v15 }
 0x560   : > { %6398 = vmatpush3.bf16.msra.mxu0 %v7446_v19  ;;  %6377 = vmatprep.subr.bf16.mxu1 %v7447_v42 }
 0x609   : > { %v4691_v20 = vpop.f32.mrb[32].mxu1 }
 0x60a   : > { %v5019_v55 = vpop.f32.mrb[4].mxu0  ;;  %v4693_v21 = vpop.f32.mrb[33].mxu1  ;;  %v6479_v37 = vadd.f32 %v4691_v20, %v1793_v34  ;;  %v7448_v20 = vld [vmem:[%s9738_s5 + $0xd8] sm:$0xff]  }
 0x60b   : > { %v5021_v22 = vpop.f32.mrb[5].mxu0  ;;  %v4695_v23 = vpop.f32.mrb[34].mxu1  ;;  %v6481_v38 = vadd.f32 %v5019_v55, %v1801_v3  ;;  %v6480_v39 = vadd.f32 %v4693_v21, %v1797_v35  ;;  %v7449_v55 = vld [vmem:[%s9738_s5 + $0x18] sm:$0xff]   ;;  %6399 = vmatprep.subr.bf16.mxu0 %v7448_v20  ;;  %v7461_v3 = vld [vmem:[%s9738_s5 + $0x30] sm:$0xff]  }
 0x60c   : > { %v5023_v24 = vpop.f32.mrb[6].mxu0  ;;  %v4696_v25 = vpop.f32.mrb[35].mxu1  ;;  %v6482_v2 = vadd.f32 %v5021_v22, %v1805_v36  ;;  %v7450_v21 = vld [vmem:[%s9738_s5 + $0x98] sm:$0xff]   ;;  %v7451_v22 = vld [vmem:[%s9738_s5 + $0x60] sm:$0xff]   ;;  %6378 = vmatpush3.bf16.msra.mxu1 %v7449_v55  ;;  %v7462_v35 = vld [vmem:[%s9738_s5 + $0xb0] sm:$0xff]  }
 0x60d   : > { %v5024_v26 = vpop.f32.mrb[7].mxu0  ;;  %v7452_v23 = vld [vmem:[%s9738_s5 + $0xe0] sm:$0xff]   ;;  %6400 = vmatpush3.bf16.msra.mxu0 %v7450_v21  ;;  %6379 = vmatprep.subr.bf16.mxu1 %v7451_v22 }
 0x60e   : > { %v7453_v24 = vld [vmem:[%s9738_s5 + $0x20] sm:$0xff]   ;;  %6401 = vmatprep.subr.bf16.mxu0 %v7452_v23  ;;  %v7455_v26 = vld [vmem:[%s9738_s5 + $0x68] sm:$0xff]  }
 0x60f   : > { %v7454_v25 = vld [vmem:[%s9738_s5 + $0xa0] sm:$0xff]  }
 0x610   : > { %6380 = vmatpush3.bf16.msra.mxu1 %v7453_v24 }
 0x611   : > { %6402 = vmatpush3.bf16.msra.mxu0 %v7454_v25  ;;  %6381 = vmatprep.subr.bf16.mxu1 %v7455_v26 }
 0x612   : > { %6403 = vmatprep.subr.bf16.mxu0 %v7456_v27 }
 0x614   : > { %6382 = vmatpush3.bf16.msra.mxu1 %v7457_v29 }
 0x615   : > { %6404 = vmatpush3.bf16.msra.mxu0 %v7458_v10  ;;  %6383 = vmatprep.subr.bf16.mxu1 %v7459_v28 }
 0x616   : > { %6405 = vmatprep.subr.bf16.mxu0 %v7460_v54 }
 0x618   : > { %6384 = vmatpush3.bf16.msra.mxu1 %v7461_v3 }
 0x619   : > { %6406 = vmatpush3.bf16.msra.mxu0 %v7462_v35 }
 0x629   : > { %v5163_v40 = vpop.f32.mrb[36].mxu1 }
 0x62a   : > { %v5239_v41 = vadd.f32 %v6479_v37, %v5163_v40  ;;  %v5234_v18 = vpop.f32.mrb[8].mxu0  ;;  %v5165_v44 = vpop.f32.mrb[37].mxu1  ;;  %v7465_v40 = vld [vmem:[%s9738_s5 + $0x38] sm:$0xff]  }
 0x62b   : > { %v5241_v45 = vadd.f32 %v6481_v38, %v5234_v18  ;;  %v5240_v46 = vadd.f32 %v6480_v39, %v5165_v44  ;;  %v5236_v47 = vpop.f32.mrb[9].mxu0  ;;  %v7463_v38 = vld [vmem:[%s9738_s5 + $0x78] sm:$0xff]  }
 0x62c   : > { %v5242_v16 = vadd.f32 %v6482_v2, %v5236_v47  ;;  %v7464_v39 = vld [vmem:[%s9738_s5 + $0xf8] sm:$0xff]   ;;  %6385 = vmatprep.subr.bf16.mxu1 %v7463_v38 }
 0x62d   : > { %v5243_v48 = vadd.f32 %v5240_v46, %v5239_v41  ;;  %v7466_v2 = vld [vmem:[%s9738_s5 + $0xb8] sm:$0xff]   ;;  %6407 = vmatprep.subr.bf16.mxu0 %v7464_v39  ;;  %6386 = vmatpush3.bf16.msra.mxu1 %v7465_v40 }
 0x62e   : > { %6408 = vmatpush3.bf16.msra.mxu0 %v7466_v2 }
 0x62f   : > { %v5244_v33 = vadd.f32 %v5243_v48, %v5241_v45 }
 0x631   : > { %v5245_v49 = vadd.f32 %v5244_v33, %v5242_v16 }
 0x633   : > { %5246 = vadd.xlane.f32.xlu1 %v5245_v49 }
 0x6c0   : > { %v5247_v9 = vpop.xlane.xlu1 %5246 }
 0x6c1   : > { %v5248_v50 = vrot.slane %v5247_v9, 4 }
 0x6c3   : > { %v5249_v17 = vadd.f32 %v5248_v50, %v5247_v9 }
 0x6c5   : > { %v5250_v32 = vrot.slane %v5249_v17, 2 }
 0x6c7   : > { %v5251_v51 = vadd.f32 %v5250_v32, %v5249_v17 }
 0x6c9   : > { %v5252_v52 = vrot.slane %v5251_v51, 1 }
 0x6cb   : > { %v5253_v53 = vadd.f32 %v5252_v52, %v5251_v51 }
 0x6cd   : > { %6569 = vpush %v5253_v53 }
 0x6fe   : > { %s6570_s15 = spop %6569 }
 0x6ff   : > { %s5257_s16 = smul.f32 0.00024414063, %s6570_s15  ;;  %s9689_s15 = scalar_lea.hbm %s9740_s7, %s6367_s8 }
 0x701   : > { %v5258_v56 = vstv %s5257_s16 }
 0x702   : > { %v9565_v57 = vsub.f32 %v5239_v41, %v5258_v56  ;;  %v9567_v58 = vsub.f32 %v5240_v46, %v5258_v56  ;;  %v9569_v59 = vsub.f32 %v5241_v45, %v5258_v56  ;;  %v9571_v60 = vsub.f32 %v5242_v16, %v5258_v56  ;;  %v6333_v56 = vld [vmem:[%s9739_s6] ss:$0 sm:$0xff] }
 0x704   : > { %v5263_v61 = vmul.f32 %v9565_v57, %v9565_v57  ;;  %v5264_v62 = vmul.f32 %v9567_v58, %v9567_v58  ;;  %v5265_v63 = vmul.f32 %v9569_v59, %v9569_v59  ;;  %v5266_v30 = vmul.f32 %v9571_v60, %v9571_v60 }
 0x706   : > { %v5267_v0 = vadd.f32 %v5264_v62, %v5263_v61 }
 0x708   : > { %v5268_v1 = vadd.f32 %v5267_v0, %v5265_v63 }
 0x70a   : > { %v5269_v31 = vadd.f32 %v5268_v1, %v5266_v30 }
 0x70c   : > { %5270 = vadd.xlane.f32.xlu0 %v5269_v31 }
 0x799   : > { %v5271_v34 = vpop.xlane.xlu0 %5270 }
 0x79a   : > { %v5272_v36 = vrot.slane %v5271_v34, 4 }
 0x79c   : > { %v5273_v37 = vadd.f32 %v5272_v36, %v5271_v34 }
 0x79e   : > { %v5274_v41 = vrot.slane %v5273_v37, 2 }
 0x7a0   : > { %v5275_v18 = vadd.f32 %v5274_v41, %v5273_v37 }
 0x7a2   : > { %v5276_v44 = vrot.slane %v5275_v18, 1 }
 0x7a4   : > { %v5277_v45 = vadd.f32 %v5276_v44, %v5275_v18 }
 0x7a6   : > { %6571 = vpush %v5277_v45 }
 0x7d7   : > { %s6572_s16 = spop %6571 }
 0x7d8   : > { %s5281_s17 = smul.f32 0.00024414063, %s6572_s16  ;;  %s5640_s16 = scalar_lea.sflag [#allocation4], %s7691_s20 }
 0x7da   : > { %s5282_s18 = sadd.f32 1e-05, %s5281_s17  ;;  %s7473_s17 = scalar_lea.vmem %s9691_s13, 128 }
 0x7db   : > { %p7474_p0 = scmp.ne.s32.totalorder %s9691_s13, %s7473_s17 }
 0x7dc   : > { %v5283_v46 = vstv %s5282_s18  ;;  %s7477_s18 = sshll.u32 %s7540_s28, 4  ;;  %s7478_s18 = int_to_ptr.vmem [resolvable:$false] %s7477_s18 }
 0x7dd   : > { %7471 = vrsqrt.f32 %v5283_v46  ;;  %p7475_p1 = pnand %p7474_p0, %p7620_p6  ;;  %p7480_p3 = scmp.lt.s32.totalorder %s9691_s13, %s7478_s18 }
 0x7df   : > { %p7476_p2 = pneg %p7475_p1 }
 0x7e7   : > { %v7472_v47 = vpop.eup %7471 }
 0x7e8   : > { %6573 = vpush %v7472_v47 }
 0x819   : > { %s6574_s19 = spop %6573 }
 0x81a   : > { %v5286_v16 = vstv %s6574_s19  ;;  %s7479_s19 = scalar_lea.vmem %s7478_s18, 256 }
 0x81b   : > { %v5287_v48 = vmul.f32 %v5286_v16, %v9565_v57  ;;  %v5288_v33 = vmul.f32 %v5286_v16, %v9567_v58  ;;  %v5289_v49 = vmul.f32 %v5286_v16, %v9569_v59  ;;  %v5290_v9 = vmul.f32 %v5286_v16, %v9571_v60  ;;  %p7481_p4 = scmp.lt.s32.totalorder %s7479_s19, %s7473_s17 }
 0x81d   : > { %v5291_v50 = vpack.c.bf16 %v5287_v48, %v5287_v48  ;;  %v5293_v17 = vpack.c.bf16 %v5289_v49, %v5289_v49  ;;  %v5292_v32 = vpack.c.bf16 %v5288_v33, %v5288_v33  ;;  %v5294_v51 = vpack.c.bf16 %v5290_v9, %v5290_v9  ;;  %p7482_p5 = por %p7481_p4, %p7480_p3 }
 0x81f   : > { %5590 = vmatprep.mubr.bf16.mxu1 %v5292_v32  ;;  %5630 = vmatprep.mubr.bf16.mxu0 %v5294_v51  ;;  %p7483_p7 = pnand %p7482_p5, %p7476_p2 }
 0x820   : > { %5591 = vmatmul.mubr.bf16.vlgmr.msra.gmra.mrb[40].mxu1 %v5291_v50  ;;  %5631 = vmatmul.mubr.bf16.vlgmr.msra.gmra.mrb[12].mxu0 %v5293_v17 }
 0x8f3   : > { %v6387_v52 = vpop.f32.mrb[40].mxu1  ;;  %v6409_v53 = vpop.f32.mrb[12].mxu0 }
 0x8f4   : > { %v6388_v57 = vpop.f32.mrb[41].mxu1  ;;  %v6410_v58 = vpop.f32.mrb[13].mxu0 }
 0x8f5   : > { %v6389_v59 = vadd.f32 %v6388_v57, %v6387_v52  ;;  %v6411_v60 = vadd.f32 %v6410_v58, %v6409_v53  ;;  %v6390_v61 = vpop.f32.mrb[42].mxu1  ;;  %v6412_v62 = vpop.f32.mrb[14].mxu0 }
 0x8f6   : > { %v6391_v63 = vpop.f32.mrb[43].mxu1  ;;  %v6413_v0 = vpop.f32.mrb[15].mxu0 }
 0x8f7   : > { %v5593_v30 = vadd.f32 %v6389_v59, %v6333_v56 }
 0x8f9   : > { %v5633_v1 = vadd.f32 %v6411_v60, %v5593_v30 }
 0x8fb   : > { %5638 = vst [vmem:[%s355_s9] sm:$0xff] %v5633_v1 }
 0x8fc   : > { %7486 = shalt.err (!%p7483_p7)
}
 0x8fd   : > { %s7487_s20 = scalar_lea.hbm %s9689_s15, 128  ;;  %s7491_s29 = scalar_lea.hbm %s9740_s7, 256 }
 0x8fe   : > { %p7488_p10 = scmp.ne.s32.totalorder %s9689_s15, %s7487_s20  ;;  %p7492_p13 = scmp.lt.u32.totalorder %s9689_s15, %s9740_s7 }
 0x8ff   : > { %p7493_p0 = scmp.lt.u32.totalorder %s7491_s29, %s7487_s20  ;;  %p7495_p2 = scmp.lt.u32.totalorder %s7487_s20, %s9689_s15 }
 0x900   : > { %p7489_p11 = pnand %p7488_p10, %p7620_p6 }
 0x901   : > { %p7494_p1 = por %p7493_p0, %p7492_p13 }
 0x902   : > { %p7490_p12 = pneg %p7489_p11 }
 0x903   : > { %p7496_p3 = por %p7495_p2, %p7494_p1 }
 0x905   : > { %p7497_p4 = pnand %p7496_p3, %p7490_p12 }
 0x907   : > { %7500 = shalt.err (!%p7497_p4)
}
 0x908   : > { %6575 = dma.vmem_to_hbm [thread:$0]  (%p7620_p6), %s9691_s13, 128, %s9689_s15, %s5640_s16  }
 0x909 PF: > { %s5665_s14 = sand.u32 1, %s7523_s24   ;;  %p6578_p5 = pnand %p5732_p9, %p7624_p8 }
 0x90a   : > { %s5666_s22 = scalar_lea.sflag [#allocation4], %s5665_s14 }
 0x90b   : > { %7518 = dma.done.wait (!%p6578_p5), %s5666_s22, 128  }
 0x90c   : > { %7520 = vsyncadd (!%p6578_p5), %s5666_s22, 4294967168  ;;  %p17_p7 = scmp.ge.s32.totalorder %s7606_s30, 4   ;;  %s9743_s24 = smov %s7527_s25 }
 0x90d   : > { %s9744_s25 = smov %s7531_s26  ;;  %s9745_s26 = smov %s7618_s10 }
 0x90e   : > { %s9746_s27 = smov %s7606_s30  ;;  %19 = sbr.rel (!%p17_p7) target bundleno = 3 (0x3), region = 116 }
 0x915   :  { %5671 = vsyncpa [#allocation4], 1 }
 0x916   :  { %5673 = vsyncpa [#allocation4 + $0x1], 1 }

// kernel: model_forward.2
= control target key start
LH: loop header
LB: loop body
LE: loop exit
PB: predicated region body
PF: predicated region fallthrough
CT: control target
= control target key end

     0   :  { %s10085_s0 = inlined_call_operand.vmem [shape: s32[16,1], index: 0, kind: input, shape index: {}]   ;;  %s10086_s1 = inlined_call_operand.hbm [shape: f32[128,512], index: 1, kind: input, shape index: {}]   ;;  %s10087_s2 = inlined_call_operand.hbm [shape: bf16[512,2048], index: 2, kind: input, shape index: {}]   ;;  %s10088_s3 = inlined_call_operand.hbm [shape: f32[1,2048], index: 3, kind: input, shape index: {}]   ;;  %s10089_s4 = inlined_call_operand.hbm [shape: s8[3,2048,2048], index: 4, kind: input, shape index: {}]   ;;  %s10090_s5 = inlined_call_operand.hbm [shape: f32[3,1,2048], index: 5, kind: input, shape index: {}]   ;;  %s10091_s6 = inlined_call_operand.hbm [shape: f32[3,1,2048], index: 6, kind: input, shape index: {}]   ;;  %s10092_s7 = inlined_call_operand.vmem [shape: bf16[3,16,2048], index: 7, kind: output, shape index: {}]  }
   0x1   :  { %10115 = sst [smem:[#allocation26_spill]] %s10085_s0 }
   0x2   :  { %10116 = sst [smem:[#allocation27_spill]] %s10087_s2 }
   0x3   :  { %10117 = sst [smem:[#allocation28_spill]] %s10089_s4 }
   0x4   :  { %10118 = sst [smem:[#allocation29_spill]] %s10092_s7 }
   0x5   :  { %12 = vsyncpa [#allocation3], 0 }
   0x6   :  { %13 = vsyncpa [#allocation5], 0 }
   0x7   :  { %14 = vsyncpa [#allocation8], 0 }
   0x8   :  { %16 = vsyncpa [#allocation8 + $0x1], 0 }
   0x9   :  { %17 = vsyncpa [#allocation11], 0 }
   0xa   :  { %19 = vsyncpa [#allocation11 + $0x1], 0  ;;  %s8992_s24 = smov 0   ;;  %s8994_s25 = smov 0  }
   0xb   :  { %s8996_s26 = smov 0   ;;  %s8998_s27 = smov 0  }
   0xc   :  { %s9000_s28 = smov 0   ;;  %s9002_s29 = smov 0  }
   0xd   :  { %s9004_s30 = smov 0   ;;  %s9006_s8 = smov 0  }
   0xe LB: > { %10119 = sst [smem:[#allocation17_spill]] %s8913_s25  ;;  %s9031_s9 = sadd.s32 4294967295, %s8937_s8   ;;  %s8937_s8 = sphi %s9006_s8, %s25_s8   ;;  %s8933_s30 = sphi %s9004_s30, %s10172_s30   ;;  %s8929_s29 = sphi %s9002_s29, %s10171_s29   ;;  %s8925_s28 = sphi %s9000_s28, %s10170_s28   ;;  %s8921_s27 = sphi %s8998_s27, %s10169_s27   ;;  %s8917_s26 = sphi %s8996_s26, %s10168_s26   ;;  %s8913_s25 = sphi %s8994_s25, %s10167_s25   ;;  %s8909_s24 = sphi %s8992_s24, %s10163_s24  }
   0xf   : > { %10120 = sst [smem:[#allocation18_spill]] %s8921_s27  ;;  %p137_p0 = scmp.ne.s32.totalorder %s8917_s26, %s8913_s25 }
  0x10   : > { %10121 = sst [smem:[#allocation19_spill]] %s8925_s28  ;;  %p138_p1 = scmp.eq.s32.totalorder %s8937_s8, 0 }
  0x11   : > { %10122 = sst [smem:[#allocation20_spill]] %s8937_s8  ;;  %p143_p2 = scmp.ne.s32.totalorder %s8913_s25, %s8909_s24 }
  0x12   : > { %p10093_p3 = scmp.eq.s32.totalorder %s9031_s9, 0  ;;  %p9039_p4 = por %p138_p1, %p137_p0 }
  0x13   : > { %p225_p5 = scmp.eq.s32.totalorder %s9031_s9, 5  ;;  %p7822_p7 = scmp.ge.s32.totalorder %s8937_s8, 1 }
  0x14   : > { %p9046_p6 = por %p10093_p3, %p143_p2  ;;  %p238_p9 = scmp.lt.s32.totalorder %s8937_s8, 7 }
  0x15   : > { %p9051_p8 = por %p225_p5, %p137_p0  ;;  %s8939_s15 = smov [#allocation4]  }
  0x16   : > { %s10124_s12 = scalar_select %p9046_p6, 1, 0 }
  0x17   : > { %s10126_s13 = scalar_select %p9051_p8, 1, 0 }
  0x18   : > { %10125 = sst [smem:[#allocation21_spill]] %s10124_s12  ;;  %p9056_p10 = pnand %p7822_p7, %p238_p9 }
  0x19   : > { %10127 = sst [smem:[#allocation22_spill]] %s10126_s13  ;;  %s266_s16 = sshll.u32 %s8939_s15, 4  ;;  %s267_s16 = int_to_ptr.vmem [resolvable:$true] %s266_s16 }
  0x1a   : > { %s10128_s14 = scalar_select %p9056_p10, 1, 0 }
  0x1b   : > { %p8581_p11 = pneg %p9056_p10  ;;  %p8604_p12 = scmp.lt.s32.totalorder %s8937_s8, 6 }
  0x1c   : > { %s10131_s2 = sld [smem:[#allocation27_spill]] }
  0x1d   : > { %p9065_p13 = pnand %p8581_p11, %p10093_p3  ;;  %p9071_p0 = pnand %p8604_p12, %p9039_p4 }
  0x1f   : > { %s10129_s17 = scalar_select %p9065_p13, 1, 0 }
  0x20   : > { %s10130_s18 = scalar_select %p9071_p0, 1, 0 }
  0x21   : > { %p9083_p2 = pneg %p9065_p13 }
  0x22   : > { %s8685_s21 = scalar_lea.hbm %s10131_s2, 65536 }
  0x23   : > { %p8686_p1 = scmp.ne.s32.totalorder %s10131_s2, %s8685_s21  ;;  %p8692_p7 = scmp.lt.u32.totalorder %s8685_s21, %s10131_s2 }
  0x24   : > { %s10132_s24 = scalar_select %p9083_p2, 1, 0 }
  0x25   : > { %p8688_p5 = pnand %p9083_p2, %p8686_p1 }
  0x27   : > { %p8689_p4 = pneg %p8688_p5 }
  0x29   : > { %p8694_p9 = pnand %p8692_p7, %p8689_p4 }
  0x2b   : > { %8697 = shalt.err (!%p8694_p9)
}
  0x2c   : > { %s8698_s19 = scalar_lea.vmem %s267_s16, 65536  ;;  %p8706_p8 = scmp.lt.s32.totalorder %s267_s16, %s267_s16 }
  0x2d   : > { %p8699_p11 = scmp.ne.s32.totalorder %s267_s16, %s8698_s19  ;;  %p8707_p6 = scmp.lt.s32.totalorder %s8698_s19, %s8698_s19 }
  0x2f   : > { %p8701_p12 = pnand %p8699_p11, %p9083_p2  ;;  %p8708_p10 = por %p8707_p6, %p8706_p8 }
  0x31   : > { %p8702_p3 = pneg %p8701_p12 }
  0x33   : > { %p8709_p0 = pnand %p8708_p10, %p8702_p3 }
  0x35   : > { %8712 = shalt.err (!%p8709_p0)
}
  0x36   : > { %s10097_s20 = smov 1024   ;;  %s10098_s21 = smov 64  }
  0x37   : > { %8587 = dma.hbm_to_vmem [thread:$0]  (!%p9065_p13), %s10131_s2, 65536, %s267_s16, [#allocation5], %s10097_s20, %s10097_s20, %s10098_s21  }
  0x38   : > { %s34_s11 = sadd.s32 1, %s8929_s29  ;;  %s37_s15 = sadd.s32 1, %s8933_s30 }
  0x39   : > { %p35_p3 = scmp.ge.s32.totalorder %s34_s11, 2  ;;  %s291_s19 = sand.u32 1, %s8937_s8  }
  0x3a   : > { %s9106_s10 = sand.u32 1, %s8917_s26   ;;  %s10110_s27 = sshll.u32 %s8929_s29, 3 }
  0x3b   : > { %s10174_s11 = smov (%p35_p3, %s34_s11), 0  ;;  %s10176_s15 = smov (!%p35_p3, %s37_s15), %s8933_s30 }
  0x3c   : > { %10133 = sst [smem:[#allocation23_spill]] %s10174_s11  ;;  %s126_s7 = ssub.s32 %s8929_s29, %s10174_s11 }
  0x3d   : > { %s7827_s28 = sshll.u32 %s9106_s10, 12  ;;  %p39_p6 = scmp.ge.s32.totalorder %s10176_s15, 3 }
  0x3e   : > { %s7829_s16 = sshll.u32 %s8933_s30, 10  ;;  %s295_s23 = scalar_lea.vmem [#allocation7], %s7827_s28 }
  0x3f   : > { %s10178_s15 = smov (%p39_p6, %s10176_s15), 0  ;;  %s301_s22 = sadd.s32 %s7829_s16, %s10110_s27 }
  0x40   : > { %10134 = sst [smem:[#allocation24_spill]] %s10178_s15  ;;  %s304_s20 = sshll.u32 %s295_s23, 4  ;;  %s9127_s20 = int_to_ptr.vmem [resolvable:$true] %s304_s20 }
  0x41   : > { %s125_s21 = ssub.s32 %s8933_s30, %s10178_s15  ;;  %s7830_s2 = sshll.u32 %s301_s22, 7 }
  0x42   : > { %s127_s8 = sor.u32 %s126_s7, %s125_s21  ;;  %s10135_s4 = sld [smem:[#allocation28_spill]] }
  0x43   : > { %p128_p8 = scmp.eq.s32.totalorder %s127_s8, 0  ;;  %s10136_s11 = sadd.s32 1, %s8917_s26 }
  0x44   : > { %s9134_s28 = scalar_lea.sflag [#allocation8], %s291_s19  ;;  %p10138_p0 = scmp.ne.s32.totalorder %s10130_s18, 0 }
  0x45   : > { %s9132_s25 = scalar_select %p128_p8, %s8917_s26, %s10136_s11  }
  0x46   : > { %p9140_p1 = pneg %p10138_p0 }
  0x47   : > { %10137 = sst [smem:[#allocation25_spill]] %s9132_s25 }
  0x48   : > { %s9125_s12 = scalar_lea.hbm %s10135_s4, %s7830_s2  ;;  %s8718_s8 = scalar_lea.hbm %s10135_s4, 393216 }
  0x49   : > { %s8713_s16 = scalar_lea.hbm %s9125_s12, 65536  ;;  %p8719_p7 = scmp.lt.u32.totalorder %s9125_s12, %s10135_s4 }
  0x4a   : > { %p8714_p10 = scmp.ne.s32.totalorder %s9125_s12, %s8713_s16  ;;  %p8720_p9 = scmp.lt.u32.totalorder %s8718_s8, %s8713_s16 }
  0x4b   : > { %s10139_s7 = scalar_select %p9140_p1, 1, 0 }
  0x4c   : > { %p8716_p5 = pnand %p9140_p1, %p8714_p10  ;;  %p8721_p11 = por %p8720_p9, %p8719_p7 }
  0x4d   : > { %p8722_p12 = scmp.lt.u32.totalorder %s8713_s16, %s9125_s12 }
  0x4e   : > { %p8717_p4 = pneg %p8716_p5 }
  0x4f   : > { %p8723_p3 = por %p8722_p12, %p8721_p11 }
  0x51   : > { %p8724_p6 = pnand %p8723_p3, %p8717_p4 }
  0x53   : > { %8727 = shalt.err (!%p8724_p6)
}
  0x54   : > { %s8728_s11 = scalar_lea.vmem %s9127_s20, 65536  ;;  %s8942_s19 = smov [#allocation7]  }
  0x55   : > { %p8729_p8 = scmp.ne.s32.totalorder %s9127_s20, %s8728_s11  ;;  %s8733_s22 = sshll.u32 %s8942_s19, 4  ;;  %s8734_s22 = int_to_ptr.vmem [resolvable:$false] %s8733_s22 }
  0x56   : > { %s8735_s23 = scalar_lea.vmem %s8734_s22, 131072  ;;  %p8736_p13 = scmp.lt.s32.totalorder %s9127_s20, %s8734_s22 }
  0x57   : > { %p8731_p10 = pnand %p8729_p8, %p9140_p1  ;;  %p8737_p2 = scmp.lt.s32.totalorder %s8735_s23, %s8728_s11 }
  0x59   : > { %p8732_p5 = pneg %p8731_p10  ;;  %p8738_p7 = por %p8737_p2, %p8736_p13 }
  0x5b   : > { %p8739_p9 = pnand %p8738_p7, %p8732_p5 }
  0x5d   : > { %8742 = shalt.err (!%p8739_p9)
}
  0x5e   : > { %s8943_s16 = smov 2048   ;;  %s10140_s0 = smov 64  }
  0x5f   : > { %s10141_s2 = smov 1024   ;;  %s8944_s8 = smov [#allocation2]  }
  0x60   : > { %8594 = dma.hbm_to_vmem [thread:$0]  (!%p10138_p0), %s9125_s12, 65536, %s9127_s20, %s9134_s28, %s8943_s16, %s10141_s2, %s10140_s0  }
  0x61   : > { %s253_s13 = sshll.u32 %s8944_s8, 4  ;;  %s8743_s11 = scalar_lea.hbm %s10086_s1, 8192  ;;  %s254_s13 = int_to_ptr.vmem [resolvable:$true] %s253_s13 }
  0x62   : > { %p8744_p13 = scmp.ne.s32.totalorder %s10086_s1, %s8743_s11  ;;  %p10142_p2 = scmp.ne.s32.totalorder %s10132_s24, 0 }
  0x63   : > { %p8750_p12 = scmp.lt.u32.totalorder %s8743_s11, %s10086_s1 }
  0x64   : > { %p8746_p4 = pnand %p8744_p13, %p10142_p2 }
  0x66   : > { %p8747_p11 = pneg %p8746_p4 }
  0x68   : > { %p8752_p3 = pnand %p8750_p12, %p8747_p11 }
  0x6a   : > { %8755 = shalt.err (!%p8752_p3)
}
  0x6b   : > { %s8756_s12 = scalar_lea.vmem %s254_s13, 8192  ;;  %p8764_p5 = scmp.lt.s32.totalorder %s254_s13, %s254_s13 }
  0x6c   : > { %p8757_p6 = scmp.ne.s32.totalorder %s254_s13, %s8756_s12  ;;  %p8765_p7 = scmp.lt.s32.totalorder %s8756_s12, %s8756_s12 }
  0x6e   : > { %p8759_p8 = pnand %p8757_p6, %p10142_p2  ;;  %p8766_p9 = por %p8765_p7, %p8764_p5 }
  0x70   : > { %p8760_p10 = pneg %p8759_p8 }
  0x72   : > { %p8767_p0 = pnand %p8766_p9, %p8760_p10 }
  0x74   : > { %8770 = shalt.err (!%p8767_p0)
}
  0x75   : > { %s8945_s20 = smov 512   ;;  %s8946_s4 = smov 32  }
  0x76   : > { %p10143_p13 = scmp.ne.s32.totalorder %s10129_s17, 0  ;;  %s7831_s0 = sshll.u32 %s9106_s10, 3 }
  0x77   : > { %s8947_s2 = smov [#allocation6]   ;;  %s7833_s21 = sshll.u32 %s8933_s30, 4 }
  0x78   : > { %8584 = dma.hbm_to_vmem [thread:$0]  (!%p10143_p13), %s10086_s1, 8192, %s254_s13, [#allocation3], %s8945_s20, %s8945_s20, %s8946_s4  }
  0x79   : > { %s280_s8 = sshll.u32 %s8947_s2, 4  ;;  %s8771_s22 = scalar_lea.hbm %s10088_s3, 256  ;;  %s281_s8 = int_to_ptr.vmem [resolvable:$true] %s280_s8 }
  0x7a   : > { %p8772_p0 = scmp.ne.s32.totalorder %s10088_s3, %s8771_s22  ;;  %p8778_p12 = scmp.lt.u32.totalorder %s8771_s22, %s10088_s3 }
  0x7c   : > { %p8774_p4 = pnand %p8772_p0, %p10142_p2 }
  0x7e   : > { %p8775_p11 = pneg %p8774_p4 }
  0x80   : > { %p8780_p3 = pnand %p8778_p12, %p8775_p11 }
  0x82   : > { %8783 = shalt.err (!%p8780_p3)
}
  0x83   : > { %s8784_s13 = scalar_lea.vmem %s281_s8, 256  ;;  %p8792_p5 = scmp.lt.s32.totalorder %s281_s8, %s281_s8 }
  0x84   : > { %p8785_p6 = scmp.ne.s32.totalorder %s281_s8, %s8784_s13  ;;  %p8793_p7 = scmp.lt.s32.totalorder %s8784_s13, %s8784_s13 }
  0x86   : > { %p8787_p8 = pnand %p8785_p6, %p10142_p2  ;;  %p8794_p9 = por %p8793_p7, %p8792_p5 }
  0x88   : > { %p8788_p10 = pneg %p8787_p8 }
  0x8a   : > { %p8795_p1 = pnand %p8794_p9, %p8788_p10 }
  0x8c   : > { %8798 = shalt.err (!%p8795_p1)
}
  0x8d   : > { %8590 = dma.hbm_to_vmem [thread:$0]  (!%p10143_p13), %s10088_s3, 256, %s281_s8, [#allocation5]  }
  0x8e   : > { %s10144_s25 = sshll.u32 %s8929_s29, 3  ;;  %s318_s24 = scalar_lea.vmem [#allocation9], %s7831_s0 }
  0x8f   : > { %s9206_s15 = sadd.s32 %s7833_s21, %s10144_s25  ;;  %s328_s27 = sshll.u32 %s318_s24, 4  ;;  %s329_s27 = int_to_ptr.vmem [resolvable:$true] %s328_s27 }
  0x90   : > { %s7834_s16 = sshll.u32 %s9206_s15, 4  ;;  %p10145_p2 = scmp.ne.s32.totalorder %s10139_s7, 0 }
  0x91   : > { %s326_s19 = scalar_lea.hbm %s10090_s5, %s7834_s16  ;;  %s8804_s22 = scalar_lea.hbm %s10090_s5, 768 }
  0x92   : > { %s8799_s11 = scalar_lea.hbm %s326_s19, 128  ;;  %p8805_p4 = scmp.lt.u32.totalorder %s326_s19, %s10090_s5 }
  0x93   : > { %p8800_p1 = scmp.ne.s32.totalorder %s326_s19, %s8799_s11  ;;  %p8806_p11 = scmp.lt.u32.totalorder %s8804_s22, %s8799_s11 }
  0x94   : > { %p8808_p3 = scmp.lt.u32.totalorder %s8799_s11, %s326_s19 }
  0x95   : > { %p8802_p0 = pnand %p8800_p1, %p10145_p2  ;;  %p8807_p12 = por %p8806_p11, %p8805_p4 }
  0x97   : > { %p8803_p13 = pneg %p8802_p0  ;;  %p8809_p6 = por %p8808_p3, %p8807_p12 }
  0x99   : > { %p8810_p8 = pnand %p8809_p6, %p8803_p13 }
  0x9b   : > { %8813 = shalt.err (!%p8810_p8)
}
  0x9c   : > { %s8814_s13 = scalar_lea.vmem %s329_s27, 128  ;;  %s8948_s20 = smov [#allocation9]  }
  0x9d   : > { %p8815_p10 = scmp.ne.s32.totalorder %s329_s27, %s8814_s13  ;;  %s8819_s4 = sshll.u32 %s8948_s20, 4  ;;  %s8820_s4 = int_to_ptr.vmem [resolvable:$false] %s8819_s4 }
  0x9e   : > { %s8821_s25 = scalar_lea.vmem %s8820_s4, 256  ;;  %p8822_p9 = scmp.lt.s32.totalorder %s329_s27, %s8820_s4 }
  0x9f   : > { %p8817_p5 = pnand %p8815_p10, %p10145_p2  ;;  %p8823_p1 = scmp.lt.s32.totalorder %s8821_s25, %s8814_s13 }
  0xa1   : > { %p8818_p7 = pneg %p8817_p5  ;;  %p8824_p0 = por %p8823_p1, %p8822_p9 }
  0xa3   : > { %p8825_p4 = pnand %p8824_p0, %p8818_p7 }
  0xa5   : > { %8828 = shalt.err (!%p8825_p4)
}
  0xa6   : > { %p10146_p11 = scmp.ne.s32.totalorder %s10130_s18, 0  ;;  %s9234_s17 = scalar_lea.hbm %s10091_s6, %s7834_s16 }
  0xa7   : > { %s339_s11 = scalar_lea.vmem [#allocation10], %s7831_s0  ;;  %s336_s21 = scalar_lea.sflag [#allocation11], %s9106_s10 }
  0xa8   : > { %8597 = dma.hbm_to_vmem [thread:$0]  (!%p10146_p11), %s326_s19, 128, %s329_s27, %s9134_s28  }
  0xa9   : > { %s349_s8 = sshll.u32 %s339_s11, 4  ;;  %s8829_s22 = scalar_lea.hbm %s9234_s17, 128  ;;  %s350_s8 = int_to_ptr.vmem [resolvable:$true] %s349_s8 }
  0xaa   : > { %p8830_p13 = scmp.ne.s32.totalorder %s9234_s17, %s8829_s22  ;;  %s8834_s27 = scalar_lea.hbm %s10091_s6, 768 }
  0xab   : > { %p8835_p6 = scmp.lt.u32.totalorder %s9234_s17, %s10091_s6  ;;  %p8836_p8 = scmp.lt.u32.totalorder %s8834_s27, %s8829_s22 }
  0xac   : > { %p8832_p12 = pnand %p8830_p13, %p10145_p2  ;;  %p8838_p5 = scmp.lt.u32.totalorder %s8829_s22, %s9234_s17 }
  0xad   : > { %p8837_p10 = por %p8836_p8, %p8835_p6 }
  0xae   : > { %p8833_p3 = pneg %p8832_p12 }
  0xaf   : > { %p8839_p7 = por %p8838_p5, %p8837_p10 }
  0xb1   : > { %p8840_p9 = pnand %p8839_p7, %p8833_p3 }
  0xb3   : > { %8843 = shalt.err (!%p8840_p9)
}
  0xb4   : > { %s8844_s10 = scalar_lea.vmem %s350_s8, 128  ;;  %s8949_s0 = smov [#allocation10]  }
  0xb5   : > { %p8845_p1 = scmp.ne.s32.totalorder %s350_s8, %s8844_s10  ;;  %s8849_s23 = sshll.u32 %s8949_s0, 4  ;;  %s8850_s23 = int_to_ptr.vmem [resolvable:$false] %s8849_s23 }
  0xb6   : > { %s8851_s12 = scalar_lea.vmem %s8850_s23, 256  ;;  %p8852_p13 = scmp.lt.s32.totalorder %s350_s8, %s8850_s23 }
  0xb7   : > { %p8847_p0 = pnand %p8845_p1, %p10145_p2  ;;  %p8853_p12 = scmp.lt.s32.totalorder %s8851_s12, %s8844_s10 }
  0xb9   : > { %p8848_p4 = pneg %p8847_p0  ;;  %p8854_p11 = por %p8853_p12, %p8852_p13 }
  0xbb   : > { %p8855_p6 = pnand %p8854_p11, %p8848_p4 }
  0xbd   : > { %8858 = shalt.err (!%p8855_p6)
}
  0xbe   : > { %p10147_p8 = scmp.ne.s32.totalorder %s10130_s18, 0  ;;  %p10148_p3 = scmp.ne.s32.totalorder %s10128_s14, 0 }
  0xbf   : > { %p10149_p10 = scmp.eq.s32.totalorder (!%p10148_p3), %s9031_s9, 0 }
  0xc0   : > { %8600 = dma.hbm_to_vmem [thread:$0]  (!%p10147_p8), %s9234_s17, 128, %s350_s8, %s336_s21  }
  0xc1   : > { %358 = sbr.rel (%p10148_p3) target bundleno = 2280 (0x8e8), region = 48 }
  0xc8   : > { %8892 = dma.done.wait (%p10149_p10), [#allocation3], 8192   ;;  %p10150_p2 = pmov %p10149_p10 }
  0xca   : > { %8894 = vsyncadd (%p10150_p2), [#allocation3], 4294959104  ;;  %p10151_p5 = pmov %p10150_p2 }
  0xcb   : > { %p10152_p7 = pmov %p10150_p2 }
  0xcc   : > { %8896 = dma.done.wait (%p10151_p5), [#allocation5], 65792  }
  0xcd   : > { %8898 = vsyncadd (%p10152_p7), [#allocation5], 4294901504  ;;  %s10153_s7 = sld [smem:[#allocation17_spill]]  ;;  %s10154_s18 = sld [smem:[#allocation21_spill]] }
  0xce   : > { %s372_s13 = sand.u32 1, %s9031_s9  }
  0xcf   : > { %s373_s4 = scalar_lea.sflag [#allocation8], %s372_s13 }
  0xd3   : > { %s9268_s20 = sand.u32 1, %s10153_s7   ;;  %p10155_p11 = scmp.ne.s32.totalorder %s10154_s18, 0 }
  0xd4   : > { %s7843_s14 = sshll.u32 %s9268_s20, 12 }
  0xd5   : > { %s9271_s25 = scalar_lea.vmem [#allocation7], %s7843_s14 }
  0xd6   : > { %8900 = dma.done.wait (%p10155_p11), %s373_s4, 65664  }
  0xd7   : > { %8902 = vsyncadd (%p10155_p11), %s373_s4, 4294901632  ;;  %s7844_s24 = sshll.u32 %s9268_s20, 3  ;;  %s391_s17 = scalar_lea.sflag [#allocation11], %s9268_s20 }
  0xd8   : > { %s9278_s2 = scalar_lea.vmem [#allocation9], %s7844_s24  ;;  %s9281_s9 = scalar_lea.vmem [#allocation10], %s7844_s24 }
  0xd9   : > { %8904 = dma.done.wait (%p10155_p11), %s391_s17, 128  }
  0xda   : > { %8906 = vsyncadd (%p10155_p11), %s391_s17, 4294967168  ;;  %v8950_v0 = vmov 0   ;;  %s10156_s21 = sld [smem:[#allocation26_spill]]  ;;  %v457_v3 = vld [vmem:[#allocation2 + $0x8] sm:$0xff]  ;;  %v459_v5 = vld [vmem:[#allocation2 + $0x18] sm:$0xff]  ;;  %s7846_s15 = sshll.u32 %s9268_s20, 6 }
  0xdb   : > { %8682 = vset.pattern.permute.xlu0 %v8950_v0  ;;  %584 = vmatprep.mubr.bf16.mxu0 %v8950_v0  ;;  %v461_v4 = vld [vmem:[#allocation2 + $0x28] sm:$0xff]  ;;  %v463_v6 = vld [vmem:[#allocation2 + $0x38] sm:$0xff]  ;;  %v456_v9 = vld [vmem:[#allocation2] sm:$0xff]  ;;  %s9867_s27 = scalar_lea.vmem [#allocation12], %s7846_s15  ;;  %s10157_s16 = sld [smem:[#allocation22_spill]] }
  0xdc   : > { %627 = vmatprep.mubr.bf16.mxu1 %v8950_v0  ;;  %v521_v7 = vpack.c.bf16 %v461_v4, %v457_v3  ;;  %v523_v8 = vpack.c.bf16 %v463_v6, %v459_v5  ;;  %v460_v10 = vld [vmem:[#allocation2 + $0x20] sm:$0xff]  ;;  %v458_v11 = vld [vmem:[#allocation2 + $0x10] sm:$0xff]  ;;  %v465_v14 = vld [vmem:[#allocation2 + $0x48] sm:$0xff] }
  0xdd   : > { %v520_v12 = vpack.c.bf16 %v460_v10, %v456_v9  ;;  %v462_v13 = vld [vmem:[#allocation2 + $0x30] sm:$0xff]  ;;  %v469_v15 = vld [vmem:[#allocation2 + $0x68] sm:$0xff]  ;;  %v467_v18 = vld [vmem:[#allocation2 + $0x58] sm:$0xff] }
  0xde   : > { %552 = vmatprep.subr.bf16.mxu0 %v521_v7  ;;  %595 = vmatprep.subr.bf16.mxu1 %v523_v8  ;;  %v522_v16 = vpack.c.bf16 %v462_v13, %v458_v11  ;;  %v525_v17 = vpack.c.bf16 %v469_v15, %v465_v14  ;;  %v471_v19 = vld [vmem:[#allocation2 + $0x78] sm:$0xff]  ;;  %v464_v20 = vld [vmem:[#allocation2 + $0x40] sm:$0xff]  ;;  %v466_v23 = vld [vmem:[#allocation2 + $0x50] sm:$0xff] }
  0xdf   : > { %553 = vmatpush1.bf16.msra.mxu0 %v520_v12  ;;  %v527_v21 = vpack.c.bf16 %v471_v19, %v467_v18  ;;  %v468_v22 = vld [vmem:[#allocation2 + $0x60] sm:$0xff]  ;;  %v470_v24 = vld [vmem:[#allocation2 + $0x70] sm:$0xff]  ;;  %v473_v27 = vld [vmem:[#allocation2 + $0x88] sm:$0xff] }
  0xe0   : > { %v439_v1 = vld [vmem:[%s10156_s21] sm:$0xff]  ;;  %v440_v2 = vld [vmem:[%s10156_s21 + $0x8] sm:$0xff]  ;;  %596 = vmatpush1.bf16.msra.mxu1 %v522_v16  ;;  %554 = vmatprep.subr.bf16.mxu0 %v525_v17  ;;  %v524_v25 = vpack.c.bf16 %v468_v22, %v464_v20  ;;  %v526_v26 = vpack.c.bf16 %v470_v24, %v466_v23  ;;  %v475_v29 = vld [vmem:[#allocation2 + $0x98] sm:$0xff] }
  0xe1   : > { %444 = vperm.xlu0 %8682, %v439_v1   ;;  %v477_v28 = vld [vmem:[#allocation2 + $0xa8] sm:$0xff]  ;;  %597 = vmatprep.subr.bf16.mxu1 %v527_v21  ;;  %v479_v31 = vld [vmem:[#allocation2 + $0xb8] sm:$0xff]  ;;  %v472_v32 = vld [vmem:[#allocation2 + $0x80] sm:$0xff]  ;;  %p10158_p9 = scmp.ne.s32.totalorder %s10157_s16, 0 }
  0xe2   : > { %v529_v30 = vpack.c.bf16 %v477_v28, %v473_v27  ;;  %v476_v33 = vld [vmem:[#allocation2 + $0xa0] sm:$0xff]  ;;  %v531_v34 = vpack.c.bf16 %v479_v31, %v475_v29  ;;  %v474_v35 = vld [vmem:[#allocation2 + $0x90] sm:$0xff]  ;;  %v481_v37 = vld [vmem:[#allocation2 + $0xc8] sm:$0xff]  ;;  %s10159_s19 = sld [smem:[#allocation18_spill]] (%p10158_p9)  ;;  %s10160_s10 = sld [smem:[#allocation19_spill]] (%p10158_p9) }
  0xe3   : > { %v478_v36 = vld [vmem:[#allocation2 + $0xb0] sm:$0xff]  ;;  %555 = vmatpush1.bf16.msra.mxu0 %v524_v25  ;;  %v528_v38 = vpack.c.bf16 %v476_v33, %v472_v32  ;;  %v485_v39 = vld [vmem:[#allocation2 + $0xe8] sm:$0xff]  ;;  %v483_v40 = vld [vmem:[#allocation2 + $0xd8] sm:$0xff]  ;;  %s10161_s20 = sld [smem:[#allocation29_spill]] (%p10158_p9) }
  0xe4   : > { %v487_v41 = vld [vmem:[#allocation2 + $0xf8] sm:$0xff]  ;;  %598 = vmatpush1.bf16.msra.mxu1 %v526_v26  ;;  %556 = vmatprep.subr.bf16.mxu0 %v529_v30  ;;  %v530_v42 = vpack.c.bf16 %v478_v36, %v474_v35  ;;  %v533_v43 = vpack.c.bf16 %v485_v39, %v481_v37  ;;  %v480_v44 = vld [vmem:[#allocation2 + $0xc0] sm:$0xff]  ;;  %v482_v46 = vld [vmem:[#allocation2 + $0xd0] sm:$0xff] }
  0xe5   : > { %447 = vperm.xlu0 %8682, %v440_v2   ;;  %v484_v45 = vld [vmem:[#allocation2 + $0xe0] sm:$0xff]  ;;  %599 = vmatprep.subr.bf16.mxu1 %v531_v34  ;;  %v535_v47 = vpack.c.bf16 %v487_v41, %v483_v40  ;;  %v486_v48 = vld [vmem:[#allocation2 + $0xf0] sm:$0xff]  ;;  %v489_v49 = vld [vmem:[#allocation2 + $0x108] sm:$0xff] }
  0xe6   : > { %v493_v50 = vld [vmem:[#allocation2 + $0x128] sm:$0xff]  ;;  %v491_v51 = vld [vmem:[#allocation2 + $0x118] sm:$0xff]  ;;  %v532_v53 = vpack.c.bf16 %v484_v45, %v480_v44  ;;  %v534_v54 = vpack.c.bf16 %v486_v48, %v482_v46  ;;  %v488_v56 = vld [vmem:[#allocation2 + $0x100] sm:$0xff] }
  0xe7   : > { %v495_v52 = vld [vmem:[#allocation2 + $0x138] sm:$0xff]  ;;  %557 = vmatpush1.bf16.msra.mxu0 %v528_v38  ;;  %v537_v55 = vpack.c.bf16 %v493_v50, %v489_v49  ;;  %v492_v57 = vld [vmem:[#allocation2 + $0x120] sm:$0xff]  ;;  %v490_v58 = vld [vmem:[#allocation2 + $0x110] sm:$0xff] }
  0xe8   : > { %600 = vmatpush1.bf16.msra.mxu1 %v530_v42  ;;  %558 = vmatprep.subr.bf16.mxu0 %v533_v43  ;;  %v539_v59 = vpack.c.bf16 %v495_v52, %v491_v51  ;;  %v494_v60 = vld [vmem:[#allocation2 + $0x130] sm:$0xff]  ;;  %v497_v61 = vld [vmem:[#allocation2 + $0x148] sm:$0xff]  ;;  %v499_v63 = vld [vmem:[#allocation2 + $0x158] sm:$0xff]  ;;  %v536_v1 = vpack.c.bf16 %v492_v57, %v488_v56  ;;  %v441_v43 = vlaneseq  ;;  %v8951_v57 = vmov 1.0|1.0   ;;  %s8374_s0 = sshll.u32 (%p10158_p9), %s10159_s19, 3 }
  0xe9   : > { %601 = vmatprep.subr.bf16.mxu1 %v535_v47  ;;  %v501_v62 = vld [vmem:[#allocation2 + $0x168] sm:$0xff]  ;;  %v503_v0 = vld [vmem:[#allocation2 + $0x178] sm:$0xff]  ;;  %v538_v2 = vpack.c.bf16 %v494_v60, %v490_v58  ;;  %v496_v4 = vld [vmem:[#allocation2 + $0x140] sm:$0xff]  ;;  %s8375_s23 = sshll.u32 (%p10158_p9), %s10160_s10, 5 }
  0xea   : > { %v541_v3 = vpack.c.bf16 %v501_v62, %v497_v61  ;;  %v500_v5 = vld [vmem:[#allocation2 + $0x160] sm:$0xff]  ;;  %v498_v6 = vld [vmem:[#allocation2 + $0x150] sm:$0xff]  ;;  %v543_v7 = vpack.c.bf16 %v503_v0, %v499_v63  ;;  %v505_v9 = vld [vmem:[#allocation2 + $0x188] sm:$0xff]  ;;  %v442_v45 = vand.u32 127, %v441_v43  ;;  %s7627_s12 = sadd.s32 (%p10158_p9), %s8375_s23, %s8374_s0 }
  0xeb   : > { %559 = vmatpush1.bf16.msra.mxu0 %v532_v53  ;;  %v502_v8 = vld [vmem:[#allocation2 + $0x170] sm:$0xff]  ;;  %v509_v10 = vld [vmem:[#allocation2 + $0x1a8] sm:$0xff]  ;;  %v507_v11 = vld [vmem:[#allocation2 + $0x198] sm:$0xff]  ;;  %v540_v14 = vpack.c.bf16 %v500_v5, %v496_v4  ;;  %s8376_s7 = sshll.u32 (%p10158_p9), %s7627_s12, 2 }
  0xec   : > { %602 = vmatpush1.bf16.msra.mxu1 %v534_v54  ;;  %560 = vmatprep.subr.bf16.mxu0 %v537_v55  ;;  %v511_v12 = vld [vmem:[#allocation2 + $0x1b8] sm:$0xff]  ;;  %v504_v13 = vld [vmem:[#allocation2 + $0x180] sm:$0xff]  ;;  %v506_v16 = vld [vmem:[#allocation2 + $0x190] sm:$0xff]  ;;  %v542_v18 = vpack.c.bf16 %v502_v8, %v498_v6  ;;  %v545_v19 = vpack.c.bf16 %v509_v10, %v505_v9  ;;  %s7629_s14 = scalar_lea.vmem (%p10158_p9), %s10161_s20, %s8376_s7 }
  0xed   : > { %603 = vmatprep.subr.bf16.mxu1 %v539_v59  ;;  %v508_v15 = vld [vmem:[#allocation2 + $0x1a0] sm:$0xff]  ;;  %v510_v17 = vld [vmem:[#allocation2 + $0x1b0] sm:$0xff]  ;;  %v643_v22 = vld [vmem:[#allocation4 + $0x8] sm:$0xff]  ;;  %v547_v23 = vpack.c.bf16 %v511_v12, %v507_v11 }
  0xee   : > { %v642_v20 = vld [vmem:[#allocation4] sm:$0xff]  ;;  %v513_v24 = vld [vmem:[#allocation2 + $0x1c8] sm:$0xff]  ;;  %v515_v28 = vld [vmem:[#allocation2 + $0x1d8] sm:$0xff]  ;;  %v544_v31 = vpack.c.bf16 %v508_v15, %v504_v13  ;;  %v546_v32 = vpack.c.bf16 %v510_v17, %v506_v16 }
  0xef   : > { %561 = vmatpush1.bf16.msra.mxu0 %v536_v1  ;;  %v650_v21 = vld [vmem:[#allocation4 + $0x40] sm:$0xff]  ;;  %v517_v25 = vld [vmem:[#allocation2 + $0x1e8] sm:$0xff]  ;;  %v519_v29 = vld [vmem:[#allocation2 + $0x1f8] sm:$0xff] }
  0xf0   : > { %604 = vmatpush1.bf16.msra.mxu1 %v538_v2  ;;  %562 = vmatprep.subr.bf16.mxu0 %v541_v3  ;;  %v7853_v26 = vcombine.low %v642_v20, %v650_v21  ;;  %v651_v27 = vld [vmem:[#allocation4 + $0x48] sm:$0xff]  ;;  %v549_v33 = vpack.c.bf16 %v517_v25, %v513_v24  ;;  %v512_v34 = vld [vmem:[#allocation2 + $0x1c0] sm:$0xff]  ;;  %v551_v36 = vpack.c.bf16 %v519_v29, %v515_v28  ;;  %v514_v37 = vld [vmem:[#allocation2 + $0x1d0] sm:$0xff] }
  0xf1   : > { %605 = vmatprep.subr.bf16.mxu1 %v543_v7  ;;  %v7855_v30 = vcombine.low %v643_v22, %v651_v27  ;;  %v516_v35 = vld [vmem:[#allocation2 + $0x1e0] sm:$0xff]  ;;  %v518_v38 = vld [vmem:[#allocation2 + $0x1f0] sm:$0xff]  ;;  %v7854_v41 = vcombine.high %v642_v20, %v650_v21  ;;  %v7856_v42 = vcombine.high %v643_v22, %v651_v27  ;;  %v659_v48 = vld [vmem:[#allocation4 + $0x88] sm:$0xff] }
  0xf2   : > { %v548_v39 = vpack.c.bf16 %v516_v35, %v512_v34  ;;  %v550_v40 = vpack.c.bf16 %v518_v38, %v514_v37  ;;  %v658_v46 = vld [vmem:[#allocation4 + $0x80] sm:$0xff]  ;;  %v667_v49 = vld [vmem:[#allocation4 + $0xc8] sm:$0xff] }
  0xf3   : > { %563 = vmatpush1.bf16.msra.mxu0 %v540_v14  ;;  %v666_v47 = vld [vmem:[#allocation4 + $0xc0] sm:$0xff]  ;;  %v7872_v52 = vcombine.high %v659_v48, %v667_v49  ;;  %v675_v55 = vld [vmem:[#allocation4 + $0x108] sm:$0xff]  ;;  %v7871_v59 = vcombine.low %v659_v48, %v667_v49 }
  0xf4   : > { %606 = vmatpush1.bf16.msra.mxu1 %v542_v18  ;;  %564 = vmatprep.subr.bf16.mxu0 %v545_v19  ;;  %v7870_v51 = vcombine.high %v658_v46, %v666_v47  ;;  %v674_v53 = vld [vmem:[#allocation4 + $0x100] sm:$0xff]  ;;  %v683_v56 = vld [vmem:[#allocation4 + $0x148] sm:$0xff]  ;;  %v7869_v58 = vcombine.low %v658_v46, %v666_v47 }
  0xf5   : > { %607 = vmatprep.subr.bf16.mxu1 %v547_v23  ;;  %v682_v54 = vld [vmem:[#allocation4 + $0x140] sm:$0xff]  ;;  %v7888_v61 = vcombine.high %v675_v55, %v683_v56  ;;  %v691_v0 = vld [vmem:[#allocation4 + $0x188] sm:$0xff]  ;;  %v7887_v3 = vcombine.low %v675_v55, %v683_v56 }
  0xf6   : > { %v7886_v60 = vcombine.high %v674_v53, %v682_v54  ;;  %v690_v62 = vld [vmem:[#allocation4 + $0x180] sm:$0xff]  ;;  %v699_v1 = vld [vmem:[#allocation4 + $0x1c8] sm:$0xff]  ;;  %v7885_v2 = vcombine.low %v674_v53, %v682_v54 }
  0xf7   : > { %565 = vmatpush1.bf16.msra.mxu0 %v544_v31  ;;  %v698_v63 = vld [vmem:[#allocation4 + $0x1c0] sm:$0xff]  ;;  %v7904_v5 = vcombine.high %v691_v0, %v699_v1  ;;  %v707_v8 = vld [vmem:[#allocation4 + $0x208] sm:$0xff]  ;;  %v7903_v11 = vcombine.low %v691_v0, %v699_v1 }
  0xf8   : > { %608 = vmatpush1.bf16.msra.mxu1 %v546_v32  ;;  %566 = vmatprep.subr.bf16.mxu0 %v549_v33  ;;  %v7902_v4 = vcombine.high %v690_v62, %v698_v63  ;;  %v706_v6 = vld [vmem:[#allocation4 + $0x200] sm:$0xff]  ;;  %v715_v9 = vld [vmem:[#allocation4 + $0x248] sm:$0xff]  ;;  %v7901_v10 = vcombine.low %v690_v62, %v698_v63 }
  0xf9   : > { %609 = vmatprep.subr.bf16.mxu1 %v551_v36  ;;  %v714_v7 = vld [vmem:[#allocation4 + $0x240] sm:$0xff]  ;;  %v7920_v13 = vcombine.high %v707_v8, %v715_v9  ;;  %v723_v16 = vld [vmem:[#allocation4 + $0x288] sm:$0xff]  ;;  %v7919_v19 = vcombine.low %v707_v8, %v715_v9 }
  0xfa   : > { %v7918_v12 = vcombine.high %v706_v6, %v714_v7  ;;  %v722_v14 = vld [vmem:[#allocation4 + $0x280] sm:$0xff]  ;;  %v731_v17 = vld [vmem:[#allocation4 + $0x2c8] sm:$0xff]  ;;  %v7917_v18 = vcombine.low %v706_v6, %v714_v7 }
  0xfb   : > { %567 = vmatpush1.bf16.msra.mxu0 %v548_v39  ;;  %v730_v15 = vld [vmem:[#allocation4 + $0x2c0] sm:$0xff]  ;;  %v7936_v21 = vcombine.high %v723_v16, %v731_v17  ;;  %v739_v24 = vld [vmem:[#allocation4 + $0x308] sm:$0xff]  ;;  %v7935_v27 = vcombine.low %v723_v16, %v731_v17 }
  0xfc   : > { %610 = vmatpush1.bf16.msra.mxu1 %v550_v40  ;;  %3798 = vmatprep.subr.bf16.mxu0 %v7854_v41  ;;  %v7934_v20 = vcombine.high %v722_v14, %v730_v15  ;;  %v738_v22 = vld [vmem:[#allocation4 + $0x300] sm:$0xff]  ;;  %v747_v25 = vld [vmem:[#allocation4 + $0x348] sm:$0xff] }
  0xfd   : > { %3884 = vmatprep.subr.bf16.mxu1 %v7856_v42  ;;  %v746_v23 = vld [vmem:[#allocation4 + $0x340] sm:$0xff]  ;;  %v7952_v29 = vcombine.high %v739_v24, %v747_v25  ;;  %v755_v32 = vld [vmem:[#allocation4 + $0x388] sm:$0xff]  ;;  %v7951_v35 = vcombine.low %v739_v24, %v747_v25 }
  0xfe   : > { %v7950_v28 = vcombine.high %v738_v22, %v746_v23  ;;  %v762_v31 = vld [vmem:[#allocation4 + $0x3c0] sm:$0xff]  ;;  %v763_v33 = vld [vmem:[#allocation4 + $0x3c8] sm:$0xff]  ;;  %v7949_v34 = vcombine.low %v738_v22, %v746_v23 }
  0xff   : > { %v7968_v37 = vcombine.high %v755_v32, %v763_v33  ;;  %v770_v38 = vld [vmem:[#allocation4 + $0x400] sm:$0xff]  ;;  %v771_v40 = vld [vmem:[#allocation4 + $0x408] sm:$0xff] }
 0x100   : > { %v778_v39 = vld [vmem:[#allocation4 + $0x440] sm:$0xff]  ;;  %v779_v41 = vld [vmem:[#allocation4 + $0x448] sm:$0xff] }
 0x101   : > { %v7984_v46 = vcombine.high %v771_v40, %v779_v41  ;;  %v786_v47 = vld [vmem:[#allocation4 + $0x480] sm:$0xff]  ;;  %v787_v49 = vld [vmem:[#allocation4 + $0x488] sm:$0xff] }
 0x102   : > { %v794_v48 = vld [vmem:[#allocation4 + $0x4c0] sm:$0xff]  ;;  %v819_v1 = vld [vmem:[#allocation4 + $0x588] sm:$0xff] }
 0x103   : > { %v7998_v53 = vcombine.high %v786_v47, %v794_v48  ;;  %v802_v55 = vld [vmem:[#allocation4 + $0x500] sm:$0xff]  ;;  %v835_v9 = vld [vmem:[#allocation4 + $0x608] sm:$0xff] }
 0x104   : > { %v810_v56 = vld [vmem:[#allocation4 + $0x540] sm:$0xff]  ;;  %v851_v17 = vld [vmem:[#allocation4 + $0x688] sm:$0xff] }
 0x105   : > { %v818_v63 = vld [vmem:[#allocation4 + $0x580] sm:$0xff]  ;;  %v867_v25 = vld [vmem:[#allocation4 + $0x708] sm:$0xff] }
 0x106   : > { %v826_v0 = vld [vmem:[#allocation4 + $0x5c0] sm:$0xff] }
 0x107   : > { %v834_v7 = vld [vmem:[#allocation4 + $0x600] sm:$0xff] }
 0x108   : > { %v842_v8 = vld [vmem:[#allocation4 + $0x640] sm:$0xff] }
 0x109   : > { %v858_v16 = vld [vmem:[#allocation4 + $0x6c0] sm:$0xff] }
 0x10a   : > { %v866_v23 = vld [vmem:[#allocation4 + $0x700] sm:$0xff] }
 0x10b   : > { %v874_v24 = vld [vmem:[#allocation4 + $0x740] sm:$0xff] }
 0x160   : > { %v445_v44 = vpop.permute.xlu0 %444 }
 0x161   : > { %vm449_vm0 = vcmp.eq.s32.totalorder %v445_v44, %v442_v45  ;;  %v7967_v44 = vcombine.low %v755_v32, %v763_v33  ;;  %v882_v33 = vld [vmem:[#allocation4 + $0x780] sm:$0xff] }
 0x164   : > { %v448_v50 = vpop.permute.xlu0 %447 }
 0x165   : > { %vm450_vm1 = vcmp.eq.s32.totalorder %v448_v50, %v442_v45  ;;  %v7982_v45 = vcombine.high %v770_v38, %v778_v39  ;;  %v795_v50 = vld [vmem:[#allocation4 + $0x4c8] sm:$0xff] }
 0x166   : > { %vm7849_vm2 = vmpackc.low %vm450_vm1, %vm449_vm0  ;;  %v8000_v54 = vcombine.high %v787_v49, %v795_v50 }
 0x167   : > { %7850 = vmatmul.mubr.msk.bf16.vlgmr.msra.gmra.mrb[0].mxu0 %vm7849_vm2, %v8951_v57  ;;  %7852 = vmatmul.mubr.msk.bf16.vlgmr.msra.gmra.mrb[0].mxu1 %vm7849_vm2, %v8951_v57  ;;  %v803_v57 = vld [vmem:[#allocation4 + $0x508] sm:$0xff] }
 0x168   : > { %3799 = vmatpush1.bf16.msra.mxu0 %v7853_v26  ;;  %3885 = vmatpush1.bf16.msra.mxu1 %v7855_v30  ;;  %v7933_v26 = vcombine.low %v722_v14, %v730_v15  ;;  %v754_v30 = vld [vmem:[#allocation4 + $0x380] sm:$0xff] }
 0x169   : > { %3800 = vmatprep.subr.bf16.mxu0 %v7870_v51  ;;  %3886 = vmatprep.subr.bf16.mxu1 %v7872_v52  ;;  %v7966_v36 = vcombine.high %v754_v30, %v762_v31  ;;  %v7965_v42 = vcombine.low %v754_v30, %v762_v31  ;;  %v7981_v51 = vcombine.low %v770_v38, %v778_v39  ;;  %v850_v15 = vld [vmem:[#allocation4 + $0x680] sm:$0xff] }
 0x16a   : > { %v7983_v52 = vcombine.low %v771_v40, %v779_v41  ;;  %v8077_v31 = vcombine.low %v866_v23, %v874_v24  ;;  %v898_v41 = vld [vmem:[#allocation4 + $0x800] sm:$0xff] }
 0x16c   : > { %3801 = vmatpush1.bf16.msra.mxu0 %v7869_v58  ;;  %3887 = vmatpush1.bf16.msra.mxu1 %v7871_v59  ;;  %v811_v58 = vld [vmem:[#allocation4 + $0x548] sm:$0xff]  ;;  %v7997_v59 = vcombine.low %v786_v47, %v794_v48 }
 0x16d   : > { %3802 = vmatprep.subr.bf16.mxu0 %v7886_v60  ;;  %3888 = vmatprep.subr.bf16.mxu1 %v7888_v61  ;;  %v7999_v60 = vcombine.low %v787_v49, %v795_v50  ;;  %v8014_v61 = vcombine.high %v802_v55, %v810_v56  ;;  %v8016_v62 = vcombine.high %v803_v57, %v811_v58 }
 0x170   : > { %3803 = vmatpush1.bf16.msra.mxu0 %v7885_v2  ;;  %3889 = vmatpush1.bf16.msra.mxu1 %v7887_v3  ;;  %v827_v2 = vld [vmem:[#allocation4 + $0x5c8] sm:$0xff]  ;;  %v8013_v3 = vcombine.low %v802_v55, %v810_v56  ;;  %v914_v56 = vld [vmem:[#allocation4 + $0x880] sm:$0xff] }
 0x171   : > { %3804 = vmatprep.subr.bf16.mxu0 %v7902_v4  ;;  %3890 = vmatprep.subr.bf16.mxu1 %v7904_v5  ;;  %v8015_v4 = vcombine.low %v803_v57, %v811_v58  ;;  %v8030_v5 = vcombine.high %v818_v63, %v826_v0  ;;  %v8032_v6 = vcombine.high %v819_v1, %v827_v2 }
 0x174   : > { %3805 = vmatpush1.bf16.msra.mxu0 %v7901_v10  ;;  %3891 = vmatpush1.bf16.msra.mxu1 %v7903_v11  ;;  %v843_v10 = vld [vmem:[#allocation4 + $0x648] sm:$0xff]  ;;  %v8029_v11 = vcombine.low %v818_v63, %v826_v0 }
 0x175   : > { %3806 = vmatprep.subr.bf16.mxu0 %v7918_v12  ;;  %3892 = vmatprep.subr.bf16.mxu1 %v7920_v13  ;;  %v8031_v12 = vcombine.low %v819_v1, %v827_v2  ;;  %v8046_v13 = vcombine.high %v834_v7, %v842_v8  ;;  %v8048_v14 = vcombine.high %v835_v9, %v843_v10  ;;  %v923_v63 = vld [vmem:[#allocation4 + $0x8c8] sm:$0xff]  ;;  %v930_v2 = vld [vmem:[#allocation4 + $0x900] sm:$0xff] }
 0x178   : > { %3807 = vmatpush1.bf16.msra.mxu0 %v7917_v18  ;;  %3893 = vmatpush1.bf16.msra.mxu1 %v7919_v19  ;;  %v859_v18 = vld [vmem:[#allocation4 + $0x6c8] sm:$0xff]  ;;  %v8045_v19 = vcombine.low %v834_v7, %v842_v8 }
 0x179   : > { %3808 = vmatprep.subr.bf16.mxu0 %v7934_v20  ;;  %3894 = vmatprep.subr.bf16.mxu1 %v7936_v21  ;;  %v8047_v20 = vcombine.low %v835_v9, %v843_v10  ;;  %v8062_v21 = vcombine.high %v850_v15, %v858_v16  ;;  %v8064_v22 = vcombine.high %v851_v17, %v859_v18  ;;  %v939_v7 = vld [vmem:[#allocation4 + $0x948] sm:$0xff] }
 0x17c   : > { %3809 = vmatpush1.bf16.msra.mxu0 %v7933_v26  ;;  %3895 = vmatpush1.bf16.msra.mxu1 %v7935_v27  ;;  %v875_v26 = vld [vmem:[#allocation4 + $0x748] sm:$0xff]  ;;  %v8061_v27 = vcombine.low %v850_v15, %v858_v16 }
 0x17d   : > { %3810 = vmatprep.subr.bf16.mxu0 %v7950_v28  ;;  %3896 = vmatprep.subr.bf16.mxu1 %v7952_v29  ;;  %v8063_v28 = vcombine.low %v851_v17, %v859_v18  ;;  %v8078_v29 = vcombine.high %v866_v23, %v874_v24  ;;  %v8080_v30 = vcombine.high %v867_v25, %v875_v26  ;;  %v955_v15 = vld [vmem:[#allocation4 + $0x9c8] sm:$0xff] }
 0x17e   : > { %v8079_v32 = vcombine.low %v867_v25, %v875_v26  ;;  %v971_v23 = vld [vmem:[#allocation4 + $0xa48] sm:$0xff] }
 0x180   : > { %3811 = vmatpush1.bf16.msra.mxu0 %v7949_v34  ;;  %3897 = vmatpush1.bf16.msra.mxu1 %v7951_v35  ;;  %v890_v34 = vld [vmem:[#allocation4 + $0x7c0] sm:$0xff]  ;;  %v883_v35 = vld [vmem:[#allocation4 + $0x788] sm:$0xff] }
 0x181   : > { %3812 = vmatprep.subr.bf16.mxu0 %v7966_v36  ;;  %3898 = vmatprep.subr.bf16.mxu1 %v7968_v37  ;;  %v8094_v36 = vcombine.high %v882_v33, %v890_v34  ;;  %v891_v37 = vld [vmem:[#allocation4 + $0x7c8] sm:$0xff]  ;;  %v8093_v38 = vcombine.low %v882_v33, %v890_v34 }
 0x182   : > { %v8095_v39 = vcombine.low %v883_v35, %v891_v37  ;;  %v8096_v40 = vcombine.high %v883_v35, %v891_v37  ;;  %v1002_v37 = vld [vmem:[#allocation4 + $0xb40] sm:$0xff] }
 0x184   : > { %3813 = vmatpush1.bf16.msra.mxu0 %v7965_v42  ;;  %3899 = vmatpush1.bf16.msra.mxu1 %v7967_v44  ;;  %v906_v42 = vld [vmem:[#allocation4 + $0x840] sm:$0xff]  ;;  %v899_v44 = vld [vmem:[#allocation4 + $0x808] sm:$0xff] }
 0x185   : > { %3814 = vmatprep.subr.bf16.mxu0 %v7982_v45  ;;  %3900 = vmatprep.subr.bf16.mxu1 %v7984_v46  ;;  %v8110_v45 = vcombine.high %v898_v41, %v906_v42  ;;  %v907_v46 = vld [vmem:[#allocation4 + $0x848] sm:$0xff]  ;;  %v8109_v47 = vcombine.low %v898_v41, %v906_v42 }
 0x186   : > { %v8111_v48 = vcombine.low %v899_v44, %v907_v46  ;;  %v8112_v49 = vcombine.high %v899_v44, %v907_v46  ;;  %v1018_v46 = vld [vmem:[#allocation4 + $0xbc0] sm:$0xff] }
 0x188   : > { %3815 = vmatpush1.bf16.msra.mxu0 %v7981_v51  ;;  %3901 = vmatpush1.bf16.msra.mxu1 %v7983_v52 }
 0x189   : > { %3816 = vmatprep.subr.bf16.mxu0 %v7998_v53  ;;  %3902 = vmatprep.subr.bf16.mxu1 %v8000_v54 }
 0x18c   : > { %3817 = vmatpush1.bf16.msra.mxu0 %v7997_v59  ;;  %3903 = vmatpush1.bf16.msra.mxu1 %v7999_v60 }
 0x18d   : > { %3818 = vmatprep.subr.bf16.mxu0 %v8014_v61  ;;  %3904 = vmatprep.subr.bf16.mxu1 %v8016_v62  ;;  %v922_v61 = vld [vmem:[#allocation4 + $0x8c0] sm:$0xff]  ;;  %v915_v62 = vld [vmem:[#allocation4 + $0x888] sm:$0xff] }
 0x18e   : > { %v8125_v8 = vcombine.low %v914_v56, %v922_v61  ;;  %v8127_v9 = vcombine.low %v915_v62, %v923_v63 }
 0x190   : > { %3819 = vmatpush1.bf16.msra.mxu0 %v8013_v3  ;;  %3905 = vmatpush1.bf16.msra.mxu1 %v8015_v4  ;;  %v8126_v3 = vcombine.high %v914_v56, %v922_v61  ;;  %v8128_v4 = vcombine.high %v915_v62, %v923_v63  ;;  %v1035_v56 = vld [vmem:[#allocation4 + $0xc48] sm:$0xff]  ;;  %v1042_v63 = vld [vmem:[#allocation4 + $0xc80] sm:$0xff] }
 0x191   : > { %3820 = vmatprep.subr.bf16.mxu0 %v8030_v5  ;;  %3906 = vmatprep.subr.bf16.mxu1 %v8032_v6  ;;  %v938_v5 = vld [vmem:[#allocation4 + $0x940] sm:$0xff]  ;;  %v931_v6 = vld [vmem:[#allocation4 + $0x908] sm:$0xff] }
 0x192   : > { %v8142_v10 = vcombine.high %v930_v2, %v938_v5  ;;  %v8141_v16 = vcombine.low %v930_v2, %v938_v5  ;;  %v8143_v17 = vcombine.low %v931_v6, %v939_v7  ;;  %v1050_v2 = vld [vmem:[#allocation4 + $0xcc0] sm:$0xff] }
 0x194   : > { %3821 = vmatpush1.bf16.msra.mxu0 %v8029_v11  ;;  %3907 = vmatpush1.bf16.msra.mxu1 %v8031_v12  ;;  %v8144_v11 = vcombine.high %v931_v6, %v939_v7  ;;  %v946_v12 = vld [vmem:[#allocation4 + $0x980] sm:$0xff]  ;;  %v8254_v7 = vcombine.high %v1042_v63, %v1050_v2 }
 0x195   : > { %3822 = vmatprep.subr.bf16.mxu0 %v8046_v13  ;;  %3908 = vmatprep.subr.bf16.mxu1 %v8048_v14  ;;  %v954_v13 = vld [vmem:[#allocation4 + $0x9c0] sm:$0xff]  ;;  %v947_v14 = vld [vmem:[#allocation4 + $0x988] sm:$0xff] }
 0x196   : > { %v8158_v18 = vcombine.high %v946_v12, %v954_v13  ;;  %v8157_v24 = vcombine.low %v946_v12, %v954_v13  ;;  %v8159_v25 = vcombine.low %v947_v14, %v955_v15  ;;  %v1067_v12 = vld [vmem:[#allocation4 + $0xd48] sm:$0xff]  ;;  %v8253_v13 = vcombine.low %v1042_v63, %v1050_v2  ;;  %v653_v63 = vld [vmem:[#allocation4 + $0x58] sm:$0xff] }
 0x198   : > { %3823 = vmatpush1.bf16.msra.mxu0 %v8045_v19  ;;  %3909 = vmatpush1.bf16.msra.mxu1 %v8047_v20  ;;  %v8160_v19 = vcombine.high %v947_v14, %v955_v15  ;;  %v962_v20 = vld [vmem:[#allocation4 + $0xa00] sm:$0xff] }
 0x199   : > { %3824 = vmatprep.subr.bf16.mxu0 %v8062_v21  ;;  %3910 = vmatprep.subr.bf16.mxu1 %v8064_v22  ;;  %v970_v21 = vld [vmem:[#allocation4 + $0xa40] sm:$0xff]  ;;  %v963_v22 = vld [vmem:[#allocation4 + $0xa08] sm:$0xff] }
 0x19a   : > { %v8174_v26 = vcombine.high %v962_v20, %v970_v21  ;;  %v8175_v33 = vcombine.low %v963_v22, %v971_v23 }
 0x19c   : > { %3825 = vmatpush1.bf16.msra.mxu0 %v8061_v27  ;;  %3911 = vmatpush1.bf16.msra.mxu1 %v8063_v28  ;;  %v8176_v27 = vcombine.high %v963_v22, %v971_v23  ;;  %v978_v28 = vld [vmem:[#allocation4 + $0xa80] sm:$0xff] }
 0x19d   : > { %3826 = vmatprep.subr.bf16.mxu0 %v8078_v29  ;;  %3912 = vmatprep.subr.bf16.mxu1 %v8080_v30  ;;  %v986_v29 = vld [vmem:[#allocation4 + $0xac0] sm:$0xff]  ;;  %v979_v30 = vld [vmem:[#allocation4 + $0xa88] sm:$0xff] }
 0x19e   : > { %v8190_v34 = vcombine.high %v978_v28, %v986_v29 }
 0x1a0   : > { %3827 = vmatpush1.bf16.msra.mxu0 %v8077_v31  ;;  %3913 = vmatpush1.bf16.msra.mxu1 %v8079_v32  ;;  %v987_v31 = vld [vmem:[#allocation4 + $0xac8] sm:$0xff]  ;;  %v8173_v32 = vcombine.low %v962_v20, %v970_v21 }
 0x1a1   : > { %3828 = vmatprep.subr.bf16.mxu0 %v8094_v36  ;;  %3914 = vmatprep.subr.bf16.mxu1 %v8096_v40  ;;  %v8192_v35 = vcombine.high %v979_v30, %v987_v31  ;;  %v994_v36 = vld [vmem:[#allocation4 + $0xb00] sm:$0xff]  ;;  %v8189_v40 = vcombine.low %v978_v28, %v986_v29  ;;  %v8191_v41 = vcombine.low %v979_v30, %v987_v31  ;;  %v1083_v20 = vld [vmem:[#allocation4 + $0xdc8] sm:$0xff] }
 0x1a2   : > { %v8206_v42 = vcombine.high %v994_v36, %v1002_v37  ;;  %v1099_v28 = vld [vmem:[#allocation4 + $0xe48] sm:$0xff] }
 0x1a4   : > { %3829 = vmatpush1.bf16.msra.mxu0 %v8093_v38  ;;  %3915 = vmatpush1.bf16.msra.mxu1 %v8095_v39  ;;  %v995_v38 = vld [vmem:[#allocation4 + $0xb08] sm:$0xff] }
 0x1a5   : > { %3841 = vmatprep.subr.bf16.mxu0 %v8110_v45  ;;  %3927 = vmatprep.subr.bf16.mxu1 %v8112_v49  ;;  %v1003_v39 = vld [vmem:[#allocation4 + $0xb48] sm:$0xff]  ;;  %v1010_v45 = vld [vmem:[#allocation4 + $0xb80] sm:$0xff]  ;;  %v8205_v49 = vcombine.low %v994_v36, %v1002_v37 }
 0x1a6   : > { %v8208_v44 = vcombine.high %v995_v38, %v1003_v39  ;;  %v1115_v36 = vld [vmem:[#allocation4 + $0xec8] sm:$0xff] }
 0x23a   : > { %v586_v50 = vpop.f32.mrb[0].mxu0  ;;  %v629_v51 = vpop.f32.mrb[0].mxu1 }
 0x23b   : > { %v588_v52 = vpop.f32.mrb[1].mxu0  ;;  %v631_v53 = vpop.f32.mrb[1].mxu1 }
 0x23c   : > { %v590_v54 = vpop.f32.mrb[2].mxu0  ;;  %v633_v55 = vpop.f32.mrb[2].mxu1 }
 0x23d   : > { %v9294_v57 = vpack.c.bf16 %v590_v54, %v586_v50  ;;  %v9296_v58 = vpack.c.bf16 %v633_v55, %v629_v51  ;;  %v592_v59 = vpop.f32.mrb[3].mxu0  ;;  %v635_v60 = vpop.f32.mrb[3].mxu1  ;;  %v8207_v50 = vcombine.low %v995_v38, %v1003_v39  ;;  %v8222_v51 = vcombine.high %v1010_v45, %v1018_v46  ;;  %v1034_v54 = vld [vmem:[#allocation4 + $0xc40] sm:$0xff]  ;;  %v1027_v55 = vld [vmem:[#allocation4 + $0xc08] sm:$0xff] }
 0x23e   : > { %v9298_v0 = vpack.c.bf16 %v592_v59, %v588_v52  ;;  %v9300_v1 = vpack.c.bf16 %v635_v60, %v631_v53  ;;  %v1026_v53 = vld [vmem:[#allocation4 + $0xc00] sm:$0xff]  ;;  %v8221_v59 = vcombine.low %v1010_v45, %v1018_v46  ;;  %v8240_v62 = vcombine.high %v1027_v55, %v1035_v56  ;;  %v1131_v45 = vld [vmem:[#allocation4 + $0xf48] sm:$0xff] }
 0x23f   : > { %v8238_v61 = vcombine.high %v1026_v53, %v1034_v54  ;;  %v8237_v5 = vcombine.low %v1026_v53, %v1034_v54  ;;  %v8239_v6 = vcombine.low %v1027_v55, %v1035_v56  ;;  %v1147_v53 = vld [vmem:[#allocation4 + $0xfc8] sm:$0xff] }
 0x240   : > { %3830 = vmatprep.mubr.bf16.mxu0 %v9298_v0  ;;  %3916 = vmatprep.mubr.bf16.mxu1 %v9298_v0 }
 0x241   : > { %3831 = vmatmul.mubr.bf16.vlgmr.msra.gmra.mrb[4].mxu0 %v9294_v57  ;;  %3917 = vmatmul.mubr.bf16.vlgmr.msra.gmra.mrb[4].mxu1 %v9294_v57 }
 0x242   : > { %3842 = vmatpush1.bf16.msra.mxu0 %v8109_v47  ;;  %3928 = vmatpush1.bf16.msra.mxu1 %v8111_v48  ;;  %v1011_v47 = vld [vmem:[#allocation4 + $0xb88] sm:$0xff] }
 0x243   : > { %3873 = vmatprep.mubr.bf16.mxu0 %v9300_v1  ;;  %3959 = vmatprep.mubr.bf16.mxu1 %v9300_v1  ;;  %v1019_v48 = vld [vmem:[#allocation4 + $0xbc8] sm:$0xff] }
 0x244   : > { %3843 = vmatprep.subr.bf16.mxu0 %v8126_v3  ;;  %3929 = vmatprep.subr.bf16.mxu1 %v8128_v4  ;;  %v8224_v52 = vcombine.high %v1011_v47, %v1019_v48  ;;  %v8223_v60 = vcombine.low %v1011_v47, %v1019_v48  ;;  %v1043_v3 = vld [vmem:[#allocation4 + $0xc88] sm:$0xff] }
 0x245   : > { %v1051_v4 = vld [vmem:[#allocation4 + $0xcc8] sm:$0xff] }
 0x246   : > { %3844 = vmatpush1.bf16.msra.mxu0 %v8125_v8  ;;  %3930 = vmatpush1.bf16.msra.mxu1 %v8127_v9  ;;  %v8256_v8 = vcombine.high %v1043_v3, %v1051_v4  ;;  %v1058_v9 = vld [vmem:[#allocation4 + $0xd00] sm:$0xff]  ;;  %v8255_v14 = vcombine.low %v1043_v3, %v1051_v4 }
 0x247   : > { %3845 = vmatprep.subr.bf16.mxu0 %v8142_v10  ;;  %3931 = vmatprep.subr.bf16.mxu1 %v8144_v11  ;;  %v1066_v10 = vld [vmem:[#allocation4 + $0xd40] sm:$0xff]  ;;  %v1059_v11 = vld [vmem:[#allocation4 + $0xd08] sm:$0xff] }
 0x248   : > { %v8270_v15 = vcombine.high %v1058_v9, %v1066_v10  ;;  %v8269_v21 = vcombine.low %v1058_v9, %v1066_v10  ;;  %v8271_v22 = vcombine.low %v1059_v11, %v1067_v12  ;;  %v669_v9 = vld [vmem:[#allocation4 + $0xd8] sm:$0xff] }
 0x24a   : > { %3846 = vmatpush1.bf16.msra.mxu0 %v8141_v16  ;;  %3932 = vmatpush1.bf16.msra.mxu1 %v8143_v17  ;;  %v8272_v16 = vcombine.high %v1059_v11, %v1067_v12  ;;  %v1074_v17 = vld [vmem:[#allocation4 + $0xd80] sm:$0xff] }
 0x24b   : > { %3847 = vmatprep.subr.bf16.mxu0 %v8158_v18  ;;  %3933 = vmatprep.subr.bf16.mxu1 %v8160_v19  ;;  %v1082_v18 = vld [vmem:[#allocation4 + $0xdc0] sm:$0xff]  ;;  %v1075_v19 = vld [vmem:[#allocation4 + $0xd88] sm:$0xff] }
 0x24c   : > { %v8286_v23 = vcombine.high %v1074_v17, %v1082_v18  ;;  %v8285_v29 = vcombine.low %v1074_v17, %v1082_v18  ;;  %v8287_v30 = vcombine.low %v1075_v19, %v1083_v20  ;;  %v685_v17 = vld [vmem:[#allocation4 + $0x158] sm:$0xff] }
 0x24e   : > { %3848 = vmatpush1.bf16.msra.mxu0 %v8157_v24  ;;  %3934 = vmatpush1.bf16.msra.mxu1 %v8159_v25  ;;  %v8288_v24 = vcombine.high %v1075_v19, %v1083_v20  ;;  %v1090_v25 = vld [vmem:[#allocation4 + $0xe00] sm:$0xff] }
 0x24f   : > { %3849 = vmatprep.subr.bf16.mxu0 %v8174_v26  ;;  %3935 = vmatprep.subr.bf16.mxu1 %v8176_v27  ;;  %v1098_v26 = vld [vmem:[#allocation4 + $0xe40] sm:$0xff]  ;;  %v1091_v27 = vld [vmem:[#allocation4 + $0xe08] sm:$0xff] }
 0x250   : > { %v8302_v31 = vcombine.high %v1090_v25, %v1098_v26  ;;  %v8301_v37 = vcombine.low %v1090_v25, %v1098_v26  ;;  %v8303_v38 = vcombine.low %v1091_v27, %v1099_v28  ;;  %v701_v25 = vld [vmem:[#allocation4 + $0x1d8] sm:$0xff] }
 0x252   : > { %3850 = vmatpush1.bf16.msra.mxu0 %v8173_v32  ;;  %3936 = vmatpush1.bf16.msra.mxu1 %v8175_v33  ;;  %v8304_v32 = vcombine.high %v1091_v27, %v1099_v28  ;;  %v1106_v33 = vld [vmem:[#allocation4 + $0xe80] sm:$0xff] }
 0x253   : > { %3851 = vmatprep.subr.bf16.mxu0 %v8190_v34  ;;  %3937 = vmatprep.subr.bf16.mxu1 %v8192_v35  ;;  %v1114_v34 = vld [vmem:[#allocation4 + $0xec0] sm:$0xff]  ;;  %v1107_v35 = vld [vmem:[#allocation4 + $0xe88] sm:$0xff] }
 0x254   : > { %v8318_v39 = vcombine.high %v1106_v33, %v1114_v34  ;;  %v8317_v46 = vcombine.low %v1106_v33, %v1114_v34  ;;  %v8319_v47 = vcombine.low %v1107_v35, %v1115_v36  ;;  %v717_v33 = vld [vmem:[#allocation4 + $0x258] sm:$0xff] }
 0x256   : > { %3852 = vmatpush1.bf16.msra.mxu0 %v8189_v40  ;;  %3938 = vmatpush1.bf16.msra.mxu1 %v8191_v41  ;;  %v8320_v40 = vcombine.high %v1107_v35, %v1115_v36  ;;  %v1122_v41 = vld [vmem:[#allocation4 + $0xf00] sm:$0xff] }
 0x257   : > { %3853 = vmatprep.subr.bf16.mxu0 %v8206_v42  ;;  %3939 = vmatprep.subr.bf16.mxu1 %v8208_v44  ;;  %v1130_v42 = vld [vmem:[#allocation4 + $0xf40] sm:$0xff]  ;;  %v1123_v44 = vld [vmem:[#allocation4 + $0xf08] sm:$0xff] }
 0x258   : > { %v8334_v48 = vcombine.high %v1122_v41, %v1130_v42  ;;  %v8333_v54 = vcombine.low %v1122_v41, %v1130_v42  ;;  %v8335_v55 = vcombine.low %v1123_v44, %v1131_v45  ;;  %v733_v41 = vld [vmem:[#allocation4 + $0x2d8] sm:$0xff] }
 0x25a   : > { %3854 = vmatpush1.bf16.msra.mxu0 %v8205_v49  ;;  %3940 = vmatpush1.bf16.msra.mxu1 %v8207_v50  ;;  %v8336_v49 = vcombine.high %v1123_v44, %v1131_v45  ;;  %v1138_v50 = vld [vmem:[#allocation4 + $0xf80] sm:$0xff] }
 0x25b   : > { %3855 = vmatprep.subr.bf16.mxu0 %v8222_v51  ;;  %3941 = vmatprep.subr.bf16.mxu1 %v8224_v52  ;;  %v1146_v51 = vld [vmem:[#allocation4 + $0xfc0] sm:$0xff]  ;;  %v1139_v52 = vld [vmem:[#allocation4 + $0xf88] sm:$0xff] }
 0x25c   : > { %v8350_v56 = vcombine.high %v1138_v50, %v1146_v51  ;;  %v8349_v2 = vcombine.low %v1138_v50, %v1146_v51  ;;  %v8351_v3 = vcombine.low %v1139_v52, %v1147_v53  ;;  %v749_v50 = vld [vmem:[#allocation4 + $0x358] sm:$0xff] }
 0x25e   : > { %3856 = vmatpush1.bf16.msra.mxu0 %v8221_v59  ;;  %3942 = vmatpush1.bf16.msra.mxu1 %v8223_v60  ;;  %v8352_v59 = vcombine.high %v1139_v52, %v1147_v53  ;;  %v644_v60 = vld [vmem:[#allocation4 + $0x10] sm:$0xff] }
 0x25f   : > { %3857 = vmatprep.subr.bf16.mxu0 %v8238_v61  ;;  %3943 = vmatprep.subr.bf16.mxu1 %v8240_v62  ;;  %v652_v61 = vld [vmem:[#allocation4 + $0x50] sm:$0xff]  ;;  %v645_v62 = vld [vmem:[#allocation4 + $0x18] sm:$0xff] }
 0x260   : > { %v7858_v4 = vcombine.high %v644_v60, %v652_v61  ;;  %v7857_v10 = vcombine.low %v644_v60, %v652_v61  ;;  %v7859_v11 = vcombine.low %v645_v62, %v653_v63  ;;  %v765_v60 = vld [vmem:[#allocation4 + $0x3d8] sm:$0xff] }
 0x262   : > { %3858 = vmatpush1.bf16.msra.mxu0 %v8237_v5  ;;  %3944 = vmatpush1.bf16.msra.mxu1 %v8239_v6  ;;  %v7860_v5 = vcombine.high %v645_v62, %v653_v63  ;;  %v660_v6 = vld [vmem:[#allocation4 + $0x90] sm:$0xff] }
 0x263   : > { %3859 = vmatprep.subr.bf16.mxu0 %v8254_v7  ;;  %3945 = vmatprep.subr.bf16.mxu1 %v8256_v8  ;;  %v668_v7 = vld [vmem:[#allocation4 + $0xd0] sm:$0xff]  ;;  %v661_v8 = vld [vmem:[#allocation4 + $0x98] sm:$0xff] }
 0x264   : > { %v7874_v12 = vcombine.high %v660_v6, %v668_v7  ;;  %v7873_v18 = vcombine.low %v660_v6, %v668_v7  ;;  %v7875_v19 = vcombine.low %v661_v8, %v669_v9  ;;  %v781_v6 = vld [vmem:[#allocation4 + $0x458] sm:$0xff] }
 0x266   : > { %3860 = vmatpush1.bf16.msra.mxu0 %v8253_v13  ;;  %3946 = vmatpush1.bf16.msra.mxu1 %v8255_v14  ;;  %v7876_v13 = vcombine.high %v661_v8, %v669_v9  ;;  %v676_v14 = vld [vmem:[#allocation4 + $0x110] sm:$0xff] }
 0x267   : > { %3861 = vmatprep.subr.bf16.mxu0 %v8270_v15  ;;  %3947 = vmatprep.subr.bf16.mxu1 %v8272_v16  ;;  %v684_v15 = vld [vmem:[#allocation4 + $0x150] sm:$0xff]  ;;  %v677_v16 = vld [vmem:[#allocation4 + $0x118] sm:$0xff] }
 0x268   : > { %v7890_v20 = vcombine.high %v676_v14, %v684_v15  ;;  %v7889_v26 = vcombine.low %v676_v14, %v684_v15  ;;  %v7891_v27 = vcombine.low %v677_v16, %v685_v17  ;;  %v797_v14 = vld [vmem:[#allocation4 + $0x4d8] sm:$0xff] }
 0x26a   : > { %3862 = vmatpush1.bf16.msra.mxu0 %v8269_v21  ;;  %3948 = vmatpush1.bf16.msra.mxu1 %v8271_v22  ;;  %v7892_v21 = vcombine.high %v677_v16, %v685_v17  ;;  %v692_v22 = vld [vmem:[#allocation4 + $0x190] sm:$0xff] }
 0x26b   : > { %3863 = vmatprep.subr.bf16.mxu0 %v8286_v23  ;;  %3949 = vmatprep.subr.bf16.mxu1 %v8288_v24  ;;  %v700_v23 = vld [vmem:[#allocation4 + $0x1d0] sm:$0xff]  ;;  %v693_v24 = vld [vmem:[#allocation4 + $0x198] sm:$0xff] }
 0x26c   : > { %v7906_v28 = vcombine.high %v692_v22, %v700_v23  ;;  %v7905_v34 = vcombine.low %v692_v22, %v700_v23  ;;  %v7907_v35 = vcombine.low %v693_v24, %v701_v25  ;;  %v813_v22 = vld [vmem:[#allocation4 + $0x558] sm:$0xff] }
 0x26e   : > { %3864 = vmatpush1.bf16.msra.mxu0 %v8285_v29  ;;  %3950 = vmatpush1.bf16.msra.mxu1 %v8287_v30  ;;  %v7908_v29 = vcombine.high %v693_v24, %v701_v25  ;;  %v708_v30 = vld [vmem:[#allocation4 + $0x210] sm:$0xff] }
 0x26f   : > { %3865 = vmatprep.subr.bf16.mxu0 %v8302_v31  ;;  %3951 = vmatprep.subr.bf16.mxu1 %v8304_v32  ;;  %v716_v31 = vld [vmem:[#allocation4 + $0x250] sm:$0xff]  ;;  %v709_v32 = vld [vmem:[#allocation4 + $0x218] sm:$0xff] }
 0x270   : > { %v7922_v36 = vcombine.high %v708_v30, %v716_v31  ;;  %v7921_v42 = vcombine.low %v708_v30, %v716_v31  ;;  %v7923_v44 = vcombine.low %v709_v32, %v717_v33  ;;  %v829_v30 = vld [vmem:[#allocation4 + $0x5d8] sm:$0xff] }
 0x272   : > { %3866 = vmatpush1.bf16.msra.mxu0 %v8301_v37  ;;  %3952 = vmatpush1.bf16.msra.mxu1 %v8303_v38  ;;  %v7924_v37 = vcombine.high %v709_v32, %v717_v33  ;;  %v724_v38 = vld [vmem:[#allocation4 + $0x290] sm:$0xff] }
 0x273   : > { %3867 = vmatprep.subr.bf16.mxu0 %v8318_v39  ;;  %3953 = vmatprep.subr.bf16.mxu1 %v8320_v40  ;;  %v732_v39 = vld [vmem:[#allocation4 + $0x2d0] sm:$0xff]  ;;  %v725_v40 = vld [vmem:[#allocation4 + $0x298] sm:$0xff] }
 0x274   : > { %v7938_v45 = vcombine.high %v724_v38, %v732_v39  ;;  %v7937_v51 = vcombine.low %v724_v38, %v732_v39  ;;  %v7939_v52 = vcombine.low %v725_v40, %v733_v41  ;;  %v845_v38 = vld [vmem:[#allocation4 + $0x658] sm:$0xff] }
 0x276   : > { %3868 = vmatpush1.bf16.msra.mxu0 %v8317_v46  ;;  %3954 = vmatpush1.bf16.msra.mxu1 %v8319_v47  ;;  %v7940_v46 = vcombine.high %v725_v40, %v733_v41  ;;  %v740_v47 = vld [vmem:[#allocation4 + $0x310] sm:$0xff] }
 0x277   : > { %3869 = vmatprep.subr.bf16.mxu0 %v8334_v48  ;;  %3955 = vmatprep.subr.bf16.mxu1 %v8336_v49  ;;  %v748_v48 = vld [vmem:[#allocation4 + $0x350] sm:$0xff]  ;;  %v741_v49 = vld [vmem:[#allocation4 + $0x318] sm:$0xff] }
 0x278   : > { %v7954_v53 = vcombine.high %v740_v47, %v748_v48  ;;  %v7953_v61 = vcombine.low %v740_v47, %v748_v48  ;;  %v7955_v62 = vcombine.low %v741_v49, %v749_v50  ;;  %v861_v47 = vld [vmem:[#allocation4 + $0x6d8] sm:$0xff] }
 0x27a   : > { %3870 = vmatpush1.bf16.msra.mxu0 %v8333_v54  ;;  %3956 = vmatpush1.bf16.msra.mxu1 %v8335_v55  ;;  %v7956_v54 = vcombine.high %v741_v49, %v749_v50  ;;  %v756_v55 = vld [vmem:[#allocation4 + $0x390] sm:$0xff] }
 0x27b   : > { %3871 = vmatprep.subr.bf16.mxu0 %v8350_v56  ;;  %3957 = vmatprep.subr.bf16.mxu1 %v8352_v59  ;;  %v764_v56 = vld [vmem:[#allocation4 + $0x3d0] sm:$0xff]  ;;  %v757_v59 = vld [vmem:[#allocation4 + $0x398] sm:$0xff] }
 0x27c   : > { %v7970_v63 = vcombine.high %v756_v55, %v764_v56  ;;  %v7969_v7 = vcombine.low %v756_v55, %v764_v56  ;;  %v7971_v8 = vcombine.low %v757_v59, %v765_v60  ;;  %v877_v55 = vld [vmem:[#allocation4 + $0x758] sm:$0xff] }
 0x27e   : > { %3872 = vmatpush1.bf16.msra.mxu0 %v8349_v2  ;;  %3958 = vmatpush1.bf16.msra.mxu1 %v8351_v3  ;;  %v7972_v2 = vcombine.high %v757_v59, %v765_v60  ;;  %v772_v3 = vld [vmem:[#allocation4 + $0x410] sm:$0xff] }
 0x27f   : > { %3970 = vmatprep.subr.bf16.mxu0 %v7858_v4  ;;  %4056 = vmatprep.subr.bf16.mxu1 %v7860_v5  ;;  %v780_v4 = vld [vmem:[#allocation4 + $0x450] sm:$0xff]  ;;  %v773_v5 = vld [vmem:[#allocation4 + $0x418] sm:$0xff] }
 0x280   : > { %v7986_v9 = vcombine.high %v772_v3, %v780_v4  ;;  %v7985_v15 = vcombine.low %v772_v3, %v780_v4  ;;  %v7987_v16 = vcombine.low %v773_v5, %v781_v6  ;;  %v893_v3 = vld [vmem:[#allocation4 + $0x7d8] sm:$0xff] }
 0x281   : > { %3874 = vmatmul.mubr.bf16.vlgmr.msra.gmra.mrb[4].mxu0 %v9296_v58  ;;  %3960 = vmatmul.mubr.bf16.vlgmr.msra.gmra.mrb[4].mxu1 %v9296_v58 }
 0x282   : > { %3971 = vmatpush1.bf16.msra.mxu0 %v7857_v10  ;;  %4002 = vmatprep.mubr.bf16.mxu0 %v9298_v0  ;;  %v7988_v10 = vcombine.high %v773_v5, %v781_v6 }
 0x283   : > { %4057 = vmatpush1.bf16.msra.mxu1 %v7859_v11  ;;  %4088 = vmatprep.mubr.bf16.mxu1 %v9298_v0  ;;  %v788_v11 = vld [vmem:[#allocation4 + $0x490] sm:$0xff] }
 0x284   : > { %3972 = vmatprep.subr.bf16.mxu0 %v7874_v12  ;;  %4058 = vmatprep.subr.bf16.mxu1 %v7876_v13  ;;  %v796_v12 = vld [vmem:[#allocation4 + $0x4d0] sm:$0xff]  ;;  %v789_v13 = vld [vmem:[#allocation4 + $0x498] sm:$0xff] }
 0x285   : > { %v8002_v17 = vcombine.high %v788_v11, %v796_v12  ;;  %v8001_v23 = vcombine.low %v788_v11, %v796_v12  ;;  %v8003_v24 = vcombine.low %v789_v13, %v797_v14  ;;  %v909_v11 = vld [vmem:[#allocation4 + $0x858] sm:$0xff] }
 0x286   : > { %3973 = vmatpush1.bf16.msra.mxu0 %v7873_v18  ;;  %v8004_v18 = vcombine.high %v789_v13, %v797_v14 }
 0x287   : > { %4059 = vmatpush1.bf16.msra.mxu1 %v7875_v19  ;;  %3974 = vmatprep.subr.bf16.mxu0 %v7890_v20  ;;  %v804_v19 = vld [vmem:[#allocation4 + $0x510] sm:$0xff] }
 0x288   : > { %4060 = vmatprep.subr.bf16.mxu1 %v7892_v21  ;;  %v812_v20 = vld [vmem:[#allocation4 + $0x550] sm:$0xff]  ;;  %v805_v21 = vld [vmem:[#allocation4 + $0x518] sm:$0xff] }
 0x289   : > { %v8018_v25 = vcombine.high %v804_v19, %v812_v20  ;;  %v8017_v31 = vcombine.low %v804_v19, %v812_v20  ;;  %v8019_v32 = vcombine.low %v805_v21, %v813_v22  ;;  %v917_v19 = vld [vmem:[#allocation4 + $0x898] sm:$0xff] }
 0x28a   : > { %3975 = vmatpush1.bf16.msra.mxu0 %v7889_v26  ;;  %v8020_v26 = vcombine.high %v805_v21, %v813_v22  ;;  %v925_v20 = vld [vmem:[#allocation4 + $0x8d8] sm:$0xff] }
 0x28b   : > { %4061 = vmatpush1.bf16.msra.mxu1 %v7891_v27  ;;  %3976 = vmatprep.subr.bf16.mxu0 %v7906_v28  ;;  %v820_v27 = vld [vmem:[#allocation4 + $0x590] sm:$0xff] }
 0x28c   : > { %4062 = vmatprep.subr.bf16.mxu1 %v7908_v29  ;;  %v828_v28 = vld [vmem:[#allocation4 + $0x5d0] sm:$0xff]  ;;  %v821_v29 = vld [vmem:[#allocation4 + $0x598] sm:$0xff] }
 0x28d   : > { %v8034_v33 = vcombine.high %v820_v27, %v828_v28  ;;  %v8033_v39 = vcombine.low %v820_v27, %v828_v28  ;;  %v8035_v40 = vcombine.low %v821_v29, %v829_v30  ;;  %v941_v27 = vld [vmem:[#allocation4 + $0x958] sm:$0xff] }
 0x28e   : > { %3977 = vmatpush1.bf16.msra.mxu0 %v7905_v34  ;;  %v8036_v34 = vcombine.high %v821_v29, %v829_v30  ;;  %v8131_v29 = vcombine.low %v917_v19, %v925_v20 }
 0x28f   : > { %4063 = vmatpush1.bf16.msra.mxu1 %v7907_v35  ;;  %3978 = vmatprep.subr.bf16.mxu0 %v7922_v36  ;;  %v836_v35 = vld [vmem:[#allocation4 + $0x610] sm:$0xff] }
 0x290   : > { %4064 = vmatprep.subr.bf16.mxu1 %v7924_v37  ;;  %v844_v36 = vld [vmem:[#allocation4 + $0x650] sm:$0xff]  ;;  %v837_v37 = vld [vmem:[#allocation4 + $0x618] sm:$0xff] }
 0x291   : > { %v8050_v41 = vcombine.high %v836_v35, %v844_v36  ;;  %v8049_v48 = vcombine.low %v836_v35, %v844_v36  ;;  %v8051_v49 = vcombine.low %v837_v37, %v845_v38  ;;  %v957_v35 = vld [vmem:[#allocation4 + $0x9d8] sm:$0xff] }
 0x292   : > { %3979 = vmatpush1.bf16.msra.mxu0 %v7921_v42  ;;  %v8052_v42 = vcombine.high %v837_v37, %v845_v38 }
 0x293   : > { %4065 = vmatpush1.bf16.msra.mxu1 %v7923_v44  ;;  %3980 = vmatprep.subr.bf16.mxu0 %v7938_v45  ;;  %v852_v44 = vld [vmem:[#allocation4 + $0x690] sm:$0xff] }
 0x294   : > { %4066 = vmatprep.subr.bf16.mxu1 %v7940_v46  ;;  %v860_v45 = vld [vmem:[#allocation4 + $0x6d0] sm:$0xff]  ;;  %v853_v46 = vld [vmem:[#allocation4 + $0x698] sm:$0xff] }
 0x295   : > { %v8066_v50 = vcombine.high %v852_v44, %v860_v45  ;;  %v8065_v56 = vcombine.low %v852_v44, %v860_v45  ;;  %v8067_v59 = vcombine.low %v853_v46, %v861_v47  ;;  %v973_v44 = vld [vmem:[#allocation4 + $0xa58] sm:$0xff] }
 0x296   : > { %3981 = vmatpush1.bf16.msra.mxu0 %v7937_v51  ;;  %v8068_v51 = vcombine.high %v853_v46, %v861_v47 }
 0x297   : > { %4067 = vmatpush1.bf16.msra.mxu1 %v7939_v52  ;;  %3982 = vmatprep.subr.bf16.mxu0 %v7954_v53  ;;  %v868_v52 = vld [vmem:[#allocation4 + $0x710] sm:$0xff] }
 0x298   : > { %4068 = vmatprep.subr.bf16.mxu1 %v7956_v54  ;;  %v876_v53 = vld [vmem:[#allocation4 + $0x750] sm:$0xff]  ;;  %v869_v54 = vld [vmem:[#allocation4 + $0x718] sm:$0xff] }
 0x299   : > { %v8082_v60 = vcombine.high %v868_v52, %v876_v53  ;;  %v8081_v4 = vcombine.low %v868_v52, %v876_v53  ;;  %v8083_v5 = vcombine.low %v869_v54, %v877_v55  ;;  %v989_v52 = vld [vmem:[#allocation4 + $0xad8] sm:$0xff] }
 0x29a   : > { %3983 = vmatpush1.bf16.msra.mxu0 %v7953_v61  ;;  %v8084_v61 = vcombine.high %v869_v54, %v877_v55 }
 0x29b   : > { %4069 = vmatpush1.bf16.msra.mxu1 %v7955_v62  ;;  %3984 = vmatprep.subr.bf16.mxu0 %v7970_v63  ;;  %v884_v62 = vld [vmem:[#allocation4 + $0x790] sm:$0xff] }
 0x29c   : > { %4070 = vmatprep.subr.bf16.mxu1 %v7972_v2  ;;  %v892_v63 = vld [vmem:[#allocation4 + $0x7d0] sm:$0xff]  ;;  %v885_v2 = vld [vmem:[#allocation4 + $0x798] sm:$0xff] }
 0x29d   : > { %v8098_v6 = vcombine.high %v884_v62, %v892_v63  ;;  %v8097_v12 = vcombine.low %v884_v62, %v892_v63  ;;  %v8099_v13 = vcombine.low %v885_v2, %v893_v3  ;;  %v1005_v62 = vld [vmem:[#allocation4 + $0xb58] sm:$0xff] }
 0x29e   : > { %3985 = vmatpush1.bf16.msra.mxu0 %v7969_v7  ;;  %v8100_v7 = vcombine.high %v885_v2, %v893_v3 }
 0x29f   : > { %4071 = vmatpush1.bf16.msra.mxu1 %v7971_v8  ;;  %3986 = vmatprep.subr.bf16.mxu0 %v7986_v9  ;;  %v900_v8 = vld [vmem:[#allocation4 + $0x810] sm:$0xff] }
 0x2a0   : > { %4072 = vmatprep.subr.bf16.mxu1 %v7988_v10  ;;  %v908_v9 = vld [vmem:[#allocation4 + $0x850] sm:$0xff]  ;;  %v901_v10 = vld [vmem:[#allocation4 + $0x818] sm:$0xff] }
 0x2a1   : > { %v8114_v14 = vcombine.high %v900_v8, %v908_v9  ;;  %v8115_v21 = vcombine.low %v901_v10, %v909_v11 }
 0x2a2   : > { %3987 = vmatpush1.bf16.msra.mxu0 %v7985_v15  ;;  %v8116_v15 = vcombine.high %v901_v10, %v909_v11 }
 0x2a3   : > { %4073 = vmatpush1.bf16.msra.mxu1 %v7987_v16  ;;  %3988 = vmatprep.subr.bf16.mxu0 %v8002_v17  ;;  %v916_v16 = vld [vmem:[#allocation4 + $0x890] sm:$0xff] }
 0x2a4   : > { %4074 = vmatprep.subr.bf16.mxu1 %v8004_v18  ;;  %v924_v17 = vld [vmem:[#allocation4 + $0x8d0] sm:$0xff]  ;;  %v8113_v18 = vcombine.low %v900_v8, %v908_v9  ;;  %v1021_v8 = vld [vmem:[#allocation4 + $0xbd8] sm:$0xff] }
 0x2a5   : > { %v8130_v22 = vcombine.high %v916_v16, %v924_v17  ;;  %v8129_v28 = vcombine.low %v916_v16, %v924_v17  ;;  %v1037_v16 = vld [vmem:[#allocation4 + $0xc58] sm:$0xff] }
 0x2a6   : > { %3989 = vmatpush1.bf16.msra.mxu0 %v8001_v23  ;;  %v932_v23 = vld [vmem:[#allocation4 + $0x910] sm:$0xff] }
 0x2a7   : > { %4075 = vmatpush1.bf16.msra.mxu1 %v8003_v24  ;;  %3990 = vmatprep.subr.bf16.mxu0 %v8018_v25  ;;  %v940_v24 = vld [vmem:[#allocation4 + $0x950] sm:$0xff]  ;;  %v8132_v25 = vcombine.high %v917_v19, %v925_v20 }
 0x2a8   : > { %4076 = vmatprep.subr.bf16.mxu1 %v8020_v26  ;;  %v933_v26 = vld [vmem:[#allocation4 + $0x918] sm:$0xff]  ;;  %v8146_v30 = vcombine.high %v932_v23, %v940_v24  ;;  %v8145_v36 = vcombine.low %v932_v23, %v940_v24 }
 0x2a9   : > { %v8147_v37 = vcombine.low %v933_v26, %v941_v27  ;;  %v1045_v23 = vld [vmem:[#allocation4 + $0xc98] sm:$0xff] }
 0x2aa   : > { %3991 = vmatpush1.bf16.msra.mxu0 %v8017_v31  ;;  %v8148_v31 = vcombine.high %v933_v26, %v941_v27  ;;  %v1053_v24 = vld [vmem:[#allocation4 + $0xcd8] sm:$0xff] }
 0x2ab   : > { %4077 = vmatpush1.bf16.msra.mxu1 %v8019_v32  ;;  %3992 = vmatprep.subr.bf16.mxu0 %v8034_v33  ;;  %v948_v32 = vld [vmem:[#allocation4 + $0x990] sm:$0xff] }
 0x2ac   : > { %4078 = vmatprep.subr.bf16.mxu1 %v8036_v34  ;;  %v956_v33 = vld [vmem:[#allocation4 + $0x9d0] sm:$0xff]  ;;  %v949_v34 = vld [vmem:[#allocation4 + $0x998] sm:$0xff] }
 0x2ad   : > { %v8162_v38 = vcombine.high %v948_v32, %v956_v33  ;;  %v8161_v45 = vcombine.low %v948_v32, %v956_v33  ;;  %v8163_v46 = vcombine.low %v949_v34, %v957_v35  ;;  %v1069_v32 = vld [vmem:[#allocation4 + $0xd58] sm:$0xff] }
 0x2ae   : > { %3993 = vmatpush1.bf16.msra.mxu0 %v8033_v39  ;;  %v8164_v39 = vcombine.high %v949_v34, %v957_v35  ;;  %v8259_v34 = vcombine.low %v1045_v23, %v1053_v24 }
 0x2af   : > { %4079 = vmatpush1.bf16.msra.mxu1 %v8035_v40  ;;  %3994 = vmatprep.subr.bf16.mxu0 %v8050_v41  ;;  %v964_v40 = vld [vmem:[#allocation4 + $0xa10] sm:$0xff] }
 0x2b0   : > { %4080 = vmatprep.subr.bf16.mxu1 %v8052_v42  ;;  %v972_v41 = vld [vmem:[#allocation4 + $0xa50] sm:$0xff]  ;;  %v965_v42 = vld [vmem:[#allocation4 + $0xa18] sm:$0xff] }
 0x2b1   : > { %v8178_v47 = vcombine.high %v964_v40, %v972_v41  ;;  %v8177_v53 = vcombine.low %v964_v40, %v972_v41  ;;  %v8179_v54 = vcombine.low %v965_v42, %v973_v44  ;;  %v1085_v40 = vld [vmem:[#allocation4 + $0xdd8] sm:$0xff] }
 0x2b2   : > { %3995 = vmatpush1.bf16.msra.mxu0 %v8049_v48  ;;  %v8180_v48 = vcombine.high %v965_v42, %v973_v44 }
 0x2b3   : > { %4081 = vmatpush1.bf16.msra.mxu1 %v8051_v49  ;;  %3996 = vmatprep.subr.bf16.mxu0 %v8066_v50  ;;  %v980_v49 = vld [vmem:[#allocation4 + $0xa90] sm:$0xff] }
 0x2b4   : > { %4082 = vmatprep.subr.bf16.mxu1 %v8068_v51  ;;  %v988_v50 = vld [vmem:[#allocation4 + $0xad0] sm:$0xff]  ;;  %v981_v51 = vld [vmem:[#allocation4 + $0xa98] sm:$0xff] }
 0x2b5   : > { %v8194_v55 = vcombine.high %v980_v49, %v988_v50  ;;  %v8193_v63 = vcombine.low %v980_v49, %v988_v50  ;;  %v8195_v2 = vcombine.low %v981_v51, %v989_v52  ;;  %v1101_v49 = vld [vmem:[#allocation4 + $0xe58] sm:$0xff] }
 0x2b6   : > { %3997 = vmatpush1.bf16.msra.mxu0 %v8065_v56  ;;  %v8196_v56 = vcombine.high %v981_v51, %v989_v52 }
 0x2b7   : > { %4083 = vmatpush1.bf16.msra.mxu1 %v8067_v59  ;;  %3998 = vmatprep.subr.bf16.mxu0 %v8082_v60  ;;  %v996_v59 = vld [vmem:[#allocation4 + $0xb10] sm:$0xff] }
 0x2b8   : > { %4084 = vmatprep.subr.bf16.mxu1 %v8084_v61  ;;  %v1004_v60 = vld [vmem:[#allocation4 + $0xb50] sm:$0xff]  ;;  %v997_v61 = vld [vmem:[#allocation4 + $0xb18] sm:$0xff] }
 0x2b9   : > { %v8210_v3 = vcombine.high %v996_v59, %v1004_v60  ;;  %v8209_v9 = vcombine.low %v996_v59, %v1004_v60  ;;  %v8211_v10 = vcombine.low %v997_v61, %v1005_v62  ;;  %v1117_v59 = vld [vmem:[#allocation4 + $0xed8] sm:$0xff] }
 0x2ba   : > { %3999 = vmatpush1.bf16.msra.mxu0 %v8081_v4  ;;  %v8212_v4 = vcombine.high %v997_v61, %v1005_v62 }
 0x2bb   : > { %4085 = vmatpush1.bf16.msra.mxu1 %v8083_v5  ;;  %4000 = vmatprep.subr.bf16.mxu0 %v8098_v6  ;;  %v1012_v5 = vld [vmem:[#allocation4 + $0xb90] sm:$0xff] }
 0x2bc   : > { %4086 = vmatprep.subr.bf16.mxu1 %v8100_v7  ;;  %v1020_v6 = vld [vmem:[#allocation4 + $0xbd0] sm:$0xff]  ;;  %v1013_v7 = vld [vmem:[#allocation4 + $0xb98] sm:$0xff] }
 0x2bd   : > { %v8226_v11 = vcombine.high %v1012_v5, %v1020_v6  ;;  %v8225_v17 = vcombine.low %v1012_v5, %v1020_v6  ;;  %v1133_v5 = vld [vmem:[#allocation4 + $0xf58] sm:$0xff] }
 0x2be   : > { %4001 = vmatpush1.bf16.msra.mxu0 %v8097_v12  ;;  %v8228_v12 = vcombine.high %v1013_v7, %v1021_v8 }
 0x2bf   : > { %4087 = vmatpush1.bf16.msra.mxu1 %v8099_v13  ;;  %4013 = vmatprep.subr.bf16.mxu0 %v8114_v14  ;;  %v1028_v13 = vld [vmem:[#allocation4 + $0xc10] sm:$0xff] }
 0x2c0   : > { %4099 = vmatprep.subr.bf16.mxu1 %v8116_v15  ;;  %v1036_v14 = vld [vmem:[#allocation4 + $0xc50] sm:$0xff]  ;;  %v1029_v15 = vld [vmem:[#allocation4 + $0xc18] sm:$0xff] }
 0x2c1   : > { %4003 = vmatmul.mubr.bf16.vlgmr.msra.gmra.mrb[8].mxu0 %v9294_v57  ;;  %v8242_v19 = vcombine.high %v1028_v13, %v1036_v14  ;;  %v8244_v20 = vcombine.high %v1029_v15, %v1037_v16  ;;  %v8243_v26 = vcombine.low %v1029_v15, %v1037_v16 }
 0x2c2   : > { %4089 = vmatmul.mubr.bf16.vlgmr.msra.gmra.mrb[8].mxu1 %v9294_v57  ;;  %4014 = vmatpush1.bf16.msra.mxu0 %v8113_v18  ;;  %v8227_v18 = vcombine.low %v1013_v7, %v1021_v8 }
 0x2c3   : > { %4045 = vmatprep.mubr.bf16.mxu0 %v9300_v1  ;;  %4100 = vmatpush1.bf16.msra.mxu1 %v8115_v21  ;;  %v1044_v21 = vld [vmem:[#allocation4 + $0xc90] sm:$0xff] }
 0x2c4   : > { %4131 = vmatprep.mubr.bf16.mxu1 %v9300_v1  ;;  %4015 = vmatprep.subr.bf16.mxu0 %v8130_v22  ;;  %v1052_v22 = vld [vmem:[#allocation4 + $0xcd0] sm:$0xff] }
 0x2c5   : > { %4101 = vmatprep.subr.bf16.mxu1 %v8132_v25  ;;  %v8241_v25 = vcombine.low %v1028_v13, %v1036_v14  ;;  %v8258_v27 = vcombine.high %v1044_v21, %v1052_v22  ;;  %v8257_v33 = vcombine.low %v1044_v21, %v1052_v22  ;;  %v1149_v13 = vld [vmem:[#allocation4 + $0xfd8] sm:$0xff]  ;;  %v655_v21 = vld [vmem:[#allocation4 + $0x68] sm:$0xff] }
 0x2c6   : > { %4016 = vmatpush1.bf16.msra.mxu0 %v8129_v28  ;;  %v8260_v28 = vcombine.high %v1045_v23, %v1053_v24 }
 0x2c7   : > { %4102 = vmatpush1.bf16.msra.mxu1 %v8131_v29  ;;  %4017 = vmatprep.subr.bf16.mxu0 %v8146_v30  ;;  %v1060_v29 = vld [vmem:[#allocation4 + $0xd10] sm:$0xff] }
 0x2c8   : > { %4103 = vmatprep.subr.bf16.mxu1 %v8148_v31  ;;  %v1068_v30 = vld [vmem:[#allocation4 + $0xd50] sm:$0xff]  ;;  %v1061_v31 = vld [vmem:[#allocation4 + $0xd18] sm:$0xff] }
 0x2c9   : > { %v8274_v35 = vcombine.high %v1060_v29, %v1068_v30  ;;  %v8273_v41 = vcombine.low %v1060_v29, %v1068_v30  ;;  %v8275_v42 = vcombine.low %v1061_v31, %v1069_v32  ;;  %v663_v29 = vld [vmem:[#allocation4 + $0xa8] sm:$0xff] }
 0x2ca   : > { %4018 = vmatpush1.bf16.msra.mxu0 %v8145_v36  ;;  %v8276_v36 = vcombine.high %v1061_v31, %v1069_v32  ;;  %v671_v30 = vld [vmem:[#allocation4 + $0xe8] sm:$0xff] }
 0x2cb   : > { %4104 = vmatpush1.bf16.msra.mxu1 %v8147_v37  ;;  %4019 = vmatprep.subr.bf16.mxu0 %v8162_v38  ;;  %v1076_v37 = vld [vmem:[#allocation4 + $0xd90] sm:$0xff] }
 0x2cc   : > { %4105 = vmatprep.subr.bf16.mxu1 %v8164_v39  ;;  %v1084_v38 = vld [vmem:[#allocation4 + $0xdd0] sm:$0xff]  ;;  %v1077_v39 = vld [vmem:[#allocation4 + $0xd98] sm:$0xff] }
 0x2cd   : > { %v8290_v44 = vcombine.high %v1076_v37, %v1084_v38  ;;  %v8289_v50 = vcombine.low %v1076_v37, %v1084_v38  ;;  %v8291_v51 = vcombine.low %v1077_v39, %v1085_v40  ;;  %v687_v37 = vld [vmem:[#allocation4 + $0x168] sm:$0xff] }
 0x2ce   : > { %4020 = vmatpush1.bf16.msra.mxu0 %v8161_v45  ;;  %v8292_v45 = vcombine.high %v1077_v39, %v1085_v40  ;;  %v7879_v39 = vcombine.low %v663_v29, %v671_v30 }
 0x2cf   : > { %4106 = vmatpush1.bf16.msra.mxu1 %v8163_v46  ;;  %4021 = vmatprep.subr.bf16.mxu0 %v8178_v47  ;;  %v1092_v46 = vld [vmem:[#allocation4 + $0xe10] sm:$0xff] }
 0x2d0   : > { %4107 = vmatprep.subr.bf16.mxu1 %v8180_v48  ;;  %v1100_v47 = vld [vmem:[#allocation4 + $0xe50] sm:$0xff]  ;;  %v1093_v48 = vld [vmem:[#allocation4 + $0xe18] sm:$0xff] }
 0x2d1   : > { %v8306_v52 = vcombine.high %v1092_v46, %v1100_v47  ;;  %v8305_v60 = vcombine.low %v1092_v46, %v1100_v47  ;;  %v8307_v61 = vcombine.low %v1093_v48, %v1101_v49  ;;  %v703_v46 = vld [vmem:[#allocation4 + $0x1e8] sm:$0xff] }
 0x2d2   : > { %4022 = vmatpush1.bf16.msra.mxu0 %v8177_v53  ;;  %v8308_v53 = vcombine.high %v1093_v48, %v1101_v49 }
 0x2d3   : > { %4108 = vmatpush1.bf16.msra.mxu1 %v8179_v54  ;;  %4023 = vmatprep.subr.bf16.mxu0 %v8194_v55  ;;  %v1108_v54 = vld [vmem:[#allocation4 + $0xe90] sm:$0xff] }
 0x2d4   : > { %4109 = vmatprep.subr.bf16.mxu1 %v8196_v56  ;;  %v1116_v55 = vld [vmem:[#allocation4 + $0xed0] sm:$0xff]  ;;  %v1109_v56 = vld [vmem:[#allocation4 + $0xe98] sm:$0xff] }
 0x2d5   : > { %v8322_v62 = vcombine.high %v1108_v54, %v1116_v55  ;;  %v8321_v6 = vcombine.low %v1108_v54, %v1116_v55  ;;  %v8323_v7 = vcombine.low %v1109_v56, %v1117_v59  ;;  %v719_v54 = vld [vmem:[#allocation4 + $0x268] sm:$0xff] }
 0x2d6   : > { %4024 = vmatpush1.bf16.msra.mxu0 %v8193_v63  ;;  %v8324_v63 = vcombine.high %v1109_v56, %v1117_v59 }
 0x2d7   : > { %4110 = vmatpush1.bf16.msra.mxu1 %v8195_v2  ;;  %4025 = vmatprep.subr.bf16.mxu0 %v8210_v3  ;;  %v1124_v2 = vld [vmem:[#allocation4 + $0xf10] sm:$0xff] }
 0x2d8   : > { %4111 = vmatprep.subr.bf16.mxu1 %v8212_v4  ;;  %v1132_v3 = vld [vmem:[#allocation4 + $0xf50] sm:$0xff]  ;;  %v1125_v4 = vld [vmem:[#allocation4 + $0xf18] sm:$0xff] }
 0x2d9   : > { %v8338_v8 = vcombine.high %v1124_v2, %v1132_v3  ;;  %v8337_v14 = vcombine.low %v1124_v2, %v1132_v3  ;;  %v8339_v15 = vcombine.low %v1125_v4, %v1133_v5  ;;  %v735_v2 = vld [vmem:[#allocation4 + $0x2e8] sm:$0xff] }
 0x2da   : > { %4026 = vmatpush1.bf16.msra.mxu0 %v8209_v9  ;;  %v8340_v9 = vcombine.high %v1125_v4, %v1133_v5 }
 0x2db   : > { %4112 = vmatpush1.bf16.msra.mxu1 %v8211_v10  ;;  %4027 = vmatprep.subr.bf16.mxu0 %v8226_v11  ;;  %v1140_v10 = vld [vmem:[#allocation4 + $0xf90] sm:$0xff] }
 0x2dc   : > { %4113 = vmatprep.subr.bf16.mxu1 %v8228_v12  ;;  %v1148_v11 = vld [vmem:[#allocation4 + $0xfd0] sm:$0xff]  ;;  %v1141_v12 = vld [vmem:[#allocation4 + $0xf98] sm:$0xff] }
 0x2dd   : > { %v8354_v16 = vcombine.high %v1140_v10, %v1148_v11  ;;  %v8353_v22 = vcombine.low %v1140_v10, %v1148_v11  ;;  %v8355_v23 = vcombine.low %v1141_v12, %v1149_v13  ;;  %v751_v10 = vld [vmem:[#allocation4 + $0x368] sm:$0xff] }
 0x2de   : > { %4028 = vmatpush1.bf16.msra.mxu0 %v8225_v17  ;;  %v8356_v17 = vcombine.high %v1141_v12, %v1149_v13 }
 0x2df   : > { %4114 = vmatpush1.bf16.msra.mxu1 %v8227_v18  ;;  %4029 = vmatprep.subr.bf16.mxu0 %v8242_v19  ;;  %v646_v18 = vld [vmem:[#allocation4 + $0x20] sm:$0xff] }
 0x2e0   : > { %4115 = vmatprep.subr.bf16.mxu1 %v8244_v20  ;;  %v654_v19 = vld [vmem:[#allocation4 + $0x60] sm:$0xff]  ;;  %v647_v20 = vld [vmem:[#allocation4 + $0x28] sm:$0xff] }
 0x2e1   : > { %v7862_v24 = vcombine.high %v646_v18, %v654_v19  ;;  %v7863_v31 = vcombine.low %v647_v20, %v655_v21 }
 0x2e2   : > { %4030 = vmatpush1.bf16.msra.mxu0 %v8241_v25  ;;  %v7864_v25 = vcombine.high %v647_v20, %v655_v21 }
 0x2e3   : > { %4116 = vmatpush1.bf16.msra.mxu1 %v8243_v26  ;;  %4031 = vmatprep.subr.bf16.mxu0 %v8258_v27  ;;  %v662_v26 = vld [vmem:[#allocation4 + $0xa0] sm:$0xff] }
 0x2e4   : > { %4117 = vmatprep.subr.bf16.mxu1 %v8260_v28  ;;  %v670_v27 = vld [vmem:[#allocation4 + $0xe0] sm:$0xff]  ;;  %v7861_v28 = vcombine.low %v646_v18, %v654_v19  ;;  %v767_v18 = vld [vmem:[#allocation4 + $0x3e8] sm:$0xff] }
 0x2e5   : > { %v7878_v32 = vcombine.high %v662_v26, %v670_v27  ;;  %v7877_v38 = vcombine.low %v662_v26, %v670_v27  ;;  %v783_v26 = vld [vmem:[#allocation4 + $0x468] sm:$0xff] }
 0x2e6   : > { %4032 = vmatpush1.bf16.msra.mxu0 %v8257_v33  ;;  %v678_v33 = vld [vmem:[#allocation4 + $0x120] sm:$0xff] }
 0x2e7   : > { %4118 = vmatpush1.bf16.msra.mxu1 %v8259_v34  ;;  %4033 = vmatprep.subr.bf16.mxu0 %v8274_v35  ;;  %v686_v34 = vld [vmem:[#allocation4 + $0x160] sm:$0xff]  ;;  %v7880_v35 = vcombine.high %v663_v29, %v671_v30 }
 0x2e8   : > { %4119 = vmatprep.subr.bf16.mxu1 %v8276_v36  ;;  %v679_v36 = vld [vmem:[#allocation4 + $0x128] sm:$0xff]  ;;  %v7894_v40 = vcombine.high %v678_v33, %v686_v34  ;;  %v7893_v47 = vcombine.low %v678_v33, %v686_v34 }
 0x2e9   : > { %v7895_v48 = vcombine.low %v679_v36, %v687_v37  ;;  %v791_v33 = vld [vmem:[#allocation4 + $0x4a8] sm:$0xff] }
 0x2ea   : > { %4034 = vmatpush1.bf16.msra.mxu0 %v8273_v41  ;;  %v7896_v41 = vcombine.high %v679_v36, %v687_v37  ;;  %v799_v34 = vld [vmem:[#allocation4 + $0x4e8] sm:$0xff] }
 0x2eb   : > { %4120 = vmatpush1.bf16.msra.mxu1 %v8275_v42  ;;  %4035 = vmatprep.subr.bf16.mxu0 %v8290_v44  ;;  %v694_v42 = vld [vmem:[#allocation4 + $0x1a0] sm:$0xff] }
 0x2ec   : > { %4121 = vmatprep.subr.bf16.mxu1 %v8292_v45  ;;  %v702_v44 = vld [vmem:[#allocation4 + $0x1e0] sm:$0xff]  ;;  %v695_v45 = vld [vmem:[#allocation4 + $0x1a8] sm:$0xff] }
 0x2ed   : > { %v7910_v49 = vcombine.high %v694_v42, %v702_v44  ;;  %v7909_v55 = vcombine.low %v694_v42, %v702_v44  ;;  %v7911_v56 = vcombine.low %v695_v45, %v703_v46  ;;  %v815_v42 = vld [vmem:[#allocation4 + $0x568] sm:$0xff] }
 0x2ee   : > { %4036 = vmatpush1.bf16.msra.mxu0 %v8289_v50  ;;  %v7912_v50 = vcombine.high %v695_v45, %v703_v46  ;;  %v8007_v45 = vcombine.low %v791_v33, %v799_v34 }
 0x2ef   : > { %4122 = vmatpush1.bf16.msra.mxu1 %v8291_v51  ;;  %4037 = vmatprep.subr.bf16.mxu0 %v8306_v52  ;;  %v710_v51 = vld [vmem:[#allocation4 + $0x220] sm:$0xff] }
 0x2f0   : > { %4123 = vmatprep.subr.bf16.mxu1 %v8308_v53  ;;  %v718_v52 = vld [vmem:[#allocation4 + $0x260] sm:$0xff]  ;;  %v711_v53 = vld [vmem:[#allocation4 + $0x228] sm:$0xff] }
 0x2f1   : > { %v7926_v59 = vcombine.high %v710_v51, %v718_v52  ;;  %v7925_v3 = vcombine.low %v710_v51, %v718_v52  ;;  %v7927_v4 = vcombine.low %v711_v53, %v719_v54  ;;  %v831_v51 = vld [vmem:[#allocation4 + $0x5e8] sm:$0xff] }
 0x2f2   : > { %4038 = vmatpush1.bf16.msra.mxu0 %v8305_v60  ;;  %v7928_v60 = vcombine.high %v711_v53, %v719_v54 }
 0x2f3   : > { %4124 = vmatpush1.bf16.msra.mxu1 %v8307_v61  ;;  %4039 = vmatprep.subr.bf16.mxu0 %v8322_v62  ;;  %v726_v61 = vld [vmem:[#allocation4 + $0x2a0] sm:$0xff] }
 0x2f4   : > { %4125 = vmatprep.subr.bf16.mxu1 %v8324_v63  ;;  %v734_v62 = vld [vmem:[#allocation4 + $0x2e0] sm:$0xff]  ;;  %v727_v63 = vld [vmem:[#allocation4 + $0x2a8] sm:$0xff] }
 0x2f5   : > { %v7942_v5 = vcombine.high %v726_v61, %v734_v62  ;;  %v7941_v11 = vcombine.low %v726_v61, %v734_v62  ;;  %v7943_v12 = vcombine.low %v727_v63, %v735_v2  ;;  %v847_v61 = vld [vmem:[#allocation4 + $0x668] sm:$0xff] }
 0x2f6   : > { %4040 = vmatpush1.bf16.msra.mxu0 %v8321_v6  ;;  %v7944_v6 = vcombine.high %v727_v63, %v735_v2 }
 0x2f7   : > { %4126 = vmatpush1.bf16.msra.mxu1 %v8323_v7  ;;  %4041 = vmatprep.subr.bf16.mxu0 %v8338_v8  ;;  %v742_v7 = vld [vmem:[#allocation4 + $0x320] sm:$0xff] }
 0x2f8   : > { %4127 = vmatprep.subr.bf16.mxu1 %v8340_v9  ;;  %v750_v8 = vld [vmem:[#allocation4 + $0x360] sm:$0xff]  ;;  %v743_v9 = vld [vmem:[#allocation4 + $0x328] sm:$0xff] }
 0x2f9   : > { %v7958_v13 = vcombine.high %v742_v7, %v750_v8  ;;  %v7957_v19 = vcombine.low %v742_v7, %v750_v8  ;;  %v7959_v20 = vcombine.low %v743_v9, %v751_v10  ;;  %v863_v7 = vld [vmem:[#allocation4 + $0x6e8] sm:$0xff] }
 0x2fa   : > { %4042 = vmatpush1.bf16.msra.mxu0 %v8337_v14  ;;  %v7960_v14 = vcombine.high %v743_v9, %v751_v10 }
 0x2fb   : > { %4128 = vmatpush1.bf16.msra.mxu1 %v8339_v15  ;;  %4043 = vmatprep.subr.bf16.mxu0 %v8354_v16  ;;  %v758_v15 = vld [vmem:[#allocation4 + $0x3a0] sm:$0xff] }
 0x2fc   : > { %4129 = vmatprep.subr.bf16.mxu1 %v8356_v17  ;;  %v766_v16 = vld [vmem:[#allocation4 + $0x3e0] sm:$0xff]  ;;  %v759_v17 = vld [vmem:[#allocation4 + $0x3a8] sm:$0xff] }
 0x2fd   : > { %v7974_v21 = vcombine.high %v758_v15, %v766_v16  ;;  %v7973_v27 = vcombine.low %v758_v15, %v766_v16  ;;  %v879_v15 = vld [vmem:[#allocation4 + $0x768] sm:$0xff] }
 0x2fe   : > { %4044 = vmatpush1.bf16.msra.mxu0 %v8353_v22  ;;  %v7976_v22 = vcombine.high %v759_v17, %v767_v18 }
 0x2ff   : > { %4130 = vmatpush1.bf16.msra.mxu1 %v8355_v23  ;;  %4142 = vmatprep.subr.bf16.mxu0 %v7862_v24  ;;  %v774_v23 = vld [vmem:[#allocation4 + $0x420] sm:$0xff] }
 0x300   : > { %4228 = vmatprep.subr.bf16.mxu1 %v7864_v25  ;;  %v782_v24 = vld [vmem:[#allocation4 + $0x460] sm:$0xff]  ;;  %v775_v25 = vld [vmem:[#allocation4 + $0x428] sm:$0xff] }
 0x301   : > { %4046 = vmatmul.mubr.bf16.vlgmr.msra.gmra.mrb[8].mxu0 %v9296_v58  ;;  %v7990_v29 = vcombine.high %v774_v23, %v782_v24  ;;  %v7992_v30 = vcombine.high %v775_v25, %v783_v26  ;;  %v7991_v36 = vcombine.low %v775_v25, %v783_v26 }
 0x302   : > { %4132 = vmatmul.mubr.bf16.vlgmr.msra.gmra.mrb[8].mxu1 %v9296_v58  ;;  %4143 = vmatpush1.bf16.msra.mxu0 %v7861_v28  ;;  %v7975_v28 = vcombine.low %v759_v17, %v767_v18 }
 0x303   : > { %4174 = vmatprep.mubr.bf16.mxu0 %v9298_v0  ;;  %4229 = vmatpush1.bf16.msra.mxu1 %v7863_v31  ;;  %v790_v31 = vld [vmem:[#allocation4 + $0x4a0] sm:$0xff] }
 0x304   : > { %4260 = vmatprep.mubr.bf16.mxu1 %v9298_v0  ;;  %4144 = vmatprep.subr.bf16.mxu0 %v7878_v32  ;;  %v798_v32 = vld [vmem:[#allocation4 + $0x4e0] sm:$0xff] }
 0x305   : > { %4230 = vmatprep.subr.bf16.mxu1 %v7880_v35  ;;  %v7989_v35 = vcombine.low %v774_v23, %v782_v24  ;;  %v8006_v37 = vcombine.high %v790_v31, %v798_v32  ;;  %v8005_v44 = vcombine.low %v790_v31, %v798_v32  ;;  %v895_v23 = vld [vmem:[#allocation4 + $0x7e8] sm:$0xff] }
 0x306   : > { %4145 = vmatpush1.bf16.msra.mxu0 %v7877_v38  ;;  %v8008_v38 = vcombine.high %v791_v33, %v799_v34  ;;  %v911_v31 = vld [vmem:[#allocation4 + $0x868] sm:$0xff] }
 0x307   : > { %4231 = vmatpush1.bf16.msra.mxu1 %v7879_v39  ;;  %4146 = vmatprep.subr.bf16.mxu0 %v7894_v40  ;;  %v806_v39 = vld [vmem:[#allocation4 + $0x520] sm:$0xff] }
 0x308   : > { %4232 = vmatprep.subr.bf16.mxu1 %v7896_v41  ;;  %v814_v40 = vld [vmem:[#allocation4 + $0x560] sm:$0xff]  ;;  %v807_v41 = vld [vmem:[#allocation4 + $0x528] sm:$0xff] }
 0x309   : > { %v8022_v46 = vcombine.high %v806_v39, %v814_v40  ;;  %v8021_v52 = vcombine.low %v806_v39, %v814_v40  ;;  %v8023_v53 = vcombine.low %v807_v41, %v815_v42  ;;  %v919_v39 = vld [vmem:[#allocation4 + $0x8a8] sm:$0xff] }
 0x30a   : > { %4147 = vmatpush1.bf16.msra.mxu0 %v7893_v47  ;;  %v8024_v47 = vcombine.high %v807_v41, %v815_v42  ;;  %v927_v40 = vld [vmem:[#allocation4 + $0x8e8] sm:$0xff] }
 0x30b   : > { %4233 = vmatpush1.bf16.msra.mxu1 %v7895_v48  ;;  %4148 = vmatprep.subr.bf16.mxu0 %v7910_v49  ;;  %v822_v48 = vld [vmem:[#allocation4 + $0x5a0] sm:$0xff] }
 0x30c   : > { %4234 = vmatprep.subr.bf16.mxu1 %v7912_v50  ;;  %v830_v49 = vld [vmem:[#allocation4 + $0x5e0] sm:$0xff]  ;;  %v823_v50 = vld [vmem:[#allocation4 + $0x5a8] sm:$0xff] }
 0x30d   : > { %v8038_v54 = vcombine.high %v822_v48, %v830_v49  ;;  %v8037_v62 = vcombine.low %v822_v48, %v830_v49  ;;  %v8039_v63 = vcombine.low %v823_v50, %v831_v51  ;;  %v943_v48 = vld [vmem:[#allocation4 + $0x968] sm:$0xff] }
 0x30e   : > { %4149 = vmatpush1.bf16.msra.mxu0 %v7909_v55  ;;  %v8040_v55 = vcombine.high %v823_v50, %v831_v51  ;;  %v8135_v50 = vcombine.low %v919_v39, %v927_v40 }
 0x30f   : > { %4235 = vmatpush1.bf16.msra.mxu1 %v7911_v56  ;;  %4150 = vmatprep.subr.bf16.mxu0 %v7926_v59  ;;  %v838_v56 = vld [vmem:[#allocation4 + $0x620] sm:$0xff] }
 0x310   : > { %4236 = vmatprep.subr.bf16.mxu1 %v7928_v60  ;;  %v846_v59 = vld [vmem:[#allocation4 + $0x660] sm:$0xff]  ;;  %v839_v60 = vld [vmem:[#allocation4 + $0x628] sm:$0xff] }
 0x311   : > { %v8054_v2 = vcombine.high %v838_v56, %v846_v59  ;;  %v8053_v8 = vcombine.low %v838_v56, %v846_v59  ;;  %v8055_v9 = vcombine.low %v839_v60, %v847_v61  ;;  %v959_v56 = vld [vmem:[#allocation4 + $0x9e8] sm:$0xff] }
 0x312   : > { %4151 = vmatpush1.bf16.msra.mxu0 %v7925_v3  ;;  %v8056_v3 = vcombine.high %v839_v60, %v847_v61 }
 0x313   : > { %4237 = vmatpush1.bf16.msra.mxu1 %v7927_v4  ;;  %4152 = vmatprep.subr.bf16.mxu0 %v7942_v5  ;;  %v854_v4 = vld [vmem:[#allocation4 + $0x6a0] sm:$0xff] }
 0x314   : > { %4238 = vmatprep.subr.bf16.mxu1 %v7944_v6  ;;  %v862_v5 = vld [vmem:[#allocation4 + $0x6e0] sm:$0xff]  ;;  %v855_v6 = vld [vmem:[#allocation4 + $0x6a8] sm:$0xff] }
 0x315   : > { %v8070_v10 = vcombine.high %v854_v4, %v862_v5  ;;  %v8069_v16 = vcombine.low %v854_v4, %v862_v5  ;;  %v8071_v17 = vcombine.low %v855_v6, %v863_v7  ;;  %v967_v4 = vld [vmem:[#allocation4 + $0xa28] sm:$0xff] }
 0x316   : > { %4153 = vmatpush1.bf16.msra.mxu0 %v7941_v11  ;;  %v8072_v11 = vcombine.high %v855_v6, %v863_v7  ;;  %v975_v5 = vld [vmem:[#allocation4 + $0xa68] sm:$0xff] }
 0x317   : > { %4239 = vmatpush1.bf16.msra.mxu1 %v7943_v12  ;;  %4154 = vmatprep.subr.bf16.mxu0 %v7958_v13  ;;  %v870_v12 = vld [vmem:[#allocation4 + $0x720] sm:$0xff] }
 0x318   : > { %4240 = vmatprep.subr.bf16.mxu1 %v7960_v14  ;;  %v878_v13 = vld [vmem:[#allocation4 + $0x760] sm:$0xff]  ;;  %v871_v14 = vld [vmem:[#allocation4 + $0x728] sm:$0xff] }
 0x319   : > { %v8086_v18 = vcombine.high %v870_v12, %v878_v13  ;;  %v8085_v24 = vcombine.low %v870_v12, %v878_v13  ;;  %v8087_v25 = vcombine.low %v871_v14, %v879_v15 }
 0x31a   : > { %4155 = vmatpush1.bf16.msra.mxu0 %v7957_v19  ;;  %v8088_v19 = vcombine.high %v871_v14, %v879_v15  ;;  %v991_v14 = vld [vmem:[#allocation4 + $0xae8] sm:$0xff] }
 0x31b   : > { %4241 = vmatpush1.bf16.msra.mxu1 %v7959_v20  ;;  %4156 = vmatprep.subr.bf16.mxu0 %v7974_v21  ;;  %v886_v20 = vld [vmem:[#allocation4 + $0x7a0] sm:$0xff] }
 0x31c   : > { %4242 = vmatprep.subr.bf16.mxu1 %v7976_v22  ;;  %v894_v21 = vld [vmem:[#allocation4 + $0x7e0] sm:$0xff]  ;;  %v887_v22 = vld [vmem:[#allocation4 + $0x7a8] sm:$0xff] }
 0x31d   : > { %v8102_v26 = vcombine.high %v886_v20, %v894_v21  ;;  %v8101_v32 = vcombine.low %v886_v20, %v894_v21  ;;  %v8103_v33 = vcombine.low %v887_v22, %v895_v23 }
 0x31e   : > { %4157 = vmatpush1.bf16.msra.mxu0 %v7973_v27  ;;  %v8104_v27 = vcombine.high %v887_v22, %v895_v23  ;;  %v998_v22 = vld [vmem:[#allocation4 + $0xb20] sm:$0xff] }
 0x31f   : > { %4243 = vmatpush1.bf16.msra.mxu1 %v7975_v28  ;;  %4158 = vmatprep.subr.bf16.mxu0 %v7990_v29  ;;  %v902_v28 = vld [vmem:[#allocation4 + $0x820] sm:$0xff] }
 0x320   : > { %4244 = vmatprep.subr.bf16.mxu1 %v7992_v30  ;;  %v910_v29 = vld [vmem:[#allocation4 + $0x860] sm:$0xff]  ;;  %v903_v30 = vld [vmem:[#allocation4 + $0x828] sm:$0xff] }
 0x321   : > { %v8118_v34 = vcombine.high %v902_v28, %v910_v29  ;;  %v8119_v41 = vcombine.low %v903_v30, %v911_v31  ;;  %v1006_v23 = vld [vmem:[#allocation4 + $0xb60] sm:$0xff] }
 0x322   : > { %4159 = vmatpush1.bf16.msra.mxu0 %v7989_v35  ;;  %v8120_v35 = vcombine.high %v903_v30, %v911_v31 }
 0x323   : > { %4245 = vmatpush1.bf16.msra.mxu1 %v7991_v36  ;;  %4160 = vmatprep.subr.bf16.mxu0 %v8006_v37  ;;  %v918_v36 = vld [vmem:[#allocation4 + $0x8a0] sm:$0xff] }
 0x324   : > { %4246 = vmatprep.subr.bf16.mxu1 %v8008_v38  ;;  %v926_v37 = vld [vmem:[#allocation4 + $0x8e0] sm:$0xff]  ;;  %v8117_v38 = vcombine.low %v902_v28, %v910_v29 }
 0x325   : > { %v8134_v42 = vcombine.high %v918_v36, %v926_v37  ;;  %v8133_v49 = vcombine.low %v918_v36, %v926_v37 }
 0x326   : > { %4161 = vmatpush1.bf16.msra.mxu0 %v8005_v44  ;;  %v934_v44 = vld [vmem:[#allocation4 + $0x920] sm:$0xff] }
 0x327   : > { %4247 = vmatpush1.bf16.msra.mxu1 %v8007_v45  ;;  %4162 = vmatprep.subr.bf16.mxu0 %v8022_v46  ;;  %v942_v45 = vld [vmem:[#allocation4 + $0x960] sm:$0xff]  ;;  %v8136_v46 = vcombine.high %v919_v39, %v927_v40 }
 0x328   : > { %4248 = vmatprep.subr.bf16.mxu1 %v8024_v47  ;;  %v935_v47 = vld [vmem:[#allocation4 + $0x928] sm:$0xff]  ;;  %v8150_v51 = vcombine.high %v934_v44, %v942_v45  ;;  %v8149_v59 = vcombine.low %v934_v44, %v942_v45 }
 0x329   : > { %v8151_v60 = vcombine.low %v935_v47, %v943_v48  ;;  %v1015_v44 = vld [vmem:[#allocation4 + $0xba8] sm:$0xff] }
 0x32a   : > { %4163 = vmatpush1.bf16.msra.mxu0 %v8021_v52  ;;  %v8152_v52 = vcombine.high %v935_v47, %v943_v48  ;;  %v1023_v45 = vld [vmem:[#allocation4 + $0xbe8] sm:$0xff] }
 0x32b   : > { %4249 = vmatpush1.bf16.msra.mxu1 %v8023_v53  ;;  %4164 = vmatprep.subr.bf16.mxu0 %v8038_v54  ;;  %v950_v53 = vld [vmem:[#allocation4 + $0x9a0] sm:$0xff] }
 0x32c   : > { %4250 = vmatprep.subr.bf16.mxu1 %v8040_v55  ;;  %v958_v54 = vld [vmem:[#allocation4 + $0x9e0] sm:$0xff]  ;;  %v951_v55 = vld [vmem:[#allocation4 + $0x9a8] sm:$0xff] }
 0x32d   : > { %v8166_v61 = vcombine.high %v950_v53, %v958_v54  ;;  %v8165_v6 = vcombine.low %v950_v53, %v958_v54  ;;  %v8167_v7 = vcombine.low %v951_v55, %v959_v56 }
 0x32e   : > { %4165 = vmatpush1.bf16.msra.mxu0 %v8037_v62  ;;  %v8168_v62 = vcombine.high %v951_v55, %v959_v56 }
 0x32f   : > { %4251 = vmatpush1.bf16.msra.mxu1 %v8039_v63  ;;  %4166 = vmatprep.subr.bf16.mxu0 %v8054_v2  ;;  %v966_v63 = vld [vmem:[#allocation4 + $0xa20] sm:$0xff] }
 0x330   : > { %4252 = vmatprep.subr.bf16.mxu1 %v8056_v3  ;;  %v974_v2 = vld [vmem:[#allocation4 + $0xa60] sm:$0xff]  ;;  %v9325_v3 = vshrl.u32 %v441_v43, 7  ;;  %v983_v43 = vld [vmem:[#allocation4 + $0xaa8] sm:$0xff] }
 0x331   : > { %v8181_v15 = vcombine.low %v966_v63, %v974_v2  ;;  %v8200_v21 = vcombine.high %v983_v43, %v991_v14  ;;  %v8199_v31 = vcombine.low %v983_v43, %v991_v14 }
 0x332   : > { %4167 = vmatpush1.bf16.msra.mxu0 %v8053_v8  ;;  %v8182_v8 = vcombine.high %v966_v63, %v974_v2  ;;  %v9328_v12 = vsub.s32 0, %v9325_v3  ;;  %v9331_v13 = vsub.s32 2, %v9325_v3  ;;  %v1030_v63 = vld [vmem:[#allocation4 + $0xc20] sm:$0xff] }
 0x333   : > { %4253 = vmatpush1.bf16.msra.mxu1 %v8055_v9  ;;  %4168 = vmatprep.subr.bf16.mxu0 %v8070_v10  ;;  %v8184_v9 = vcombine.high %v967_v4, %v975_v5  ;;  %v982_v10 = vld [vmem:[#allocation4 + $0xaa0] sm:$0xff] }
 0x334   : > { %4254 = vmatprep.subr.bf16.mxu1 %v8072_v11  ;;  %v990_v11 = vld [vmem:[#allocation4 + $0xae0] sm:$0xff] }
 0x335   : > { %v8198_v20 = vcombine.high %v982_v10, %v990_v11  ;;  %v8197_v30 = vcombine.low %v982_v10, %v990_v11  ;;  %v1038_v2 = vld [vmem:[#allocation4 + $0xc60] sm:$0xff] }
 0x336   : > { %4169 = vmatpush1.bf16.msra.mxu0 %v8069_v16  ;;  %v9333_v16 = vld [vmem:[#allocation6] sm:$0xff] }
 0x337   : > { %4255 = vmatpush1.bf16.msra.mxu1 %v8071_v17  ;;  %4170 = vmatprep.subr.bf16.mxu0 %v8086_v18  ;;  %v9336_v17 = vsub.s32 1, %v9325_v3  ;;  %v9339_v18 = vsub.s32 3, %v9325_v3 }
 0x338   : > { %4256 = vmatprep.subr.bf16.mxu1 %v8088_v19  ;;  %v8183_v19 = vcombine.low %v967_v4, %v975_v5 }
 0x339   : > { %v1165_v28 = vrot.slane %v9333_v16, %v9336_v17  ;;  %v1173_v29 = vrot.slane %v9333_v16, %v9339_v18 }
 0x33a   : > { %4171 = vmatpush1.bf16.msra.mxu0 %v8085_v24  ;;  %v1161_v24 = vrot.slane %v9333_v16, %v9328_v12 }
 0x33b   : > { %4257 = vmatpush1.bf16.msra.mxu1 %v8087_v25  ;;  %4172 = vmatprep.subr.bf16.mxu0 %v8102_v26  ;;  %v1169_v25 = vrot.slane %v9333_v16, %v9331_v13  ;;  %v999_v26 = vld [vmem:[#allocation4 + $0xb28] sm:$0xff] }
 0x33c   : > { %4258 = vmatprep.subr.bf16.mxu1 %v8104_v27  ;;  %v1007_v27 = vld [vmem:[#allocation4 + $0xb68] sm:$0xff] }
 0x33d   : > { %v8216_v37 = vcombine.high %v999_v26, %v1007_v27 }
 0x33e   : > { %4173 = vmatpush1.bf16.msra.mxu0 %v8101_v32  ;;  %v8214_v32 = vcombine.high %v998_v22, %v1006_v23 }
 0x33f   : > { %4259 = vmatpush1.bf16.msra.mxu1 %v8103_v33  ;;  %4185 = vmatprep.subr.bf16.mxu0 %v8118_v34  ;;  %v1014_v33 = vld [vmem:[#allocation4 + $0xba0] sm:$0xff] }
 0x340   : > { %4271 = vmatprep.subr.bf16.mxu1 %v8120_v35  ;;  %v1022_v34 = vld [vmem:[#allocation4 + $0xbe0] sm:$0xff] }
 0x341   : > { %4175 = vmatmul.mubr.bf16.vlgmr.msra.gmra.mrb[12].mxu0 %v9294_v57  ;;  %v8230_v56 = vcombine.high %v1014_v33, %v1022_v34 }
 0x342   : > { %4261 = vmatmul.mubr.bf16.vlgmr.msra.gmra.mrb[12].mxu1 %v9294_v57  ;;  %4186 = vmatpush1.bf16.msra.mxu0 %v8117_v38 }
 0x343   : > { %4217 = vmatprep.mubr.bf16.mxu0 %v9300_v1  ;;  %4272 = vmatpush1.bf16.msra.mxu1 %v8119_v41 }
 0x344   : > { %4303 = vmatprep.mubr.bf16.mxu1 %v9300_v1  ;;  %4187 = vmatprep.subr.bf16.mxu0 %v8134_v42  ;;  %v8213_v42 = vcombine.low %v998_v22, %v1006_v23 }
 0x345   : > { %4273 = vmatprep.subr.bf16.mxu1 %v8136_v46 }
 0x346   : > { %4188 = vmatpush1.bf16.msra.mxu0 %v8133_v49 }
 0x347   : > { %4274 = vmatpush1.bf16.msra.mxu1 %v8135_v50  ;;  %4189 = vmatprep.subr.bf16.mxu0 %v8150_v51  ;;  %v8215_v50 = vcombine.low %v999_v26, %v1007_v27  ;;  %v8229_v51 = vcombine.low %v1014_v33, %v1022_v34  ;;  %v1047_v26 = vld [vmem:[#allocation4 + $0xca8] sm:$0xff]  ;;  %v1070_v33 = vld [vmem:[#allocation4 + $0xd60] sm:$0xff] }
 0x348   : > { %4275 = vmatprep.subr.bf16.mxu1 %v8152_v52  ;;  %v1055_v27 = vld [vmem:[#allocation4 + $0xce8] sm:$0xff] }
 0x349   : > { %v1063_v34 = vld [vmem:[#allocation4 + $0xd28] sm:$0xff] }
 0x34a   : > { %4190 = vmatpush1.bf16.msra.mxu0 %v8149_v59 }
 0x34b   : > { %4276 = vmatpush1.bf16.msra.mxu1 %v8151_v60  ;;  %4191 = vmatprep.subr.bf16.mxu0 %v8166_v61  ;;  %v8231_v61 = vcombine.low %v1015_v44, %v1023_v45 }
 0x34c   : > { %4277 = vmatprep.subr.bf16.mxu1 %v8168_v62  ;;  %v8232_v62 = vcombine.high %v1015_v44, %v1023_v45  ;;  %v1087_v44 = vld [vmem:[#allocation4 + $0xde8] sm:$0xff] }
 0x34e   : > { %4192 = vmatpush1.bf16.msra.mxu0 %v8165_v6 }
 0x34f   : > { %4278 = vmatpush1.bf16.msra.mxu1 %v8167_v7  ;;  %4193 = vmatprep.subr.bf16.mxu0 %v8182_v8  ;;  %v1031_v8 = vld [vmem:[#allocation4 + $0xc28] sm:$0xff] }
 0x350   : > { %4279 = vmatprep.subr.bf16.mxu1 %v8184_v9  ;;  %v1039_v9 = vld [vmem:[#allocation4 + $0xc68] sm:$0xff] }
 0x351   : > { %v8248_v23 = vcombine.high %v1031_v8, %v1039_v9 }
 0x352   : > { %4194 = vmatpush1.bf16.msra.mxu0 %v8181_v15 }
 0x353   : > { %4280 = vmatpush1.bf16.msra.mxu1 %v8183_v19  ;;  %4195 = vmatprep.subr.bf16.mxu0 %v8198_v20  ;;  %v8246_v20 = vcombine.high %v1030_v63, %v1038_v2 }
 0x354   : > { %v3875_v35 = vpop.f32.mrb[4].mxu0  ;;  %v3961_v36 = vpop.f32.mrb[4].mxu1  ;;  %4281 = vmatprep.subr.bf16.mxu1 %v8200_v21 }
 0x355   : > { %v8387_v38 = vadd.f32 %v3875_v35, %v1161_v24  ;;  %v8391_v39 = vadd.f32 %v3961_v36, %v1169_v25  ;;  %v3877_v40 = vpop.f32.mrb[5].mxu0  ;;  %v3963_v41 = vpop.f32.mrb[5].mxu1  ;;  %v1071_v35 = vld [vmem:[#allocation4 + $0xd68] sm:$0xff] }
 0x356   : > { %v8388_v46 = vadd.f32 %v3877_v40, %v1165_v28  ;;  %v8392_v47 = vadd.f32 %v3963_v41, %v1173_v29  ;;  %v3879_v48 = vpop.f32.mrb[6].mxu0  ;;  %v3965_v49 = vpop.f32.mrb[6].mxu1  ;;  %4196 = vmatpush1.bf16.msra.mxu0 %v8197_v30  ;;  %v1078_v40 = vld [vmem:[#allocation4 + $0xda0] sm:$0xff] }
 0x357   : > { %v8389_v52 = vadd.f32 %v3879_v48, %v1161_v24  ;;  %v8393_v53 = vadd.f32 %v3965_v49, %v1169_v25  ;;  %4282 = vmatpush1.bf16.msra.mxu1 %v8199_v31  ;;  %v3881_v54 = vpop.f32.mrb[7].mxu0  ;;  %v3967_v55 = vpop.f32.mrb[7].mxu1  ;;  %4197 = vmatprep.subr.bf16.mxu0 %v8214_v32  ;;  %v4486_v4 = vmax.f32 %v8387_v38, 0.0  ;;  %v4488_v5 = vmax.f32 %v8391_v39, 0.0  ;;  %v1046_v24 = vld [vmem:[#allocation4 + $0xca0] sm:$0xff] }
 0x358   : > { %v8390_v59 = vadd.f32 %v3881_v54, %v1165_v28  ;;  %v8394_v60 = vadd.f32 %v3967_v55, %v1173_v29  ;;  %4283 = vmatprep.subr.bf16.mxu1 %v8216_v37  ;;  %v4487_v10 = vmax.f32 %v8388_v46, 0.0  ;;  %v4489_v11 = vmax.f32 %v8392_v47, 0.0  ;;  %v1054_v25 = vld [vmem:[#allocation4 + $0xce0] sm:$0xff] }
 0x359   : > { %v4502_v6 = vmax.f32 %v8389_v52, 0.0  ;;  %v4504_v7 = vmax.f32 %v8393_v53, 0.0  ;;  %v8245_v28 = vcombine.low %v1030_v63, %v1038_v2  ;;  %v8247_v29 = vcombine.low %v1031_v8, %v1039_v9  ;;  %v1062_v32 = vld [vmem:[#allocation4 + $0xd20] sm:$0xff]  ;;  %v1103_v52 = vld [vmem:[#allocation4 + $0xe68] sm:$0xff] }
 0x35a   : > { %v4503_v43 = vmax.f32 %v8390_v59, 0.0  ;;  %v4505_v14 = vmax.f32 %v8394_v60, 0.0  ;;  %4198 = vmatpush1.bf16.msra.mxu0 %v8213_v42  ;;  %v8262_v30 = vcombine.high %v1046_v24, %v1054_v25  ;;  %v8264_v31 = vcombine.high %v1047_v26, %v1055_v27  ;;  %v1086_v41 = vld [vmem:[#allocation4 + $0xde0] sm:$0xff]  ;;  %v1079_v42 = vld [vmem:[#allocation4 + $0xda8] sm:$0xff] }
 0x35b   : > { %v9349_v15 = vpack.c.bf16 %v4502_v6, %v4486_v4  ;;  %v9351_v19 = vpack.c.bf16 %v4504_v7, %v4488_v5  ;;  %4284 = vmatpush1.bf16.msra.mxu1 %v8215_v50  ;;  %4199 = vmatprep.subr.bf16.mxu0 %v8230_v56  ;;  %v8261_v36 = vcombine.low %v1046_v24, %v1054_v25  ;;  %v1094_v49 = vld [vmem:[#allocation4 + $0xe20] sm:$0xff]  ;;  %v1127_v8 = vld [vmem:[#allocation4 + $0xf28] sm:$0xff] }
 0x35c   : > { %v9353_v21 = vpack.c.bf16 %v4503_v43, %v4487_v10  ;;  %v9355_v22 = vpack.c.bf16 %v4505_v14, %v4489_v11  ;;  %4285 = vmatprep.subr.bf16.mxu1 %v8232_v62  ;;  %v8263_v37 = vcombine.low %v1047_v26, %v1055_v27  ;;  %v8278_v38 = vcombine.high %v1062_v32, %v1070_v33  ;;  %v1102_v50 = vld [vmem:[#allocation4 + $0xe60] sm:$0xff]  ;;  %v1119_v62 = vld [vmem:[#allocation4 + $0xee8] sm:$0xff] }
 0x35d   : > { %v8280_v39 = vcombine.high %v1063_v34, %v1071_v35  ;;  %v8277_v45 = vcombine.low %v1062_v32, %v1070_v33  ;;  %v8279_v46 = vcombine.low %v1063_v34, %v1071_v35  ;;  %v8294_v47 = vcombine.high %v1078_v40, %v1086_v41  ;;  %v1110_v59 = vld [vmem:[#allocation4 + $0xea0] sm:$0xff]  ;;  %v1135_v9 = vld [vmem:[#allocation4 + $0xf68] sm:$0xff]  ;;  %v649_v32 = vld [vmem:[#allocation4 + $0x38] sm:$0xff] }
 0x35e   : > { %4200 = vmatpush1.bf16.msra.mxu0 %v8229_v51  ;;  %v8296_v48 = vcombine.high %v1079_v42, %v1087_v44  ;;  %v1095_v51 = vld [vmem:[#allocation4 + $0xe28] sm:$0xff]  ;;  %v8293_v53 = vcombine.low %v1078_v40, %v1086_v41  ;;  %v8295_v54 = vcombine.low %v1079_v42, %v1087_v44  ;;  %v8310_v55 = vcombine.high %v1094_v49, %v1102_v50  ;;  %v1118_v60 = vld [vmem:[#allocation4 + $0xee0] sm:$0xff]  ;;  %v657_v33 = vld [vmem:[#allocation4 + $0x78] sm:$0xff] }
 0x35f   : > { %4286 = vmatpush1.bf16.msra.mxu1 %v8231_v61  ;;  %4201 = vmatprep.subr.bf16.mxu0 %v8246_v20  ;;  %v8312_v56 = vcombine.high %v1095_v51, %v1103_v52  ;;  %v1111_v61 = vld [vmem:[#allocation4 + $0xea8] sm:$0xff]  ;;  %v8309_v63 = vcombine.low %v1094_v49, %v1102_v50  ;;  %v8311_v2 = vcombine.low %v1095_v51, %v1103_v52  ;;  %v1126_v6 = vld [vmem:[#allocation4 + $0xf20] sm:$0xff]  ;;  %v665_v41 = vld [vmem:[#allocation4 + $0xb8] sm:$0xff] }
 0x360   : > { %4287 = vmatprep.subr.bf16.mxu1 %v8248_v23  ;;  %v8326_v4 = vcombine.high %v1110_v59, %v1118_v60  ;;  %v8328_v5 = vcombine.high %v1111_v61, %v1119_v62  ;;  %v1134_v7 = vld [vmem:[#allocation4 + $0xf60] sm:$0xff]  ;;  %v8325_v10 = vcombine.low %v1110_v59, %v1118_v60  ;;  %v8327_v11 = vcombine.low %v1111_v61, %v1119_v62  ;;  %v1143_v24 = vld [vmem:[#allocation4 + $0xfa8] sm:$0xff]  ;;  %v673_v42 = vld [vmem:[#allocation4 + $0xf8] sm:$0xff] }
 0x361   : > { %v8342_v43 = vcombine.high %v1126_v6, %v1134_v7  ;;  %v8344_v14 = vcombine.high %v1127_v8, %v1135_v9  ;;  %v1142_v20 = vld [vmem:[#allocation4 + $0xfa0] sm:$0xff]  ;;  %v1151_v25 = vld [vmem:[#allocation4 + $0xfe8] sm:$0xff]  ;;  %v8341_v26 = vcombine.low %v1126_v6, %v1134_v7  ;;  %v8343_v27 = vcombine.low %v1127_v8, %v1135_v9  ;;  %v681_v49 = vld [vmem:[#allocation4 + $0x138] sm:$0xff] }
 0x362   : > { %4202 = vmatpush1.bf16.msra.mxu0 %v8245_v28  ;;  %v1150_v23 = vld [vmem:[#allocation4 + $0xfe0] sm:$0xff]  ;;  %v8359_v35 = vcombine.low %v1143_v24, %v1151_v25  ;;  %v7867_v44 = vcombine.low %v649_v32, %v657_v33  ;;  %v689_v50 = vld [vmem:[#allocation4 + $0x178] sm:$0xff]  ;;  %v7883_v52 = vcombine.low %v665_v41, %v673_v42 }
 0x363   : > { %4288 = vmatpush1.bf16.msra.mxu1 %v8247_v29  ;;  %4203 = vmatprep.subr.bf16.mxu0 %v8262_v30  ;;  %v8358_v28 = vcombine.high %v1142_v20, %v1150_v23  ;;  %v8360_v29 = vcombine.high %v1143_v24, %v1151_v25  ;;  %v648_v30 = vld [vmem:[#allocation4 + $0x30] sm:$0xff]  ;;  %v8357_v34 = vcombine.low %v1142_v20, %v1150_v23  ;;  %v697_v59 = vld [vmem:[#allocation4 + $0x1b8] sm:$0xff] }
 0x364   : > { %4289 = vmatprep.subr.bf16.mxu1 %v8264_v31  ;;  %v656_v31 = vld [vmem:[#allocation4 + $0x70] sm:$0xff]  ;;  %v705_v60 = vld [vmem:[#allocation4 + $0x1f8] sm:$0xff]  ;;  %v7899_v62 = vcombine.low %v681_v49, %v689_v50 }
 0x365   : > { %v7865_v40 = vcombine.low %v648_v30, %v656_v31  ;;  %v713_v6 = vld [vmem:[#allocation4 + $0x238] sm:$0xff]  ;;  %v7915_v8 = vcombine.low %v697_v59, %v705_v60 }
 0x366   : > { %4204 = vmatpush1.bf16.msra.mxu0 %v8261_v36  ;;  %v7866_v36 = vcombine.high %v648_v30, %v656_v31  ;;  %v721_v7 = vld [vmem:[#allocation4 + $0x278] sm:$0xff] }
 0x367   : > { %4290 = vmatpush1.bf16.msra.mxu1 %v8263_v37  ;;  %4205 = vmatprep.subr.bf16.mxu0 %v8278_v38  ;;  %v7868_v37 = vcombine.high %v649_v32, %v657_v33  ;;  %v664_v38 = vld [vmem:[#allocation4 + $0xb0] sm:$0xff]  ;;  %v737_v20 = vld [vmem:[#allocation4 + $0x2f8] sm:$0xff]  ;;  %v7931_v24 = vcombine.low %v713_v6, %v721_v7 }
 0x368   : > { %4291 = vmatprep.subr.bf16.mxu1 %v8280_v39  ;;  %v672_v39 = vld [vmem:[#allocation4 + $0xf0] sm:$0xff]  ;;  %v753_v30 = vld [vmem:[#allocation4 + $0x378] sm:$0xff] }
 0x369   : > { %v7881_v51 = vcombine.low %v664_v38, %v672_v39 }
 0x36a   : > { %4206 = vmatpush1.bf16.msra.mxu0 %v8277_v45  ;;  %v7882_v45 = vcombine.high %v664_v38, %v672_v39  ;;  %v769_v38 = vld [vmem:[#allocation4 + $0x3f8] sm:$0xff] }
 0x36b   : > { %4292 = vmatpush1.bf16.msra.mxu1 %v8279_v46  ;;  %4207 = vmatprep.subr.bf16.mxu0 %v8294_v47  ;;  %v680_v46 = vld [vmem:[#allocation4 + $0x130] sm:$0xff] }
 0x36c   : > { %4293 = vmatprep.subr.bf16.mxu1 %v8296_v48  ;;  %v688_v47 = vld [vmem:[#allocation4 + $0x170] sm:$0xff]  ;;  %v7884_v48 = vcombine.high %v665_v41, %v673_v42 }
 0x36d   : > { %v7897_v61 = vcombine.low %v680_v46, %v688_v47 }
 0x36e   : > { %4208 = vmatpush1.bf16.msra.mxu0 %v8293_v53  ;;  %v7898_v53 = vcombine.high %v680_v46, %v688_v47  ;;  %v777_v46 = vld [vmem:[#allocation4 + $0x438] sm:$0xff] }
 0x36f   : > { %4294 = vmatpush1.bf16.msra.mxu1 %v8295_v54  ;;  %4209 = vmatprep.subr.bf16.mxu0 %v8310_v55  ;;  %v7900_v54 = vcombine.high %v681_v49, %v689_v50  ;;  %v696_v55 = vld [vmem:[#allocation4 + $0x1b0] sm:$0xff]  ;;  %v785_v47 = vld [vmem:[#allocation4 + $0x478] sm:$0xff] }
 0x370   : > { %4295 = vmatprep.subr.bf16.mxu1 %v8312_v56  ;;  %v704_v56 = vld [vmem:[#allocation4 + $0x1f0] sm:$0xff] }
 0x372   : > { %4210 = vmatpush1.bf16.msra.mxu0 %v8309_v63  ;;  %v7914_v63 = vcombine.high %v696_v55, %v704_v56 }
 0x373   : > { %4296 = vmatpush1.bf16.msra.mxu1 %v8311_v2  ;;  %4211 = vmatprep.subr.bf16.mxu0 %v8326_v4  ;;  %v7916_v2 = vcombine.high %v697_v59, %v705_v60  ;;  %v712_v4 = vld [vmem:[#allocation4 + $0x230] sm:$0xff]  ;;  %v7995_v59 = vcombine.low %v777_v46, %v785_v47 }
 0x374   : > { %4297 = vmatprep.subr.bf16.mxu1 %v8328_v5  ;;  %v720_v5 = vld [vmem:[#allocation4 + $0x270] sm:$0xff] }
 0x375   : > { %v7930_v9 = vcombine.high %v712_v4, %v720_v5  ;;  %v7929_v23 = vcombine.low %v712_v4, %v720_v5  ;;  %v817_v4 = vld [vmem:[#allocation4 + $0x578] sm:$0xff] }
 0x376   : > { %4212 = vmatpush1.bf16.msra.mxu0 %v8325_v10  ;;  %v7932_v10 = vcombine.high %v713_v6, %v721_v7 }
 0x377   : > { %4298 = vmatpush1.bf16.msra.mxu1 %v8327_v11  ;;  %4213 = vmatprep.subr.bf16.mxu0 %v8342_v43  ;;  %v728_v11 = vld [vmem:[#allocation4 + $0x2b0] sm:$0xff] }
 0x378   : > { %4299 = vmatprep.subr.bf16.mxu1 %v8344_v14  ;;  %v736_v43 = vld [vmem:[#allocation4 + $0x2f0] sm:$0xff]  ;;  %v729_v14 = vld [vmem:[#allocation4 + $0x2b8] sm:$0xff] }
 0x379   : > { %v7946_v25 = vcombine.high %v728_v11, %v736_v43  ;;  %v7945_v31 = vcombine.low %v728_v11, %v736_v43  ;;  %v7947_v32 = vcombine.low %v729_v14, %v737_v20  ;;  %v833_v11 = vld [vmem:[#allocation4 + $0x5f8] sm:$0xff] }
 0x37a   : > { %4214 = vmatpush1.bf16.msra.mxu0 %v8341_v26  ;;  %v7948_v26 = vcombine.high %v729_v14, %v737_v20 }
 0x37b   : > { %4300 = vmatpush1.bf16.msra.mxu1 %v8343_v27  ;;  %4215 = vmatprep.subr.bf16.mxu0 %v8358_v28  ;;  %v744_v27 = vld [vmem:[#allocation4 + $0x330] sm:$0xff] }
 0x37c   : > { %4301 = vmatprep.subr.bf16.mxu1 %v8360_v29  ;;  %v752_v28 = vld [vmem:[#allocation4 + $0x370] sm:$0xff]  ;;  %v745_v29 = vld [vmem:[#allocation4 + $0x338] sm:$0xff] }
 0x37d   : > { %v7962_v33 = vcombine.high %v744_v27, %v752_v28  ;;  %v7961_v39 = vcombine.low %v744_v27, %v752_v28  ;;  %v849_v27 = vld [vmem:[#allocation4 + $0x678] sm:$0xff] }
 0x37e   : > { %4216 = vmatpush1.bf16.msra.mxu0 %v8357_v34  ;;  %v7964_v34 = vcombine.high %v745_v29, %v753_v30 }
 0x37f   : > { %4302 = vmatpush1.bf16.msra.mxu1 %v8359_v35  ;;  %4314 = vmatprep.subr.bf16.mxu0 %v7866_v36  ;;  %v760_v35 = vld [vmem:[#allocation4 + $0x3b0] sm:$0xff] }
 0x380   : > { %4400 = vmatprep.subr.bf16.mxu1 %v7868_v37  ;;  %v768_v36 = vld [vmem:[#allocation4 + $0x3f0] sm:$0xff]  ;;  %v761_v37 = vld [vmem:[#allocation4 + $0x3b8] sm:$0xff] }
 0x381   : > { %4218 = vmatmul.mubr.bf16.vlgmr.msra.gmra.mrb[12].mxu0 %v9296_v58  ;;  %v7978_v41 = vcombine.high %v760_v35, %v768_v36  ;;  %v7980_v42 = vcombine.high %v761_v37, %v769_v38  ;;  %v7979_v49 = vcombine.low %v761_v37, %v769_v38 }
 0x382   : > { %4304 = vmatmul.mubr.bf16.vlgmr.msra.gmra.mrb[12].mxu1 %v9296_v58  ;;  %4315 = vmatpush1.bf16.msra.mxu0 %v7865_v40  ;;  %v7963_v40 = vcombine.low %v745_v29, %v753_v30 }
 0x383   : > { %4346 = vmatprep.mubr.bf16.mxu0 %v9298_v0  ;;  %4401 = vmatpush1.bf16.msra.mxu1 %v7867_v44  ;;  %v776_v44 = vld [vmem:[#allocation4 + $0x430] sm:$0xff] }
 0x384   : > { %4432 = vmatprep.mubr.bf16.mxu1 %v9298_v0  ;;  %4316 = vmatprep.subr.bf16.mxu0 %v7882_v45  ;;  %v7913_v0 = vcombine.low %v696_v55, %v704_v56  ;;  %v784_v45 = vld [vmem:[#allocation4 + $0x470] sm:$0xff]  ;;  %v801_v55 = vld [vmem:[#allocation4 + $0x4f8] sm:$0xff] }
 0x385   : > { %4402 = vmatprep.subr.bf16.mxu1 %v7884_v48  ;;  %v7977_v48 = vcombine.low %v760_v35, %v768_v36  ;;  %v7994_v50 = vcombine.high %v776_v44, %v784_v45  ;;  %v7993_v56 = vcombine.low %v776_v44, %v784_v45  ;;  %v865_v35 = vld [vmem:[#allocation4 + $0x6f8] sm:$0xff] }
 0x386   : > { %4317 = vmatpush1.bf16.msra.mxu0 %v7881_v51  ;;  %v7996_v51 = vcombine.high %v777_v46, %v785_v47  ;;  %v881_v44 = vld [vmem:[#allocation4 + $0x778] sm:$0xff] }
 0x387   : > { %4403 = vmatpush1.bf16.msra.mxu1 %v7883_v52  ;;  %4318 = vmatprep.subr.bf16.mxu0 %v7898_v53  ;;  %v792_v52 = vld [vmem:[#allocation4 + $0x4b0] sm:$0xff] }
 0x388   : > { %4404 = vmatprep.subr.bf16.mxu1 %v7900_v54  ;;  %v800_v53 = vld [vmem:[#allocation4 + $0x4f0] sm:$0xff]  ;;  %v793_v54 = vld [vmem:[#allocation4 + $0x4b8] sm:$0xff] }
 0x389   : > { %v8010_v60 = vcombine.high %v792_v52, %v800_v53  ;;  %v8009_v5 = vcombine.low %v792_v52, %v800_v53  ;;  %v8011_v6 = vcombine.low %v793_v54, %v801_v55  ;;  %v897_v52 = vld [vmem:[#allocation4 + $0x7f8] sm:$0xff] }
 0x38a   : > { %4319 = vmatpush1.bf16.msra.mxu0 %v7897_v61  ;;  %v8012_v61 = vcombine.high %v793_v54, %v801_v55 }
 0x38b   : > { %4405 = vmatpush1.bf16.msra.mxu1 %v7899_v62  ;;  %4320 = vmatprep.subr.bf16.mxu0 %v7914_v63  ;;  %v808_v62 = vld [vmem:[#allocation4 + $0x530] sm:$0xff] }
 0x38c   : > { %4406 = vmatprep.subr.bf16.mxu1 %v7916_v2  ;;  %v816_v63 = vld [vmem:[#allocation4 + $0x570] sm:$0xff]  ;;  %v809_v2 = vld [vmem:[#allocation4 + $0x538] sm:$0xff] }
 0x38d   : > { %v8026_v7 = vcombine.high %v808_v62, %v816_v63  ;;  %v8025_v43 = vcombine.low %v808_v62, %v816_v63  ;;  %v8027_v14 = vcombine.low %v809_v2, %v817_v4  ;;  %v913_v62 = vld [vmem:[#allocation4 + $0x878] sm:$0xff] }
 0x38e   : > { %4321 = vmatpush1.bf16.msra.mxu0 %v7913_v0  ;;  %v8028_v0 = vcombine.high %v809_v2, %v817_v4 }
 0x38f   : > { %4407 = vmatpush1.bf16.msra.mxu1 %v7915_v8  ;;  %4322 = vmatprep.subr.bf16.mxu0 %v7930_v9  ;;  %v824_v8 = vld [vmem:[#allocation4 + $0x5b0] sm:$0xff] }
 0x390   : > { %4408 = vmatprep.subr.bf16.mxu1 %v7932_v10  ;;  %v832_v9 = vld [vmem:[#allocation4 + $0x5f0] sm:$0xff]  ;;  %v825_v10 = vld [vmem:[#allocation4 + $0x5b8] sm:$0xff] }
 0x391   : > { %v8042_v20 = vcombine.high %v824_v8, %v832_v9  ;;  %v8041_v28 = vcombine.low %v824_v8, %v832_v9  ;;  %v8043_v29 = vcombine.low %v825_v10, %v833_v11  ;;  %v921_v8 = vld [vmem:[#allocation4 + $0x8b8] sm:$0xff] }
 0x392   : > { %4323 = vmatpush1.bf16.msra.mxu0 %v7929_v23  ;;  %v8044_v23 = vcombine.high %v825_v10, %v833_v11  ;;  %v929_v9 = vld [vmem:[#allocation4 + $0x8f8] sm:$0xff] }
 0x393   : > { %4409 = vmatpush1.bf16.msra.mxu1 %v7931_v24  ;;  %4324 = vmatprep.subr.bf16.mxu0 %v7946_v25  ;;  %v840_v24 = vld [vmem:[#allocation4 + $0x630] sm:$0xff] }
 0x394   : > { %4410 = vmatprep.subr.bf16.mxu1 %v7948_v26  ;;  %v848_v25 = vld [vmem:[#allocation4 + $0x670] sm:$0xff]  ;;  %v841_v26 = vld [vmem:[#allocation4 + $0x638] sm:$0xff] }
 0x395   : > { %v8058_v30 = vcombine.high %v840_v24, %v848_v25  ;;  %v8057_v36 = vcombine.low %v840_v24, %v848_v25  ;;  %v8059_v37 = vcombine.low %v841_v26, %v849_v27  ;;  %v945_v24 = vld [vmem:[#allocation4 + $0x978] sm:$0xff] }
 0x396   : > { %4325 = vmatpush1.bf16.msra.mxu0 %v7945_v31  ;;  %v8060_v31 = vcombine.high %v841_v26, %v849_v27  ;;  %v8139_v26 = vcombine.low %v921_v8, %v929_v9 }
 0x397   : > { %4411 = vmatpush1.bf16.msra.mxu1 %v7947_v32  ;;  %4326 = vmatprep.subr.bf16.mxu0 %v7962_v33  ;;  %v856_v32 = vld [vmem:[#allocation4 + $0x6b0] sm:$0xff] }
 0x398   : > { %4412 = vmatprep.subr.bf16.mxu1 %v7964_v34  ;;  %v864_v33 = vld [vmem:[#allocation4 + $0x6f0] sm:$0xff]  ;;  %v857_v34 = vld [vmem:[#allocation4 + $0x6b8] sm:$0xff] }
 0x399   : > { %v8074_v38 = vcombine.high %v856_v32, %v864_v33  ;;  %v8073_v45 = vcombine.low %v856_v32, %v864_v33  ;;  %v8075_v46 = vcombine.low %v857_v34, %v865_v35  ;;  %v961_v32 = vld [vmem:[#allocation4 + $0x9f8] sm:$0xff] }
 0x39a   : > { %4327 = vmatpush1.bf16.msra.mxu0 %v7961_v39  ;;  %v8076_v39 = vcombine.high %v857_v34, %v865_v35 }
 0x39b   : > { %4413 = vmatpush1.bf16.msra.mxu1 %v7963_v40  ;;  %4328 = vmatprep.subr.bf16.mxu0 %v7978_v41  ;;  %v872_v40 = vld [vmem:[#allocation4 + $0x730] sm:$0xff] }
 0x39c   : > { %4414 = vmatprep.subr.bf16.mxu1 %v7980_v42  ;;  %v880_v41 = vld [vmem:[#allocation4 + $0x770] sm:$0xff]  ;;  %v873_v42 = vld [vmem:[#allocation4 + $0x738] sm:$0xff] }
 0x39d   : > { %v8090_v47 = vcombine.high %v872_v40, %v880_v41  ;;  %v8089_v53 = vcombine.low %v872_v40, %v880_v41  ;;  %v8091_v54 = vcombine.low %v873_v42, %v881_v44 }
 0x39e   : > { %4329 = vmatpush1.bf16.msra.mxu0 %v7977_v48  ;;  %v8092_v48 = vcombine.high %v873_v42, %v881_v44  ;;  %v984_v44 = vld [vmem:[#allocation4 + $0xab0] sm:$0xff] }
 0x39f   : > { %4415 = vmatpush1.bf16.msra.mxu1 %v7979_v49  ;;  %4330 = vmatprep.subr.bf16.mxu0 %v7994_v50  ;;  %v888_v49 = vld [vmem:[#allocation4 + $0x7b0] sm:$0xff] }
 0x3a0   : > { %4416 = vmatprep.subr.bf16.mxu1 %v7996_v51  ;;  %v896_v50 = vld [vmem:[#allocation4 + $0x7f0] sm:$0xff]  ;;  %v889_v51 = vld [vmem:[#allocation4 + $0x7b8] sm:$0xff] }
 0x3a1   : > { %v8106_v55 = vcombine.high %v888_v49, %v896_v50  ;;  %v8105_v63 = vcombine.low %v888_v49, %v896_v50  ;;  %v8107_v2 = vcombine.low %v889_v51, %v897_v52  ;;  %v9369_v50 = vsub.s32 6, %v9325_v3 }
 0x3a2   : > { %4331 = vmatpush1.bf16.msra.mxu0 %v7993_v56  ;;  %v8108_v56 = vcombine.high %v889_v51, %v897_v52  ;;  %v9372_v51 = vsub.s32 5, %v9325_v3 }
 0x3a3   : > { %4417 = vmatpush1.bf16.msra.mxu1 %v7995_v59  ;;  %4332 = vmatprep.subr.bf16.mxu0 %v8010_v60  ;;  %v904_v59 = vld [vmem:[#allocation4 + $0x830] sm:$0xff] }
 0x3a4   : > { %4418 = vmatprep.subr.bf16.mxu1 %v8012_v61  ;;  %v912_v60 = vld [vmem:[#allocation4 + $0x870] sm:$0xff]  ;;  %v905_v61 = vld [vmem:[#allocation4 + $0x838] sm:$0xff] }
 0x3a5   : > { %v8122_v4 = vcombine.high %v904_v59, %v912_v60  ;;  %v8123_v10 = vcombine.low %v905_v61, %v913_v62 }
 0x3a6   : > { %4333 = vmatpush1.bf16.msra.mxu0 %v8009_v5  ;;  %v8124_v5 = vcombine.high %v905_v61, %v913_v62  ;;  %v1001_v61 = vld [vmem:[#allocation4 + $0xb38] sm:$0xff] }
 0x3a7   : > { %4419 = vmatpush1.bf16.msra.mxu1 %v8011_v6  ;;  %4334 = vmatprep.subr.bf16.mxu0 %v8026_v7  ;;  %v920_v6 = vld [vmem:[#allocation4 + $0x8b0] sm:$0xff]  ;;  %v1009_v62 = vld [vmem:[#allocation4 + $0xb78] sm:$0xff] }
 0x3a8   : > { %4420 = vmatprep.subr.bf16.mxu1 %v8028_v0  ;;  %v928_v7 = vld [vmem:[#allocation4 + $0x8f0] sm:$0xff]  ;;  %v8121_v0 = vcombine.low %v904_v59, %v912_v60 }
 0x3a9   : > { %v8138_v11 = vcombine.high %v920_v6, %v928_v7  ;;  %v8137_v25 = vcombine.low %v920_v6, %v928_v7  ;;  %v1008_v59 = vld [vmem:[#allocation4 + $0xb70] sm:$0xff] }
 0x3aa   : > { %4335 = vmatpush1.bf16.msra.mxu0 %v8025_v43  ;;  %v936_v43 = vld [vmem:[#allocation4 + $0x930] sm:$0xff] }
 0x3ab   : > { %4421 = vmatpush1.bf16.msra.mxu1 %v8027_v14  ;;  %4336 = vmatprep.subr.bf16.mxu0 %v8042_v20  ;;  %v944_v14 = vld [vmem:[#allocation4 + $0x970] sm:$0xff]  ;;  %v8140_v20 = vcombine.high %v921_v8, %v929_v9 }
 0x3ac   : > { %4422 = vmatprep.subr.bf16.mxu1 %v8044_v23  ;;  %v937_v23 = vld [vmem:[#allocation4 + $0x938] sm:$0xff]  ;;  %v8154_v27 = vcombine.high %v936_v43, %v944_v14  ;;  %v8153_v33 = vcombine.low %v936_v43, %v944_v14  ;;  %v1016_v8 = vld [vmem:[#allocation4 + $0xbb0] sm:$0xff] }
 0x3ad   : > { %v1024_v9 = vld [vmem:[#allocation4 + $0xbf0] sm:$0xff]  ;;  %v1017_v14 = vld [vmem:[#allocation4 + $0xbb8] sm:$0xff] }
 0x3ae   : > { %4337 = vmatpush1.bf16.msra.mxu0 %v8041_v28  ;;  %v8156_v28 = vcombine.high %v937_v23, %v945_v24 }
 0x3af   : > { %4423 = vmatpush1.bf16.msra.mxu1 %v8043_v29  ;;  %4338 = vmatprep.subr.bf16.mxu0 %v8058_v30  ;;  %v952_v29 = vld [vmem:[#allocation4 + $0x9b0] sm:$0xff] }
 0x3b0   : > { %4424 = vmatprep.subr.bf16.mxu1 %v8060_v31  ;;  %v960_v30 = vld [vmem:[#allocation4 + $0x9f0] sm:$0xff]  ;;  %v953_v31 = vld [vmem:[#allocation4 + $0x9b8] sm:$0xff] }
 0x3b1   : > { %v8170_v34 = vcombine.high %v952_v29, %v960_v30  ;;  %v8172_v35 = vcombine.high %v953_v31, %v961_v32  ;;  %v8171_v40 = vcombine.low %v953_v31, %v961_v32  ;;  %v8234_v32 = vcombine.high %v1016_v8, %v1024_v9 }
 0x3b2   : > { %4339 = vmatpush1.bf16.msra.mxu0 %v8057_v36  ;;  %v968_v36 = vld [vmem:[#allocation4 + $0xa30] sm:$0xff] }
 0x3b3   : > { %4425 = vmatpush1.bf16.msra.mxu1 %v8059_v37  ;;  %4340 = vmatprep.subr.bf16.mxu0 %v8074_v38  ;;  %v976_v37 = vld [vmem:[#allocation4 + $0xa70] sm:$0xff]  ;;  %v969_v38 = vld [vmem:[#allocation4 + $0xa38] sm:$0xff] }
 0x3b4   : > { %4426 = vmatprep.subr.bf16.mxu1 %v8076_v39  ;;  %v977_v39 = vld [vmem:[#allocation4 + $0xa78] sm:$0xff]  ;;  %v8186_v41 = vcombine.high %v968_v36, %v976_v37  ;;  %v8185_v49 = vcombine.low %v968_v36, %v976_v37  ;;  %v1032_v37 = vld [vmem:[#allocation4 + $0xc30] sm:$0xff] }
 0x3b5   : > { %v8188_v42 = vcombine.high %v969_v38, %v977_v39  ;;  %v8187_v52 = vcombine.low %v969_v38, %v977_v39  ;;  %v1040_v38 = vld [vmem:[#allocation4 + $0xc70] sm:$0xff] }
 0x3b6   : > { %4341 = vmatpush1.bf16.msra.mxu0 %v8073_v45  ;;  %v992_v45 = vld [vmem:[#allocation4 + $0xaf0] sm:$0xff] }
 0x3b7   : > { %4427 = vmatpush1.bf16.msra.mxu1 %v8075_v46  ;;  %4342 = vmatprep.subr.bf16.mxu0 %v8090_v47  ;;  %v9366_v46 = vsub.s32 4, %v9325_v3  ;;  %v985_v47 = vld [vmem:[#allocation4 + $0xab8] sm:$0xff] }
 0x3b8   : > { %4428 = vmatprep.subr.bf16.mxu1 %v8092_v48  ;;  %v993_v48 = vld [vmem:[#allocation4 + $0xaf8] sm:$0xff] }
 0x3b9   : > { %v1177_v60 = vrot.slane %v9333_v16, %v9366_v46 }
 0x3ba   : > { %4343 = vmatpush1.bf16.msra.mxu0 %v8089_v53  ;;  %v9375_v53 = vsub.s32 7, %v9325_v3 }
 0x3bb   : > { %4429 = vmatpush1.bf16.msra.mxu1 %v8091_v54  ;;  %4344 = vmatprep.subr.bf16.mxu0 %v8106_v55  ;;  %v8202_v54 = vcombine.high %v984_v44, %v992_v45  ;;  %v8204_v55 = vcombine.high %v985_v47, %v993_v48 }
 0x3bc   : > { %4430 = vmatprep.subr.bf16.mxu1 %v8108_v56  ;;  %v1000_v56 = vld [vmem:[#allocation4 + $0xb30] sm:$0xff]  ;;  %v1189_v3 = vrot.slane %v9333_v16, %v9375_v53 }
 0x3bd   : > { %v8218_v6 = vcombine.high %v1000_v56, %v1008_v59 }
 0x3be   : > { %4345 = vmatpush1.bf16.msra.mxu0 %v8105_v63  ;;  %v1185_v63 = vrot.slane %v9333_v16, %v9369_v50 }
 0x3bf   : > { %4431 = vmatpush1.bf16.msra.mxu1 %v8107_v2  ;;  %4357 = vmatprep.subr.bf16.mxu0 %v8122_v4  ;;  %v1181_v2 = vrot.slane %v9333_v16, %v9372_v51  ;;  %v8201_v4 = vcombine.low %v984_v44, %v992_v45  ;;  %v8219_v16 = vcombine.low %v1001_v61, %v1009_v62  ;;  %v1041_v44 = vld [vmem:[#allocation4 + $0xc78] sm:$0xff] }
 0x3c0   : > { %4443 = vmatprep.subr.bf16.mxu1 %v8124_v5  ;;  %v8203_v5 = vcombine.low %v985_v47, %v993_v48 }
 0x3c1   : > { %4347 = vmatmul.mubr.bf16.vlgmr.msra.gmra.mrb[16].mxu0 %v9294_v57 }
 0x3c2   : > { %4433 = vmatmul.mubr.bf16.vlgmr.msra.gmra.mrb[16].mxu1 %v9294_v57  ;;  %4358 = vmatpush1.bf16.msra.mxu0 %v8121_v0  ;;  %v8155_v57 = vcombine.low %v937_v23, %v945_v24  ;;  %v8220_v0 = vcombine.high %v1001_v61, %v1009_v62  ;;  %v1048_v62 = vld [vmem:[#allocation4 + $0xcb0] sm:$0xff] }
 0x3c3   : > { %4389 = vmatprep.mubr.bf16.mxu0 %v9300_v1  ;;  %4444 = vmatpush1.bf16.msra.mxu1 %v8123_v10 }
 0x3c4   : > { %4475 = vmatprep.mubr.bf16.mxu1 %v9300_v1  ;;  %4359 = vmatprep.subr.bf16.mxu0 %v8138_v11  ;;  %v8169_v1 = vcombine.low %v952_v29, %v960_v30 }
 0x3c5   : > { %4445 = vmatprep.subr.bf16.mxu1 %v8140_v20  ;;  %v1025_v20 = vld [vmem:[#allocation4 + $0xbf8] sm:$0xff] }
 0x3c6   : > { %4360 = vmatpush1.bf16.msra.mxu0 %v8137_v25  ;;  %v8236_v36 = vcombine.high %v1017_v14, %v1025_v20 }
 0x3c7   : > { %4446 = vmatpush1.bf16.msra.mxu1 %v8139_v26  ;;  %4361 = vmatprep.subr.bf16.mxu0 %v8154_v27  ;;  %v8217_v27 = vcombine.low %v1000_v56, %v1008_v59  ;;  %v8250_v56 = vcombine.high %v1032_v37, %v1040_v38 }
 0x3c8   : > { %4447 = vmatprep.subr.bf16.mxu1 %v8156_v28 }
 0x3ca   : > { %4362 = vmatpush1.bf16.msra.mxu0 %v8153_v33 }
 0x3cb   : > { %4448 = vmatpush1.bf16.msra.mxu1 %v8155_v57  ;;  %4363 = vmatprep.subr.bf16.mxu0 %v8170_v34 }
 0x3cc   : > { %4449 = vmatprep.subr.bf16.mxu1 %v8172_v35  ;;  %v8233_v35 = vcombine.low %v1016_v8, %v1024_v9  ;;  %v1064_v8 = vld [vmem:[#allocation4 + $0xd30] sm:$0xff] }
 0x3cd   : > { %v1072_v9 = vld [vmem:[#allocation4 + $0xd70] sm:$0xff] }
 0x3ce   : > { %4364 = vmatpush1.bf16.msra.mxu0 %v8169_v1 }
 0x3cf   : > { %4450 = vmatpush1.bf16.msra.mxu1 %v8171_v40  ;;  %4365 = vmatprep.subr.bf16.mxu0 %v8186_v41  ;;  %v8235_v41 = vcombine.low %v1017_v14, %v1025_v20  ;;  %v8282_v20 = vcombine.high %v1064_v8, %v1072_v9 }
 0x3d0   : > { %4451 = vmatprep.subr.bf16.mxu1 %v8188_v42  ;;  %v1033_v42 = vld [vmem:[#allocation4 + $0xc38] sm:$0xff] }
 0x3d1   : > { %v8252_v61 = vcombine.high %v1033_v42, %v1041_v44 }
 0x3d2   : > { %4366 = vmatpush1.bf16.msra.mxu0 %v8185_v49 }
 0x3d3   : > { %4452 = vmatpush1.bf16.msra.mxu1 %v8187_v52  ;;  %4367 = vmatprep.subr.bf16.mxu0 %v8202_v54 }
 0x3d4   : > { %v4047_v7 = vpop.f32.mrb[8].mxu0  ;;  %4453 = vmatprep.subr.bf16.mxu1 %v8204_v55 }
 0x3d5   : > { %v8395_v10 = vadd.f32 %v4047_v7, %v1177_v60  ;;  %v4133_v11 = vpop.f32.mrb[8].mxu1  ;;  %v4049_v43 = vpop.f32.mrb[9].mxu0 }
 0x3d6   : > { %v8399_v23 = vadd.f32 %v4133_v11, %v1185_v63  ;;  %v8396_v24 = vadd.f32 %v4049_v43, %v1181_v2  ;;  %v4135_v25 = vpop.f32.mrb[9].mxu1  ;;  %v4051_v26 = vpop.f32.mrb[10].mxu0  ;;  %4368 = vmatpush1.bf16.msra.mxu0 %v8201_v4  ;;  %v1049_v4 = vld [vmem:[#allocation4 + $0xcb8] sm:$0xff] }
 0x3d7   : > { %v8400_v28 = vadd.f32 %v4135_v25, %v1189_v3  ;;  %v8397_v29 = vadd.f32 %v4051_v26, %v1177_v60  ;;  %v4137_v30 = vpop.f32.mrb[10].mxu1  ;;  %4454 = vmatpush1.bf16.msra.mxu1 %v8203_v5  ;;  %v4053_v31 = vpop.f32.mrb[11].mxu0  ;;  %4369 = vmatprep.subr.bf16.mxu0 %v8218_v6  ;;  %v4490_v39 = vmax.f32 %v8395_v10, 0.0  ;;  %v8249_v5 = vcombine.low %v1032_v37, %v1040_v38  ;;  %v1065_v10 = vld [vmem:[#allocation4 + $0xd38] sm:$0xff]  ;;  %v1088_v25 = vld [vmem:[#allocation4 + $0xdf0] sm:$0xff] }
 0x3d8   : > { %v8401_v33 = vadd.f32 %v4137_v30, %v1185_v63  ;;  %v8398_v57 = vadd.f32 %v4053_v31, %v1181_v2  ;;  %v4139_v34 = vpop.f32.mrb[11].mxu1  ;;  %4455 = vmatprep.subr.bf16.mxu1 %v8220_v0  ;;  %v4492_v45 = vmax.f32 %v8399_v23, 0.0  ;;  %v4491_v47 = vmax.f32 %v8396_v24, 0.0  ;;  %v1056_v63 = vld [vmem:[#allocation4 + $0xcf0] sm:$0xff]  ;;  %v1073_v11 = vld [vmem:[#allocation4 + $0xd78] sm:$0xff] }
 0x3d9   : > { %v4506_v1 = vmax.f32 %v8397_v29, 0.0  ;;  %v8402_v40 = vadd.f32 %v4139_v34, %v1189_v3  ;;  %v4493_v52 = vmax.f32 %v8400_v28, 0.0  ;;  %v1057_v3 = vld [vmem:[#allocation4 + $0xcf8] sm:$0xff]  ;;  %v8251_v6 = vcombine.low %v1033_v42, %v1041_v44  ;;  %v1080_v24 = vld [vmem:[#allocation4 + $0xdb0] sm:$0xff] }
 0x3da   : > { %v4508_v48 = vmax.f32 %v8401_v33, 0.0  ;;  %v4507_v49 = vmax.f32 %v8398_v57, 0.0  ;;  %4370 = vmatpush1.bf16.msra.mxu0 %v8217_v27  ;;  %v8266_v7 = vcombine.high %v1048_v62, %v1056_v63  ;;  %v8268_v0 = vcombine.high %v1049_v4, %v1057_v3  ;;  %v1081_v26 = vld [vmem:[#allocation4 + $0xdb8] sm:$0xff]  ;;  %v1096_v31 = vld [vmem:[#allocation4 + $0xe30] sm:$0xff] }
 0x3db   : > { %v9385_v54 = vpack.c.bf16 %v4506_v1, %v4490_v39  ;;  %v4509_v55 = vmax.f32 %v8402_v40, 0.0  ;;  %4456 = vmatpush1.bf16.msra.mxu1 %v8219_v16  ;;  %4371 = vmatprep.subr.bf16.mxu0 %v8234_v32  ;;  %v8265_v43 = vcombine.low %v1048_v62, %v1056_v63  ;;  %v8267_v14 = vcombine.low %v1049_v4, %v1057_v3  ;;  %v1089_v27 = vld [vmem:[#allocation4 + $0xdf8] sm:$0xff]  ;;  %v1104_v32 = vld [vmem:[#allocation4 + $0xe70] sm:$0xff] }
 0x3dc   : > { %v9387_v59 = vpack.c.bf16 %v4508_v48, %v4492_v45  ;;  %v9389_v60 = vpack.c.bf16 %v4507_v49, %v4491_v47  ;;  %4457 = vmatprep.subr.bf16.mxu1 %v8236_v36  ;;  %v8284_v23 = vcombine.high %v1065_v10, %v1073_v11  ;;  %v8281_v16 = vcombine.low %v1064_v8, %v1072_v9  ;;  %v1097_v33 = vld [vmem:[#allocation4 + $0xe38] sm:$0xff]  ;;  %v1112_v38 = vld [vmem:[#allocation4 + $0xeb0] sm:$0xff] }
 0x3dd   : > { %v9391_v2 = vpack.c.bf16 %v4509_v55, %v4493_v52  ;;  %v8283_v28 = vcombine.low %v1065_v10, %v1073_v11  ;;  %v8298_v29 = vcombine.high %v1080_v24, %v1088_v25  ;;  %v8300_v30 = vcombine.high %v1081_v26, %v1089_v27  ;;  %v1105_v57 = vld [vmem:[#allocation4 + $0xe78] sm:$0xff]  ;;  %v1120_v39 = vld [vmem:[#allocation4 + $0xef0] sm:$0xff]  ;;  %v4537_v10 = vld [vmem:[%s9271_s25 + $0x18] sm:$0xff] }
 0x3de   : > { %4372 = vmatpush1.bf16.msra.mxu0 %v8233_v35  ;;  %v8297_v34 = vcombine.low %v1080_v24, %v1088_v25  ;;  %v8299_v35 = vcombine.low %v1081_v26, %v1089_v27  ;;  %v8314_v36 = vcombine.high %v1096_v31, %v1104_v32  ;;  %v8316_v37 = vcombine.high %v1097_v33, %v1105_v57  ;;  %v1113_v1 = vld [vmem:[#allocation4 + $0xeb8] sm:$0xff]  ;;  %v1128_v47 = vld [vmem:[#allocation4 + $0xf30] sm:$0xff]  ;;  %v4536_v24 = vld [vmem:[%s9271_s25 + $0x10] sm:$0xff] }
 0x3df   : > { %4458 = vmatpush1.bf16.msra.mxu1 %v8235_v41  ;;  %4373 = vmatprep.subr.bf16.mxu0 %v8250_v56  ;;  %v1121_v40 = vld [vmem:[#allocation4 + $0xef8] sm:$0xff]  ;;  %v8313_v41 = vcombine.low %v1096_v31, %v1104_v32  ;;  %v8315_v42 = vcombine.low %v1097_v33, %v1105_v57  ;;  %v8330_v44 = vcombine.high %v1112_v38, %v1120_v39  ;;  %v1136_v48 = vld [vmem:[#allocation4 + $0xf70] sm:$0xff]  ;;  %v5048_v26 = vunpack.c.l.s8.bf16 %v4536_v24 }
 0x3e0   : > { %4459 = vmatprep.subr.bf16.mxu1 %v8252_v61  ;;  %v8332_v45 = vcombine.high %v1113_v1, %v1121_v40  ;;  %v1129_v49 = vld [vmem:[#allocation4 + $0xf38] sm:$0xff]  ;;  %v8329_v55 = vcombine.low %v1112_v38, %v1120_v39  ;;  %v8331_v56 = vcombine.low %v1113_v1, %v1121_v40  ;;  %v8346_v61 = vcombine.high %v1128_v47, %v1136_v48  ;;  %v1144_v63 = vld [vmem:[#allocation4 + $0xfb0] sm:$0xff]  ;;  %v4553_v39 = vld [vmem:[%s9271_s25 + $0x98] sm:$0xff] }
 0x3e1   : > { %v1137_v52 = vld [vmem:[#allocation4 + $0xf78] sm:$0xff]  ;;  %v1152_v4 = vld [vmem:[#allocation4 + $0xff0] sm:$0xff]  ;;  %v5056_v31 = vunpack.c.h.s8.bf16 %v4536_v24  ;;  %v4568_v24 = vld [vmem:[%s9271_s25 + $0x110] sm:$0xff] }
 0x3e2   : > { %4374 = vmatpush1.bf16.msra.mxu0 %v8249_v5  ;;  %v8348_v62 = vcombine.high %v1129_v49, %v1137_v52  ;;  %v1145_v3 = vld [vmem:[#allocation4 + $0xfb8] sm:$0xff]  ;;  %v8361_v11 = vcombine.low %v1144_v63, %v1152_v4  ;;  %v4542_v33 = vld [vmem:[%s9271_s25 + $0x40] sm:$0xff] }
 0x3e3   : > { %4460 = vmatpush1.bf16.msra.mxu1 %v8251_v6  ;;  %4375 = vmatprep.subr.bf16.mxu0 %v8266_v7  ;;  %v1153_v5 = vld [vmem:[#allocation4 + $0xff8] sm:$0xff]  ;;  %v8345_v6 = vcombine.low %v1128_v47, %v1136_v48  ;;  %v8347_v7 = vcombine.low %v1129_v49, %v1137_v52  ;;  %v5070_v1 = vunpack.c.h.s8.bf16 %v4542_v33  ;;  %v5089_v52 = vunpack.c.h.s8.bf16 %v4553_v39 }
 0x3e4   : > { %4461 = vmatprep.subr.bf16.mxu1 %v8268_v0  ;;  %v8362_v0 = vcombine.high %v1144_v63, %v1152_v4  ;;  %v8364_v8 = vcombine.high %v1145_v3, %v1153_v5  ;;  %v4535_v9 = vld [vmem:[%s9271_s25 + $0x8] sm:$0xff]  ;;  %v4558_v4 = vld [vmem:[%s9271_s25 + $0xc0] sm:$0xff] }
 0x3e5   : > { %v5055_v27 = vunpack.c.h.s8.bf16 %v4535_v9  ;;  %v4551_v38 = vld [vmem:[%s9271_s25 + $0x88] sm:$0xff] }
 0x3e6   : > { %4376 = vmatpush1.bf16.msra.mxu0 %v8265_v43  ;;  %v8363_v43 = vcombine.low %v1145_v3, %v1153_v5  ;;  %v5087_v49 = vunpack.c.h.s8.bf16 %v4551_v38  ;;  %v4560_v5 = vld [vmem:[%s9271_s25 + $0xd0] sm:$0xff] }
 0x3e7   : > { %4462 = vmatpush1.bf16.msra.mxu1 %v8267_v14  ;;  %4377 = vmatprep.subr.bf16.mxu0 %v8282_v20  ;;  %v5047_v14 = vunpack.c.l.s8.bf16 %v4535_v9  ;;  %v4534_v20 = vld [vmem:[%s9271_s25] sm:$0xff]  ;;  %v4567_v9 = vld [vmem:[%s9271_s25 + $0x108] sm:$0xff] }
 0x3e8   : > { %4463 = vmatprep.subr.bf16.mxu1 %v8284_v23  ;;  %v5049_v23 = vunpack.c.l.s8.bf16 %v4537_v10  ;;  %v5046_v25 = vunpack.c.l.s8.bf16 %v4534_v20 }
 0x3ea   : > { %4378 = vmatpush1.bf16.msra.mxu0 %v8281_v16  ;;  %v4543_v16 = vld [vmem:[%s9271_s25 + $0x48] sm:$0xff] }
 0x3eb   : > { %4464 = vmatpush1.bf16.msra.mxu1 %v8283_v28  ;;  %4379 = vmatprep.subr.bf16.mxu0 %v8298_v29  ;;  %v5057_v28 = vunpack.c.h.s8.bf16 %v4537_v10  ;;  %v4545_v29 = vld [vmem:[%s9271_s25 + $0x58] sm:$0xff]  ;;  %v5063_v32 = vunpack.c.l.s8.bf16 %v4543_v16 }
 0x3ec   : > { %4465 = vmatprep.subr.bf16.mxu1 %v8300_v30  ;;  %v5054_v30 = vunpack.c.h.s8.bf16 %v4534_v20  ;;  %v5065_v57 = vunpack.c.l.s8.bf16 %v4545_v29  ;;  %v4569_v10 = vld [vmem:[%s9271_s25 + $0x118] sm:$0xff]  ;;  %v4566_v20 = vld [vmem:[%s9271_s25 + $0x100] sm:$0xff] }
 0x3ee   : > { %4380 = vmatpush1.bf16.msra.mxu0 %v8297_v34  ;;  %v4544_v34 = vld [vmem:[%s9271_s25 + $0x50] sm:$0xff] }
 0x3ef   : > { %4466 = vmatpush1.bf16.msra.mxu1 %v8299_v35  ;;  %4381 = vmatprep.subr.bf16.mxu0 %v8314_v36  ;;  %v5062_v35 = vunpack.c.l.s8.bf16 %v4542_v33  ;;  %v5071_v36 = vunpack.c.h.s8.bf16 %v4543_v16  ;;  %v5072_v40 = vunpack.c.h.s8.bf16 %v4544_v34  ;;  %v5121_v16 = vunpack.c.h.s8.bf16 %v4569_v10  ;;  %v4574_v33 = vld [vmem:[%s9271_s25 + $0x140] sm:$0xff] }
 0x3f0   : > { %4467 = vmatprep.subr.bf16.mxu1 %v8316_v37  ;;  %v5073_v37 = vunpack.c.h.s8.bf16 %v4545_v29  ;;  %v4577_v29 = vld [vmem:[%s9271_s25 + $0x158] sm:$0xff] }
 0x3f2   : > { %4382 = vmatpush1.bf16.msra.mxu0 %v8313_v41  ;;  %v5079_v41 = vunpack.c.l.s8.bf16 %v4551_v38  ;;  %v4583_v38 = vld [vmem:[%s9271_s25 + $0x188] sm:$0xff] }
 0x3f3   : > { %4468 = vmatpush1.bf16.msra.mxu1 %v8315_v42  ;;  %4383 = vmatprep.subr.bf16.mxu0 %v8330_v44  ;;  %v4550_v42 = vld [vmem:[%s9271_s25 + $0x80] sm:$0xff]  ;;  %v5081_v44 = vunpack.c.l.s8.bf16 %v4553_v39  ;;  %v4585_v39 = vld [vmem:[%s9271_s25 + $0x198] sm:$0xff] }
 0x3f4   : > { %4469 = vmatprep.subr.bf16.mxu1 %v8332_v45  ;;  %v4552_v45 = vld [vmem:[%s9271_s25 + $0x90] sm:$0xff]  ;;  %v5078_v47 = vunpack.c.l.s8.bf16 %v4550_v42 }
 0x3f5   : > { %v5080_v48 = vunpack.c.l.s8.bf16 %v4552_v45 }
 0x3f6   : > { %4384 = vmatpush1.bf16.msra.mxu0 %v8329_v55  ;;  %v4559_v55 = vld [vmem:[%s9271_s25 + $0xc8] sm:$0xff] }
 0x3f7   : > { %4470 = vmatpush1.bf16.msra.mxu1 %v8331_v56  ;;  %4385 = vmatprep.subr.bf16.mxu0 %v8346_v61  ;;  %v4561_v56 = vld [vmem:[%s9271_s25 + $0xd8] sm:$0xff]  ;;  %v5086_v61 = vunpack.c.h.s8.bf16 %v4550_v42  ;;  %v5095_v63 = vunpack.c.l.s8.bf16 %v4559_v55  ;;  %v4582_v42 = vld [vmem:[%s9271_s25 + $0x180] sm:$0xff] }
 0x3f8   : > { %4471 = vmatprep.subr.bf16.mxu1 %v8348_v62  ;;  %v5088_v62 = vunpack.c.h.s8.bf16 %v4552_v45  ;;  %v5097_v3 = vunpack.c.l.s8.bf16 %v4561_v56  ;;  %v4584_v45 = vld [vmem:[%s9271_s25 + $0x190] sm:$0xff] }
 0x3fa   : > { %4386 = vmatpush1.bf16.msra.mxu0 %v8345_v6  ;;  %v5094_v6 = vunpack.c.l.s8.bf16 %v4558_v4 }
 0x3fb   : > { %4472 = vmatpush1.bf16.msra.mxu1 %v8347_v7  ;;  %4387 = vmatprep.subr.bf16.mxu0 %v8362_v0  ;;  %v5096_v7 = vunpack.c.l.s8.bf16 %v4560_v5  ;;  %v5103_v0 = vunpack.c.h.s8.bf16 %v4559_v55  ;;  %v4591_v55 = vld [vmem:[%s9271_s25 + $0x1c8] sm:$0xff] }
 0x3fc   : > { %4473 = vmatprep.subr.bf16.mxu1 %v8364_v8  ;;  %v5105_v8 = vunpack.c.h.s8.bf16 %v4561_v56  ;;  %v4593_v56 = vld [vmem:[%s9271_s25 + $0x1d8] sm:$0xff] }
 0x3fe   : > { %4388 = vmatpush1.bf16.msra.mxu0 %v8361_v11  ;;  %v5102_v11 = vunpack.c.h.s8.bf16 %v4558_v4  ;;  %v4590_v4 = vld [vmem:[%s9271_s25 + $0x1c0] sm:$0xff] }
 0x3ff   : > { %4474 = vmatpush1.bf16.msra.mxu1 %v8363_v43  ;;  %6070 = vmatprep.subr.bf16.mxu0 %v5047_v14  ;;  %v5104_v43 = vunpack.c.h.s8.bf16 %v4560_v5  ;;  %v5111_v14 = vunpack.c.l.s8.bf16 %v4567_v9  ;;  %v4592_v5 = vld [vmem:[%s9271_s25 + $0x1d0] sm:$0xff] }
 0x400   : > { %6414 = vmatprep.subr.bf16.mxu1 %v5049_v23  ;;  %v5113_v23 = vunpack.c.l.s8.bf16 %v4569_v10  ;;  %v4601_v10 = vld [vmem:[%s9271_s25 + $0x218] sm:$0xff] }
 0x401   : > { %4390 = vmatmul.mubr.bf16.vlgmr.msra.gmra.mrb[16].mxu0 %v9296_v58 }
 0x402   : > { %4476 = vmatmul.mubr.bf16.vlgmr.msra.gmra.mrb[16].mxu1 %v9296_v58  ;;  %6071 = vmatpush1.bf16.msra.mxu0 %v5046_v25  ;;  %v5064_v58 = vunpack.c.l.s8.bf16 %v4544_v34  ;;  %v5110_v25 = vunpack.c.l.s8.bf16 %v4566_v20  ;;  %v4576_v34 = vld [vmem:[%s9271_s25 + $0x150] sm:$0xff] }
 0x403   : > { %6102 = vmatprep.mubr.bf16.mxu0 %v9353_v21  ;;  %6415 = vmatpush1.bf16.msra.mxu1 %v5048_v26  ;;  %v5112_v26 = vunpack.c.l.s8.bf16 %v4568_v24 }
 0x404   : > { %6446 = vmatprep.mubr.bf16.mxu1 %v9353_v21  ;;  %6072 = vmatprep.subr.bf16.mxu0 %v5055_v27  ;;  %v5119_v27 = vunpack.c.h.s8.bf16 %v4567_v9  ;;  %v4599_v9 = vld [vmem:[%s9271_s25 + $0x208] sm:$0xff] }
 0x405   : > { %6416 = vmatprep.subr.bf16.mxu1 %v5057_v28  ;;  %v4575_v28 = vld [vmem:[%s9271_s25 + $0x148] sm:$0xff] }
 0x406   : > { %6073 = vmatpush1.bf16.msra.mxu0 %v5054_v30  ;;  %v5118_v30 = vunpack.c.h.s8.bf16 %v4566_v20  ;;  %v4598_v20 = vld [vmem:[%s9271_s25 + $0x200] sm:$0xff] }
 0x407   : > { %6417 = vmatpush1.bf16.msra.mxu1 %v5056_v31  ;;  %6074 = vmatprep.subr.bf16.mxu0 %v5063_v32  ;;  %v5120_v31 = vunpack.c.h.s8.bf16 %v4568_v24  ;;  %v5127_v32 = vunpack.c.l.s8.bf16 %v4575_v28  ;;  %v4600_v24 = vld [vmem:[%s9271_s25 + $0x210] sm:$0xff] }
 0x408   : > { %6418 = vmatprep.subr.bf16.mxu1 %v5065_v57  ;;  %v5129_v57 = vunpack.c.l.s8.bf16 %v4577_v29 }
 0x40a   : > { %6075 = vmatpush1.bf16.msra.mxu0 %v5062_v35  ;;  %v5126_v35 = vunpack.c.l.s8.bf16 %v4574_v33 }
 0x40b   : > { %6419 = vmatpush1.bf16.msra.mxu1 %v5064_v58  ;;  %6076 = vmatprep.subr.bf16.mxu0 %v5071_v36  ;;  %v5128_v58 = vunpack.c.l.s8.bf16 %v4576_v34  ;;  %v5135_v36 = vunpack.c.h.s8.bf16 %v4575_v28  ;;  %v5185_v28 = vunpack.c.h.s8.bf16 %v4601_v10 }
 0x40c   : > { %6420 = vmatprep.subr.bf16.mxu1 %v5073_v37  ;;  %v5137_v37 = vunpack.c.h.s8.bf16 %v4577_v29  ;;  %v4609_v29 = vld [vmem:[%s9271_s25 + $0x258] sm:$0xff] }
 0x40e   : > { %6077 = vmatpush1.bf16.msra.mxu0 %v5070_v1  ;;  %v5134_v1 = vunpack.c.h.s8.bf16 %v4574_v33  ;;  %v4606_v33 = vld [vmem:[%s9271_s25 + $0x240] sm:$0xff] }
 0x40f   : > { %6421 = vmatpush1.bf16.msra.mxu1 %v5072_v40  ;;  %6078 = vmatprep.subr.bf16.mxu0 %v5079_v41  ;;  %v5136_v40 = vunpack.c.h.s8.bf16 %v4576_v34  ;;  %v5143_v41 = vunpack.c.l.s8.bf16 %v4583_v38  ;;  %v4608_v34 = vld [vmem:[%s9271_s25 + $0x250] sm:$0xff] }
 0x410   : > { %6422 = vmatprep.subr.bf16.mxu1 %v5081_v44  ;;  %v5145_v44 = vunpack.c.l.s8.bf16 %v4585_v39 }
 0x412   : > { %6079 = vmatpush1.bf16.msra.mxu0 %v5078_v47  ;;  %v5142_v47 = vunpack.c.l.s8.bf16 %v4582_v42 }
 0x413   : > { %6423 = vmatpush1.bf16.msra.mxu1 %v5080_v48  ;;  %6080 = vmatprep.subr.bf16.mxu0 %v5087_v49  ;;  %v5144_v48 = vunpack.c.l.s8.bf16 %v4584_v45  ;;  %v5151_v49 = vunpack.c.h.s8.bf16 %v4583_v38  ;;  %v4615_v38 = vld [vmem:[%s9271_s25 + $0x288] sm:$0xff] }
 0x414   : > { %6424 = vmatprep.subr.bf16.mxu1 %v5089_v52  ;;  %v5153_v52 = vunpack.c.h.s8.bf16 %v4585_v39  ;;  %v4617_v39 = vld [vmem:[%s9271_s25 + $0x298] sm:$0xff] }
 0x416   : > { %6081 = vmatpush1.bf16.msra.mxu0 %v5086_v61  ;;  %v5150_v61 = vunpack.c.h.s8.bf16 %v4582_v42  ;;  %v4614_v42 = vld [vmem:[%s9271_s25 + $0x280] sm:$0xff] }
 0x417   : > { %6425 = vmatpush1.bf16.msra.mxu1 %v5088_v62  ;;  %6082 = vmatprep.subr.bf16.mxu0 %v5095_v63  ;;  %v5152_v62 = vunpack.c.h.s8.bf16 %v4584_v45  ;;  %v5159_v63 = vunpack.c.l.s8.bf16 %v4591_v55  ;;  %v4616_v45 = vld [vmem:[%s9271_s25 + $0x290] sm:$0xff] }
 0x418   : > { %6426 = vmatprep.subr.bf16.mxu1 %v5097_v3  ;;  %v5161_v3 = vunpack.c.l.s8.bf16 %v4593_v56 }
 0x41a   : > { %6083 = vmatpush1.bf16.msra.mxu0 %v5094_v6  ;;  %v5158_v6 = vunpack.c.l.s8.bf16 %v4590_v4 }
 0x41b   : > { %6427 = vmatpush1.bf16.msra.mxu1 %v5096_v7  ;;  %6084 = vmatprep.subr.bf16.mxu0 %v5103_v0  ;;  %v5160_v7 = vunpack.c.l.s8.bf16 %v4592_v5  ;;  %v5167_v0 = vunpack.c.h.s8.bf16 %v4591_v55  ;;  %v5217_v55 = vunpack.c.h.s8.bf16 %v4617_v39 }
 0x41c   : > { %6428 = vmatprep.subr.bf16.mxu1 %v5105_v8  ;;  %v5169_v8 = vunpack.c.h.s8.bf16 %v4593_v56  ;;  %v4623_v56 = vld [vmem:[%s9271_s25 + $0x2c8] sm:$0xff] }
 0x41e   : > { %6085 = vmatpush1.bf16.msra.mxu0 %v5102_v11  ;;  %v5166_v11 = vunpack.c.h.s8.bf16 %v4590_v4 }
 0x41f   : > { %6429 = vmatpush1.bf16.msra.mxu1 %v5104_v43  ;;  %6086 = vmatprep.subr.bf16.mxu0 %v5111_v14  ;;  %v5168_v43 = vunpack.c.h.s8.bf16 %v4592_v5  ;;  %v5175_v14 = vunpack.c.l.s8.bf16 %v4599_v9 }
 0x420   : > { %6430 = vmatprep.subr.bf16.mxu1 %v5113_v23  ;;  %v5177_v23 = vunpack.c.l.s8.bf16 %v4601_v10  ;;  %v4624_v10 = vld [vmem:[%s9271_s25 + $0x2d0] sm:$0xff] }
 0x422   : > { %6087 = vmatpush1.bf16.msra.mxu0 %v5110_v25  ;;  %v5174_v25 = vunpack.c.l.s8.bf16 %v4598_v20 }
 0x423   : > { %6431 = vmatpush1.bf16.msra.mxu1 %v5112_v26  ;;  %6088 = vmatprep.subr.bf16.mxu0 %v5119_v27  ;;  %v5176_v26 = vunpack.c.l.s8.bf16 %v4600_v24  ;;  %v5183_v27 = vunpack.c.h.s8.bf16 %v4599_v9 }
 0x424   : > { %6432 = vmatprep.subr.bf16.mxu1 %v5121_v16  ;;  %v4607_v16 = vld [vmem:[%s9271_s25 + $0x248] sm:$0xff] }
 0x426   : > { %6089 = vmatpush1.bf16.msra.mxu0 %v5118_v30  ;;  %v5182_v30 = vunpack.c.h.s8.bf16 %v4598_v20 }
 0x427   : > { %6433 = vmatpush1.bf16.msra.mxu1 %v5120_v31  ;;  %6090 = vmatprep.subr.bf16.mxu0 %v5127_v32  ;;  %v5184_v31 = vunpack.c.h.s8.bf16 %v4600_v24  ;;  %v5191_v32 = vunpack.c.l.s8.bf16 %v4607_v16 }
 0x428   : > { %6434 = vmatprep.subr.bf16.mxu1 %v5129_v57  ;;  %v5193_v57 = vunpack.c.l.s8.bf16 %v4609_v29 }
 0x42a   : > { %6091 = vmatpush1.bf16.msra.mxu0 %v5126_v35  ;;  %v5190_v35 = vunpack.c.l.s8.bf16 %v4606_v33 }
 0x42b   : > { %6435 = vmatpush1.bf16.msra.mxu1 %v5128_v58  ;;  %6092 = vmatprep.subr.bf16.mxu0 %v5135_v36  ;;  %v5192_v58 = vunpack.c.l.s8.bf16 %v4608_v34  ;;  %v5199_v36 = vunpack.c.h.s8.bf16 %v4607_v16 }
 0x42c   : > { %6436 = vmatprep.subr.bf16.mxu1 %v5137_v37  ;;  %v5201_v37 = vunpack.c.h.s8.bf16 %v4609_v29 }
 0x42e   : > { %6093 = vmatpush1.bf16.msra.mxu0 %v5134_v1  ;;  %v5198_v1 = vunpack.c.h.s8.bf16 %v4606_v33 }
 0x42f   : > { %6437 = vmatpush1.bf16.msra.mxu1 %v5136_v40  ;;  %6094 = vmatprep.subr.bf16.mxu0 %v5143_v41  ;;  %v5200_v40 = vunpack.c.h.s8.bf16 %v4608_v34  ;;  %v5207_v41 = vunpack.c.l.s8.bf16 %v4615_v38 }
 0x430   : > { %6438 = vmatprep.subr.bf16.mxu1 %v5145_v44  ;;  %v5209_v44 = vunpack.c.l.s8.bf16 %v4617_v39  ;;  %v5232_v39 = vunpack.c.h.s8.bf16 %v4624_v10 }
 0x432   : > { %6095 = vmatpush1.bf16.msra.mxu0 %v5142_v47  ;;  %v5206_v47 = vunpack.c.l.s8.bf16 %v4614_v42 }
 0x433   : > { %6439 = vmatpush1.bf16.msra.mxu1 %v5144_v48  ;;  %6096 = vmatprep.subr.bf16.mxu0 %v5151_v49  ;;  %v9445_v48 = vld [vmem:[#allocation6 + $0x8] sm:$0xff]  ;;  %v5208_v49 = vunpack.c.l.s8.bf16 %v4616_v45 }
 0x434   : > { %6440 = vmatprep.subr.bf16.mxu1 %v5153_v52  ;;  %v5215_v52 = vunpack.c.h.s8.bf16 %v4615_v38  ;;  %v1197_v4 = vrot.slane %v9445_v48, %v9336_v17  ;;  %v1205_v5 = vrot.slane %v9445_v48, %v9339_v18 }
 0x436   : > { %6097 = vmatpush1.bf16.msra.mxu0 %v5150_v61  ;;  %v1193_v61 = vrot.slane %v9445_v48, %v9328_v12 }
 0x437   : > { %6441 = vmatpush1.bf16.msra.mxu1 %v5152_v62  ;;  %6098 = vmatprep.subr.bf16.mxu0 %v5159_v63  ;;  %v4625_v62 = vld [vmem:[%s9271_s25 + $0x2d8] sm:$0xff]  ;;  %v1201_v63 = vrot.slane %v9445_v48, %v9331_v13 }
 0x438   : > { %6442 = vmatprep.subr.bf16.mxu1 %v5161_v3  ;;  %v5214_v3 = vunpack.c.h.s8.bf16 %v4614_v42  ;;  %v5225_v9 = vunpack.c.l.s8.bf16 %v4625_v62  ;;  %v5233_v34 = vunpack.c.h.s8.bf16 %v4625_v62 }
 0x43a   : > { %6099 = vmatpush1.bf16.msra.mxu0 %v5158_v6  ;;  %v5216_v6 = vunpack.c.h.s8.bf16 %v4616_v45 }
 0x43b   : > { %6443 = vmatpush1.bf16.msra.mxu1 %v5160_v7  ;;  %6100 = vmatprep.subr.bf16.mxu0 %v5167_v0  ;;  %v5223_v7 = vunpack.c.l.s8.bf16 %v4623_v56  ;;  %v4622_v0 = vld [vmem:[%s9271_s25 + $0x2c0] sm:$0xff] }
 0x43c   : > { %6444 = vmatprep.subr.bf16.mxu1 %v5169_v8 }
 0x43e   : > { %6101 = vmatpush1.bf16.msra.mxu0 %v5166_v11 }
 0x43f   : > { %6445 = vmatpush1.bf16.msra.mxu1 %v5168_v43  ;;  %6113 = vmatprep.subr.bf16.mxu0 %v5175_v14 }
 0x440   : > { %6457 = vmatprep.subr.bf16.mxu1 %v5177_v23 }
 0x441   : > { %6103 = vmatmul.mubr.bf16.vlgmr.msra.gmra.mrb[20].mxu0 %v9349_v15 }
 0x442   : > { %6447 = vmatmul.mubr.bf16.vlgmr.msra.gmra.mrb[20].mxu1 %v9349_v15  ;;  %6114 = vmatpush1.bf16.msra.mxu0 %v5174_v25 }
 0x443   : > { %6145 = vmatprep.mubr.bf16.mxu0 %v9355_v22  ;;  %6458 = vmatpush1.bf16.msra.mxu1 %v5176_v26  ;;  %v5222_v26 = vunpack.c.l.s8.bf16 %v4622_v0 }
 0x444   : > { %6489 = vmatprep.mubr.bf16.mxu1 %v9355_v22  ;;  %6115 = vmatprep.subr.bf16.mxu0 %v5183_v27 }
 0x445   : > { %6459 = vmatprep.subr.bf16.mxu1 %v5185_v28 }
 0x446   : > { %6116 = vmatpush1.bf16.msra.mxu0 %v5182_v30  ;;  %v5224_v30 = vunpack.c.l.s8.bf16 %v4624_v10 }
 0x447   : > { %6460 = vmatpush1.bf16.msra.mxu1 %v5184_v31  ;;  %6117 = vmatprep.subr.bf16.mxu0 %v5191_v32  ;;  %v5231_v31 = vunpack.c.h.s8.bf16 %v4623_v56 }
 0x448   : > { %6461 = vmatprep.subr.bf16.mxu1 %v5193_v57 }
 0x44a   : > { %6118 = vmatpush1.bf16.msra.mxu0 %v5190_v35  ;;  %v5230_v35 = vunpack.c.h.s8.bf16 %v4622_v0  ;;  %v4639_v0 = vld [vmem:[%s9271_s25 + $0x348] sm:$0xff] }
 0x44b   : > { %6462 = vmatpush1.bf16.msra.mxu1 %v5192_v58  ;;  %6119 = vmatprep.subr.bf16.mxu0 %v5199_v36  ;;  %v4631_v58 = vld [vmem:[%s9271_s25 + $0x308] sm:$0xff] }
 0x44c   : > { %6463 = vmatprep.subr.bf16.mxu1 %v5201_v37 }
 0x44e   : > { %6120 = vmatpush1.bf16.msra.mxu0 %v5198_v1  ;;  %v4633_v1 = vld [vmem:[%s9271_s25 + $0x318] sm:$0xff] }
 0x44f   : > { %6464 = vmatpush1.bf16.msra.mxu1 %v5200_v40  ;;  %6121 = vmatprep.subr.bf16.mxu0 %v5207_v41  ;;  %v5241_v62 = vunpack.c.l.s8.bf16 %v4633_v1 }
 0x450   : > { %6465 = vmatprep.subr.bf16.mxu1 %v5209_v44 }
 0x452   : > { %6122 = vmatpush1.bf16.msra.mxu0 %v5206_v47 }
 0x453   : > { %6466 = vmatpush1.bf16.msra.mxu1 %v5208_v49  ;;  %6123 = vmatprep.subr.bf16.mxu0 %v5215_v52  ;;  %v5239_v52 = vunpack.c.l.s8.bf16 %v4631_v58 }
 0x454   : > { %v4219_v8 = vpop.f32.mrb[12].mxu0  ;;  %6467 = vmatprep.subr.bf16.mxu1 %v5217_v55  ;;  %v4630_v55 = vld [vmem:[%s9271_s25 + $0x300] sm:$0xff] }
 0x455   : > { %v8403_v11 = vadd.f32 %v4219_v8, %v1193_v61  ;;  %v4305_v43 = vpop.f32.mrb[12].mxu1  ;;  %v4221_v14 = vpop.f32.mrb[13].mxu0  ;;  %v4641_v8 = vld [vmem:[%s9271_s25 + $0x358] sm:$0xff] }
 0x456   : > { %v8407_v20 = vadd.f32 %v4305_v43, %v1201_v63  ;;  %v8404_v23 = vadd.f32 %v4221_v14, %v1197_v4  ;;  %v4307_v24 = vpop.f32.mrb[13].mxu1  ;;  %v4223_v25 = vpop.f32.mrb[14].mxu0  ;;  %6124 = vmatpush1.bf16.msra.mxu0 %v5214_v3  ;;  %v5238_v3 = vunpack.c.l.s8.bf16 %v4630_v55  ;;  %v4638_v43 = vld [vmem:[%s9271_s25 + $0x340] sm:$0xff]  ;;  %v5257_v14 = vunpack.c.l.s8.bf16 %v4641_v8 }
 0x457   : > { %v8408_v27 = vadd.f32 %v4307_v24, %v1205_v5  ;;  %v8405_v16 = vadd.f32 %v4223_v25, %v1193_v61  ;;  %v4309_v28 = vpop.f32.mrb[14].mxu1  ;;  %6468 = vmatpush1.bf16.msra.mxu1 %v5216_v6  ;;  %v4225_v29 = vpop.f32.mrb[15].mxu0  ;;  %6125 = vmatprep.subr.bf16.mxu0 %v5223_v7  ;;  %v4494_v36 = vmax.f32 %v8403_v11, 0.0  ;;  %v5247_v6 = vunpack.c.h.s8.bf16 %v4631_v58 }
 0x458   : > { %v8409_v32 = vadd.f32 %v4309_v28, %v1201_v63  ;;  %v8406_v33 = vadd.f32 %v4225_v29, %v1197_v4  ;;  %v4311_v57 = vpop.f32.mrb[15].mxu1  ;;  %6469 = vmatprep.subr.bf16.mxu1 %v5225_v9  ;;  %v4496_v40 = vmax.f32 %v8407_v20, 0.0  ;;  %v4495_v41 = vmax.f32 %v8404_v23, 0.0  ;;  %v4632_v63 = vld [vmem:[%s9271_s25 + $0x310] sm:$0xff] }
 0x459   : > { %v4510_v37 = vmax.f32 %v8405_v16, 0.0  ;;  %v8410_v38 = vadd.f32 %v4311_v57, %v1205_v5  ;;  %v4497_v45 = vmax.f32 %v8408_v27, 0.0  ;;  %v5240_v5 = vunpack.c.l.s8.bf16 %v4632_v63  ;;  %v4640_v20 = vld [vmem:[%s9271_s25 + $0x350] sm:$0xff]  ;;  %v4647_v27 = vld [vmem:[%s9271_s25 + $0x388] sm:$0xff]  ;;  %v4649_v16 = vld [vmem:[%s9271_s25 + $0x398] sm:$0xff] }
 0x45a   : > { %v4512_v42 = vmax.f32 %v8409_v32, 0.0  ;;  %v4511_v44 = vmax.f32 %v8406_v33, 0.0  ;;  %6126 = vmatpush1.bf16.msra.mxu0 %v5222_v26  ;;  %v5249_v7 = vunpack.c.h.s8.bf16 %v4633_v1  ;;  %v5246_v9 = vunpack.c.h.s8.bf16 %v4630_v55  ;;  %v4648_v33 = vld [vmem:[%s9271_s25 + $0x390] sm:$0xff]  ;;  %v4663_v55 = vld [vmem:[%s9271_s25 + $0x408] sm:$0xff] }
 0x45b   : > { %v9461_v47 = vpack.c.bf16 %v4510_v37, %v4494_v36  ;;  %v4513_v49 = vmax.f32 %v8410_v38, 0.0  ;;  %6470 = vmatpush1.bf16.msra.mxu1 %v5224_v30  ;;  %6127 = vmatprep.subr.bf16.mxu0 %v5231_v31  ;;  %v5248_v10 = vunpack.c.h.s8.bf16 %v4632_v63  ;;  %v5255_v11 = vunpack.c.l.s8.bf16 %v4639_v0  ;;  %v4646_v31 = vld [vmem:[%s9271_s25 + $0x380] sm:$0xff]  ;;  %v4655_v36 = vld [vmem:[%s9271_s25 + $0x3c8] sm:$0xff]  ;;  %v4657_v37 = vld [vmem:[%s9271_s25 + $0x3d8] sm:$0xff] }
 0x45c   : > { %v9464_v56 = vpack.c.bf16 %v4512_v42, %v4496_v40  ;;  %v9466_v61 = vpack.c.bf16 %v4511_v44, %v4495_v41  ;;  %6471 = vmatprep.subr.bf16.mxu1 %v5233_v34  ;;  %v5254_v23 = vunpack.c.l.s8.bf16 %v4638_v43  ;;  %v5256_v24 = vunpack.c.l.s8.bf16 %v4640_v20  ;;  %v4654_v40 = vld [vmem:[%s9271_s25 + $0x3c0] sm:$0xff]  ;;  %v4656_v42 = vld [vmem:[%s9271_s25 + $0x3d0] sm:$0xff] }
 0x45d   : > { %v9469_v4 = vpack.c.bf16 %v4513_v49, %v4497_v45  ;;  %v5263_v25 = vunpack.c.h.s8.bf16 %v4639_v0  ;;  %v5265_v26 = vunpack.c.h.s8.bf16 %v4641_v8  ;;  %v5262_v28 = vunpack.c.h.s8.bf16 %v4638_v43  ;;  %v4664_v0 = vld [vmem:[%s9271_s25 + $0x410] sm:$0xff] }
 0x45e   : > { %6128 = vmatpush1.bf16.msra.mxu0 %v5230_v35  ;;  %v5264_v29 = vunpack.c.h.s8.bf16 %v4640_v20  ;;  %v5271_v30 = vunpack.c.l.s8.bf16 %v4647_v27  ;;  %v5273_v32 = vunpack.c.l.s8.bf16 %v4649_v16  ;;  %v5270_v57 = vunpack.c.l.s8.bf16 %v4646_v31 }
 0x45f   : > { %6472 = vmatpush1.bf16.msra.mxu1 %v5232_v39  ;;  %6129 = vmatprep.subr.bf16.mxu0 %v5239_v52  ;;  %v5272_v34 = vunpack.c.l.s8.bf16 %v4648_v33  ;;  %v5279_v35 = vunpack.c.h.s8.bf16 %v4647_v27  ;;  %v5281_v58 = vunpack.c.h.s8.bf16 %v4649_v16  ;;  %v5278_v38 = vunpack.c.h.s8.bf16 %v4646_v31  ;;  %v4672_v27 = vld [vmem:[%s9271_s25 + $0x450] sm:$0xff]  ;;  %v4679_v31 = vld [vmem:[%s9271_s25 + $0x488] sm:$0xff] }
 0x460   : > { %6473 = vmatprep.subr.bf16.mxu1 %v5241_v62  ;;  %v5280_v39 = vunpack.c.h.s8.bf16 %v4648_v33  ;;  %v5287_v1 = vunpack.c.l.s8.bf16 %v4655_v36  ;;  %v5289_v41 = vunpack.c.l.s8.bf16 %v4657_v37  ;;  %v5286_v44 = vunpack.c.l.s8.bf16 %v4654_v40  ;;  %v4665_v62 = vld [vmem:[%s9271_s25 + $0x418] sm:$0xff] }
 0x461   : > { %v5288_v45 = vunpack.c.l.s8.bf16 %v4656_v42  ;;  %v5295_v49 = vunpack.c.h.s8.bf16 %v4655_v36  ;;  %v5297_v52 = vunpack.c.h.s8.bf16 %v4657_v37  ;;  %v5294_v63 = vunpack.c.h.s8.bf16 %v4654_v40  ;;  %v4680_v36 = vld [vmem:[%s9271_s25 + $0x490] sm:$0xff]  ;;  %v4687_v40 = vld [vmem:[%s9271_s25 + $0x4c8] sm:$0xff] }
 0x462   : > { %6130 = vmatpush1.bf16.msra.mxu0 %v5238_v3  ;;  %v5296_v3 = vunpack.c.h.s8.bf16 %v4656_v42  ;;  %v5313_v43 = vunpack.c.h.s8.bf16 %v4665_v62 }
 0x463   : > { %6474 = vmatpush1.bf16.msra.mxu1 %v5240_v5  ;;  %6131 = vmatprep.subr.bf16.mxu0 %v5247_v6  ;;  %v5303_v5 = vunpack.c.l.s8.bf16 %v4663_v55  ;;  %v4662_v6 = vld [vmem:[%s9271_s25 + $0x400] sm:$0xff] }
 0x464   : > { %6475 = vmatprep.subr.bf16.mxu1 %v5249_v7  ;;  %v5305_v7 = vunpack.c.l.s8.bf16 %v4665_v62  ;;  %v5302_v8 = vunpack.c.l.s8.bf16 %v4662_v6  ;;  %v5310_v20 = vunpack.c.h.s8.bf16 %v4662_v6  ;;  %v4695_v6 = vld [vmem:[%s9271_s25 + $0x508] sm:$0xff] }
 0x466   : > { %6132 = vmatpush1.bf16.msra.mxu0 %v5246_v9  ;;  %v5304_v9 = vunpack.c.l.s8.bf16 %v4664_v0 }
 0x467   : > { %6476 = vmatpush1.bf16.msra.mxu1 %v5248_v10  ;;  %6133 = vmatprep.subr.bf16.mxu0 %v5255_v11  ;;  %v5311_v10 = vunpack.c.h.s8.bf16 %v4663_v55  ;;  %v4671_v11 = vld [vmem:[%s9271_s25 + $0x448] sm:$0xff]  ;;  %v4688_v55 = vld [vmem:[%s9271_s25 + $0x4d0] sm:$0xff] }
 0x468   : > { %6477 = vmatprep.subr.bf16.mxu1 %v5257_v14  ;;  %v4673_v14 = vld [vmem:[%s9271_s25 + $0x458] sm:$0xff] }
 0x46a   : > { %6134 = vmatpush1.bf16.msra.mxu0 %v5254_v23  ;;  %v5312_v23 = vunpack.c.h.s8.bf16 %v4664_v0 }
 0x46b   : > { %6478 = vmatpush1.bf16.msra.mxu1 %v5256_v24  ;;  %6135 = vmatprep.subr.bf16.mxu0 %v5263_v25  ;;  %v5319_v24 = vunpack.c.l.s8.bf16 %v4671_v11  ;;  %v4670_v25 = vld [vmem:[%s9271_s25 + $0x440] sm:$0xff] }
 0x46c   : > { %6479 = vmatprep.subr.bf16.mxu1 %v5265_v26  ;;  %v5321_v26 = vunpack.c.l.s8.bf16 %v4673_v14  ;;  %v5318_v16 = vunpack.c.l.s8.bf16 %v4670_v25  ;;  %v5326_v33 = vunpack.c.h.s8.bf16 %v4670_v25  ;;  %v4703_v25 = vld [vmem:[%s9271_s25 + $0x548] sm:$0xff] }
 0x46e   : > { %6136 = vmatpush1.bf16.msra.mxu0 %v5262_v28  ;;  %v5320_v28 = vunpack.c.l.s8.bf16 %v4672_v27 }
 0x46f   : > { %6480 = vmatpush1.bf16.msra.mxu1 %v5264_v29  ;;  %6137 = vmatprep.subr.bf16.mxu0 %v5271_v30  ;;  %v5327_v29 = vunpack.c.h.s8.bf16 %v4671_v11  ;;  %v5329_v30 = vunpack.c.h.s8.bf16 %v4673_v14 }
 0x470   : > { %6481 = vmatprep.subr.bf16.mxu1 %v5273_v32  ;;  %v4681_v32 = vld [vmem:[%s9271_s25 + $0x498] sm:$0xff] }
 0x472   : > { %6138 = vmatpush1.bf16.msra.mxu0 %v5270_v57  ;;  %v5328_v57 = vunpack.c.h.s8.bf16 %v4672_v27 }
 0x473   : > { %6482 = vmatpush1.bf16.msra.mxu1 %v5272_v34  ;;  %6139 = vmatprep.subr.bf16.mxu0 %v5279_v35  ;;  %v5335_v34 = vunpack.c.l.s8.bf16 %v4679_v31  ;;  %v4678_v35 = vld [vmem:[%s9271_s25 + $0x480] sm:$0xff] }
 0x474   : > { %6483 = vmatprep.subr.bf16.mxu1 %v5281_v58  ;;  %v5337_v58 = vunpack.c.l.s8.bf16 %v4681_v32  ;;  %v5334_v37 = vunpack.c.l.s8.bf16 %v4678_v35  ;;  %v5342_v42 = vunpack.c.h.s8.bf16 %v4678_v35  ;;  %v4711_v35 = vld [vmem:[%s9271_s25 + $0x588] sm:$0xff] }
 0x476   : > { %6140 = vmatpush1.bf16.msra.mxu0 %v5278_v38  ;;  %v5336_v38 = vunpack.c.l.s8.bf16 %v4680_v36 }
 0x477   : > { %6484 = vmatpush1.bf16.msra.mxu1 %v5280_v39  ;;  %6141 = vmatprep.subr.bf16.mxu0 %v5287_v1  ;;  %v5343_v39 = vunpack.c.h.s8.bf16 %v4679_v31  ;;  %v5345_v1 = vunpack.c.h.s8.bf16 %v4681_v32  ;;  %v4704_v31 = vld [vmem:[%s9271_s25 + $0x550] sm:$0xff] }
 0x478   : > { %6485 = vmatprep.subr.bf16.mxu1 %v5289_v41  ;;  %v4689_v41 = vld [vmem:[%s9271_s25 + $0x4d8] sm:$0xff] }
 0x47a   : > { %6142 = vmatpush1.bf16.msra.mxu0 %v5286_v44  ;;  %v5344_v44 = vunpack.c.h.s8.bf16 %v4680_v36 }
 0x47b   : > { %6486 = vmatpush1.bf16.msra.mxu1 %v5288_v45  ;;  %6143 = vmatprep.subr.bf16.mxu0 %v5295_v49  ;;  %v5351_v45 = vunpack.c.l.s8.bf16 %v4687_v40  ;;  %v4686_v49 = vld [vmem:[%s9271_s25 + $0x4c0] sm:$0xff] }
 0x47c   : > { %6487 = vmatprep.subr.bf16.mxu1 %v5297_v52  ;;  %v5353_v52 = vunpack.c.l.s8.bf16 %v4689_v41  ;;  %v5350_v62 = vunpack.c.l.s8.bf16 %v4686_v49  ;;  %v5358_v0 = vunpack.c.h.s8.bf16 %v4686_v49  ;;  %v4719_v49 = vld [vmem:[%s9271_s25 + $0x5c8] sm:$0xff] }
 0x47e   : > { %6144 = vmatpush1.bf16.msra.mxu0 %v5294_v63  ;;  %v5352_v63 = vunpack.c.l.s8.bf16 %v4688_v55 }
 0x47f   : > { %6488 = vmatpush1.bf16.msra.mxu1 %v5296_v3  ;;  %6156 = vmatprep.subr.bf16.mxu0 %v5303_v5  ;;  %v5359_v3 = vunpack.c.h.s8.bf16 %v4687_v40  ;;  %v5361_v5 = vunpack.c.h.s8.bf16 %v4689_v41  ;;  %v4712_v40 = vld [vmem:[%s9271_s25 + $0x590] sm:$0xff] }
 0x480   : > { %6500 = vmatprep.subr.bf16.mxu1 %v5305_v7  ;;  %v4697_v7 = vld [vmem:[%s9271_s25 + $0x518] sm:$0xff] }
 0x481   : > { %6146 = vmatmul.mubr.bf16.vlgmr.msra.gmra.mrb[20].mxu0 %v9351_v19  ;;  %v5369_v11 = vunpack.c.l.s8.bf16 %v4697_v7 }
 0x482   : > { %6490 = vmatmul.mubr.bf16.vlgmr.msra.gmra.mrb[20].mxu1 %v9351_v19  ;;  %6157 = vmatpush1.bf16.msra.mxu0 %v5302_v8  ;;  %v5360_v8 = vunpack.c.h.s8.bf16 %v4688_v55 }
 0x483   : > { %6188 = vmatprep.mubr.bf16.mxu0 %v9389_v60  ;;  %6501 = vmatpush1.bf16.msra.mxu1 %v5304_v9  ;;  %v5367_v9 = vunpack.c.l.s8.bf16 %v4695_v6 }
 0x484   : > { %6532 = vmatprep.mubr.bf16.mxu1 %v9389_v60  ;;  %6158 = vmatprep.subr.bf16.mxu0 %v5311_v10  ;;  %v4694_v10 = vld [vmem:[%s9271_s25 + $0x500] sm:$0xff] }
 0x485   : > { %6502 = vmatprep.subr.bf16.mxu1 %v5313_v43  ;;  %v4696_v43 = vld [vmem:[%s9271_s25 + $0x510] sm:$0xff]  ;;  %v5366_v14 = vunpack.c.l.s8.bf16 %v4694_v10  ;;  %v5374_v27 = vunpack.c.h.s8.bf16 %v4694_v10  ;;  %v4727_v10 = vld [vmem:[%s9271_s25 + $0x608] sm:$0xff] }
 0x486   : > { %6159 = vmatpush1.bf16.msra.mxu0 %v5310_v20  ;;  %v5368_v20 = vunpack.c.l.s8.bf16 %v4696_v43 }
 0x487   : > { %6503 = vmatpush1.bf16.msra.mxu1 %v5312_v23  ;;  %6160 = vmatprep.subr.bf16.mxu0 %v5319_v24  ;;  %v5375_v23 = vunpack.c.h.s8.bf16 %v4695_v6  ;;  %v5377_v24 = vunpack.c.h.s8.bf16 %v4697_v7  ;;  %v4720_v6 = vld [vmem:[%s9271_s25 + $0x5d0] sm:$0xff] }
 0x488   : > { %6504 = vmatprep.subr.bf16.mxu1 %v5321_v26  ;;  %v4705_v26 = vld [vmem:[%s9271_s25 + $0x558] sm:$0xff] }
 0x48a   : > { %6161 = vmatpush1.bf16.msra.mxu0 %v5318_v16  ;;  %v5376_v16 = vunpack.c.h.s8.bf16 %v4696_v43 }
 0x48b   : > { %6505 = vmatpush1.bf16.msra.mxu1 %v5320_v28  ;;  %6162 = vmatprep.subr.bf16.mxu0 %v5327_v29  ;;  %v5383_v28 = vunpack.c.l.s8.bf16 %v4703_v25  ;;  %v4702_v29 = vld [vmem:[%s9271_s25 + $0x540] sm:$0xff] }
 0x48c   : > { %6506 = vmatprep.subr.bf16.mxu1 %v5329_v30  ;;  %v5385_v30 = vunpack.c.l.s8.bf16 %v4705_v26  ;;  %v5382_v32 = vunpack.c.l.s8.bf16 %v4702_v29  ;;  %v5390_v36 = vunpack.c.h.s8.bf16 %v4702_v29 }
 0x48e   : > { %6163 = vmatpush1.bf16.msra.mxu0 %v5326_v33  ;;  %v5384_v33 = vunpack.c.l.s8.bf16 %v4704_v31 }
 0x48f   : > { %6507 = vmatpush1.bf16.msra.mxu1 %v5328_v57  ;;  %6164 = vmatprep.subr.bf16.mxu0 %v5335_v34  ;;  %v5391_v57 = vunpack.c.h.s8.bf16 %v4703_v25  ;;  %v5393_v34 = vunpack.c.h.s8.bf16 %v4705_v26  ;;  %v4728_v25 = vld [vmem:[%s9271_s25 + $0x610] sm:$0xff] }
 0x490   : > { %6508 = vmatprep.subr.bf16.mxu1 %v5337_v58  ;;  %v4713_v58 = vld [vmem:[%s9271_s25 + $0x598] sm:$0xff] }
 0x492   : > { %6165 = vmatpush1.bf16.msra.mxu0 %v5334_v37  ;;  %v5392_v37 = vunpack.c.h.s8.bf16 %v4704_v31 }
 0x493   : > { %6509 = vmatpush1.bf16.msra.mxu1 %v5336_v38  ;;  %6166 = vmatprep.subr.bf16.mxu0 %v5343_v39  ;;  %v5399_v38 = vunpack.c.l.s8.bf16 %v4711_v35  ;;  %v4710_v39 = vld [vmem:[%s9271_s25 + $0x580] sm:$0xff] }
 0x494   : > { %6510 = vmatprep.subr.bf16.mxu1 %v5345_v1  ;;  %v5401_v1 = vunpack.c.l.s8.bf16 %v4713_v58  ;;  %v5398_v41 = vunpack.c.l.s8.bf16 %v4710_v39  ;;  %v5406_v55 = vunpack.c.h.s8.bf16 %v4710_v39  ;;  %v4743_v39 = vld [vmem:[%s9271_s25 + $0x688] sm:$0xff] }
 0x496   : > { %6167 = vmatpush1.bf16.msra.mxu0 %v5342_v42  ;;  %v5400_v42 = vunpack.c.l.s8.bf16 %v4712_v40 }
 0x497   : > { %6511 = vmatpush1.bf16.msra.mxu1 %v5344_v44  ;;  %6168 = vmatprep.subr.bf16.mxu0 %v5351_v45  ;;  %v5407_v44 = vunpack.c.h.s8.bf16 %v4711_v35  ;;  %v5409_v45 = vunpack.c.h.s8.bf16 %v4713_v58  ;;  %v4736_v35 = vld [vmem:[%s9271_s25 + $0x650] sm:$0xff] }
 0x498   : > { %6512 = vmatprep.subr.bf16.mxu1 %v5353_v52  ;;  %v4721_v52 = vld [vmem:[%s9271_s25 + $0x5d8] sm:$0xff] }
 0x49a   : > { %6169 = vmatpush1.bf16.msra.mxu0 %v5350_v62  ;;  %v5408_v62 = vunpack.c.h.s8.bf16 %v4712_v40 }
 0x49b   : > { %6513 = vmatpush1.bf16.msra.mxu1 %v5352_v63  ;;  %6170 = vmatprep.subr.bf16.mxu0 %v5359_v3  ;;  %v5415_v63 = vunpack.c.l.s8.bf16 %v4719_v49  ;;  %v4718_v3 = vld [vmem:[%s9271_s25 + $0x5c0] sm:$0xff] }
 0x49c   : > { %6514 = vmatprep.subr.bf16.mxu1 %v5361_v5  ;;  %v5417_v5 = vunpack.c.l.s8.bf16 %v4721_v52  ;;  %v5414_v7 = vunpack.c.l.s8.bf16 %v4718_v3  ;;  %v5422_v43 = vunpack.c.h.s8.bf16 %v4718_v3  ;;  %v4751_v3 = vld [vmem:[%s9271_s25 + $0x6c8] sm:$0xff] }
 0x49e   : > { %6171 = vmatpush1.bf16.msra.mxu0 %v5358_v0  ;;  %v5416_v0 = vunpack.c.l.s8.bf16 %v4720_v6 }
 0x49f   : > { %6515 = vmatpush1.bf16.msra.mxu1 %v5360_v8  ;;  %6172 = vmatprep.subr.bf16.mxu0 %v5367_v9  ;;  %v5423_v8 = vunpack.c.h.s8.bf16 %v4719_v49  ;;  %v5425_v9 = vunpack.c.h.s8.bf16 %v4721_v52  ;;  %v4744_v49 = vld [vmem:[%s9271_s25 + $0x690] sm:$0xff] }
 0x4a0   : > { %6516 = vmatprep.subr.bf16.mxu1 %v5369_v11  ;;  %v4729_v11 = vld [vmem:[%s9271_s25 + $0x618] sm:$0xff] }
 0x4a1   : > { %v5441_v29 = vunpack.c.h.s8.bf16 %v4729_v11 }
 0x4a2   : > { %6173 = vmatpush1.bf16.msra.mxu0 %v5366_v14  ;;  %v5424_v14 = vunpack.c.h.s8.bf16 %v4720_v6  ;;  %v4753_v6 = vld [vmem:[%s9271_s25 + $0x6d8] sm:$0xff] }
 0x4a3   : > { %6517 = vmatpush1.bf16.msra.mxu1 %v5368_v20  ;;  %6174 = vmatprep.subr.bf16.mxu0 %v5375_v23  ;;  %v5431_v20 = vunpack.c.l.s8.bf16 %v4727_v10  ;;  %v4726_v23 = vld [vmem:[%s9271_s25 + $0x600] sm:$0xff] }
 0x4a4   : > { %6518 = vmatprep.subr.bf16.mxu1 %v5377_v24  ;;  %v5433_v24 = vunpack.c.l.s8.bf16 %v4729_v11  ;;  %v5430_v26 = vunpack.c.l.s8.bf16 %v4726_v23  ;;  %v5438_v31 = vunpack.c.h.s8.bf16 %v4726_v23  ;;  %v5479_v11 = vunpack.c.l.s8.bf16 %v4751_v3  ;;  %v4752_v23 = vld [vmem:[%s9271_s25 + $0x6d0] sm:$0xff] }
 0x4a6   : > { %6175 = vmatpush1.bf16.msra.mxu0 %v5374_v27  ;;  %v5432_v27 = vunpack.c.l.s8.bf16 %v4728_v25 }
 0x4a7   : > { %6519 = vmatpush1.bf16.msra.mxu1 %v5376_v16  ;;  %6176 = vmatprep.subr.bf16.mxu0 %v5383_v28  ;;  %v5439_v16 = vunpack.c.h.s8.bf16 %v4727_v10  ;;  %v4735_v28 = vld [vmem:[%s9271_s25 + $0x648] sm:$0xff]  ;;  %v5472_v10 = vunpack.c.h.s8.bf16 %v4744_v49 }
 0x4a8   : > { %6520 = vmatprep.subr.bf16.mxu1 %v5385_v30  ;;  %v4737_v30 = vld [vmem:[%s9271_s25 + $0x658] sm:$0xff] }
 0x4aa   : > { %6177 = vmatpush1.bf16.msra.mxu0 %v5382_v32  ;;  %v5440_v32 = vunpack.c.h.s8.bf16 %v4728_v25 }
 0x4ab   : > { %6521 = vmatpush1.bf16.msra.mxu1 %v5384_v33  ;;  %6178 = vmatprep.subr.bf16.mxu0 %v5391_v57  ;;  %v5447_v33 = vunpack.c.l.s8.bf16 %v4735_v28  ;;  %v4734_v57 = vld [vmem:[%s9271_s25 + $0x640] sm:$0xff] }
 0x4ac   : > { %6522 = vmatprep.subr.bf16.mxu1 %v5393_v34  ;;  %v5449_v34 = vunpack.c.l.s8.bf16 %v4737_v30  ;;  %v5446_v58 = vunpack.c.l.s8.bf16 %v4734_v57  ;;  %v5454_v40 = vunpack.c.h.s8.bf16 %v4734_v57  ;;  %v5480_v57 = vunpack.c.l.s8.bf16 %v4752_v23 }
 0x4ae   : > { %6179 = vmatpush1.bf16.msra.mxu0 %v5390_v36  ;;  %v5448_v36 = vunpack.c.l.s8.bf16 %v4736_v35 }
 0x4af   : > { %6523 = vmatpush1.bf16.msra.mxu1 %v5392_v37  ;;  %6180 = vmatprep.subr.bf16.mxu0 %v5399_v38  ;;  %v5455_v37 = vunpack.c.h.s8.bf16 %v4735_v28  ;;  %v5457_v38 = vunpack.c.h.s8.bf16 %v4737_v30 }
 0x4b0   : > { %6524 = vmatprep.subr.bf16.mxu1 %v5401_v1  ;;  %v4745_v1 = vld [vmem:[%s9271_s25 + $0x698] sm:$0xff] }
 0x4b2   : > { %6181 = vmatpush1.bf16.msra.mxu0 %v5398_v41  ;;  %v5456_v41 = vunpack.c.h.s8.bf16 %v4736_v35 }
 0x4b3   : > { %6525 = vmatpush1.bf16.msra.mxu1 %v5400_v42  ;;  %6182 = vmatprep.subr.bf16.mxu0 %v5407_v44  ;;  %v5463_v42 = vunpack.c.l.s8.bf16 %v4743_v39  ;;  %v4742_v44 = vld [vmem:[%s9271_s25 + $0x680] sm:$0xff] }
 0x4b4   : > { %6526 = vmatprep.subr.bf16.mxu1 %v5409_v45  ;;  %v5465_v45 = vunpack.c.l.s8.bf16 %v4745_v1  ;;  %v5462_v52 = vunpack.c.l.s8.bf16 %v4742_v44 }
 0x4b6   : > { %6183 = vmatpush1.bf16.msra.mxu0 %v5406_v55  ;;  %v5464_v55 = vunpack.c.l.s8.bf16 %v4744_v49 }
 0x4b7   : > { %6527 = vmatpush1.bf16.msra.mxu1 %v5408_v62  ;;  %6184 = vmatprep.subr.bf16.mxu0 %v5415_v63  ;;  %v5471_v62 = vunpack.c.h.s8.bf16 %v4743_v39  ;;  %v5473_v63 = vunpack.c.h.s8.bf16 %v4745_v1  ;;  %v4759_v39 = vld [vmem:[%s9271_s25 + $0x708] sm:$0xff] }
 0x4b8   : > { %6528 = vmatprep.subr.bf16.mxu1 %v5417_v5  ;;  %v1209_v5 = vrot.slane %v9445_v48, %v9366_v46 }
 0x4ba   : > { %6185 = vmatpush1.bf16.msra.mxu0 %v5414_v7  ;;  %v1217_v7 = vrot.slane %v9445_v48, %v9369_v50 }
 0x4bb   : > { %6529 = vmatpush1.bf16.msra.mxu1 %v5416_v0  ;;  %6186 = vmatprep.subr.bf16.mxu0 %v5423_v8  ;;  %v1213_v0 = vrot.slane %v9445_v48, %v9372_v51  ;;  %v5470_v8 = vunpack.c.h.s8.bf16 %v4742_v44  ;;  %v4761_v44 = vld [vmem:[%s9271_s25 + $0x718] sm:$0xff] }
 0x4bc   : > { %6530 = vmatprep.subr.bf16.mxu1 %v5425_v9  ;;  %v1221_v9 = vrot.slane %v9445_v48, %v9375_v53 }
 0x4be   : > { %6187 = vmatpush1.bf16.msra.mxu0 %v5422_v43  ;;  %v4750_v43 = vld [vmem:[%s9271_s25 + $0x6c0] sm:$0xff] }
 0x4bf   : > { %6531 = vmatpush1.bf16.msra.mxu1 %v5424_v14  ;;  %6199 = vmatprep.subr.bf16.mxu0 %v5431_v20  ;;  %v5481_v20 = vunpack.c.l.s8.bf16 %v4753_v6  ;;  %v5478_v30 = vunpack.c.l.s8.bf16 %v4750_v43 }
 0x4c0   : > { %6543 = vmatprep.subr.bf16.mxu1 %v5433_v24 }
 0x4c1   : > { %6189 = vmatmul.mubr.bf16.vlgmr.msra.gmra.mrb[20].mxu0 %v9385_v54 }
 0x4c2   : > { %6533 = vmatmul.mubr.bf16.vlgmr.msra.gmra.mrb[20].mxu1 %v9385_v54  ;;  %6200 = vmatpush1.bf16.msra.mxu0 %v5430_v26 }
 0x4c3   : > { %6231 = vmatprep.mubr.bf16.mxu0 %v9391_v2  ;;  %6544 = vmatpush1.bf16.msra.mxu1 %v5432_v27 }
 0x4c4   : > { %6575 = vmatprep.mubr.bf16.mxu1 %v9391_v2  ;;  %6201 = vmatprep.subr.bf16.mxu0 %v5439_v16 }
 0x4c5   : > { %6545 = vmatprep.subr.bf16.mxu1 %v5441_v29 }
 0x4c6   : > { %6202 = vmatpush1.bf16.msra.mxu0 %v5438_v31 }
 0x4c7   : > { %6546 = vmatpush1.bf16.msra.mxu1 %v5440_v32  ;;  %6203 = vmatprep.subr.bf16.mxu0 %v5447_v33 }
 0x4c8   : > { %6547 = vmatprep.subr.bf16.mxu1 %v5449_v34  ;;  %v5487_v34 = vunpack.c.h.s8.bf16 %v4751_v3 }
 0x4ca   : > { %6204 = vmatpush1.bf16.msra.mxu0 %v5446_v58 }
 0x4cb   : > { %6548 = vmatpush1.bf16.msra.mxu1 %v5448_v36  ;;  %6205 = vmatprep.subr.bf16.mxu0 %v5455_v37  ;;  %v5489_v37 = vunpack.c.h.s8.bf16 %v4753_v6  ;;  %v4758_v6 = vld [vmem:[%s9271_s25 + $0x700] sm:$0xff] }
 0x4cc   : > { %6549 = vmatprep.subr.bf16.mxu1 %v5457_v38  ;;  %v5486_v38 = vunpack.c.h.s8.bf16 %v4750_v43 }
 0x4ce   : > { %6206 = vmatpush1.bf16.msra.mxu0 %v5454_v40 }
 0x4cf   : > { %6550 = vmatpush1.bf16.msra.mxu1 %v5456_v41  ;;  %6207 = vmatprep.subr.bf16.mxu0 %v5463_v42  ;;  %v5488_v42 = vunpack.c.h.s8.bf16 %v4752_v23  ;;  %v4767_v23 = vld [vmem:[%s9271_s25 + $0x748] sm:$0xff] }
 0x4d0   : > { %6551 = vmatprep.subr.bf16.mxu1 %v5465_v45 }
 0x4d2   : > { %6208 = vmatpush1.bf16.msra.mxu0 %v5462_v52 }
 0x4d3   : > { %6552 = vmatpush1.bf16.msra.mxu1 %v5464_v55  ;;  %6209 = vmatprep.subr.bf16.mxu0 %v5471_v62 }
 0x4d4   : > { %v4391_v14 = vpop.f32.mrb[16].mxu0  ;;  %6553 = vmatprep.subr.bf16.mxu1 %v5473_v63 }
 0x4d5   : > { %v8411_v24 = vadd.f32 %v4391_v14, %v1209_v5  ;;  %v4477_v25 = vpop.f32.mrb[16].mxu1  ;;  %v4393_v26 = vpop.f32.mrb[17].mxu0  ;;  %v5503_v14 = vunpack.c.h.s8.bf16 %v4759_v39 }
 0x4d6   : > { %v8415_v27 = vadd.f32 %v4477_v25, %v1217_v7  ;;  %v8412_v16 = vadd.f32 %v4393_v26, %v1213_v0  ;;  %v4479_v28 = vpop.f32.mrb[17].mxu1  ;;  %v4395_v29 = vpop.f32.mrb[18].mxu0  ;;  %6210 = vmatpush1.bf16.msra.mxu0 %v5470_v8  ;;  %v5497_v8 = vunpack.c.l.s8.bf16 %v4761_v44  ;;  %v5502_v25 = vunpack.c.h.s8.bf16 %v4758_v6 }
 0x4d7   : > { %v8416_v31 = vadd.f32 %v4479_v28, %v1221_v9  ;;  %v8413_v48 = vadd.f32 %v4395_v29, %v1209_v5  ;;  %v4481_v32 = vpop.f32.mrb[18].mxu1  ;;  %6554 = vmatpush1.bf16.msra.mxu1 %v5472_v10  ;;  %v4397_v33 = vpop.f32.mrb[19].mxu0  ;;  %6211 = vmatprep.subr.bf16.mxu0 %v5479_v11  ;;  %v4498_v1 = vmax.f32 %v8411_v24, 0.0  ;;  %v5495_v5 = vunpack.c.l.s8.bf16 %v4759_v39  ;;  %v4769_v24 = vld [vmem:[%s9271_s25 + $0x758] sm:$0xff]  ;;  %v4768_v29 = vld [vmem:[%s9271_s25 + $0x750] sm:$0xff] }
 0x4d8   : > { %v8417_v35 = vadd.f32 %v4481_v32, %v1217_v7  ;;  %v8414_v58 = vadd.f32 %v4397_v33, %v1213_v0  ;;  %v4483_v36 = vpop.f32.mrb[19].mxu1  ;;  %6555 = vmatprep.subr.bf16.mxu1 %v5481_v20  ;;  %v4500_v45 = vmax.f32 %v8415_v27, 0.0  ;;  %v4499_v49 = vmax.f32 %v8412_v16, 0.0  ;;  %v4766_v16 = vld [vmem:[%s9271_s25 + $0x740] sm:$0xff]  ;;  %v4775_v33 = vld [vmem:[%s9271_s25 + $0x788] sm:$0xff] }
 0x4d9   : > { %v4514_v40 = vmax.f32 %v8413_v48, 0.0  ;;  %v8418_v41 = vadd.f32 %v4483_v36, %v1221_v9  ;;  %v4501_v62 = vmax.f32 %v8416_v31, 0.0  ;;  %v4760_v9 = vld [vmem:[%s9271_s25 + $0x710] sm:$0xff]  ;;  %v5494_v11 = vunpack.c.l.s8.bf16 %v4758_v6  ;;  %v4774_v36 = vld [vmem:[%s9271_s25 + $0x780] sm:$0xff] }
 0x4da   : > { %v4516_v52 = vmax.f32 %v8417_v35, 0.0  ;;  %v4515_v55 = vmax.f32 %v8414_v58, 0.0  ;;  %6212 = vmatpush1.bf16.msra.mxu0 %v5478_v30  ;;  %v5496_v43 = vunpack.c.l.s8.bf16 %v4760_v9  ;;  %v5505_v20 = vunpack.c.h.s8.bf16 %v4761_v44  ;;  %v4785_v44 = vld [vmem:[%s9271_s25 + $0x7d8] sm:$0xff] }
 0x4db   : > { %v9549_v63 = vpack.c.bf16 %v4514_v40, %v4498_v1  ;;  %v4517_v3 = vmax.f32 %v8418_v41, 0.0  ;;  %6556 = vmatpush1.bf16.msra.mxu1 %v5480_v57  ;;  %6213 = vmatprep.subr.bf16.mxu0 %v5487_v34  ;;  %v5504_v26 = vunpack.c.h.s8.bf16 %v4760_v9  ;;  %v5511_v27 = vunpack.c.l.s8.bf16 %v4767_v23  ;;  %v4777_v57 = vld [vmem:[%s9271_s25 + $0x798] sm:$0xff] }
 0x4dc   : > { %v9552_v7 = vpack.c.bf16 %v4516_v52, %v4500_v45  ;;  %v9554_v0 = vpack.c.bf16 %v4515_v55, %v4499_v49  ;;  %6557 = vmatprep.subr.bf16.mxu1 %v5489_v37  ;;  %v5513_v28 = vunpack.c.l.s8.bf16 %v4769_v24  ;;  %v5510_v30 = vunpack.c.l.s8.bf16 %v4766_v16  ;;  %v4782_v55 = vld [vmem:[%s9271_s25 + $0x7c0] sm:$0xff] }
 0x4dd   : > { %v9557_v10 = vpack.c.bf16 %v4517_v3, %v4501_v62  ;;  %v5512_v31 = vunpack.c.l.s8.bf16 %v4768_v29  ;;  %v5519_v48 = vunpack.c.h.s8.bf16 %v4767_v23  ;;  %v5521_v32 = vunpack.c.h.s8.bf16 %v4769_v24  ;;  %v4784_v3 = vld [vmem:[%s9271_s25 + $0x7d0] sm:$0xff]  ;;  %v4790_v24 = vld [vmem:[%s9271_s25 + $0x800] sm:$0xff] }
 0x4de   : > { %6214 = vmatpush1.bf16.msra.mxu0 %v5486_v38  ;;  %v5518_v34 = vunpack.c.h.s8.bf16 %v4766_v16  ;;  %v5520_v35 = vunpack.c.h.s8.bf16 %v4768_v29  ;;  %v5527_v58 = vunpack.c.l.s8.bf16 %v4775_v33  ;;  %v5529_v37 = vunpack.c.l.s8.bf16 %v4777_v57  ;;  %v4776_v38 = vld [vmem:[%s9271_s25 + $0x790] sm:$0xff]  ;;  %v4799_v29 = vld [vmem:[%s9271_s25 + $0x848] sm:$0xff] }
 0x4df   : > { %6558 = vmatpush1.bf16.msra.mxu1 %v5488_v42  ;;  %6215 = vmatprep.subr.bf16.mxu0 %v5495_v5  ;;  %v5526_v39 = vunpack.c.l.s8.bf16 %v4774_v36  ;;  %v5528_v1 = vunpack.c.l.s8.bf16 %v4776_v38  ;;  %v5535_v40 = vunpack.c.h.s8.bf16 %v4775_v33  ;;  %v5537_v41 = vunpack.c.h.s8.bf16 %v4777_v57  ;;  %v4783_v42 = vld [vmem:[%s9271_s25 + $0x7c8] sm:$0xff]  ;;  %v4798_v57 = vld [vmem:[%s9271_s25 + $0x840] sm:$0xff] }
 0x4e0   : > { %6559 = vmatprep.subr.bf16.mxu1 %v5497_v8  ;;  %v5534_v45 = vunpack.c.h.s8.bf16 %v4774_v36  ;;  %v5536_v49 = vunpack.c.h.s8.bf16 %v4776_v38  ;;  %v5543_v52 = vunpack.c.l.s8.bf16 %v4783_v42  ;;  %v5545_v62 = vunpack.c.l.s8.bf16 %v4785_v44 }
 0x4e1   : > { %v5542_v5 = vunpack.c.l.s8.bf16 %v4782_v55  ;;  %v5544_v6 = vunpack.c.l.s8.bf16 %v4784_v3  ;;  %v5551_v8 = vunpack.c.h.s8.bf16 %v4783_v42  ;;  %v5553_v9 = vunpack.c.h.s8.bf16 %v4785_v44  ;;  %v4806_v44 = vld [vmem:[%s9271_s25 + $0x880] sm:$0xff] }
 0x4e2   : > { %6216 = vmatpush1.bf16.msra.mxu0 %v5494_v11  ;;  %v4791_v11 = vld [vmem:[%s9271_s25 + $0x808] sm:$0xff]  ;;  %v5575_v33 = vunpack.c.l.s8.bf16 %v4799_v29 }
 0x4e3   : > { %6560 = vmatpush1.bf16.msra.mxu1 %v5496_v43  ;;  %6217 = vmatprep.subr.bf16.mxu0 %v5503_v14  ;;  %v4793_v43 = vld [vmem:[%s9271_s25 + $0x818] sm:$0xff]  ;;  %v5550_v14 = vunpack.c.h.s8.bf16 %v4782_v55  ;;  %v5559_v23 = vunpack.c.l.s8.bf16 %v4791_v11 }
 0x4e4   : > { %6561 = vmatprep.subr.bf16.mxu1 %v5505_v20  ;;  %v5552_v20 = vunpack.c.h.s8.bf16 %v4784_v3 }
 0x4e6   : > { %6218 = vmatpush1.bf16.msra.mxu0 %v5502_v25  ;;  %v5561_v25 = vunpack.c.l.s8.bf16 %v4793_v43 }
 0x4e7   : > { %6562 = vmatpush1.bf16.msra.mxu1 %v5504_v26  ;;  %6219 = vmatprep.subr.bf16.mxu0 %v5511_v27  ;;  %v4792_v26 = vld [vmem:[%s9271_s25 + $0x810] sm:$0xff]  ;;  %v5558_v27 = vunpack.c.l.s8.bf16 %v4790_v24 }
 0x4e8   : > { %6563 = vmatprep.subr.bf16.mxu1 %v5513_v28  ;;  %v5560_v16 = vunpack.c.l.s8.bf16 %v4792_v26  ;;  %v5567_v28 = vunpack.c.h.s8.bf16 %v4791_v11 }
 0x4ea   : > { %6220 = vmatpush1.bf16.msra.mxu0 %v5510_v30  ;;  %v5569_v30 = vunpack.c.h.s8.bf16 %v4793_v43  ;;  %v4814_v43 = vld [vmem:[%s9271_s25 + $0x8c0] sm:$0xff] }
 0x4eb   : > { %6564 = vmatpush1.bf16.msra.mxu1 %v5512_v31  ;;  %6221 = vmatprep.subr.bf16.mxu0 %v5519_v48  ;;  %v4801_v31 = vld [vmem:[%s9271_s25 + $0x858] sm:$0xff]  ;;  %v5566_v48 = vunpack.c.h.s8.bf16 %v4790_v24 }
 0x4ec   : > { %6565 = vmatprep.subr.bf16.mxu1 %v5521_v32  ;;  %v5568_v32 = vunpack.c.h.s8.bf16 %v4792_v26  ;;  %v5585_v38 = vunpack.c.h.s8.bf16 %v4801_v31 }
 0x4ee   : > { %6222 = vmatpush1.bf16.msra.mxu0 %v5518_v34  ;;  %v5577_v34 = vunpack.c.l.s8.bf16 %v4801_v31  ;;  %v4822_v31 = vld [vmem:[%s9271_s25 + $0x900] sm:$0xff] }
 0x4ef   : > { %6566 = vmatpush1.bf16.msra.mxu1 %v5520_v35  ;;  %6223 = vmatprep.subr.bf16.mxu0 %v5527_v58  ;;  %v4800_v35 = vld [vmem:[%s9271_s25 + $0x850] sm:$0xff]  ;;  %v5574_v58 = vunpack.c.l.s8.bf16 %v4798_v57 }
 0x4f0   : > { %6567 = vmatprep.subr.bf16.mxu1 %v5529_v37  ;;  %v5576_v36 = vunpack.c.l.s8.bf16 %v4800_v35  ;;  %v5583_v37 = vunpack.c.h.s8.bf16 %v4799_v29 }
 0x4f2   : > { %6224 = vmatpush1.bf16.msra.mxu0 %v5526_v39  ;;  %v4807_v39 = vld [vmem:[%s9271_s25 + $0x888] sm:$0xff] }
 0x4f3   : > { %6568 = vmatpush1.bf16.msra.mxu1 %v5528_v1  ;;  %6225 = vmatprep.subr.bf16.mxu0 %v5535_v40  ;;  %v4809_v1 = vld [vmem:[%s9271_s25 + $0x898] sm:$0xff]  ;;  %v5582_v40 = vunpack.c.h.s8.bf16 %v4798_v57  ;;  %v5591_v42 = vunpack.c.l.s8.bf16 %v4807_v39 }
 0x4f4   : > { %6569 = vmatprep.subr.bf16.mxu1 %v5537_v41  ;;  %v5584_v41 = vunpack.c.h.s8.bf16 %v4800_v35  ;;  %v5601_v3 = vunpack.c.h.s8.bf16 %v4809_v1 }
 0x4f6   : > { %6226 = vmatpush1.bf16.msra.mxu0 %v5534_v45  ;;  %v5593_v45 = vunpack.c.l.s8.bf16 %v4809_v1  ;;  %v4830_v1 = vld [vmem:[%s9271_s25 + $0x940] sm:$0xff] }
 0x4f7   : > { %6570 = vmatpush1.bf16.msra.mxu1 %v5536_v49  ;;  %6227 = vmatprep.subr.bf16.mxu0 %v5543_v52  ;;  %v4808_v49 = vld [vmem:[%s9271_s25 + $0x890] sm:$0xff]  ;;  %v5590_v52 = vunpack.c.l.s8.bf16 %v4806_v44 }
 0x4f8   : > { %6571 = vmatprep.subr.bf16.mxu1 %v5545_v62  ;;  %v5592_v55 = vunpack.c.l.s8.bf16 %v4808_v49  ;;  %v5599_v62 = vunpack.c.h.s8.bf16 %v4807_v39 }
 0x4fa   : > { %6228 = vmatpush1.bf16.msra.mxu0 %v5542_v5  ;;  %v4815_v5 = vld [vmem:[%s9271_s25 + $0x8c8] sm:$0xff] }
 0x4fb   : > { %6572 = vmatpush1.bf16.msra.mxu1 %v5544_v6  ;;  %6229 = vmatprep.subr.bf16.mxu0 %v5551_v8  ;;  %v4817_v6 = vld [vmem:[%s9271_s25 + $0x8d8] sm:$0xff]  ;;  %v5598_v8 = vunpack.c.h.s8.bf16 %v4806_v44  ;;  %v5607_v11 = vunpack.c.l.s8.bf16 %v4815_v5 }
 0x4fc   : > { %6573 = vmatprep.subr.bf16.mxu1 %v5553_v9  ;;  %v5600_v9 = vunpack.c.h.s8.bf16 %v4808_v49  ;;  %v5617_v26 = vunpack.c.h.s8.bf16 %v4817_v6 }
 0x4fe   : > { %6230 = vmatpush1.bf16.msra.mxu0 %v5550_v14  ;;  %v5609_v14 = vunpack.c.l.s8.bf16 %v4817_v6  ;;  %v4838_v6 = vld [vmem:[%s9271_s25 + $0x980] sm:$0xff] }
 0x4ff   : > { %6574 = vmatpush1.bf16.msra.mxu1 %v5552_v20  ;;  %6242 = vmatprep.subr.bf16.mxu0 %v5559_v23  ;;  %v4816_v20 = vld [vmem:[%s9271_s25 + $0x8d0] sm:$0xff]  ;;  %v5606_v23 = vunpack.c.l.s8.bf16 %v4814_v43 }
 0x500   : > { %6586 = vmatprep.subr.bf16.mxu1 %v5561_v25  ;;  %v5608_v24 = vunpack.c.l.s8.bf16 %v4816_v20  ;;  %v5615_v25 = vunpack.c.h.s8.bf16 %v4815_v5  ;;  %v5616_v29 = vunpack.c.h.s8.bf16 %v4816_v20 }
 0x501   : > { %6232 = vmatmul.mubr.bf16.vlgmr.msra.gmra.mrb[20].mxu0 %v9387_v59 }
 0x502   : > { %6576 = vmatmul.mubr.bf16.vlgmr.msra.gmra.mrb[20].mxu1 %v9387_v59  ;;  %6243 = vmatpush1.bf16.msra.mxu0 %v5558_v27  ;;  %v4823_v27 = vld [vmem:[%s9271_s25 + $0x908] sm:$0xff] }
 0x503   : > { %6274 = vmatprep.mubr.bf16.mxu0 %v9466_v61  ;;  %6587 = vmatpush1.bf16.msra.mxu1 %v5560_v16  ;;  %v4825_v16 = vld [vmem:[%s9271_s25 + $0x918] sm:$0xff] }
 0x504   : > { %6618 = vmatprep.mubr.bf16.mxu1 %v9466_v61  ;;  %6244 = vmatprep.subr.bf16.mxu0 %v5567_v28  ;;  %v5614_v28 = vunpack.c.h.s8.bf16 %v4814_v43  ;;  %v5633_v35 = vunpack.c.h.s8.bf16 %v4825_v16 }
 0x505   : > { %6588 = vmatprep.subr.bf16.mxu1 %v5569_v30  ;;  %v5623_v30 = vunpack.c.l.s8.bf16 %v4823_v27 }
 0x506   : > { %6245 = vmatpush1.bf16.msra.mxu0 %v5566_v48  ;;  %v5625_v48 = vunpack.c.l.s8.bf16 %v4825_v16  ;;  %v4846_v16 = vld [vmem:[%s9271_s25 + $0x9c0] sm:$0xff] }
 0x507   : > { %6589 = vmatpush1.bf16.msra.mxu1 %v5568_v32  ;;  %6246 = vmatprep.subr.bf16.mxu0 %v5575_v33  ;;  %v4824_v32 = vld [vmem:[%s9271_s25 + $0x910] sm:$0xff]  ;;  %v5622_v33 = vunpack.c.l.s8.bf16 %v4822_v31 }
 0x508   : > { %6590 = vmatprep.subr.bf16.mxu1 %v5577_v34  ;;  %v5624_v57 = vunpack.c.l.s8.bf16 %v4824_v32  ;;  %v5631_v34 = vunpack.c.h.s8.bf16 %v4823_v27 }
 0x50a   : > { %6247 = vmatpush1.bf16.msra.mxu0 %v5574_v58  ;;  %v4831_v58 = vld [vmem:[%s9271_s25 + $0x948] sm:$0xff] }
 0x50b   : > { %6591 = vmatpush1.bf16.msra.mxu1 %v5576_v36  ;;  %6248 = vmatprep.subr.bf16.mxu0 %v5583_v37  ;;  %v4833_v36 = vld [vmem:[%s9271_s25 + $0x958] sm:$0xff]  ;;  %v5630_v37 = vunpack.c.h.s8.bf16 %v4822_v31  ;;  %v5639_v39 = vunpack.c.l.s8.bf16 %v4831_v58 }
 0x50c   : > { %6592 = vmatprep.subr.bf16.mxu1 %v5585_v38  ;;  %v5632_v38 = vunpack.c.h.s8.bf16 %v4824_v32  ;;  %v5649_v49 = vunpack.c.h.s8.bf16 %v4833_v36 }
 0x50e   : > { %6249 = vmatpush1.bf16.msra.mxu0 %v5582_v40  ;;  %v5641_v40 = vunpack.c.l.s8.bf16 %v4833_v36  ;;  %v4854_v36 = vld [vmem:[%s9271_s25 + $0xa00] sm:$0xff] }
 0x50f   : > { %6593 = vmatpush1.bf16.msra.mxu1 %v5584_v41  ;;  %6250 = vmatprep.subr.bf16.mxu0 %v5591_v42  ;;  %v4832_v41 = vld [vmem:[%s9271_s25 + $0x950] sm:$0xff]  ;;  %v5638_v42 = vunpack.c.l.s8.bf16 %v4830_v1 }
 0x510   : > { %6594 = vmatprep.subr.bf16.mxu1 %v5593_v45  ;;  %v5640_v44 = vunpack.c.l.s8.bf16 %v4832_v41  ;;  %v5647_v45 = vunpack.c.h.s8.bf16 %v4831_v58 }
 0x512   : > { %6251 = vmatpush1.bf16.msra.mxu0 %v5590_v52  ;;  %v4839_v52 = vld [vmem:[%s9271_s25 + $0x988] sm:$0xff] }
 0x513   : > { %6595 = vmatpush1.bf16.msra.mxu1 %v5592_v55  ;;  %6252 = vmatprep.subr.bf16.mxu0 %v5599_v62  ;;  %v4841_v55 = vld [vmem:[%s9271_s25 + $0x998] sm:$0xff]  ;;  %v5646_v62 = vunpack.c.h.s8.bf16 %v4830_v1  ;;  %v5655_v5 = vunpack.c.l.s8.bf16 %v4839_v52 }
 0x514   : > { %6596 = vmatprep.subr.bf16.mxu1 %v5601_v3  ;;  %v5648_v3 = vunpack.c.h.s8.bf16 %v4832_v41  ;;  %v5665_v20 = vunpack.c.h.s8.bf16 %v4841_v55  ;;  %v4863_v41 = vld [vmem:[%s9271_s25 + $0xa48] sm:$0xff] }
 0x516   : > { %6253 = vmatpush1.bf16.msra.mxu0 %v5598_v8  ;;  %v5657_v8 = vunpack.c.l.s8.bf16 %v4841_v55  ;;  %v4862_v55 = vld [vmem:[%s9271_s25 + $0xa40] sm:$0xff] }
 0x517   : > { %6597 = vmatpush1.bf16.msra.mxu1 %v5600_v9  ;;  %6254 = vmatprep.subr.bf16.mxu0 %v5607_v11  ;;  %v4840_v9 = vld [vmem:[%s9271_s25 + $0x990] sm:$0xff]  ;;  %v5654_v11 = vunpack.c.l.s8.bf16 %v4838_v6 }
 0x518   : > { %6598 = vmatprep.subr.bf16.mxu1 %v5609_v14  ;;  %v5656_v43 = vunpack.c.l.s8.bf16 %v4840_v9  ;;  %v5663_v14 = vunpack.c.h.s8.bf16 %v4839_v52  ;;  %v5703_v52 = vunpack.c.l.s8.bf16 %v4863_v41 }
 0x51a   : > { %6255 = vmatpush1.bf16.msra.mxu0 %v5606_v23  ;;  %v4847_v23 = vld [vmem:[%s9271_s25 + $0x9c8] sm:$0xff] }
 0x51b   : > { %6599 = vmatpush1.bf16.msra.mxu1 %v5608_v24  ;;  %6256 = vmatprep.subr.bf16.mxu0 %v5615_v25  ;;  %v4849_v24 = vld [vmem:[%s9271_s25 + $0x9d8] sm:$0xff]  ;;  %v5662_v25 = vunpack.c.h.s8.bf16 %v4838_v6  ;;  %v5671_v27 = vunpack.c.l.s8.bf16 %v4847_v23 }
 0x51c   : > { %6600 = vmatprep.subr.bf16.mxu1 %v5617_v26  ;;  %v5664_v26 = vunpack.c.h.s8.bf16 %v4840_v9  ;;  %v5681_v32 = vunpack.c.h.s8.bf16 %v4849_v24 }
 0x51e   : > { %6257 = vmatpush1.bf16.msra.mxu0 %v5614_v28  ;;  %v5673_v28 = vunpack.c.l.s8.bf16 %v4849_v24  ;;  %v4870_v24 = vld [vmem:[%s9271_s25 + $0xa80] sm:$0xff] }
 0x51f   : > { %6601 = vmatpush1.bf16.msra.mxu1 %v5616_v29  ;;  %6258 = vmatprep.subr.bf16.mxu0 %v5623_v30  ;;  %v4848_v29 = vld [vmem:[%s9271_s25 + $0x9d0] sm:$0xff]  ;;  %v5670_v30 = vunpack.c.l.s8.bf16 %v4846_v16 }
 0x520   : > { %6602 = vmatprep.subr.bf16.mxu1 %v5625_v48  ;;  %v5672_v31 = vunpack.c.l.s8.bf16 %v4848_v29  ;;  %v5679_v48 = vunpack.c.h.s8.bf16 %v4847_v23 }
 0x522   : > { %6259 = vmatpush1.bf16.msra.mxu0 %v5622_v33  ;;  %v4855_v33 = vld [vmem:[%s9271_s25 + $0xa08] sm:$0xff] }
 0x523   : > { %6603 = vmatpush1.bf16.msra.mxu1 %v5624_v57  ;;  %6260 = vmatprep.subr.bf16.mxu0 %v5631_v34  ;;  %v4857_v57 = vld [vmem:[%s9271_s25 + $0xa18] sm:$0xff]  ;;  %v5678_v34 = vunpack.c.h.s8.bf16 %v4846_v16  ;;  %v5687_v58 = vunpack.c.l.s8.bf16 %v4855_v33 }
 0x524   : > { %6604 = vmatprep.subr.bf16.mxu1 %v5633_v35  ;;  %v5680_v35 = vunpack.c.h.s8.bf16 %v4848_v29 }
 0x526   : > { %6261 = vmatpush1.bf16.msra.mxu0 %v5630_v37  ;;  %v5689_v37 = vunpack.c.l.s8.bf16 %v4857_v57 }
 0x527   : > { %6605 = vmatpush1.bf16.msra.mxu1 %v5632_v38  ;;  %6262 = vmatprep.subr.bf16.mxu0 %v5639_v39  ;;  %v4856_v38 = vld [vmem:[%s9271_s25 + $0xa10] sm:$0xff]  ;;  %v5686_v39 = vunpack.c.l.s8.bf16 %v4854_v36 }
 0x528   : > { %6606 = vmatprep.subr.bf16.mxu1 %v5641_v40  ;;  %v5688_v1 = vunpack.c.l.s8.bf16 %v4856_v38  ;;  %v5695_v40 = vunpack.c.h.s8.bf16 %v4855_v33 }
 0x52a   : > { %6263 = vmatpush1.bf16.msra.mxu0 %v5638_v42  ;;  %v5697_v42 = vunpack.c.h.s8.bf16 %v4857_v57  ;;  %v4878_v57 = vld [vmem:[%s9271_s25 + $0xac0] sm:$0xff] }
 0x52b   : > { %6607 = vmatpush1.bf16.msra.mxu1 %v5640_v44  ;;  %6264 = vmatprep.subr.bf16.mxu0 %v5647_v45  ;;  %v4865_v44 = vld [vmem:[%s9271_s25 + $0xa58] sm:$0xff]  ;;  %v5694_v45 = vunpack.c.h.s8.bf16 %v4854_v36 }
 0x52c   : > { %6608 = vmatprep.subr.bf16.mxu1 %v5649_v49  ;;  %v5696_v49 = vunpack.c.h.s8.bf16 %v4856_v38  ;;  %v5713_v9 = vunpack.c.h.s8.bf16 %v4865_v44 }
 0x52e   : > { %6265 = vmatpush1.bf16.msra.mxu0 %v5646_v62  ;;  %v5705_v62 = vunpack.c.l.s8.bf16 %v4865_v44  ;;  %v4886_v44 = vld [vmem:[%s9271_s25 + $0xb00] sm:$0xff] }
 0x52f   : > { %6609 = vmatpush1.bf16.msra.mxu1 %v5648_v3  ;;  %6266 = vmatprep.subr.bf16.mxu0 %v5655_v5  ;;  %v4864_v3 = vld [vmem:[%s9271_s25 + $0xa50] sm:$0xff]  ;;  %v5702_v5 = vunpack.c.l.s8.bf16 %v4862_v55 }
 0x530   : > { %6610 = vmatprep.subr.bf16.mxu1 %v5657_v8  ;;  %v5704_v6 = vunpack.c.l.s8.bf16 %v4864_v3  ;;  %v5711_v8 = vunpack.c.h.s8.bf16 %v4863_v41 }
 0x532   : > { %6267 = vmatpush1.bf16.msra.mxu0 %v5654_v11  ;;  %v4871_v11 = vld [vmem:[%s9271_s25 + $0xa88] sm:$0xff] }
 0x533   : > { %6611 = vmatpush1.bf16.msra.mxu1 %v5656_v43  ;;  %6268 = vmatprep.subr.bf16.mxu0 %v5663_v14  ;;  %v4873_v43 = vld [vmem:[%s9271_s25 + $0xa98] sm:$0xff]  ;;  %v5710_v14 = vunpack.c.h.s8.bf16 %v4862_v55  ;;  %v5719_v23 = vunpack.c.l.s8.bf16 %v4871_v11 }
 0x534   : > { %6612 = vmatprep.subr.bf16.mxu1 %v5665_v20  ;;  %v5712_v20 = vunpack.c.h.s8.bf16 %v4864_v3  ;;  %v5729_v29 = vunpack.c.h.s8.bf16 %v4873_v43 }
 0x536   : > { %6269 = vmatpush1.bf16.msra.mxu0 %v5662_v25  ;;  %v5721_v25 = vunpack.c.l.s8.bf16 %v4873_v43  ;;  %v4894_v43 = vld [vmem:[%s9271_s25 + $0xb40] sm:$0xff] }
 0x537   : > { %6613 = vmatpush1.bf16.msra.mxu1 %v5664_v26  ;;  %6270 = vmatprep.subr.bf16.mxu0 %v5671_v27  ;;  %v4872_v26 = vld [vmem:[%s9271_s25 + $0xa90] sm:$0xff]  ;;  %v5718_v27 = vunpack.c.l.s8.bf16 %v4870_v24 }
 0x538   : > { %6614 = vmatprep.subr.bf16.mxu1 %v5673_v28  ;;  %v5720_v16 = vunpack.c.l.s8.bf16 %v4872_v26  ;;  %v5727_v28 = vunpack.c.h.s8.bf16 %v4871_v11 }
 0x53a   : > { %6271 = vmatpush1.bf16.msra.mxu0 %v5670_v30  ;;  %v4879_v30 = vld [vmem:[%s9271_s25 + $0xac8] sm:$0xff] }
 0x53b   : > { %6615 = vmatpush1.bf16.msra.mxu1 %v5672_v31  ;;  %6272 = vmatprep.subr.bf16.mxu0 %v5679_v48  ;;  %v4881_v31 = vld [vmem:[%s9271_s25 + $0xad8] sm:$0xff]  ;;  %v5726_v48 = vunpack.c.h.s8.bf16 %v4870_v24  ;;  %v5735_v33 = vunpack.c.l.s8.bf16 %v4879_v30 }
 0x53c   : > { %6616 = vmatprep.subr.bf16.mxu1 %v5681_v32  ;;  %v5728_v32 = vunpack.c.h.s8.bf16 %v4872_v26  ;;  %v5745_v38 = vunpack.c.h.s8.bf16 %v4881_v31 }
 0x53e   : > { %6273 = vmatpush1.bf16.msra.mxu0 %v5678_v34  ;;  %v5737_v34 = vunpack.c.l.s8.bf16 %v4881_v31  ;;  %v4902_v31 = vld [vmem:[%s9271_s25 + $0xb80] sm:$0xff] }
 0x53f   : > { %6617 = vmatpush1.bf16.msra.mxu1 %v5680_v35  ;;  %6285 = vmatprep.subr.bf16.mxu0 %v5687_v58  ;;  %v4880_v35 = vld [vmem:[%s9271_s25 + $0xad0] sm:$0xff]  ;;  %v5734_v58 = vunpack.c.l.s8.bf16 %v4878_v57 }
 0x540   : > { %6629 = vmatprep.subr.bf16.mxu1 %v5689_v37  ;;  %v5736_v36 = vunpack.c.l.s8.bf16 %v4880_v35  ;;  %v5743_v37 = vunpack.c.h.s8.bf16 %v4879_v30  ;;  %v5744_v41 = vunpack.c.h.s8.bf16 %v4880_v35 }
 0x541   : > { %6275 = vmatmul.mubr.bf16.vlgmr.msra.gmra.mrb[20].mxu0 %v9461_v47 }
 0x542   : > { %6619 = vmatmul.mubr.bf16.vlgmr.msra.gmra.mrb[20].mxu1 %v9461_v47  ;;  %6286 = vmatpush1.bf16.msra.mxu0 %v5686_v39  ;;  %v4887_v39 = vld [vmem:[%s9271_s25 + $0xb08] sm:$0xff] }
 0x543   : > { %6317 = vmatprep.mubr.bf16.mxu0 %v9469_v4  ;;  %6630 = vmatpush1.bf16.msra.mxu1 %v5688_v1  ;;  %v4889_v1 = vld [vmem:[%s9271_s25 + $0xb18] sm:$0xff] }
 0x544   : > { %6661 = vmatprep.mubr.bf16.mxu1 %v9469_v4  ;;  %6287 = vmatprep.subr.bf16.mxu0 %v5695_v40  ;;  %v5742_v40 = vunpack.c.h.s8.bf16 %v4878_v57  ;;  %v5761_v3 = vunpack.c.h.s8.bf16 %v4889_v1 }
 0x545   : > { %6631 = vmatprep.subr.bf16.mxu1 %v5697_v42  ;;  %v5751_v42 = vunpack.c.l.s8.bf16 %v4887_v39 }
 0x546   : > { %6288 = vmatpush1.bf16.msra.mxu0 %v5694_v45  ;;  %v5753_v45 = vunpack.c.l.s8.bf16 %v4889_v1  ;;  %v4910_v1 = vld [vmem:[%s9271_s25 + $0xbc0] sm:$0xff] }
 0x547   : > { %6632 = vmatpush1.bf16.msra.mxu1 %v5696_v49  ;;  %6289 = vmatprep.subr.bf16.mxu0 %v5703_v52  ;;  %v4888_v49 = vld [vmem:[%s9271_s25 + $0xb10] sm:$0xff]  ;;  %v5750_v52 = vunpack.c.l.s8.bf16 %v4886_v44 }
 0x548   : > { %6633 = vmatprep.subr.bf16.mxu1 %v5705_v62  ;;  %v5752_v55 = vunpack.c.l.s8.bf16 %v4888_v49  ;;  %v5759_v62 = vunpack.c.h.s8.bf16 %v4887_v39 }
 0x54a   : > { %6290 = vmatpush1.bf16.msra.mxu0 %v5702_v5  ;;  %v4895_v5 = vld [vmem:[%s9271_s25 + $0xb48] sm:$0xff] }
 0x54b   : > { %6634 = vmatpush1.bf16.msra.mxu1 %v5704_v6  ;;  %6291 = vmatprep.subr.bf16.mxu0 %v5711_v8  ;;  %v4897_v6 = vld [vmem:[%s9271_s25 + $0xb58] sm:$0xff]  ;;  %v5758_v8 = vunpack.c.h.s8.bf16 %v4886_v44  ;;  %v5767_v11 = vunpack.c.l.s8.bf16 %v4895_v5 }
 0x54c   : > { %6635 = vmatprep.subr.bf16.mxu1 %v5713_v9  ;;  %v5760_v9 = vunpack.c.h.s8.bf16 %v4888_v49  ;;  %v5777_v26 = vunpack.c.h.s8.bf16 %v4897_v6 }
 0x54e   : > { %6292 = vmatpush1.bf16.msra.mxu0 %v5710_v14  ;;  %v5769_v14 = vunpack.c.l.s8.bf16 %v4897_v6  ;;  %v4918_v6 = vld [vmem:[%s9271_s25 + $0xc00] sm:$0xff] }
 0x54f   : > { %6636 = vmatpush1.bf16.msra.mxu1 %v5712_v20  ;;  %6293 = vmatprep.subr.bf16.mxu0 %v5719_v23  ;;  %v4896_v20 = vld [vmem:[%s9271_s25 + $0xb50] sm:$0xff]  ;;  %v5766_v23 = vunpack.c.l.s8.bf16 %v4894_v43 }
 0x550   : > { %6637 = vmatprep.subr.bf16.mxu1 %v5721_v25  ;;  %v5768_v24 = vunpack.c.l.s8.bf16 %v4896_v20  ;;  %v5775_v25 = vunpack.c.h.s8.bf16 %v4895_v5 }
 0x552   : > { %6294 = vmatpush1.bf16.msra.mxu0 %v5718_v27  ;;  %v4903_v27 = vld [vmem:[%s9271_s25 + $0xb88] sm:$0xff] }
 0x553   : > { %6638 = vmatpush1.bf16.msra.mxu1 %v5720_v16  ;;  %6295 = vmatprep.subr.bf16.mxu0 %v5727_v28  ;;  %v4905_v16 = vld [vmem:[%s9271_s25 + $0xb98] sm:$0xff]  ;;  %v5774_v28 = vunpack.c.h.s8.bf16 %v4894_v43  ;;  %v5783_v30 = vunpack.c.l.s8.bf16 %v4903_v27 }
 0x554   : > { %6639 = vmatprep.subr.bf16.mxu1 %v5729_v29  ;;  %v5776_v29 = vunpack.c.h.s8.bf16 %v4896_v20  ;;  %v5793_v35 = vunpack.c.h.s8.bf16 %v4905_v16  ;;  %v4927_v20 = vld [vmem:[%s9271_s25 + $0xc48] sm:$0xff] }
 0x556   : > { %6296 = vmatpush1.bf16.msra.mxu0 %v5726_v48  ;;  %v5785_v48 = vunpack.c.l.s8.bf16 %v4905_v16  ;;  %v4926_v16 = vld [vmem:[%s9271_s25 + $0xc40] sm:$0xff] }
 0x557   : > { %6640 = vmatpush1.bf16.msra.mxu1 %v5728_v32  ;;  %6297 = vmatprep.subr.bf16.mxu0 %v5735_v33  ;;  %v4904_v32 = vld [vmem:[%s9271_s25 + $0xb90] sm:$0xff]  ;;  %v5782_v33 = vunpack.c.l.s8.bf16 %v4902_v31 }
 0x558   : > { %6641 = vmatprep.subr.bf16.mxu1 %v5737_v34  ;;  %v5784_v57 = vunpack.c.l.s8.bf16 %v4904_v32  ;;  %v5791_v34 = vunpack.c.h.s8.bf16 %v4903_v27  ;;  %v5831_v27 = vunpack.c.l.s8.bf16 %v4927_v20 }
 0x55a   : > { %6298 = vmatpush1.bf16.msra.mxu0 %v5734_v58  ;;  %v4911_v58 = vld [vmem:[%s9271_s25 + $0xbc8] sm:$0xff] }
 0x55b   : > { %6642 = vmatpush1.bf16.msra.mxu1 %v5736_v36  ;;  %6299 = vmatprep.subr.bf16.mxu0 %v5743_v37  ;;  %v4913_v36 = vld [vmem:[%s9271_s25 + $0xbd8] sm:$0xff]  ;;  %v5790_v37 = vunpack.c.h.s8.bf16 %v4902_v31  ;;  %v5799_v39 = vunpack.c.l.s8.bf16 %v4911_v58 }
 0x55c   : > { %6643 = vmatprep.subr.bf16.mxu1 %v5745_v38  ;;  %v5792_v38 = vunpack.c.h.s8.bf16 %v4904_v32  ;;  %v5809_v49 = vunpack.c.h.s8.bf16 %v4913_v36 }
 0x55e   : > { %6300 = vmatpush1.bf16.msra.mxu0 %v5742_v40  ;;  %v5801_v40 = vunpack.c.l.s8.bf16 %v4913_v36  ;;  %v4934_v36 = vld [vmem:[%s9271_s25 + $0xc80] sm:$0xff] }
 0x55f   : > { %6644 = vmatpush1.bf16.msra.mxu1 %v5744_v41  ;;  %6301 = vmatprep.subr.bf16.mxu0 %v5751_v42  ;;  %v4912_v41 = vld [vmem:[%s9271_s25 + $0xbd0] sm:$0xff]  ;;  %v5798_v42 = vunpack.c.l.s8.bf16 %v4910_v1 }
 0x560   : > { %6645 = vmatprep.subr.bf16.mxu1 %v5753_v45  ;;  %v5800_v44 = vunpack.c.l.s8.bf16 %v4912_v41  ;;  %v5807_v45 = vunpack.c.h.s8.bf16 %v4911_v58 }
 0x562   : > { %6302 = vmatpush1.bf16.msra.mxu0 %v5750_v52  ;;  %v4919_v52 = vld [vmem:[%s9271_s25 + $0xc08] sm:$0xff] }
 0x563   : > { %6646 = vmatpush1.bf16.msra.mxu1 %v5752_v55  ;;  %6303 = vmatprep.subr.bf16.mxu0 %v5759_v62  ;;  %v4921_v55 = vld [vmem:[%s9271_s25 + $0xc18] sm:$0xff]  ;;  %v5806_v62 = vunpack.c.h.s8.bf16 %v4910_v1  ;;  %v5815_v5 = vunpack.c.l.s8.bf16 %v4919_v52 }
 0x564   : > { %6647 = vmatprep.subr.bf16.mxu1 %v5761_v3  ;;  %v5808_v3 = vunpack.c.h.s8.bf16 %v4912_v41 }
 0x566   : > { %6304 = vmatpush1.bf16.msra.mxu0 %v5758_v8  ;;  %v5817_v8 = vunpack.c.l.s8.bf16 %v4921_v55 }
 0x567   : > { %6648 = vmatpush1.bf16.msra.mxu1 %v5760_v9  ;;  %6305 = vmatprep.subr.bf16.mxu0 %v5767_v11  ;;  %v4920_v9 = vld [vmem:[%s9271_s25 + $0xc10] sm:$0xff]  ;;  %v5814_v11 = vunpack.c.l.s8.bf16 %v4918_v6 }
 0x568   : > { %6649 = vmatprep.subr.bf16.mxu1 %v5769_v14  ;;  %v5816_v43 = vunpack.c.l.s8.bf16 %v4920_v9  ;;  %v5823_v14 = vunpack.c.h.s8.bf16 %v4919_v52 }
 0x56a   : > { %6306 = vmatpush1.bf16.msra.mxu0 %v5766_v23  ;;  %v5825_v23 = vunpack.c.h.s8.bf16 %v4921_v55  ;;  %v4942_v55 = vld [vmem:[%s9271_s25 + $0xcc0] sm:$0xff] }
 0x56b   : > { %6650 = vmatpush1.bf16.msra.mxu1 %v5768_v24  ;;  %6307 = vmatprep.subr.bf16.mxu0 %v5775_v25  ;;  %v4929_v24 = vld [vmem:[%s9271_s25 + $0xc58] sm:$0xff]  ;;  %v5822_v25 = vunpack.c.h.s8.bf16 %v4918_v6 }
 0x56c   : > { %6651 = vmatprep.subr.bf16.mxu1 %v5777_v26  ;;  %v5824_v26 = vunpack.c.h.s8.bf16 %v4920_v9  ;;  %v5841_v32 = vunpack.c.h.s8.bf16 %v4929_v24 }
 0x56e   : > { %6308 = vmatpush1.bf16.msra.mxu0 %v5774_v28  ;;  %v5833_v28 = vunpack.c.l.s8.bf16 %v4929_v24  ;;  %v4950_v24 = vld [vmem:[%s9271_s25 + $0xd00] sm:$0xff] }
 0x56f   : > { %6652 = vmatpush1.bf16.msra.mxu1 %v5776_v29  ;;  %6309 = vmatprep.subr.bf16.mxu0 %v5783_v30  ;;  %v4928_v29 = vld [vmem:[%s9271_s25 + $0xc50] sm:$0xff]  ;;  %v5830_v30 = vunpack.c.l.s8.bf16 %v4926_v16 }
 0x570   : > { %6653 = vmatprep.subr.bf16.mxu1 %v5785_v48  ;;  %v5832_v31 = vunpack.c.l.s8.bf16 %v4928_v29  ;;  %v5839_v48 = vunpack.c.h.s8.bf16 %v4927_v20 }
 0x572   : > { %6310 = vmatpush1.bf16.msra.mxu0 %v5782_v33  ;;  %v4935_v33 = vld [vmem:[%s9271_s25 + $0xc88] sm:$0xff] }
 0x573   : > { %6654 = vmatpush1.bf16.msra.mxu1 %v5784_v57  ;;  %6311 = vmatprep.subr.bf16.mxu0 %v5791_v34  ;;  %v4937_v57 = vld [vmem:[%s9271_s25 + $0xc98] sm:$0xff]  ;;  %v5838_v34 = vunpack.c.h.s8.bf16 %v4926_v16  ;;  %v5847_v58 = vunpack.c.l.s8.bf16 %v4935_v33 }
 0x574   : > { %6655 = vmatprep.subr.bf16.mxu1 %v5793_v35  ;;  %v5840_v35 = vunpack.c.h.s8.bf16 %v4928_v29  ;;  %v5857_v41 = vunpack.c.h.s8.bf16 %v4937_v57 }
 0x576   : > { %6312 = vmatpush1.bf16.msra.mxu0 %v5790_v37  ;;  %v5849_v37 = vunpack.c.l.s8.bf16 %v4937_v57  ;;  %v4958_v57 = vld [vmem:[%s9271_s25 + $0xd40] sm:$0xff] }
 0x577   : > { %6656 = vmatpush1.bf16.msra.mxu1 %v5792_v38  ;;  %6313 = vmatprep.subr.bf16.mxu0 %v5799_v39  ;;  %v4936_v38 = vld [vmem:[%s9271_s25 + $0xc90] sm:$0xff]  ;;  %v5846_v39 = vunpack.c.l.s8.bf16 %v4934_v36 }
 0x578   : > { %6657 = vmatprep.subr.bf16.mxu1 %v5801_v40  ;;  %v5848_v1 = vunpack.c.l.s8.bf16 %v4936_v38  ;;  %v5855_v40 = vunpack.c.h.s8.bf16 %v4935_v33 }
 0x57a   : > { %6314 = vmatpush1.bf16.msra.mxu0 %v5798_v42  ;;  %v4943_v42 = vld [vmem:[%s9271_s25 + $0xcc8] sm:$0xff] }
 0x57b   : > { %6658 = vmatpush1.bf16.msra.mxu1 %v5800_v44  ;;  %6315 = vmatprep.subr.bf16.mxu0 %v5807_v45  ;;  %v4945_v44 = vld [vmem:[%s9271_s25 + $0xcd8] sm:$0xff]  ;;  %v5854_v45 = vunpack.c.h.s8.bf16 %v4934_v36  ;;  %v5863_v52 = vunpack.c.l.s8.bf16 %v4943_v42 }
 0x57c   : > { %6659 = vmatprep.subr.bf16.mxu1 %v5809_v49  ;;  %v5856_v49 = vunpack.c.h.s8.bf16 %v4936_v38  ;;  %v5873_v9 = vunpack.c.h.s8.bf16 %v4945_v44 }
 0x57e   : > { %6316 = vmatpush1.bf16.msra.mxu0 %v5806_v62  ;;  %v5865_v62 = vunpack.c.l.s8.bf16 %v4945_v44  ;;  %v4966_v44 = vld [vmem:[%s9271_s25 + $0xd80] sm:$0xff] }
 0x57f   : > { %6660 = vmatpush1.bf16.msra.mxu1 %v5808_v3  ;;  %6328 = vmatprep.subr.bf16.mxu0 %v5815_v5  ;;  %v4944_v3 = vld [vmem:[%s9271_s25 + $0xcd0] sm:$0xff]  ;;  %v5862_v5 = vunpack.c.l.s8.bf16 %v4942_v55 }
 0x580   : > { %6672 = vmatprep.subr.bf16.mxu1 %v5817_v8  ;;  %v5864_v6 = vunpack.c.l.s8.bf16 %v4944_v3  ;;  %v5871_v8 = vunpack.c.h.s8.bf16 %v4943_v42  ;;  %v5872_v20 = vunpack.c.h.s8.bf16 %v4944_v3 }
 0x581   : > { %6318 = vmatmul.mubr.bf16.vlgmr.msra.gmra.mrb[20].mxu0 %v9464_v56 }
 0x582   : > { %6662 = vmatmul.mubr.bf16.vlgmr.msra.gmra.mrb[20].mxu1 %v9464_v56  ;;  %6329 = vmatpush1.bf16.msra.mxu0 %v5814_v11  ;;  %v4951_v11 = vld [vmem:[%s9271_s25 + $0xd08] sm:$0xff] }
 0x583   : > { %6360 = vmatprep.mubr.bf16.mxu0 %v9554_v0  ;;  %6673 = vmatpush1.bf16.msra.mxu1 %v5816_v43  ;;  %v4953_v43 = vld [vmem:[%s9271_s25 + $0xd18] sm:$0xff] }
 0x584   : > { %6704 = vmatprep.mubr.bf16.mxu1 %v9554_v0  ;;  %6330 = vmatprep.subr.bf16.mxu0 %v5823_v14  ;;  %v5870_v14 = vunpack.c.h.s8.bf16 %v4942_v55  ;;  %v5889_v29 = vunpack.c.h.s8.bf16 %v4953_v43 }
 0x585   : > { %6674 = vmatprep.subr.bf16.mxu1 %v5825_v23  ;;  %v5879_v23 = vunpack.c.l.s8.bf16 %v4951_v11 }
 0x586   : > { %6331 = vmatpush1.bf16.msra.mxu0 %v5822_v25  ;;  %v5881_v25 = vunpack.c.l.s8.bf16 %v4953_v43  ;;  %v4974_v43 = vld [vmem:[%s9271_s25 + $0xdc0] sm:$0xff] }
 0x587   : > { %6675 = vmatpush1.bf16.msra.mxu1 %v5824_v26  ;;  %6332 = vmatprep.subr.bf16.mxu0 %v5831_v27  ;;  %v4952_v26 = vld [vmem:[%s9271_s25 + $0xd10] sm:$0xff]  ;;  %v5878_v27 = vunpack.c.l.s8.bf16 %v4950_v24 }
 0x588   : > { %6676 = vmatprep.subr.bf16.mxu1 %v5833_v28  ;;  %v5880_v16 = vunpack.c.l.s8.bf16 %v4952_v26  ;;  %v5887_v28 = vunpack.c.h.s8.bf16 %v4951_v11 }
 0x58a   : > { %6333 = vmatpush1.bf16.msra.mxu0 %v5830_v30  ;;  %v4959_v30 = vld [vmem:[%s9271_s25 + $0xd48] sm:$0xff] }
 0x58b   : > { %6677 = vmatpush1.bf16.msra.mxu1 %v5832_v31  ;;  %6334 = vmatprep.subr.bf16.mxu0 %v5839_v48  ;;  %v4961_v31 = vld [vmem:[%s9271_s25 + $0xd58] sm:$0xff]  ;;  %v5886_v48 = vunpack.c.h.s8.bf16 %v4950_v24  ;;  %v5895_v33 = vunpack.c.l.s8.bf16 %v4959_v30 }
 0x58c   : > { %6678 = vmatprep.subr.bf16.mxu1 %v5841_v32  ;;  %v5888_v32 = vunpack.c.h.s8.bf16 %v4952_v26  ;;  %v5905_v38 = vunpack.c.h.s8.bf16 %v4961_v31 }
 0x58e   : > { %6335 = vmatpush1.bf16.msra.mxu0 %v5838_v34  ;;  %v5897_v34 = vunpack.c.l.s8.bf16 %v4961_v31  ;;  %v4982_v31 = vld [vmem:[%s9271_s25 + $0xe00] sm:$0xff] }
 0x58f   : > { %6679 = vmatpush1.bf16.msra.mxu1 %v5840_v35  ;;  %6336 = vmatprep.subr.bf16.mxu0 %v5847_v58  ;;  %v4960_v35 = vld [vmem:[%s9271_s25 + $0xd50] sm:$0xff]  ;;  %v5894_v58 = vunpack.c.l.s8.bf16 %v4958_v57 }
 0x590   : > { %6680 = vmatprep.subr.bf16.mxu1 %v5849_v37  ;;  %v5896_v36 = vunpack.c.l.s8.bf16 %v4960_v35  ;;  %v5903_v37 = vunpack.c.h.s8.bf16 %v4959_v30 }
 0x592   : > { %6337 = vmatpush1.bf16.msra.mxu0 %v5846_v39  ;;  %v4967_v39 = vld [vmem:[%s9271_s25 + $0xd88] sm:$0xff] }
 0x593   : > { %6681 = vmatpush1.bf16.msra.mxu1 %v5848_v1  ;;  %6338 = vmatprep.subr.bf16.mxu0 %v5855_v40  ;;  %v4969_v1 = vld [vmem:[%s9271_s25 + $0xd98] sm:$0xff]  ;;  %v5902_v40 = vunpack.c.h.s8.bf16 %v4958_v57  ;;  %v5911_v42 = vunpack.c.l.s8.bf16 %v4967_v39 }
 0x594   : > { %6682 = vmatprep.subr.bf16.mxu1 %v5857_v41  ;;  %v5904_v41 = vunpack.c.h.s8.bf16 %v4960_v35  ;;  %v5921_v3 = vunpack.c.h.s8.bf16 %v4969_v1  ;;  %v4991_v35 = vld [vmem:[%s9271_s25 + $0xe48] sm:$0xff] }
 0x596   : > { %6339 = vmatpush1.bf16.msra.mxu0 %v5854_v45  ;;  %v5913_v45 = vunpack.c.l.s8.bf16 %v4969_v1  ;;  %v4990_v1 = vld [vmem:[%s9271_s25 + $0xe40] sm:$0xff] }
 0x597   : > { %6683 = vmatpush1.bf16.msra.mxu1 %v5856_v49  ;;  %6340 = vmatprep.subr.bf16.mxu0 %v5863_v52  ;;  %v4968_v49 = vld [vmem:[%s9271_s25 + $0xd90] sm:$0xff]  ;;  %v5910_v52 = vunpack.c.l.s8.bf16 %v4966_v44 }
 0x598   : > { %6684 = vmatprep.subr.bf16.mxu1 %v5865_v62  ;;  %v5912_v55 = vunpack.c.l.s8.bf16 %v4968_v49  ;;  %v5919_v62 = vunpack.c.h.s8.bf16 %v4967_v39  ;;  %v5959_v39 = vunpack.c.l.s8.bf16 %v4991_v35 }
 0x59a   : > { %6341 = vmatpush1.bf16.msra.mxu0 %v5862_v5  ;;  %v4975_v5 = vld [vmem:[%s9271_s25 + $0xdc8] sm:$0xff] }
 0x59b   : > { %6685 = vmatpush1.bf16.msra.mxu1 %v5864_v6  ;;  %6342 = vmatprep.subr.bf16.mxu0 %v5871_v8  ;;  %v4977_v6 = vld [vmem:[%s9271_s25 + $0xdd8] sm:$0xff]  ;;  %v5918_v8 = vunpack.c.h.s8.bf16 %v4966_v44  ;;  %v5927_v11 = vunpack.c.l.s8.bf16 %v4975_v5 }
 0x59c   : > { %6686 = vmatprep.subr.bf16.mxu1 %v5873_v9  ;;  %v5920_v9 = vunpack.c.h.s8.bf16 %v4968_v49  ;;  %v5937_v26 = vunpack.c.h.s8.bf16 %v4977_v6 }
 0x59e   : > { %6343 = vmatpush1.bf16.msra.mxu0 %v5870_v14  ;;  %v5929_v14 = vunpack.c.l.s8.bf16 %v4977_v6  ;;  %v4998_v6 = vld [vmem:[%s9271_s25 + $0xe80] sm:$0xff] }
 0x59f   : > { %6687 = vmatpush1.bf16.msra.mxu1 %v5872_v20  ;;  %6344 = vmatprep.subr.bf16.mxu0 %v5879_v23  ;;  %v4976_v20 = vld [vmem:[%s9271_s25 + $0xdd0] sm:$0xff]  ;;  %v5926_v23 = vunpack.c.l.s8.bf16 %v4974_v43 }
 0x5a0   : > { %6688 = vmatprep.subr.bf16.mxu1 %v5881_v25  ;;  %v5928_v24 = vunpack.c.l.s8.bf16 %v4976_v20  ;;  %v5935_v25 = vunpack.c.h.s8.bf16 %v4975_v5 }
 0x5a2   : > { %6345 = vmatpush1.bf16.msra.mxu0 %v5878_v27  ;;  %v4983_v27 = vld [vmem:[%s9271_s25 + $0xe08] sm:$0xff] }
 0x5a3   : > { %6689 = vmatpush1.bf16.msra.mxu1 %v5880_v16  ;;  %6346 = vmatprep.subr.bf16.mxu0 %v5887_v28  ;;  %v4985_v16 = vld [vmem:[%s9271_s25 + $0xe18] sm:$0xff]  ;;  %v5934_v28 = vunpack.c.h.s8.bf16 %v4974_v43  ;;  %v5943_v30 = vunpack.c.l.s8.bf16 %v4983_v27 }
 0x5a4   : > { %6690 = vmatprep.subr.bf16.mxu1 %v5889_v29  ;;  %v5936_v29 = vunpack.c.h.s8.bf16 %v4976_v20 }
 0x5a6   : > { %6347 = vmatpush1.bf16.msra.mxu0 %v5886_v48  ;;  %v5945_v48 = vunpack.c.l.s8.bf16 %v4985_v16 }
 0x5a7   : > { %6691 = vmatpush1.bf16.msra.mxu1 %v5888_v32  ;;  %6348 = vmatprep.subr.bf16.mxu0 %v5895_v33  ;;  %v4984_v32 = vld [vmem:[%s9271_s25 + $0xe10] sm:$0xff]  ;;  %v5942_v33 = vunpack.c.l.s8.bf16 %v4982_v31 }
 0x5a8   : > { %6692 = vmatprep.subr.bf16.mxu1 %v5897_v34  ;;  %v5944_v57 = vunpack.c.l.s8.bf16 %v4984_v32  ;;  %v5951_v34 = vunpack.c.h.s8.bf16 %v4983_v27 }
 0x5aa   : > { %6349 = vmatpush1.bf16.msra.mxu0 %v5894_v58  ;;  %v5953_v58 = vunpack.c.h.s8.bf16 %v4985_v16  ;;  %v5006_v16 = vld [vmem:[%s9271_s25 + $0xec0] sm:$0xff] }
 0x5ab   : > { %6693 = vmatpush1.bf16.msra.mxu1 %v5896_v36  ;;  %6350 = vmatprep.subr.bf16.mxu0 %v5903_v37  ;;  %v4993_v36 = vld [vmem:[%s9271_s25 + $0xe58] sm:$0xff]  ;;  %v5950_v37 = vunpack.c.h.s8.bf16 %v4982_v31 }
 0x5ac   : > { %6694 = vmatprep.subr.bf16.mxu1 %v5905_v38  ;;  %v5952_v38 = vunpack.c.h.s8.bf16 %v4984_v32  ;;  %v5969_v49 = vunpack.c.h.s8.bf16 %v4993_v36 }
 0x5ae   : > { %6351 = vmatpush1.bf16.msra.mxu0 %v5902_v40  ;;  %v5961_v40 = vunpack.c.l.s8.bf16 %v4993_v36  ;;  %v5014_v36 = vld [vmem:[%s9271_s25 + $0xf00] sm:$0xff] }
 0x5af   : > { %6695 = vmatpush1.bf16.msra.mxu1 %v5904_v41  ;;  %6352 = vmatprep.subr.bf16.mxu0 %v5911_v42  ;;  %v4992_v41 = vld [vmem:[%s9271_s25 + $0xe50] sm:$0xff]  ;;  %v5958_v42 = vunpack.c.l.s8.bf16 %v4990_v1 }
 0x5b0   : > { %6696 = vmatprep.subr.bf16.mxu1 %v5913_v45  ;;  %v5960_v44 = vunpack.c.l.s8.bf16 %v4992_v41  ;;  %v5967_v45 = vunpack.c.h.s8.bf16 %v4991_v35 }
 0x5b2   : > { %6353 = vmatpush1.bf16.msra.mxu0 %v5910_v52  ;;  %v4999_v52 = vld [vmem:[%s9271_s25 + $0xe88] sm:$0xff] }
 0x5b3   : > { %6697 = vmatpush1.bf16.msra.mxu1 %v5912_v55  ;;  %6354 = vmatprep.subr.bf16.mxu0 %v5919_v62  ;;  %v5001_v55 = vld [vmem:[%s9271_s25 + $0xe98] sm:$0xff]  ;;  %v5966_v62 = vunpack.c.h.s8.bf16 %v4990_v1  ;;  %v5975_v5 = vunpack.c.l.s8.bf16 %v4999_v52 }
 0x5b4   : > { %6698 = vmatprep.subr.bf16.mxu1 %v5921_v3  ;;  %v5968_v3 = vunpack.c.h.s8.bf16 %v4992_v41  ;;  %v5985_v20 = vunpack.c.h.s8.bf16 %v5001_v55 }
 0x5b6   : > { %6355 = vmatpush1.bf16.msra.mxu0 %v5918_v8  ;;  %v5977_v8 = vunpack.c.l.s8.bf16 %v5001_v55  ;;  %v5022_v55 = vld [vmem:[%s9271_s25 + $0xf40] sm:$0xff] }
 0x5b7   : > { %6699 = vmatpush1.bf16.msra.mxu1 %v5920_v9  ;;  %6356 = vmatprep.subr.bf16.mxu0 %v5927_v11  ;;  %v5000_v9 = vld [vmem:[%s9271_s25 + $0xe90] sm:$0xff]  ;;  %v5974_v11 = vunpack.c.l.s8.bf16 %v4998_v6 }
 0x5b8   : > { %6700 = vmatprep.subr.bf16.mxu1 %v5929_v14  ;;  %v5976_v43 = vunpack.c.l.s8.bf16 %v5000_v9  ;;  %v5983_v14 = vunpack.c.h.s8.bf16 %v4999_v52 }
 0x5ba   : > { %6357 = vmatpush1.bf16.msra.mxu0 %v5926_v23  ;;  %v5007_v23 = vld [vmem:[%s9271_s25 + $0xec8] sm:$0xff] }
 0x5bb   : > { %6701 = vmatpush1.bf16.msra.mxu1 %v5928_v24  ;;  %6358 = vmatprep.subr.bf16.mxu0 %v5935_v25  ;;  %v5009_v24 = vld [vmem:[%s9271_s25 + $0xed8] sm:$0xff]  ;;  %v5982_v25 = vunpack.c.h.s8.bf16 %v4998_v6  ;;  %v5991_v27 = vunpack.c.l.s8.bf16 %v5007_v23 }
 0x5bc   : > { %6702 = vmatprep.subr.bf16.mxu1 %v5937_v26  ;;  %v5984_v26 = vunpack.c.h.s8.bf16 %v5000_v9  ;;  %v6001_v32 = vunpack.c.h.s8.bf16 %v5009_v24 }
 0x5be   : > { %6359 = vmatpush1.bf16.msra.mxu0 %v5934_v28  ;;  %v5993_v28 = vunpack.c.l.s8.bf16 %v5009_v24  ;;  %v5030_v24 = vld [vmem:[%s9271_s25 + $0xf80] sm:$0xff] }
 0x5bf   : > { %6703 = vmatpush1.bf16.msra.mxu1 %v5936_v29  ;;  %6371 = vmatprep.subr.bf16.mxu0 %v5943_v30  ;;  %v5008_v29 = vld [vmem:[%s9271_s25 + $0xed0] sm:$0xff]  ;;  %v5990_v30 = vunpack.c.l.s8.bf16 %v5006_v16 }
 0x5c0   : > { %6715 = vmatprep.subr.bf16.mxu1 %v5945_v48  ;;  %v5992_v31 = vunpack.c.l.s8.bf16 %v5008_v29  ;;  %v5999_v48 = vunpack.c.h.s8.bf16 %v5007_v23  ;;  %v6000_v35 = vunpack.c.h.s8.bf16 %v5008_v29 }
 0x5c1   : > { %6361 = vmatmul.mubr.bf16.vlgmr.msra.gmra.mrb[20].mxu0 %v9549_v63 }
 0x5c2   : > { %6705 = vmatmul.mubr.bf16.vlgmr.msra.gmra.mrb[20].mxu1 %v9549_v63  ;;  %6372 = vmatpush1.bf16.msra.mxu0 %v5942_v33  ;;  %v5015_v33 = vld [vmem:[%s9271_s25 + $0xf08] sm:$0xff] }
 0x5c3   : > { %6403 = vmatprep.mubr.bf16.mxu0 %v9557_v10  ;;  %6716 = vmatpush1.bf16.msra.mxu1 %v5944_v57  ;;  %v5017_v57 = vld [vmem:[%s9271_s25 + $0xf18] sm:$0xff] }
 0x5c4   : > { %6747 = vmatprep.mubr.bf16.mxu1 %v9557_v10  ;;  %6373 = vmatprep.subr.bf16.mxu0 %v5951_v34  ;;  %v5998_v34 = vunpack.c.h.s8.bf16 %v5006_v16  ;;  %v6017_v41 = vunpack.c.h.s8.bf16 %v5017_v57 }
 0x5c5   : > { %6717 = vmatprep.subr.bf16.mxu1 %v5953_v58  ;;  %v6007_v58 = vunpack.c.l.s8.bf16 %v5015_v33 }
 0x5c6   : > { %6374 = vmatpush1.bf16.msra.mxu0 %v5950_v37  ;;  %v6009_v37 = vunpack.c.l.s8.bf16 %v5017_v57  ;;  %v5038_v57 = vld [vmem:[%s9271_s25 + $0xfc0] sm:$0xff] }
 0x5c7   : > { %6718 = vmatpush1.bf16.msra.mxu1 %v5952_v38  ;;  %6375 = vmatprep.subr.bf16.mxu0 %v5959_v39  ;;  %v5016_v38 = vld [vmem:[%s9271_s25 + $0xf10] sm:$0xff]  ;;  %v6006_v39 = vunpack.c.l.s8.bf16 %v5014_v36 }
 0x5c8   : > { %6719 = vmatprep.subr.bf16.mxu1 %v5961_v40  ;;  %v6008_v1 = vunpack.c.l.s8.bf16 %v5016_v38  ;;  %v6015_v40 = vunpack.c.h.s8.bf16 %v5015_v33 }
 0x5ca   : > { %6376 = vmatpush1.bf16.msra.mxu0 %v5958_v42  ;;  %v5023_v42 = vld [vmem:[%s9271_s25 + $0xf48] sm:$0xff] }
 0x5cb   : > { %6720 = vmatpush1.bf16.msra.mxu1 %v5960_v44  ;;  %6377 = vmatprep.subr.bf16.mxu0 %v5967_v45  ;;  %v5025_v44 = vld [vmem:[%s9271_s25 + $0xf58] sm:$0xff]  ;;  %v6014_v45 = vunpack.c.h.s8.bf16 %v5014_v36  ;;  %v6023_v52 = vunpack.c.l.s8.bf16 %v5023_v42 }
 0x5cc   : > { %6721 = vmatprep.subr.bf16.mxu1 %v5969_v49  ;;  %v6016_v49 = vunpack.c.h.s8.bf16 %v5016_v38  ;;  %v6033_v9 = vunpack.c.h.s8.bf16 %v5025_v44 }
 0x5ce   : > { %6378 = vmatpush1.bf16.msra.mxu0 %v5966_v62  ;;  %v6025_v62 = vunpack.c.l.s8.bf16 %v5025_v44  ;;  %v4538_v44 = vld [vmem:[%s9271_s25 + $0x20] sm:$0xff] }
 0x5cf   : > { %6722 = vmatpush1.bf16.msra.mxu1 %v5968_v3  ;;  %6379 = vmatprep.subr.bf16.mxu0 %v5975_v5  ;;  %v5024_v3 = vld [vmem:[%s9271_s25 + $0xf50] sm:$0xff]  ;;  %v6022_v5 = vunpack.c.l.s8.bf16 %v5022_v55 }
 0x5d0   : > { %6723 = vmatprep.subr.bf16.mxu1 %v5977_v8  ;;  %v6024_v6 = vunpack.c.l.s8.bf16 %v5024_v3  ;;  %v6031_v8 = vunpack.c.h.s8.bf16 %v5023_v42 }
 0x5d2   : > { %6380 = vmatpush1.bf16.msra.mxu0 %v5974_v11  ;;  %v5031_v11 = vld [vmem:[%s9271_s25 + $0xf88] sm:$0xff] }
 0x5d3   : > { %6724 = vmatpush1.bf16.msra.mxu1 %v5976_v43  ;;  %6381 = vmatprep.subr.bf16.mxu0 %v5983_v14  ;;  %v5033_v43 = vld [vmem:[%s9271_s25 + $0xf98] sm:$0xff]  ;;  %v6030_v14 = vunpack.c.h.s8.bf16 %v5022_v55  ;;  %v6039_v23 = vunpack.c.l.s8.bf16 %v5031_v11 }
 0x5d4   : > { %6725 = vmatprep.subr.bf16.mxu1 %v5985_v20  ;;  %v6032_v20 = vunpack.c.h.s8.bf16 %v5024_v3  ;;  %v6049_v29 = vunpack.c.h.s8.bf16 %v5033_v43  ;;  %v4547_v3 = vld [vmem:[%s9271_s25 + $0x68] sm:$0xff] }
 0x5d6   : > { %6382 = vmatpush1.bf16.msra.mxu0 %v5982_v25  ;;  %v6041_v25 = vunpack.c.l.s8.bf16 %v5033_v43  ;;  %v4546_v43 = vld [vmem:[%s9271_s25 + $0x60] sm:$0xff] }
 0x5d7   : > { %6726 = vmatpush1.bf16.msra.mxu1 %v5984_v26  ;;  %6383 = vmatprep.subr.bf16.mxu0 %v5991_v27  ;;  %v5032_v26 = vld [vmem:[%s9271_s25 + $0xf90] sm:$0xff]  ;;  %v6038_v27 = vunpack.c.l.s8.bf16 %v5030_v24 }
 0x5d8   : > { %6727 = vmatprep.subr.bf16.mxu1 %v5993_v28  ;;  %v6040_v16 = vunpack.c.l.s8.bf16 %v5032_v26  ;;  %v6047_v28 = vunpack.c.h.s8.bf16 %v5031_v11  ;;  %v5067_v11 = vunpack.c.l.s8.bf16 %v4547_v3 }
 0x5da   : > { %6384 = vmatpush1.bf16.msra.mxu0 %v5990_v30  ;;  %v5039_v30 = vld [vmem:[%s9271_s25 + $0xfc8] sm:$0xff] }
 0x5db   : > { %6728 = vmatpush1.bf16.msra.mxu1 %v5992_v31  ;;  %6385 = vmatprep.subr.bf16.mxu0 %v5999_v48  ;;  %v5041_v31 = vld [vmem:[%s9271_s25 + $0xfd8] sm:$0xff]  ;;  %v6046_v48 = vunpack.c.h.s8.bf16 %v5030_v24  ;;  %v6055_v33 = vunpack.c.l.s8.bf16 %v5039_v30 }
 0x5dc   : > { %6729 = vmatprep.subr.bf16.mxu1 %v6001_v32  ;;  %v6048_v32 = vunpack.c.h.s8.bf16 %v5032_v26  ;;  %v6065_v38 = vunpack.c.h.s8.bf16 %v5041_v31 }
 0x5de   : > { %6386 = vmatpush1.bf16.msra.mxu0 %v5998_v34  ;;  %v6057_v34 = vunpack.c.l.s8.bf16 %v5041_v31 }
 0x5df   : > { %6730 = vmatpush1.bf16.msra.mxu1 %v6000_v35  ;;  %6387 = vmatprep.subr.bf16.mxu0 %v6007_v58  ;;  %v5040_v35 = vld [vmem:[%s9271_s25 + $0xfd0] sm:$0xff]  ;;  %v6054_v58 = vunpack.c.l.s8.bf16 %v5038_v57 }
 0x5e0   : > { %6731 = vmatprep.subr.bf16.mxu1 %v6009_v37  ;;  %v6056_v36 = vunpack.c.l.s8.bf16 %v5040_v35  ;;  %v6063_v37 = vunpack.c.h.s8.bf16 %v5039_v30  ;;  %v4554_v30 = vld [vmem:[%s9271_s25 + $0xa0] sm:$0xff] }
 0x5e2   : > { %6388 = vmatpush1.bf16.msra.mxu0 %v6006_v39  ;;  %v4539_v39 = vld [vmem:[%s9271_s25 + $0x28] sm:$0xff] }
 0x5e3   : > { %6732 = vmatpush1.bf16.msra.mxu1 %v6008_v1  ;;  %6389 = vmatprep.subr.bf16.mxu0 %v6015_v40  ;;  %v4541_v1 = vld [vmem:[%s9271_s25 + $0x38] sm:$0xff]  ;;  %v6062_v40 = vunpack.c.h.s8.bf16 %v5038_v57  ;;  %v5051_v42 = vunpack.c.l.s8.bf16 %v4539_v39 }
 0x5e4   : > { %6733 = vmatprep.subr.bf16.mxu1 %v6017_v41  ;;  %v6064_v41 = vunpack.c.h.s8.bf16 %v5040_v35  ;;  %v4563_v35 = vld [vmem:[%s9271_s25 + $0xe8] sm:$0xff] }
 0x5e6   : > { %6390 = vmatpush1.bf16.msra.mxu0 %v6014_v45  ;;  %v5053_v45 = vunpack.c.l.s8.bf16 %v4541_v1 }
 0x5e7   : > { %6734 = vmatpush1.bf16.msra.mxu1 %v6016_v49  ;;  %6391 = vmatprep.subr.bf16.mxu0 %v6023_v52  ;;  %v4540_v49 = vld [vmem:[%s9271_s25 + $0x30] sm:$0xff]  ;;  %v5050_v52 = vunpack.c.l.s8.bf16 %v4538_v44 }
 0x5e8   : > { %6735 = vmatprep.subr.bf16.mxu1 %v6025_v62  ;;  %v5052_v55 = vunpack.c.l.s8.bf16 %v4540_v49  ;;  %v5059_v62 = vunpack.c.h.s8.bf16 %v4539_v39  ;;  %v4562_v39 = vld [vmem:[%s9271_s25 + $0xe0] sm:$0xff] }
 0x5ea   : > { %6392 = vmatpush1.bf16.msra.mxu0 %v6022_v5  ;;  %v5061_v5 = vunpack.c.h.s8.bf16 %v4541_v1 }
 0x5eb   : > { %6736 = vmatpush1.bf16.msra.mxu1 %v6024_v6  ;;  %6393 = vmatprep.subr.bf16.mxu0 %v6031_v8  ;;  %v4549_v6 = vld [vmem:[%s9271_s25 + $0x78] sm:$0xff]  ;;  %v5058_v8 = vunpack.c.h.s8.bf16 %v4538_v44  ;;  %v5107_v44 = vunpack.c.h.s8.bf16 %v4563_v35 }
 0x5ec   : > { %6737 = vmatprep.subr.bf16.mxu1 %v6033_v9  ;;  %v5060_v9 = vunpack.c.h.s8.bf16 %v4540_v49  ;;  %v5077_v26 = vunpack.c.h.s8.bf16 %v4549_v6  ;;  %v4571_v49 = vld [vmem:[%s9271_s25 + $0x128] sm:$0xff] }
 0x5ee   : > { %6394 = vmatpush1.bf16.msra.mxu0 %v6030_v14  ;;  %v5069_v14 = vunpack.c.l.s8.bf16 %v4549_v6 }
 0x5ef   : > { %6738 = vmatpush1.bf16.msra.mxu1 %v6032_v20  ;;  %6395 = vmatprep.subr.bf16.mxu0 %v6039_v23  ;;  %v4548_v20 = vld [vmem:[%s9271_s25 + $0x70] sm:$0xff]  ;;  %v5066_v23 = vunpack.c.l.s8.bf16 %v4546_v43 }
 0x5f0   : > { %6739 = vmatprep.subr.bf16.mxu1 %v6041_v25  ;;  %v5068_v24 = vunpack.c.l.s8.bf16 %v4548_v20  ;;  %v5075_v25 = vunpack.c.h.s8.bf16 %v4547_v3  ;;  %v5115_v3 = vunpack.c.l.s8.bf16 %v4571_v49 }
 0x5f2   : > { %6396 = vmatpush1.bf16.msra.mxu0 %v6038_v27  ;;  %v4555_v27 = vld [vmem:[%s9271_s25 + $0xa8] sm:$0xff] }
 0x5f3   : > { %6740 = vmatpush1.bf16.msra.mxu1 %v6040_v16  ;;  %6397 = vmatprep.subr.bf16.mxu0 %v6047_v28  ;;  %v4557_v16 = vld [vmem:[%s9271_s25 + $0xb8] sm:$0xff]  ;;  %v5074_v28 = vunpack.c.h.s8.bf16 %v4546_v43  ;;  %v5091_v57 = vunpack.c.h.s8.bf16 %v4555_v27  ;;  %v5123_v43 = vunpack.c.h.s8.bf16 %v4571_v49  ;;  %v4594_v49 = vld [vmem:[%s9271_s25 + $0x1e0] sm:$0xff] }
 0x5f4   : > { %6741 = vmatprep.subr.bf16.mxu1 %v6049_v29  ;;  %v5083_v29 = vunpack.c.l.s8.bf16 %v4555_v27  ;;  %v5085_v31 = vunpack.c.l.s8.bf16 %v4557_v16  ;;  %v4578_v27 = vld [vmem:[%s9271_s25 + $0x160] sm:$0xff] }
 0x5f6   : > { %6398 = vmatpush1.bf16.msra.mxu0 %v6046_v48  ;;  %v4556_v48 = vld [vmem:[%s9271_s25 + $0xb0] sm:$0xff] }
 0x5f7   : > { %6742 = vmatpush1.bf16.msra.mxu1 %v6048_v32  ;;  %6399 = vmatprep.subr.bf16.mxu0 %v6055_v33  ;;  %v5082_v32 = vunpack.c.l.s8.bf16 %v4554_v30  ;;  %v5084_v33 = vunpack.c.l.s8.bf16 %v4556_v48 }
 0x5f8   : > { %6743 = vmatprep.subr.bf16.mxu1 %v6057_v34  ;;  %v5093_v34 = vunpack.c.h.s8.bf16 %v4557_v16 }
 0x5fa   : > { %6400 = vmatpush1.bf16.msra.mxu0 %v6054_v58  ;;  %v4565_v58 = vld [vmem:[%s9271_s25 + $0xf8] sm:$0xff] }
 0x5fb   : > { %6744 = vmatpush1.bf16.msra.mxu1 %v6056_v36  ;;  %6401 = vmatprep.subr.bf16.mxu0 %v6063_v37  ;;  %v5090_v36 = vunpack.c.h.s8.bf16 %v4554_v30  ;;  %v5092_v37 = vunpack.c.h.s8.bf16 %v4556_v48  ;;  %v5101_v1 = vunpack.c.l.s8.bf16 %v4565_v58  ;;  %v4587_v48 = vld [vmem:[%s9271_s25 + $0x1a8] sm:$0xff] }
 0x5fc   : > { %6745 = vmatprep.subr.bf16.mxu1 %v6065_v38  ;;  %v5099_v38 = vunpack.c.l.s8.bf16 %v4563_v35  ;;  %v4586_v35 = vld [vmem:[%s9271_s25 + $0x1a0] sm:$0xff] }
 0x5fe   : > { %6402 = vmatpush1.bf16.msra.mxu0 %v6062_v40  ;;  %v4564_v40 = vld [vmem:[%s9271_s25 + $0xf0] sm:$0xff] }
 0x5ff   : > { %6746 = vmatpush1.bf16.msra.mxu1 %v6064_v41  ;;  %6758 = vmatprep.subr.bf16.mxu0 %v5051_v42  ;;  %v5098_v41 = vunpack.c.l.s8.bf16 %v4562_v39  ;;  %v5100_v42 = vunpack.c.l.s8.bf16 %v4564_v40 }
 0x600   : > { %7102 = vmatprep.subr.bf16.mxu1 %v5053_v45  ;;  %v5109_v45 = vunpack.c.h.s8.bf16 %v4565_v58 }
 0x601   : > { %6404 = vmatmul.mubr.bf16.vlgmr.msra.gmra.mrb[20].mxu0 %v9552_v7 }
 0x602   : > { %6748 = vmatmul.mubr.bf16.vlgmr.msra.gmra.mrb[20].mxu1 %v9552_v7  ;;  %6759 = vmatpush1.bf16.msra.mxu0 %v5050_v52  ;;  %v4573_v52 = vld [vmem:[%s9271_s25 + $0x138] sm:$0xff] }
 0x603   : > { %6790 = vmatprep.mubr.bf16.mxu0 %v9353_v21  ;;  %7103 = vmatpush1.bf16.msra.mxu1 %v5052_v55  ;;  %v5106_v55 = vunpack.c.h.s8.bf16 %v4562_v39  ;;  %v5117_v6 = vunpack.c.l.s8.bf16 %v4573_v52  ;;  %v5155_v39 = vunpack.c.h.s8.bf16 %v4587_v48 }
 0x604   : > { %7134 = vmatprep.mubr.bf16.mxu1 %v9353_v21  ;;  %6760 = vmatprep.subr.bf16.mxu0 %v5059_v62  ;;  %v5076_v21 = vunpack.c.h.s8.bf16 %v4548_v20  ;;  %v5108_v62 = vunpack.c.h.s8.bf16 %v4564_v40  ;;  %v4579_v20 = vld [vmem:[%s9271_s25 + $0x168] sm:$0xff] }
 0x605   : > { %7104 = vmatprep.subr.bf16.mxu1 %v5061_v5  ;;  %v4570_v5 = vld [vmem:[%s9271_s25 + $0x120] sm:$0xff]  ;;  %v5139_v30 = vunpack.c.h.s8.bf16 %v4579_v20  ;;  %v4595_v40 = vld [vmem:[%s9271_s25 + $0x1e8] sm:$0xff] }
 0x606   : > { %6761 = vmatpush1.bf16.msra.mxu0 %v5058_v8  ;;  %v4572_v8 = vld [vmem:[%s9271_s25 + $0x130] sm:$0xff] }
 0x607   : > { %7105 = vmatpush1.bf16.msra.mxu1 %v5060_v9  ;;  %6762 = vmatprep.subr.bf16.mxu0 %v5067_v11  ;;  %v5114_v9 = vunpack.c.l.s8.bf16 %v4570_v5  ;;  %v5116_v11 = vunpack.c.l.s8.bf16 %v4572_v8 }
 0x608   : > { %7106 = vmatprep.subr.bf16.mxu1 %v5069_v14  ;;  %v5125_v14 = vunpack.c.h.s8.bf16 %v4573_v52 }
 0x60a   : > { %6763 = vmatpush1.bf16.msra.mxu0 %v5066_v23  ;;  %v4581_v23 = vld [vmem:[%s9271_s25 + $0x178] sm:$0xff] }
 0x60b   : > { %7107 = vmatpush1.bf16.msra.mxu1 %v5068_v24  ;;  %6764 = vmatprep.subr.bf16.mxu0 %v5075_v25  ;;  %v5122_v24 = vunpack.c.h.s8.bf16 %v4570_v5  ;;  %v5124_v25 = vunpack.c.h.s8.bf16 %v4572_v8  ;;  %v5133_v16 = vunpack.c.l.s8.bf16 %v4581_v23  ;;  %v5171_v5 = vunpack.c.h.s8.bf16 %v4595_v40  ;;  %v4603_v8 = vld [vmem:[%s9271_s25 + $0x228] sm:$0xff] }
 0x60c   : > { %7108 = vmatprep.subr.bf16.mxu1 %v5077_v26  ;;  %v5131_v26 = vunpack.c.l.s8.bf16 %v4579_v20  ;;  %v4602_v20 = vld [vmem:[%s9271_s25 + $0x220] sm:$0xff] }
 0x60e   : > { %6765 = vmatpush1.bf16.msra.mxu0 %v5074_v28  ;;  %v4580_v28 = vld [vmem:[%s9271_s25 + $0x170] sm:$0xff] }
 0x60f   : > { %7109 = vmatpush1.bf16.msra.mxu1 %v5076_v21  ;;  %6766 = vmatprep.subr.bf16.mxu0 %v5083_v29  ;;  %v5130_v21 = vunpack.c.l.s8.bf16 %v4578_v27  ;;  %v5132_v29 = vunpack.c.l.s8.bf16 %v4580_v28 }
 0x610   : > { %7110 = vmatprep.subr.bf16.mxu1 %v5085_v31  ;;  %v5141_v31 = vunpack.c.h.s8.bf16 %v4581_v23 }
 0x612   : > { %6767 = vmatpush1.bf16.msra.mxu0 %v5082_v32  ;;  %v4589_v32 = vld [vmem:[%s9271_s25 + $0x1b8] sm:$0xff] }
 0x613   : > { %7111 = vmatpush1.bf16.msra.mxu1 %v5084_v33  ;;  %6768 = vmatprep.subr.bf16.mxu0 %v5091_v57  ;;  %v5138_v33 = vunpack.c.h.s8.bf16 %v4578_v27  ;;  %v5140_v57 = vunpack.c.h.s8.bf16 %v4580_v28  ;;  %v5149_v58 = vunpack.c.l.s8.bf16 %v4589_v32  ;;  %v5187_v27 = vunpack.c.h.s8.bf16 %v4603_v8 }
 0x614   : > { %7112 = vmatprep.subr.bf16.mxu1 %v5093_v34  ;;  %v5147_v34 = vunpack.c.l.s8.bf16 %v4587_v48  ;;  %v4610_v48 = vld [vmem:[%s9271_s25 + $0x260] sm:$0xff] }
 0x616   : > { %6769 = vmatpush1.bf16.msra.mxu0 %v5090_v36  ;;  %v4588_v36 = vld [vmem:[%s9271_s25 + $0x1b0] sm:$0xff] }
 0x617   : > { %7113 = vmatpush1.bf16.msra.mxu1 %v5092_v37  ;;  %6770 = vmatprep.subr.bf16.mxu0 %v5099_v38  ;;  %v5146_v37 = vunpack.c.l.s8.bf16 %v4586_v35  ;;  %v5148_v38 = vunpack.c.l.s8.bf16 %v4588_v36 }
 0x618   : > { %7114 = vmatprep.subr.bf16.mxu1 %v5101_v1  ;;  %v5157_v1 = vunpack.c.h.s8.bf16 %v4589_v32 }
 0x61a   : > { %6771 = vmatpush1.bf16.msra.mxu0 %v5098_v41  ;;  %v4597_v41 = vld [vmem:[%s9271_s25 + $0x1f8] sm:$0xff] }
 0x61b   : > { %7115 = vmatpush1.bf16.msra.mxu1 %v5100_v42  ;;  %6772 = vmatprep.subr.bf16.mxu0 %v5107_v44  ;;  %v5154_v42 = vunpack.c.h.s8.bf16 %v4586_v35  ;;  %v5156_v44 = vunpack.c.h.s8.bf16 %v4588_v36  ;;  %v5165_v52 = vunpack.c.l.s8.bf16 %v4597_v41  ;;  %v4621_v36 = vld [vmem:[%s9271_s25 + $0x2b8] sm:$0xff] }
 0x61c   : > { %7116 = vmatprep.subr.bf16.mxu1 %v5109_v45  ;;  %v5163_v45 = vunpack.c.l.s8.bf16 %v4595_v40  ;;  %v4620_v40 = vld [vmem:[%s9271_s25 + $0x2b0] sm:$0xff] }
 0x61e   : > { %6773 = vmatpush1.bf16.msra.mxu0 %v5106_v55  ;;  %v4596_v55 = vld [vmem:[%s9271_s25 + $0x1f0] sm:$0xff] }
 0x61f   : > { %7117 = vmatpush1.bf16.msra.mxu1 %v5108_v62  ;;  %6774 = vmatprep.subr.bf16.mxu0 %v5115_v3  ;;  %v5162_v62 = vunpack.c.l.s8.bf16 %v4594_v49  ;;  %v5164_v3 = vunpack.c.l.s8.bf16 %v4596_v55 }
 0x620   : > { %7118 = vmatprep.subr.bf16.mxu1 %v5117_v6  ;;  %v5173_v6 = vunpack.c.h.s8.bf16 %v4597_v41 }
 0x622   : > { %6775 = vmatpush1.bf16.msra.mxu0 %v5114_v9  ;;  %v4605_v9 = vld [vmem:[%s9271_s25 + $0x238] sm:$0xff] }
 0x623   : > { %7119 = vmatpush1.bf16.msra.mxu1 %v5116_v11  ;;  %6776 = vmatprep.subr.bf16.mxu0 %v5123_v43  ;;  %v5170_v11 = vunpack.c.h.s8.bf16 %v4594_v49  ;;  %v5172_v43 = vunpack.c.h.s8.bf16 %v4596_v55  ;;  %v5181_v23 = vunpack.c.l.s8.bf16 %v4605_v9  ;;  %v5189_v28 = vunpack.c.h.s8.bf16 %v4605_v9  ;;  %v4627_v49 = vld [vmem:[%s9271_s25 + $0x2e8] sm:$0xff] }
 0x624   : > { %7120 = vmatprep.subr.bf16.mxu1 %v5125_v14  ;;  %v5179_v14 = vunpack.c.l.s8.bf16 %v4603_v8  ;;  %v4628_v8 = vld [vmem:[%s9271_s25 + $0x2f0] sm:$0xff] }
 0x626   : > { %6777 = vmatpush1.bf16.msra.mxu0 %v5122_v24  ;;  %v4604_v24 = vld [vmem:[%s9271_s25 + $0x230] sm:$0xff] }
 0x627   : > { %7121 = vmatpush1.bf16.msra.mxu1 %v5124_v25  ;;  %6778 = vmatprep.subr.bf16.mxu0 %v5131_v26  ;;  %v5178_v25 = vunpack.c.l.s8.bf16 %v4602_v20  ;;  %v5180_v26 = vunpack.c.l.s8.bf16 %v4604_v24 }
 0x628   : > { %7122 = vmatprep.subr.bf16.mxu1 %v5133_v16  ;;  %v4611_v16 = vld [vmem:[%s9271_s25 + $0x268] sm:$0xff] }
 0x62a   : > { %6779 = vmatpush1.bf16.msra.mxu0 %v5130_v21  ;;  %v4613_v21 = vld [vmem:[%s9271_s25 + $0x278] sm:$0xff] }
 0x62b   : > { %7123 = vmatpush1.bf16.msra.mxu1 %v5132_v29  ;;  %6780 = vmatprep.subr.bf16.mxu0 %v5139_v30  ;;  %v5186_v29 = vunpack.c.h.s8.bf16 %v4602_v20  ;;  %v5188_v30 = vunpack.c.h.s8.bf16 %v4604_v24  ;;  %v5197_v32 = vunpack.c.l.s8.bf16 %v4613_v21  ;;  %v5205_v35 = vunpack.c.h.s8.bf16 %v4613_v21  ;;  %v4635_v20 = vld [vmem:[%s9271_s25 + $0x328] sm:$0xff] }
 0x62c   : > { %7124 = vmatprep.subr.bf16.mxu1 %v5141_v31  ;;  %v5195_v31 = vunpack.c.l.s8.bf16 %v4611_v16 }
 0x62e   : > { %6781 = vmatpush1.bf16.msra.mxu0 %v5138_v33  ;;  %v4612_v33 = vld [vmem:[%s9271_s25 + $0x270] sm:$0xff] }
 0x62f   : > { %7125 = vmatpush1.bf16.msra.mxu1 %v5140_v57  ;;  %6782 = vmatprep.subr.bf16.mxu0 %v5147_v34  ;;  %v5194_v57 = vunpack.c.l.s8.bf16 %v4610_v48  ;;  %v5203_v34 = vunpack.c.h.s8.bf16 %v4611_v16 }
 0x630   : > { %7126 = vmatprep.subr.bf16.mxu1 %v5149_v58  ;;  %v4619_v58 = vld [vmem:[%s9271_s25 + $0x2a8] sm:$0xff] }
 0x632   : > { %6783 = vmatpush1.bf16.msra.mxu0 %v5146_v37  ;;  %v5202_v37 = vunpack.c.h.s8.bf16 %v4610_v48  ;;  %v4643_v48 = vld [vmem:[%s9271_s25 + $0x368] sm:$0xff] }
 0x633   : > { %7127 = vmatpush1.bf16.msra.mxu1 %v5148_v38  ;;  %6784 = vmatprep.subr.bf16.mxu0 %v5155_v39  ;;  %v5211_v38 = vunpack.c.l.s8.bf16 %v4619_v58  ;;  %v4618_v39 = vld [vmem:[%s9271_s25 + $0x2a0] sm:$0xff] }
 0x634   : > { %7128 = vmatprep.subr.bf16.mxu1 %v5157_v1  ;;  %v5213_v1 = vunpack.c.l.s8.bf16 %v4621_v36  ;;  %v5210_v41 = vunpack.c.l.s8.bf16 %v4618_v39  ;;  %v5218_v55 = vunpack.c.h.s8.bf16 %v4618_v39  ;;  %v4651_v39 = vld [vmem:[%s9271_s25 + $0x3a8] sm:$0xff] }
 0x636   : > { %6785 = vmatpush1.bf16.msra.mxu0 %v5154_v42  ;;  %v5212_v42 = vunpack.c.l.s8.bf16 %v4620_v40 }
 0x637   : > { %7129 = vmatpush1.bf16.msra.mxu1 %v5156_v44  ;;  %6786 = vmatprep.subr.bf16.mxu0 %v5163_v45  ;;  %v5219_v44 = vunpack.c.h.s8.bf16 %v4619_v58  ;;  %v5221_v45 = vunpack.c.h.s8.bf16 %v4621_v36  ;;  %v4644_v58 = vld [vmem:[%s9271_s25 + $0x370] sm:$0xff] }
 0x638   : > { %7130 = vmatprep.subr.bf16.mxu1 %v5165_v52  ;;  %v4629_v52 = vld [vmem:[%s9271_s25 + $0x2f8] sm:$0xff] }
 0x63a   : > { %6787 = vmatpush1.bf16.msra.mxu0 %v5162_v62  ;;  %v5220_v62 = vunpack.c.h.s8.bf16 %v4620_v40 }
 0x63b   : > { %7131 = vmatpush1.bf16.msra.mxu1 %v5164_v3  ;;  %6788 = vmatprep.subr.bf16.mxu0 %v5171_v5  ;;  %v5227_v3 = vunpack.c.l.s8.bf16 %v4627_v49  ;;  %v4626_v5 = vld [vmem:[%s9271_s25 + $0x2e0] sm:$0xff] }
 0x63c   : > { %7132 = vmatprep.subr.bf16.mxu1 %v5173_v6  ;;  %v5229_v6 = vunpack.c.l.s8.bf16 %v4629_v52  ;;  %v5226_v9 = vunpack.c.l.s8.bf16 %v4626_v5  ;;  %v5234_v24 = vunpack.c.h.s8.bf16 %v4626_v5  ;;  %v4659_v5 = vld [vmem:[%s9271_s25 + $0x3e8] sm:$0xff] }
 0x63e   : > { %6789 = vmatpush1.bf16.msra.mxu0 %v5170_v11  ;;  %v5228_v11 = vunpack.c.l.s8.bf16 %v4628_v8 }
 0x63f   : > { %7133 = vmatpush1.bf16.msra.mxu1 %v5172_v43  ;;  %6801 = vmatprep.subr.bf16.mxu0 %v5179_v14  ;;  %v5235_v43 = vunpack.c.h.s8.bf16 %v4627_v49  ;;  %v5237_v14 = vunpack.c.h.s8.bf16 %v4629_v52  ;;  %v4652_v49 = vld [vmem:[%s9271_s25 + $0x3b0] sm:$0xff] }
 0x640   : > { %7145 = vmatprep.subr.bf16.mxu1 %v5181_v23  ;;  %v4637_v23 = vld [vmem:[%s9271_s25 + $0x338] sm:$0xff] }
 0x641   : > { %6791 = vmatmul.mubr.bf16.vlgmr.msra.gmra.mrb[24].mxu0 %v9349_v15  ;;  %v5245_v16 = vunpack.c.l.s8.bf16 %v4637_v23 }
 0x642   : > { %7135 = vmatmul.mubr.bf16.vlgmr.msra.gmra.mrb[24].mxu1 %v9349_v15  ;;  %6802 = vmatpush1.bf16.msra.mxu0 %v5178_v25  ;;  %v5196_v15 = vunpack.c.l.s8.bf16 %v4612_v33  ;;  %v5236_v25 = vunpack.c.h.s8.bf16 %v4628_v8 }
 0x643   : > { %6833 = vmatprep.mubr.bf16.mxu0 %v9355_v22  ;;  %7146 = vmatpush1.bf16.msra.mxu1 %v5180_v26  ;;  %v5243_v26 = vunpack.c.l.s8.bf16 %v4635_v20 }
 0x644   : > { %7177 = vmatprep.mubr.bf16.mxu1 %v9355_v22  ;;  %6803 = vmatprep.subr.bf16.mxu0 %v5187_v27  ;;  %v5204_v22 = vunpack.c.h.s8.bf16 %v4612_v33  ;;  %v4634_v27 = vld [vmem:[%s9271_s25 + $0x320] sm:$0xff] }
 0x645   : > { %7147 = vmatprep.subr.bf16.mxu1 %v5189_v28  ;;  %v4636_v28 = vld [vmem:[%s9271_s25 + $0x330] sm:$0xff]  ;;  %v5242_v21 = vunpack.c.l.s8.bf16 %v4634_v27  ;;  %v5250_v33 = vunpack.c.h.s8.bf16 %v4634_v27  ;;  %v4667_v27 = vld [vmem:[%s9271_s25 + $0x428] sm:$0xff] }
 0x646   : > { %6804 = vmatpush1.bf16.msra.mxu0 %v5186_v29  ;;  %v5244_v29 = vunpack.c.l.s8.bf16 %v4636_v28 }
 0x647   : > { %7148 = vmatpush1.bf16.msra.mxu1 %v5188_v30  ;;  %6805 = vmatprep.subr.bf16.mxu0 %v5195_v31  ;;  %v5251_v30 = vunpack.c.h.s8.bf16 %v4635_v20  ;;  %v5253_v31 = vunpack.c.h.s8.bf16 %v4637_v23  ;;  %v4660_v20 = vld [vmem:[%s9271_s25 + $0x3f0] sm:$0xff] }
 0x648   : > { %7149 = vmatprep.subr.bf16.mxu1 %v5197_v32  ;;  %v4645_v32 = vld [vmem:[%s9271_s25 + $0x378] sm:$0xff] }
 0x64a   : > { %6806 = vmatpush1.bf16.msra.mxu0 %v5194_v57  ;;  %v5252_v57 = vunpack.c.h.s8.bf16 %v4636_v28 }
 0x64b   : > { %7150 = vmatpush1.bf16.msra.mxu1 %v5196_v15  ;;  %6807 = vmatprep.subr.bf16.mxu0 %v5203_v34  ;;  %v5259_v15 = vunpack.c.l.s8.bf16 %v4643_v48  ;;  %v4642_v34 = vld [vmem:[%s9271_s25 + $0x360] sm:$0xff] }
 0x64c   : > { %7151 = vmatprep.subr.bf16.mxu1 %v5205_v35  ;;  %v5261_v35 = vunpack.c.l.s8.bf16 %v4645_v32  ;;  %v5258_v36 = vunpack.c.l.s8.bf16 %v4642_v34  ;;  %v5266_v40 = vunpack.c.h.s8.bf16 %v4642_v34 }
 0x64e   : > { %6808 = vmatpush1.bf16.msra.mxu0 %v5202_v37  ;;  %v5260_v37 = vunpack.c.l.s8.bf16 %v4644_v58 }
 0x64f   : > { %7152 = vmatpush1.bf16.msra.mxu1 %v5204_v22  ;;  %6809 = vmatprep.subr.bf16.mxu0 %v5211_v38  ;;  %v5267_v22 = vunpack.c.h.s8.bf16 %v4643_v48  ;;  %v5269_v38 = vunpack.c.h.s8.bf16 %v4645_v32  ;;  %v4668_v48 = vld [vmem:[%s9271_s25 + $0x430] sm:$0xff] }
 0x650   : > { %7153 = vmatprep.subr.bf16.mxu1 %v5213_v1  ;;  %v4653_v1 = vld [vmem:[%s9271_s25 + $0x3b8] sm:$0xff] }
 0x652   : > { %6810 = vmatpush1.bf16.msra.mxu0 %v5210_v41  ;;  %v5268_v41 = vunpack.c.h.s8.bf16 %v4644_v58 }
 0x653   : > { %7154 = vmatpush1.bf16.msra.mxu1 %v5212_v42  ;;  %6811 = vmatprep.subr.bf16.mxu0 %v5219_v44  ;;  %v5275_v42 = vunpack.c.l.s8.bf16 %v4651_v39  ;;  %v4650_v44 = vld [vmem:[%s9271_s25 + $0x3a0] sm:$0xff] }
 0x654   : > { %7155 = vmatprep.subr.bf16.mxu1 %v5221_v45  ;;  %v5277_v45 = vunpack.c.l.s8.bf16 %v4653_v1  ;;  %v5274_v52 = vunpack.c.l.s8.bf16 %v4650_v44  ;;  %v5282_v8 = vunpack.c.h.s8.bf16 %v4650_v44  ;;  %v4685_v44 = vld [vmem:[%s9271_s25 + $0x4b8] sm:$0xff] }
 0x656   : > { %6812 = vmatpush1.bf16.msra.mxu0 %v5218_v55  ;;  %v5276_v55 = vunpack.c.l.s8.bf16 %v4652_v49 }
 0x657   : > { %7156 = vmatpush1.bf16.msra.mxu1 %v5220_v62  ;;  %6813 = vmatprep.subr.bf16.mxu0 %v5227_v3  ;;  %v5283_v62 = vunpack.c.h.s8.bf16 %v4651_v39  ;;  %v5285_v3 = vunpack.c.h.s8.bf16 %v4653_v1  ;;  %v4676_v39 = vld [vmem:[%s9271_s25 + $0x470] sm:$0xff] }
 0x658   : > { %7157 = vmatprep.subr.bf16.mxu1 %v5229_v6  ;;  %v4661_v6 = vld [vmem:[%s9271_s25 + $0x3f8] sm:$0xff] }
 0x65a   : > { %6814 = vmatpush1.bf16.msra.mxu0 %v5226_v9  ;;  %v5284_v9 = vunpack.c.h.s8.bf16 %v4652_v49 }
 0x65b   : > { %7158 = vmatpush1.bf16.msra.mxu1 %v5228_v11  ;;  %6815 = vmatprep.subr.bf16.mxu0 %v5235_v43  ;;  %v5291_v11 = vunpack.c.l.s8.bf16 %v4659_v5  ;;  %v4658_v43 = vld [vmem:[%s9271_s25 + $0x3e0] sm:$0xff] }
 0x65c   : > { %7159 = vmatprep.subr.bf16.mxu1 %v5237_v14  ;;  %v5293_v14 = vunpack.c.l.s8.bf16 %v4661_v6  ;;  %v5290_v23 = vunpack.c.l.s8.bf16 %v4658_v43  ;;  %v5298_v28 = vunpack.c.h.s8.bf16 %v4658_v43 }
 0x65e   : > { %6816 = vmatpush1.bf16.msra.mxu0 %v5234_v24  ;;  %v5292_v24 = vunpack.c.l.s8.bf16 %v4660_v20 }
 0x65f   : > { %7160 = vmatpush1.bf16.msra.mxu1 %v5236_v25  ;;  %6817 = vmatprep.subr.bf16.mxu0 %v5243_v26  ;;  %v5299_v25 = vunpack.c.h.s8.bf16 %v4659_v5  ;;  %v5301_v26 = vunpack.c.h.s8.bf16 %v4661_v6 }
 0x660   : > { %7161 = vmatprep.subr.bf16.mxu1 %v5245_v16  ;;  %v4669_v16 = vld [vmem:[%s9271_s25 + $0x438] sm:$0xff] }
 0x661   : > { %v5317_v34 = vunpack.c.h.s8.bf16 %v4669_v16 }
 0x662   : > { %6818 = vmatpush1.bf16.msra.mxu0 %v5242_v21  ;;  %v5300_v21 = vunpack.c.h.s8.bf16 %v4660_v20 }
 0x663   : > { %7162 = vmatpush1.bf16.msra.mxu1 %v5244_v29  ;;  %6819 = vmatprep.subr.bf16.mxu0 %v5251_v30  ;;  %v5307_v29 = vunpack.c.l.s8.bf16 %v4667_v27  ;;  %v4666_v30 = vld [vmem:[%s9271_s25 + $0x420] sm:$0xff] }
 0x664   : > { %7163 = vmatprep.subr.bf16.mxu1 %v5253_v31  ;;  %v5309_v31 = vunpack.c.l.s8.bf16 %v4669_v16  ;;  %v5306_v32 = vunpack.c.l.s8.bf16 %v4666_v30  ;;  %v5314_v58 = vunpack.c.h.s8.bf16 %v4666_v30 }
 0x666   : > { %6820 = vmatpush1.bf16.msra.mxu0 %v5250_v33  ;;  %v5308_v33 = vunpack.c.l.s8.bf16 %v4668_v48 }
 0x667   : > { %7164 = vmatpush1.bf16.msra.mxu1 %v5252_v57  ;;  %6821 = vmatprep.subr.bf16.mxu0 %v5259_v15  ;;  %v5315_v57 = vunpack.c.h.s8.bf16 %v4667_v27  ;;  %v4675_v15 = vld [vmem:[%s9271_s25 + $0x468] sm:$0xff] }
 0x668   : > { %7165 = vmatprep.subr.bf16.mxu1 %v5261_v35  ;;  %v4677_v35 = vld [vmem:[%s9271_s25 + $0x478] sm:$0xff] }
 0x66a   : > { %6822 = vmatpush1.bf16.msra.mxu0 %v5258_v36  ;;  %v5316_v36 = vunpack.c.h.s8.bf16 %v4668_v48 }
 0x66b   : > { %7166 = vmatpush1.bf16.msra.mxu1 %v5260_v37  ;;  %6823 = vmatprep.subr.bf16.mxu0 %v5267_v22  ;;  %v5323_v37 = vunpack.c.l.s8.bf16 %v4675_v15  ;;  %v4674_v22 = vld [vmem:[%s9271_s25 + $0x460] sm:$0xff] }
 0x66c   : > { %7167 = vmatprep.subr.bf16.mxu1 %v5269_v38  ;;  %v5325_v38 = vunpack.c.l.s8.bf16 %v4677_v35  ;;  %v5322_v1 = vunpack.c.l.s8.bf16 %v4674_v22 }
 0x66e   : > { %6824 = vmatpush1.bf16.msra.mxu0 %v5266_v40  ;;  %v5331_v40 = vunpack.c.h.s8.bf16 %v4675_v15 }
 0x66f   : > { %7168 = vmatpush1.bf16.msra.mxu1 %v5268_v41  ;;  %6825 = vmatprep.subr.bf16.mxu0 %v5275_v42  ;;  %v5333_v41 = vunpack.c.h.s8.bf16 %v4677_v35  ;;  %v4683_v42 = vld [vmem:[%s9271_s25 + $0x4a8] sm:$0xff] }
 0x670   : > { %7169 = vmatprep.subr.bf16.mxu1 %v5277_v45  ;;  %v5330_v45 = vunpack.c.h.s8.bf16 %v4674_v22  ;;  %v5339_v49 = vunpack.c.l.s8.bf16 %v4683_v42  ;;  %v5347_v6 = vunpack.c.h.s8.bf16 %v4683_v42 }
 0x672   : > { %6826 = vmatpush1.bf16.msra.mxu0 %v5274_v52  ;;  %v4682_v52 = vld [vmem:[%s9271_s25 + $0x4a0] sm:$0xff] }
 0x673   : > { %7170 = vmatpush1.bf16.msra.mxu1 %v5276_v55  ;;  %6827 = vmatprep.subr.bf16.mxu0 %v5283_v62  ;;  %v5341_v55 = vunpack.c.l.s8.bf16 %v4685_v44  ;;  %v4684_v62 = vld [vmem:[%s9271_s25 + $0x4b0] sm:$0xff]  ;;  %v5346_v43 = vunpack.c.h.s8.bf16 %v4682_v52 }
 0x674   : > { %7171 = vmatprep.subr.bf16.mxu1 %v5285_v3  ;;  %v5338_v3 = vunpack.c.l.s8.bf16 %v4682_v52  ;;  %v5340_v5 = vunpack.c.l.s8.bf16 %v4684_v62 }
 0x676   : > { %6828 = vmatpush1.bf16.msra.mxu0 %v5282_v8  ;;  %v5349_v8 = vunpack.c.h.s8.bf16 %v4685_v44 }
 0x677   : > { %7172 = vmatpush1.bf16.msra.mxu1 %v5284_v9  ;;  %6829 = vmatprep.subr.bf16.mxu0 %v5291_v11  ;;  %v4691_v9 = vld [vmem:[%s9271_s25 + $0x4e8] sm:$0xff]  ;;  %v4693_v11 = vld [vmem:[%s9271_s25 + $0x4f8] sm:$0xff] }
 0x678   : > { %7173 = vmatprep.subr.bf16.mxu1 %v5293_v14  ;;  %v5348_v14 = vunpack.c.h.s8.bf16 %v4684_v62  ;;  %v5355_v20 = vunpack.c.l.s8.bf16 %v4691_v9  ;;  %v5363_v16 = vunpack.c.h.s8.bf16 %v4691_v9 }
 0x67a   : > { %6830 = vmatpush1.bf16.msra.mxu0 %v5290_v23  ;;  %v4690_v23 = vld [vmem:[%s9271_s25 + $0x4e0] sm:$0xff] }
 0x67b   : > { %7174 = vmatpush1.bf16.msra.mxu1 %v5292_v24  ;;  %6831 = vmatprep.subr.bf16.mxu0 %v5299_v25  ;;  %v5357_v24 = vunpack.c.l.s8.bf16 %v4693_v11  ;;  %v4692_v25 = vld [vmem:[%s9271_s25 + $0x4f0] sm:$0xff]  ;;  %v5362_v30 = vunpack.c.h.s8.bf16 %v4690_v23 }
 0x67c   : > { %7175 = vmatprep.subr.bf16.mxu1 %v5301_v26  ;;  %v5354_v26 = vunpack.c.l.s8.bf16 %v4690_v23  ;;  %v5356_v27 = vunpack.c.l.s8.bf16 %v4692_v25 }
 0x67e   : > { %6832 = vmatpush1.bf16.msra.mxu0 %v5298_v28  ;;  %v5365_v28 = vunpack.c.h.s8.bf16 %v4693_v11 }
 0x67f   : > { %7176 = vmatpush1.bf16.msra.mxu1 %v5300_v21  ;;  %6844 = vmatprep.subr.bf16.mxu0 %v5307_v29  ;;  %v4699_v21 = vld [vmem:[%s9271_s25 + $0x528] sm:$0xff]  ;;  %v4701_v29 = vld [vmem:[%s9271_s25 + $0x538] sm:$0xff] }
 0x680   : > { %7188 = vmatprep.subr.bf16.mxu1 %v5309_v31  ;;  %v5364_v31 = vunpack.c.h.s8.bf16 %v4692_v25  ;;  %v5371_v48 = vunpack.c.l.s8.bf16 %v4699_v21  ;;  %v5379_v35 = vunpack.c.h.s8.bf16 %v4699_v21 }
 0x681   : > { %6834 = vmatmul.mubr.bf16.vlgmr.msra.gmra.mrb[24].mxu0 %v9351_v19 }
 0x682   : > { %7178 = vmatmul.mubr.bf16.vlgmr.msra.gmra.mrb[24].mxu1 %v9351_v19  ;;  %6845 = vmatpush1.bf16.msra.mxu0 %v5306_v32  ;;  %v5324_v19 = vunpack.c.l.s8.bf16 %v4676_v39  ;;  %v4698_v32 = vld [vmem:[%s9271_s25 + $0x520] sm:$0xff] }
 0x683   : > { %6876 = vmatprep.mubr.bf16.mxu0 %v9389_v60  ;;  %7189 = vmatpush1.bf16.msra.mxu1 %v5308_v33  ;;  %v5373_v33 = vunpack.c.l.s8.bf16 %v4701_v29  ;;  %v5370_v15 = vunpack.c.l.s8.bf16 %v4698_v32  ;;  %v5378_v22 = vunpack.c.h.s8.bf16 %v4698_v32 }
 0x684   : > { %7220 = vmatprep.mubr.bf16.mxu1 %v9389_v60  ;;  %6846 = vmatprep.subr.bf16.mxu0 %v5315_v57  ;;  %v5332_v60 = vunpack.c.h.s8.bf16 %v4676_v39  ;;  %v4700_v57 = vld [vmem:[%s9271_s25 + $0x530] sm:$0xff] }
 0x685   : > { %7190 = vmatprep.subr.bf16.mxu1 %v5317_v34  ;;  %v5372_v34 = vunpack.c.l.s8.bf16 %v4700_v57 }
 0x686   : > { %6847 = vmatpush1.bf16.msra.mxu0 %v5314_v58  ;;  %v5381_v58 = vunpack.c.h.s8.bf16 %v4701_v29 }
 0x687   : > { %7191 = vmatpush1.bf16.msra.mxu1 %v5316_v36  ;;  %6848 = vmatprep.subr.bf16.mxu0 %v5323_v37  ;;  %v4707_v36 = vld [vmem:[%s9271_s25 + $0x568] sm:$0xff]  ;;  %v4709_v37 = vld [vmem:[%s9271_s25 + $0x578] sm:$0xff] }
 0x688   : > { %7192 = vmatprep.subr.bf16.mxu1 %v5325_v38  ;;  %v5380_v38 = vunpack.c.h.s8.bf16 %v4700_v57  ;;  %v5387_v39 = vunpack.c.l.s8.bf16 %v4707_v36  ;;  %v5395_v44 = vunpack.c.h.s8.bf16 %v4707_v36 }
 0x68a   : > { %6849 = vmatpush1.bf16.msra.mxu0 %v5322_v1  ;;  %v4706_v1 = vld [vmem:[%s9271_s25 + $0x560] sm:$0xff] }
 0x68b   : > { %7193 = vmatpush1.bf16.msra.mxu1 %v5324_v19  ;;  %6850 = vmatprep.subr.bf16.mxu0 %v5331_v40  ;;  %v5389_v19 = vunpack.c.l.s8.bf16 %v4709_v37  ;;  %v4708_v40 = vld [vmem:[%s9271_s25 + $0x570] sm:$0xff]  ;;  %v5394_v52 = vunpack.c.h.s8.bf16 %v4706_v1 }
 0x68c   : > { %7194 = vmatprep.subr.bf16.mxu1 %v5333_v41  ;;  %v5386_v41 = vunpack.c.l.s8.bf16 %v4706_v1  ;;  %v5388_v42 = vunpack.c.l.s8.bf16 %v4708_v40 }
 0x68e   : > { %6851 = vmatpush1.bf16.msra.mxu0 %v5330_v45  ;;  %v5397_v45 = vunpack.c.h.s8.bf16 %v4709_v37 }
 0x68f   : > { %7195 = vmatpush1.bf16.msra.mxu1 %v5332_v60  ;;  %6852 = vmatprep.subr.bf16.mxu0 %v5339_v49  ;;  %v4715_v60 = vld [vmem:[%s9271_s25 + $0x5a8] sm:$0xff]  ;;  %v4717_v49 = vld [vmem:[%s9271_s25 + $0x5b8] sm:$0xff] }
 0x690   : > { %7196 = vmatprep.subr.bf16.mxu1 %v5341_v55  ;;  %v5396_v55 = vunpack.c.h.s8.bf16 %v4708_v40  ;;  %v5403_v62 = vunpack.c.l.s8.bf16 %v4715_v60  ;;  %v5411_v11 = vunpack.c.h.s8.bf16 %v4715_v60 }
 0x692   : > { %6853 = vmatpush1.bf16.msra.mxu0 %v5338_v3  ;;  %v4714_v3 = vld [vmem:[%s9271_s25 + $0x5a0] sm:$0xff] }
 0x693   : > { %7197 = vmatpush1.bf16.msra.mxu1 %v5340_v5  ;;  %6854 = vmatprep.subr.bf16.mxu0 %v5347_v6  ;;  %v5405_v5 = vunpack.c.l.s8.bf16 %v4717_v49  ;;  %v4716_v6 = vld [vmem:[%s9271_s25 + $0x5b0] sm:$0xff]  ;;  %v5410_v23 = vunpack.c.h.s8.bf16 %v4714_v3 }
 0x694   : > { %7198 = vmatprep.subr.bf16.mxu1 %v5349_v8  ;;  %v5402_v8 = vunpack.c.l.s8.bf16 %v4714_v3  ;;  %v5404_v9 = vunpack.c.l.s8.bf16 %v4716_v6 }
 0x696   : > { %6855 = vmatpush1.bf16.msra.mxu0 %v5346_v43  ;;  %v5413_v43 = vunpack.c.h.s8.bf16 %v4717_v49 }
 0x697   : > { %7199 = vmatpush1.bf16.msra.mxu1 %v5348_v14  ;;  %6856 = vmatprep.subr.bf16.mxu0 %v5355_v20  ;;  %v4723_v14 = vld [vmem:[%s9271_s25 + $0x5e8] sm:$0xff]  ;;  %v4725_v20 = vld [vmem:[%s9271_s25 + $0x5f8] sm:$0xff] }
 0x698   : > { %7200 = vmatprep.subr.bf16.mxu1 %v5357_v24  ;;  %v5412_v24 = vunpack.c.h.s8.bf16 %v4716_v6  ;;  %v5419_v25 = vunpack.c.l.s8.bf16 %v4723_v14  ;;  %v5427_v29 = vunpack.c.h.s8.bf16 %v4723_v14 }
 0x69a   : > { %6857 = vmatpush1.bf16.msra.mxu0 %v5354_v26  ;;  %v4722_v26 = vld [vmem:[%s9271_s25 + $0x5e0] sm:$0xff] }
 0x69b   : > { %7201 = vmatpush1.bf16.msra.mxu1 %v5356_v27  ;;  %6858 = vmatprep.subr.bf16.mxu0 %v5363_v16  ;;  %v5421_v27 = vunpack.c.l.s8.bf16 %v4725_v20  ;;  %v4724_v16 = vld [vmem:[%s9271_s25 + $0x5f0] sm:$0xff]  ;;  %v5426_v32 = vunpack.c.h.s8.bf16 %v4722_v26 }
 0x69c   : > { %7202 = vmatprep.subr.bf16.mxu1 %v5365_v28  ;;  %v5418_v28 = vunpack.c.l.s8.bf16 %v4722_v26  ;;  %v5420_v21 = vunpack.c.l.s8.bf16 %v4724_v16  ;;  %v9844_v26 = vld [vmem:[%s9271_s25 + $0x6f8] sm:$0xff] }
 0x69e   : > { %6859 = vmatpush1.bf16.msra.mxu0 %v5362_v30  ;;  %v5429_v30 = vunpack.c.h.s8.bf16 %v4725_v20  ;;  %v7504_v20 = vld [vmem:[%s9281_s9] sm:$0xff] }
 0x69f   : > { %7203 = vmatpush1.bf16.msra.mxu1 %v5364_v31  ;;  %6860 = vmatprep.subr.bf16.mxu0 %v5371_v48  ;;  %v4731_v31 = vld [vmem:[%s9271_s25 + $0x628] sm:$0xff]  ;;  %v4733_v48 = vld [vmem:[%s9271_s25 + $0x638] sm:$0xff] }
 0x6a0   : > { %7204 = vmatprep.subr.bf16.mxu1 %v5373_v33  ;;  %v5428_v33 = vunpack.c.h.s8.bf16 %v4724_v16  ;;  %v5435_v57 = vunpack.c.l.s8.bf16 %v4731_v31  ;;  %v5443_v37 = vunpack.c.h.s8.bf16 %v4731_v31 }
 0x6a2   : > { %6861 = vmatpush1.bf16.msra.mxu0 %v5370_v15  ;;  %v4730_v15 = vld [vmem:[%s9271_s25 + $0x620] sm:$0xff] }
 0x6a3   : > { %7205 = vmatpush1.bf16.msra.mxu1 %v5372_v34  ;;  %6862 = vmatprep.subr.bf16.mxu0 %v5379_v35  ;;  %v5437_v34 = vunpack.c.l.s8.bf16 %v4733_v48  ;;  %v4732_v35 = vld [vmem:[%s9271_s25 + $0x630] sm:$0xff]  ;;  %v5442_v1 = vunpack.c.h.s8.bf16 %v4730_v15 }
 0x6a4   : > { %7206 = vmatprep.subr.bf16.mxu1 %v5381_v58  ;;  %v5434_v58 = vunpack.c.l.s8.bf16 %v4730_v15  ;;  %v5436_v36 = vunpack.c.l.s8.bf16 %v4732_v35  ;;  %v7513_v15 = vrot.slane %v7504_v20, %v9336_v17 }
 0x6a6   : > { %6863 = vmatpush1.bf16.msra.mxu0 %v5378_v22  ;;  %v4739_v22 = vld [vmem:[%s9271_s25 + $0x668] sm:$0xff] }
 0x6a7   : > { %7207 = vmatpush1.bf16.msra.mxu1 %v5380_v38  ;;  %6864 = vmatprep.subr.bf16.mxu0 %v5387_v39  ;;  %v5445_v38 = vunpack.c.h.s8.bf16 %v4733_v48  ;;  %v4741_v39 = vld [vmem:[%s9271_s25 + $0x678] sm:$0xff]  ;;  %v5451_v40 = vunpack.c.l.s8.bf16 %v4739_v22  ;;  %v5459_v60 = vunpack.c.h.s8.bf16 %v4739_v22 }
 0x6a8   : > { %7208 = vmatprep.subr.bf16.mxu1 %v5389_v19  ;;  %v5444_v19 = vunpack.c.h.s8.bf16 %v4732_v35  ;;  %v5461_v49 = vunpack.c.h.s8.bf16 %v4741_v39 }
 0x6aa   : > { %6865 = vmatpush1.bf16.msra.mxu0 %v5386_v41  ;;  %v4738_v41 = vld [vmem:[%s9271_s25 + $0x660] sm:$0xff] }
 0x6ab   : > { %7209 = vmatpush1.bf16.msra.mxu1 %v5388_v42  ;;  %6866 = vmatprep.subr.bf16.mxu0 %v5395_v44  ;;  %v5453_v42 = vunpack.c.l.s8.bf16 %v4741_v39  ;;  %v4740_v44 = vld [vmem:[%s9271_s25 + $0x670] sm:$0xff] }
 0x6ac   : > { %7210 = vmatprep.subr.bf16.mxu1 %v5397_v45  ;;  %v5450_v45 = vunpack.c.l.s8.bf16 %v4738_v41 }
 0x6ae   : > { %6867 = vmatpush1.bf16.msra.mxu0 %v5394_v52  ;;  %v4747_v52 = vld [vmem:[%s9271_s25 + $0x6a8] sm:$0xff] }
 0x6af   : > { %7211 = vmatpush1.bf16.msra.mxu1 %v5396_v55  ;;  %6868 = vmatprep.subr.bf16.mxu0 %v5403_v62  ;;  %v4749_v55 = vld [vmem:[%s9271_s25 + $0x6b8] sm:$0xff]  ;;  %v5458_v62 = vunpack.c.h.s8.bf16 %v4738_v41  ;;  %v5467_v3 = vunpack.c.l.s8.bf16 %v4747_v52  ;;  %v5475_v14 = vunpack.c.h.s8.bf16 %v4747_v52 }
 0x6b0   : > { %7212 = vmatprep.subr.bf16.mxu1 %v5405_v5  ;;  %v4746_v5 = vld [vmem:[%s9271_s25 + $0x6a0] sm:$0xff]  ;;  %v5469_v6 = vunpack.c.l.s8.bf16 %v4749_v55 }
 0x6b2   : > { %6869 = vmatpush1.bf16.msra.mxu0 %v5402_v8  ;;  %v4748_v8 = vld [vmem:[%s9271_s25 + $0x6b0] sm:$0xff] }
 0x6b3   : > { %7213 = vmatpush1.bf16.msra.mxu1 %v5404_v9  ;;  %6870 = vmatprep.subr.bf16.mxu0 %v5411_v11  ;;  %v5466_v9 = vunpack.c.l.s8.bf16 %v4746_v5  ;;  %v7446_v11 = vld [vmem:[%s9278_s2] sm:$0xff]  ;;  %v5476_v31 = vunpack.c.h.s8.bf16 %v4748_v8 }
 0x6b4   : > { %7214 = vmatprep.subr.bf16.mxu1 %v5413_v43  ;;  %v5468_v43 = vunpack.c.l.s8.bf16 %v4748_v8  ;;  %v7455_v16 = vrot.slane %v7446_v11, %v9336_v17 }
 0x6b6   : > { %6871 = vmatpush1.bf16.msra.mxu0 %v5410_v23  ;;  %v5477_v23 = vunpack.c.h.s8.bf16 %v4749_v55  ;;  %v4763_v55 = vld [vmem:[%s9271_s25 + $0x728] sm:$0xff] }
 0x6b7   : > { %7215 = vmatpush1.bf16.msra.mxu1 %v5412_v24  ;;  %6872 = vmatprep.subr.bf16.mxu0 %v5419_v25  ;;  %v4755_v24 = vld [vmem:[%s9271_s25 + $0x6e8] sm:$0xff]  ;;  %v7451_v25 = vrot.slane %v7446_v11, %v9328_v12 }
 0x6b8   : > { %7216 = vmatprep.subr.bf16.mxu1 %v5421_v27  ;;  %v7459_v27 = vrot.slane %v7446_v11, %v9331_v13  ;;  %v5483_v48 = vunpack.c.l.s8.bf16 %v4755_v24 }
 0x6ba   : > { %6873 = vmatpush1.bf16.msra.mxu0 %v5418_v28  ;;  %v5474_v28 = vunpack.c.h.s8.bf16 %v4746_v5  ;;  %v4765_v5 = vld [vmem:[%s9271_s25 + $0x738] sm:$0xff] }
 0x6bb   : > { %7217 = vmatpush1.bf16.msra.mxu1 %v5420_v21  ;;  %6874 = vmatprep.subr.bf16.mxu0 %v5427_v29  ;;  %v9849_v21 = vld [vmem:[%s9271_s25 + $0x6e0] sm:$0xff]  ;;  %v7509_v29 = vrot.slane %v7504_v20, %v9328_v12  ;;  %v7521_v12 = vrot.slane %v7504_v20, %v9339_v18 }
 0x6bc   : > { %7218 = vmatprep.subr.bf16.mxu1 %v5429_v30  ;;  %v7463_v30 = vrot.slane %v7446_v11, %v9339_v18  ;;  %v5493_v18 = vunpack.c.h.s8.bf16 %v9844_v26  ;;  %v5490_v11 = vunpack.c.h.s8.bf16 %v9849_v21 }
 0x6be   : > { %6875 = vmatpush1.bf16.msra.mxu0 %v5426_v32  ;;  %v4756_v32 = vld [vmem:[%s9271_s25 + $0x6f0] sm:$0xff] }
 0x6bf   : > { %7219 = vmatpush1.bf16.msra.mxu1 %v5428_v33  ;;  %6887 = vmatprep.subr.bf16.mxu0 %v5435_v57  ;;  %v7517_v57 = vrot.slane %v7504_v20, %v9331_v13  ;;  %v5491_v13 = vunpack.c.h.s8.bf16 %v4755_v24  ;;  %v5492_v20 = vunpack.c.h.s8.bf16 %v4756_v32  ;;  %v4762_v24 = vld [vmem:[%s9271_s25 + $0x720] sm:$0xff] }
 0x6c0   : > { %7231 = vmatprep.subr.bf16.mxu1 %v5437_v34  ;;  %v5485_v34 = vunpack.c.l.s8.bf16 %v9844_v26  ;;  %v5501_v26 = vunpack.c.l.s8.bf16 %v4765_v5 }
 0x6c1   : > { %6877 = vmatmul.mubr.bf16.vlgmr.msra.gmra.mrb[24].mxu0 %v9385_v54 }
 0x6c2   : > { %7221 = vmatmul.mubr.bf16.vlgmr.msra.gmra.mrb[24].mxu1 %v9385_v54  ;;  %6888 = vmatpush1.bf16.msra.mxu0 %v5434_v58  ;;  %v5452_v54 = vunpack.c.l.s8.bf16 %v4740_v44 }
 0x6c3   : > { %6919 = vmatprep.mubr.bf16.mxu0 %v9391_v2  ;;  %7232 = vmatpush1.bf16.msra.mxu1 %v5436_v36 }
 0x6c4   : > { %7263 = vmatprep.mubr.bf16.mxu1 %v9391_v2  ;;  %6889 = vmatprep.subr.bf16.mxu0 %v5443_v37  ;;  %v5460_v2 = vunpack.c.h.s8.bf16 %v4740_v44  ;;  %v5482_v37 = vunpack.c.l.s8.bf16 %v9849_v21 }
 0x6c5   : > { %7233 = vmatprep.subr.bf16.mxu1 %v5445_v38 }
 0x6c6   : > { %6890 = vmatpush1.bf16.msra.mxu0 %v5442_v1 }
 0x6c7   : > { %7234 = vmatpush1.bf16.msra.mxu1 %v5444_v19  ;;  %6891 = vmatprep.subr.bf16.mxu0 %v5451_v40  ;;  %v5484_v19 = vunpack.c.l.s8.bf16 %v4756_v32  ;;  %v5506_v32 = vunpack.c.h.s8.bf16 %v4762_v24 }
 0x6c8   : > { %7235 = vmatprep.subr.bf16.mxu1 %v5453_v42 }
 0x6ca   : > { %6892 = vmatpush1.bf16.msra.mxu0 %v5450_v45 }
 0x6cb   : > { %7236 = vmatpush1.bf16.msra.mxu1 %v5452_v54  ;;  %6893 = vmatprep.subr.bf16.mxu0 %v5459_v60 }
 0x6cc   : > { %7237 = vmatprep.subr.bf16.mxu1 %v5461_v49 }
 0x6ce   : > { %6894 = vmatpush1.bf16.msra.mxu0 %v5458_v62 }
 0x6cf   : > { %7238 = vmatpush1.bf16.msra.mxu1 %v5460_v2  ;;  %6895 = vmatprep.subr.bf16.mxu0 %v5467_v3 }
 0x6d0   : > { %7239 = vmatprep.subr.bf16.mxu1 %v5469_v6 }
 0x6d2   : > { %6896 = vmatpush1.bf16.msra.mxu0 %v5466_v9 }
 0x6d3   : > { %7240 = vmatpush1.bf16.msra.mxu1 %v5468_v43  ;;  %6897 = vmatprep.subr.bf16.mxu0 %v5475_v14 }
 0x6d4   : > { %v6405_v33 = vpop.f32.mrb[20].mxu0  ;;  %7241 = vmatprep.subr.bf16.mxu1 %v5477_v23  ;;  %v5499_v23 = vunpack.c.l.s8.bf16 %v4763_v55 }
 0x6d5   : > { %v7488_v35 = vmul.f32 %v7451_v25, %v6405_v33  ;;  %v6749_v58 = vpop.f32.mrb[20].mxu1  ;;  %v6407_v36 = vpop.f32.mrb[21].mxu0 }
 0x6d6   : > { %v7490_v22 = vmul.f32 %v7459_v27, %v6749_v58  ;;  %v7489_v38 = vmul.f32 %v7455_v16, %v6407_v36  ;;  %v6751_v39 = vpop.f32.mrb[21].mxu1  ;;  %v6409_v1 = vpop.f32.mrb[22].mxu0  ;;  %6898 = vmatpush1.bf16.msra.mxu0 %v5474_v28  ;;  %v5498_v28 = vunpack.c.l.s8.bf16 %v4762_v24 }
 0x6d7   : > { %v7546_v17 = vadd.f32 %v7509_v29, %v7488_v35  ;;  %v7491_v40 = vmul.f32 %v7463_v30, %v6751_v39  ;;  %v7496_v41 = vmul.f32 %v7451_v25, %v6409_v1  ;;  %v6753_v42 = vpop.f32.mrb[22].mxu1  ;;  %7242 = vmatpush1.bf16.msra.mxu1 %v5476_v31  ;;  %v6411_v44 = vpop.f32.mrb[23].mxu0  ;;  %6899 = vmatprep.subr.bf16.mxu0 %v5483_v48  ;;  %v4771_v31 = vld [vmem:[%s9271_s25 + $0x768] sm:$0xff]  ;;  %v4773_v48 = vld [vmem:[%s9271_s25 + $0x778] sm:$0xff]  ;;  %v4772_v35 = vld [vmem:[%s9271_s25 + $0x770] sm:$0xff] }
 0x6d8   : > { %v7548_v45 = vadd.f32 %v7517_v57, %v7490_v22  ;;  %v7547_v54 = vadd.f32 %v7513_v15, %v7489_v38  ;;  %v7498_v60 = vmul.f32 %v7459_v27, %v6753_v42  ;;  %v7497_v49 = vmul.f32 %v7455_v16, %v6411_v44  ;;  %v6755_v52 = vpop.f32.mrb[23].mxu1  ;;  %7243 = vmatprep.subr.bf16.mxu1 %v5485_v34  ;;  %v4764_v27 = vld [vmem:[%s9271_s25 + $0x730] sm:$0xff]  ;;  %v4779_v22 = vld [vmem:[%s9271_s25 + $0x7a8] sm:$0xff]  ;;  %v4781_v38 = vld [vmem:[%s9271_s25 + $0x7b8] sm:$0xff] }
 0x6d9   : > { %v7549_v62 = vadd.f32 %v7521_v12, %v7491_v40  ;;  %v7554_v2 = vadd.f32 %v7509_v29, %v7496_v41  ;;  %v7499_v3 = vmul.f32 %v7463_v30, %v6755_v52  ;;  %v5500_v21 = vunpack.c.l.s8.bf16 %v4764_v27  ;;  %v4780_v40 = vld [vmem:[%s9271_s25 + $0x7b0] sm:$0xff] }
 0x6da   : > { %v8379_v6 = vpack.c.bf16 %v7547_v54, %v7546_v17  ;;  %v7556_v8 = vadd.f32 %v7517_v57, %v7498_v60  ;;  %v7555_v9 = vadd.f32 %v7513_v15, %v7497_v49  ;;  %6900 = vmatpush1.bf16.msra.mxu0 %v5482_v37  ;;  %v5507_v29 = vunpack.c.h.s8.bf16 %v4763_v55  ;;  %v4770_v15 = vld [vmem:[%s9271_s25 + $0x760] sm:$0xff]  ;;  %v4789_v54 = vld [vmem:[%s9271_s25 + $0x7f8] sm:$0xff] }
 0x6db   : > { %v8380_v43 = vpack.c.bf16 %v7549_v62, %v7548_v45  ;;  %v7557_v14 = vadd.f32 %v7521_v12, %v7499_v3  ;;  %7244 = vmatpush1.bf16.msra.mxu1 %v5484_v19  ;;  %6901 = vmatprep.subr.bf16.mxu0 %v5491_v13  ;;  %v5509_v30 = vunpack.c.h.s8.bf16 %v4765_v5  ;;  %v5508_v33 = vunpack.c.h.s8.bf16 %v4764_v27  ;;  %v4778_v13 = vld [vmem:[%s9271_s25 + $0x7a0] sm:$0xff]  ;;  %v4787_v45 = vld [vmem:[%s9271_s25 + $0x7e8] sm:$0xff] }
 0x6dc   : > { %7610 = vst [vmem:[%s9867_s27] sm:$0xff] %v8379_v6  ;;  %v8383_v25 = vpack.c.bf16 %v7555_v9, %v7554_v2  ;;  %7245 = vmatprep.subr.bf16.mxu1 %v5493_v18  ;;  %v5515_v57 = vunpack.c.l.s8.bf16 %v4771_v31  ;;  %v5517_v34 = vunpack.c.l.s8.bf16 %v4773_v48  ;;  %v5514_v58 = vunpack.c.l.s8.bf16 %v4770_v15  ;;  %v4786_v55 = vld [vmem:[%s9271_s25 + $0x7e0] sm:$0xff]  ;;  %v4788_v2 = vld [vmem:[%s9271_s25 + $0x7f0] sm:$0xff]  ;;  %v4795_v9 = vld [vmem:[%s9271_s25 + $0x828] sm:$0xff] }
 0x6dd   : > { %7611 = vst [vmem:[%s9867_s27 + $0x8] sm:$0xff] %v8380_v43  ;;  %v8384_v16 = vpack.c.bf16 %v7557_v14, %v7556_v8  ;;  %v5516_v36 = vunpack.c.l.s8.bf16 %v4772_v35  ;;  %v5523_v12 = vunpack.c.h.s8.bf16 %v4771_v31  ;;  %v5525_v37 = vunpack.c.h.s8.bf16 %v4773_v48 }
 0x6de   : > { %7614 = vst [vmem:[%s9867_s27 + $0x20] sm:$0xff] %v8383_v25  ;;  %6902 = vmatpush1.bf16.msra.mxu0 %v5490_v11  ;;  %v5522_v39 = vunpack.c.h.s8.bf16 %v4770_v15  ;;  %v5524_v1 = vunpack.c.h.s8.bf16 %v4772_v35  ;;  %v5531_v19 = vunpack.c.l.s8.bf16 %v4779_v22  ;;  %v5533_v17 = vunpack.c.l.s8.bf16 %v4781_v38  ;;  %v4797_v11 = vld [vmem:[%s9271_s25 + $0x838] sm:$0xff]  ;;  %v4796_v25 = vld [vmem:[%s9271_s25 + $0x830] sm:$0xff] }
 0x6df   : > { %7615 = vst [vmem:[%s9867_s27 + $0x28] sm:$0xff] %v8384_v16  ;;  %7246 = vmatpush1.bf16.msra.mxu1 %v5492_v20  ;;  %6903 = vmatprep.subr.bf16.mxu0 %v5499_v23  ;;  %v5530_v41 = vunpack.c.l.s8.bf16 %v4778_v13  ;;  %v5532_v42 = vunpack.c.l.s8.bf16 %v4780_v40  ;;  %v5539_v44 = vunpack.c.h.s8.bf16 %v4779_v22  ;;  %v5541_v18 = vunpack.c.h.s8.bf16 %v4781_v38  ;;  %v4794_v23 = vld [vmem:[%s9271_s25 + $0x820] sm:$0xff] }
 0x6e0   : > { %7247 = vmatprep.subr.bf16.mxu1 %v5501_v26  ;;  %v5538_v60 = vunpack.c.h.s8.bf16 %v4778_v13  ;;  %v5540_v49 = vunpack.c.h.s8.bf16 %v4780_v40  ;;  %v5547_v52 = vunpack.c.l.s8.bf16 %v4787_v45  ;;  %v5549_v62 = vunpack.c.l.s8.bf16 %v4789_v54  ;;  %v4810_v22 = vld [vmem:[%s9271_s25 + $0x8a0] sm:$0xff]  ;;  %v4819_v40 = vld [vmem:[%s9271_s25 + $0x8e8] sm:$0xff] }
 0x6e1   : > { %v5546_v3 = vunpack.c.l.s8.bf16 %v4786_v55  ;;  %v5548_v5 = vunpack.c.l.s8.bf16 %v4788_v2  ;;  %v5555_v6 = vunpack.c.h.s8.bf16 %v4787_v45  ;;  %v5557_v8 = vunpack.c.h.s8.bf16 %v4789_v54  ;;  %v4818_v45 = vld [vmem:[%s9271_s25 + $0x8e0] sm:$0xff] }
 0x6e2   : > { %6904 = vmatpush1.bf16.msra.mxu0 %v5498_v28  ;;  %v5554_v43 = vunpack.c.h.s8.bf16 %v4786_v55  ;;  %v5556_v14 = vunpack.c.h.s8.bf16 %v4788_v2  ;;  %v5563_v20 = vunpack.c.l.s8.bf16 %v4795_v9  ;;  %v5565_v24 = vunpack.c.l.s8.bf16 %v4797_v11  ;;  %v4803_v28 = vld [vmem:[%s9271_s25 + $0x868] sm:$0xff] }
 0x6e3   : > { %7248 = vmatpush1.bf16.msra.mxu1 %v5500_v21  ;;  %6905 = vmatprep.subr.bf16.mxu0 %v5507_v29  ;;  %v5562_v26 = vunpack.c.l.s8.bf16 %v4794_v23  ;;  %v5564_v27 = vunpack.c.l.s8.bf16 %v4796_v25  ;;  %v5571_v16 = vunpack.c.h.s8.bf16 %v4795_v9  ;;  %v5573_v21 = vunpack.c.h.s8.bf16 %v4797_v11  ;;  %v4805_v29 = vld [vmem:[%s9271_s25 + $0x878] sm:$0xff]  ;;  %v4827_v2 = vld [vmem:[%s9271_s25 + $0x928] sm:$0xff]  ;;  %v4826_v9 = vld [vmem:[%s9271_s25 + $0x920] sm:$0xff] }
 0x6e4   : > { %7249 = vmatprep.subr.bf16.mxu1 %v5509_v30  ;;  %v5570_v30 = vunpack.c.h.s8.bf16 %v4794_v23  ;;  %v5572_v31 = vunpack.c.h.s8.bf16 %v4796_v25  ;;  %v5579_v48 = vunpack.c.l.s8.bf16 %v4803_v28  ;;  %v5589_v35 = vunpack.c.h.s8.bf16 %v4805_v29  ;;  %v4835_v25 = vld [vmem:[%s9271_s25 + $0x968] sm:$0xff] }
 0x6e5   : > { %v5619_v55 = vunpack.c.h.s8.bf16 %v4819_v40  ;;  %v5635_v23 = vunpack.c.h.s8.bf16 %v4827_v2 }
 0x6e6   : > { %6906 = vmatpush1.bf16.msra.mxu0 %v5506_v32  ;;  %v4802_v32 = vld [vmem:[%s9271_s25 + $0x860] sm:$0xff] }
 0x6e7   : > { %7250 = vmatpush1.bf16.msra.mxu1 %v5508_v33  ;;  %6907 = vmatprep.subr.bf16.mxu0 %v5515_v57  ;;  %v5581_v33 = vunpack.c.l.s8.bf16 %v4805_v29  ;;  %v4804_v57 = vld [vmem:[%s9271_s25 + $0x870] sm:$0xff]  ;;  %v5578_v15 = vunpack.c.l.s8.bf16 %v4802_v32 }
 0x6e8   : > { %7251 = vmatprep.subr.bf16.mxu1 %v5517_v34  ;;  %v5587_v34 = vunpack.c.h.s8.bf16 %v4803_v28  ;;  %v5643_v28 = vunpack.c.l.s8.bf16 %v4835_v25 }
 0x6ea   : > { %6908 = vmatpush1.bf16.msra.mxu0 %v5514_v58  ;;  %v4811_v58 = vld [vmem:[%s9271_s25 + $0x8a8] sm:$0xff] }
 0x6eb   : > { %7252 = vmatpush1.bf16.msra.mxu1 %v5516_v36  ;;  %6909 = vmatprep.subr.bf16.mxu0 %v5523_v12  ;;  %v4813_v36 = vld [vmem:[%s9271_s25 + $0x8b8] sm:$0xff]  ;;  %v5586_v12 = vunpack.c.h.s8.bf16 %v4802_v32  ;;  %v5603_v13 = vunpack.c.h.s8.bf16 %v4811_v58  ;;  %v5651_v32 = vunpack.c.h.s8.bf16 %v4835_v25  ;;  %v4866_v25 = vld [vmem:[%s9271_s25 + $0xa60] sm:$0xff] }
 0x6ec   : > { %7253 = vmatprep.subr.bf16.mxu1 %v5525_v37  ;;  %v5595_v37 = vunpack.c.l.s8.bf16 %v4811_v58  ;;  %v5597_v38 = vunpack.c.l.s8.bf16 %v4813_v36  ;;  %v4842_v58 = vld [vmem:[%s9271_s25 + $0x9a0] sm:$0xff] }
 0x6ee   : > { %6910 = vmatpush1.bf16.msra.mxu0 %v5522_v39  ;;  %v4812_v39 = vld [vmem:[%s9271_s25 + $0x8b0] sm:$0xff] }
 0x6ef   : > { %7254 = vmatpush1.bf16.msra.mxu1 %v5524_v1  ;;  %6911 = vmatprep.subr.bf16.mxu0 %v5531_v19  ;;  %v5594_v1 = vunpack.c.l.s8.bf16 %v4810_v22  ;;  %v5596_v19 = vunpack.c.l.s8.bf16 %v4812_v39 }
 0x6f0   : > { %7255 = vmatprep.subr.bf16.mxu1 %v5533_v17  ;;  %v5605_v17 = vunpack.c.h.s8.bf16 %v4813_v36 }
 0x6f2   : > { %6912 = vmatpush1.bf16.msra.mxu0 %v5530_v41  ;;  %v4821_v41 = vld [vmem:[%s9271_s25 + $0x8f8] sm:$0xff] }
 0x6f3   : > { %7256 = vmatpush1.bf16.msra.mxu1 %v5532_v42  ;;  %6913 = vmatprep.subr.bf16.mxu0 %v5539_v44  ;;  %v5602_v42 = vunpack.c.h.s8.bf16 %v4810_v22  ;;  %v5604_v44 = vunpack.c.h.s8.bf16 %v4812_v39  ;;  %v5613_v54 = vunpack.c.l.s8.bf16 %v4821_v41  ;;  %v4851_v39 = vld [vmem:[%s9271_s25 + $0x9e8] sm:$0xff] }
 0x6f4   : > { %7257 = vmatprep.subr.bf16.mxu1 %v5541_v18  ;;  %v5611_v18 = vunpack.c.l.s8.bf16 %v4819_v40  ;;  %v4850_v40 = vld [vmem:[%s9271_s25 + $0x9e0] sm:$0xff] }
 0x6f6   : > { %6914 = vmatpush1.bf16.msra.mxu0 %v5538_v60  ;;  %v4820_v60 = vld [vmem:[%s9271_s25 + $0x8f0] sm:$0xff] }
 0x6f7   : > { %7258 = vmatpush1.bf16.msra.mxu1 %v5540_v49  ;;  %6915 = vmatprep.subr.bf16.mxu0 %v5547_v52  ;;  %v5610_v49 = vunpack.c.l.s8.bf16 %v4818_v45  ;;  %v5612_v52 = vunpack.c.l.s8.bf16 %v4820_v60 }
 0x6f8   : > { %7259 = vmatprep.subr.bf16.mxu1 %v5549_v62  ;;  %v5621_v62 = vunpack.c.h.s8.bf16 %v4821_v41 }
 0x6fa   : > { %6916 = vmatpush1.bf16.msra.mxu0 %v5546_v3  ;;  %v4829_v3 = vld [vmem:[%s9271_s25 + $0x938] sm:$0xff] }
 0x6fb   : > { %7260 = vmatpush1.bf16.msra.mxu1 %v5548_v5  ;;  %6917 = vmatprep.subr.bf16.mxu0 %v5555_v6  ;;  %v5618_v5 = vunpack.c.h.s8.bf16 %v4818_v45  ;;  %v5620_v6 = vunpack.c.h.s8.bf16 %v4820_v60  ;;  %v5629_v11 = vunpack.c.l.s8.bf16 %v4829_v3  ;;  %v5683_v45 = vunpack.c.h.s8.bf16 %v4851_v39  ;;  %v4859_v60 = vld [vmem:[%s9271_s25 + $0xa28] sm:$0xff] }
 0x6fc   : > { %7261 = vmatprep.subr.bf16.mxu1 %v5557_v8  ;;  %v5627_v8 = vunpack.c.l.s8.bf16 %v4827_v2  ;;  %v4858_v2 = vld [vmem:[%s9271_s25 + $0xa20] sm:$0xff] }
 0x6fe   : > { %6918 = vmatpush1.bf16.msra.mxu0 %v5554_v43  ;;  %v4828_v43 = vld [vmem:[%s9271_s25 + $0x930] sm:$0xff] }
 0x6ff   : > { %7262 = vmatpush1.bf16.msra.mxu1 %v5556_v14  ;;  %6930 = vmatprep.subr.bf16.mxu0 %v5563_v20  ;;  %v5626_v14 = vunpack.c.l.s8.bf16 %v4826_v9  ;;  %v5628_v20 = vunpack.c.l.s8.bf16 %v4828_v43 }
 0x700   : > { %7274 = vmatprep.subr.bf16.mxu1 %v5565_v24  ;;  %v5637_v24 = vunpack.c.h.s8.bf16 %v4829_v3 }
 0x701   : > { %6920 = vmatmul.mubr.bf16.vlgmr.msra.gmra.mrb[24].mxu0 %v9387_v59 }
 0x702   : > { %7264 = vmatmul.mubr.bf16.vlgmr.msra.gmra.mrb[24].mxu1 %v9387_v59  ;;  %6931 = vmatpush1.bf16.msra.mxu0 %v5562_v26  ;;  %v5580_v59 = vunpack.c.l.s8.bf16 %v4804_v57  ;;  %v4837_v26 = vld [vmem:[%s9271_s25 + $0x978] sm:$0xff] }
 0x703   : > { %6962 = vmatprep.mubr.bf16.mxu0 %v9466_v61  ;;  %7275 = vmatpush1.bf16.msra.mxu1 %v5564_v27  ;;  %v5634_v27 = vunpack.c.h.s8.bf16 %v4826_v9  ;;  %v5645_v29 = vunpack.c.l.s8.bf16 %v4837_v26  ;;  %v5699_v9 = vunpack.c.h.s8.bf16 %v4859_v60 }
 0x704   : > { %7306 = vmatprep.mubr.bf16.mxu1 %v9466_v61  ;;  %6932 = vmatprep.subr.bf16.mxu0 %v5571_v16  ;;  %v5588_v61 = vunpack.c.h.s8.bf16 %v4804_v57  ;;  %v5636_v16 = vunpack.c.h.s8.bf16 %v4828_v43  ;;  %v4843_v57 = vld [vmem:[%s9271_s25 + $0x9a8] sm:$0xff] }
 0x705   : > { %7276 = vmatprep.subr.bf16.mxu1 %v5573_v21  ;;  %v4834_v21 = vld [vmem:[%s9271_s25 + $0x960] sm:$0xff]  ;;  %v5667_v22 = vunpack.c.h.s8.bf16 %v4843_v57 }
 0x706   : > { %6933 = vmatpush1.bf16.msra.mxu0 %v5570_v30  ;;  %v4836_v30 = vld [vmem:[%s9271_s25 + $0x970] sm:$0xff] }
 0x707   : > { %7277 = vmatpush1.bf16.msra.mxu1 %v5572_v31  ;;  %6934 = vmatprep.subr.bf16.mxu0 %v5579_v48  ;;  %v5642_v31 = vunpack.c.l.s8.bf16 %v4834_v21  ;;  %v5644_v48 = vunpack.c.l.s8.bf16 %v4836_v30 }
 0x708   : > { %7278 = vmatprep.subr.bf16.mxu1 %v5581_v33  ;;  %v5653_v33 = vunpack.c.h.s8.bf16 %v4837_v26 }
 0x70a   : > { %6935 = vmatpush1.bf16.msra.mxu0 %v5578_v15  ;;  %v4845_v15 = vld [vmem:[%s9271_s25 + $0x9b8] sm:$0xff] }
 0x70b   : > { %7279 = vmatpush1.bf16.msra.mxu1 %v5580_v59  ;;  %6936 = vmatprep.subr.bf16.mxu0 %v5587_v34  ;;  %v5650_v59 = vunpack.c.h.s8.bf16 %v4834_v21  ;;  %v5652_v34 = vunpack.c.h.s8.bf16 %v4836_v30  ;;  %v5661_v36 = vunpack.c.l.s8.bf16 %v4845_v15  ;;  %v4877_v30 = vld [vmem:[%s9271_s25 + $0xab8] sm:$0xff] }
 0x70c   : > { %7280 = vmatprep.subr.bf16.mxu1 %v5589_v35  ;;  %v5659_v35 = vunpack.c.l.s8.bf16 %v4843_v57  ;;  %v4876_v57 = vld [vmem:[%s9271_s25 + $0xab0] sm:$0xff] }
 0x70e   : > { %6937 = vmatpush1.bf16.msra.mxu0 %v5586_v12  ;;  %v4844_v12 = vld [vmem:[%s9271_s25 + $0x9b0] sm:$0xff] }
 0x70f   : > { %7281 = vmatpush1.bf16.msra.mxu1 %v5588_v61  ;;  %6938 = vmatprep.subr.bf16.mxu0 %v5595_v37  ;;  %v5658_v61 = vunpack.c.l.s8.bf16 %v4842_v58  ;;  %v5660_v37 = vunpack.c.l.s8.bf16 %v4844_v12 }
 0x710   : > { %7282 = vmatprep.subr.bf16.mxu1 %v5597_v38  ;;  %v5669_v38 = vunpack.c.h.s8.bf16 %v4845_v15 }
 0x712   : > { %6939 = vmatpush1.bf16.msra.mxu0 %v5594_v1  ;;  %v4853_v1 = vld [vmem:[%s9271_s25 + $0x9f8] sm:$0xff] }
 0x713   : > { %7283 = vmatpush1.bf16.msra.mxu1 %v5596_v19  ;;  %6940 = vmatprep.subr.bf16.mxu0 %v5603_v13  ;;  %v5666_v19 = vunpack.c.h.s8.bf16 %v4842_v58  ;;  %v5668_v13 = vunpack.c.h.s8.bf16 %v4844_v12  ;;  %v5677_v41 = vunpack.c.l.s8.bf16 %v4853_v1  ;;  %v4883_v58 = vld [vmem:[%s9271_s25 + $0xae8] sm:$0xff] }
 0x714   : > { %7284 = vmatprep.subr.bf16.mxu1 %v5605_v17  ;;  %v5675_v17 = vunpack.c.l.s8.bf16 %v4851_v39  ;;  %v4884_v39 = vld [vmem:[%s9271_s25 + $0xaf0] sm:$0xff] }
 0x716   : > { %6941 = vmatpush1.bf16.msra.mxu0 %v5602_v42  ;;  %v4852_v42 = vld [vmem:[%s9271_s25 + $0x9f0] sm:$0xff] }
 0x717   : > { %7285 = vmatpush1.bf16.msra.mxu1 %v5604_v44  ;;  %6942 = vmatprep.subr.bf16.mxu0 %v5611_v18  ;;  %v5674_v44 = vunpack.c.l.s8.bf16 %v4850_v40  ;;  %v5676_v18 = vunpack.c.l.s8.bf16 %v4852_v42 }
 0x718   : > { %7286 = vmatprep.subr.bf16.mxu1 %v5613_v54  ;;  %v5685_v54 = vunpack.c.h.s8.bf16 %v4853_v1 }
 0x71a   : > { %6943 = vmatpush1.bf16.msra.mxu0 %v5610_v49  ;;  %v4861_v49 = vld [vmem:[%s9271_s25 + $0xa38] sm:$0xff] }
 0x71b   : > { %7287 = vmatpush1.bf16.msra.mxu1 %v5612_v52  ;;  %6944 = vmatprep.subr.bf16.mxu0 %v5619_v55  ;;  %v5682_v52 = vunpack.c.h.s8.bf16 %v4850_v40  ;;  %v5684_v55 = vunpack.c.h.s8.bf16 %v4852_v42  ;;  %v5693_v3 = vunpack.c.l.s8.bf16 %v4861_v49  ;;  %v5701_v43 = vunpack.c.h.s8.bf16 %v4861_v49  ;;  %v4891_v40 = vld [vmem:[%s9271_s25 + $0xb28] sm:$0xff] }
 0x71c   : > { %7288 = vmatprep.subr.bf16.mxu1 %v5621_v62  ;;  %v5691_v62 = vunpack.c.l.s8.bf16 %v4859_v60  ;;  %v4892_v60 = vld [vmem:[%s9271_s25 + $0xb30] sm:$0xff] }
 0x71e   : > { %6945 = vmatpush1.bf16.msra.mxu0 %v5618_v5  ;;  %v4860_v5 = vld [vmem:[%s9271_s25 + $0xa30] sm:$0xff] }
 0x71f   : > { %7289 = vmatpush1.bf16.msra.mxu1 %v5620_v6  ;;  %6946 = vmatprep.subr.bf16.mxu0 %v5627_v8  ;;  %v5690_v6 = vunpack.c.l.s8.bf16 %v4858_v2  ;;  %v5692_v8 = vunpack.c.l.s8.bf16 %v4860_v5 }
 0x720   : > { %7290 = vmatprep.subr.bf16.mxu1 %v5629_v11  ;;  %v4867_v11 = vld [vmem:[%s9271_s25 + $0xa68] sm:$0xff] }
 0x722   : > { %6947 = vmatpush1.bf16.msra.mxu0 %v5626_v14  ;;  %v4869_v14 = vld [vmem:[%s9271_s25 + $0xa78] sm:$0xff] }
 0x723   : > { %7291 = vmatpush1.bf16.msra.mxu1 %v5628_v20  ;;  %6948 = vmatprep.subr.bf16.mxu0 %v5635_v23  ;;  %v5698_v20 = vunpack.c.h.s8.bf16 %v4858_v2  ;;  %v5700_v23 = vunpack.c.h.s8.bf16 %v4860_v5  ;;  %v5709_v26 = vunpack.c.l.s8.bf16 %v4869_v14  ;;  %v5717_v21 = vunpack.c.h.s8.bf16 %v4869_v14  ;;  %v4899_v2 = vld [vmem:[%s9271_s25 + $0xb68] sm:$0xff] }
 0x724   : > { %7292 = vmatprep.subr.bf16.mxu1 %v5637_v24  ;;  %v5707_v24 = vunpack.c.l.s8.bf16 %v4867_v11 }
 0x726   : > { %6949 = vmatpush1.bf16.msra.mxu0 %v5634_v27  ;;  %v4868_v27 = vld [vmem:[%s9271_s25 + $0xa70] sm:$0xff] }
 0x727   : > { %7293 = vmatpush1.bf16.msra.mxu1 %v5636_v16  ;;  %6950 = vmatprep.subr.bf16.mxu0 %v5643_v28  ;;  %v5706_v16 = vunpack.c.l.s8.bf16 %v4866_v25  ;;  %v5715_v28 = vunpack.c.h.s8.bf16 %v4867_v11 }
 0x728   : > { %7294 = vmatprep.subr.bf16.mxu1 %v5645_v29  ;;  %v4875_v29 = vld [vmem:[%s9271_s25 + $0xaa8] sm:$0xff] }
 0x72a   : > { %6951 = vmatpush1.bf16.msra.mxu0 %v5642_v31  ;;  %v5714_v31 = vunpack.c.h.s8.bf16 %v4866_v25  ;;  %v4907_v25 = vld [vmem:[%s9271_s25 + $0xba8] sm:$0xff] }
 0x72b   : > { %7295 = vmatpush1.bf16.msra.mxu1 %v5644_v48  ;;  %6952 = vmatprep.subr.bf16.mxu0 %v5651_v32  ;;  %v5723_v48 = vunpack.c.l.s8.bf16 %v4875_v29  ;;  %v4874_v32 = vld [vmem:[%s9271_s25 + $0xaa0] sm:$0xff] }
 0x72c   : > { %7296 = vmatprep.subr.bf16.mxu1 %v5653_v33  ;;  %v5725_v33 = vunpack.c.l.s8.bf16 %v4877_v30  ;;  %v5722_v15 = vunpack.c.l.s8.bf16 %v4874_v32  ;;  %v5730_v12 = vunpack.c.h.s8.bf16 %v4874_v32  ;;  %v4915_v32 = vld [vmem:[%s9271_s25 + $0xbe8] sm:$0xff] }
 0x72e   : > { %6953 = vmatpush1.bf16.msra.mxu0 %v5650_v59  ;;  %v5724_v59 = vunpack.c.l.s8.bf16 %v4876_v57 }
 0x72f   : > { %7297 = vmatpush1.bf16.msra.mxu1 %v5652_v34  ;;  %6954 = vmatprep.subr.bf16.mxu0 %v5659_v35  ;;  %v5731_v34 = vunpack.c.h.s8.bf16 %v4875_v29  ;;  %v5733_v35 = vunpack.c.h.s8.bf16 %v4877_v30  ;;  %v4908_v29 = vld [vmem:[%s9271_s25 + $0xbb0] sm:$0xff] }
 0x730   : > { %7298 = vmatprep.subr.bf16.mxu1 %v5661_v36  ;;  %v4885_v36 = vld [vmem:[%s9271_s25 + $0xaf8] sm:$0xff] }
 0x732   : > { %6955 = vmatpush1.bf16.msra.mxu0 %v5658_v61  ;;  %v5732_v61 = vunpack.c.h.s8.bf16 %v4876_v57 }
 0x733   : > { %7299 = vmatpush1.bf16.msra.mxu1 %v5660_v37  ;;  %6956 = vmatprep.subr.bf16.mxu0 %v5667_v22  ;;  %v5739_v37 = vunpack.c.l.s8.bf16 %v4883_v58  ;;  %v4882_v22 = vld [vmem:[%s9271_s25 + $0xae0] sm:$0xff] }
 0x734   : > { %7300 = vmatprep.subr.bf16.mxu1 %v5669_v38  ;;  %v5741_v38 = vunpack.c.l.s8.bf16 %v4885_v36  ;;  %v5738_v1 = vunpack.c.l.s8.bf16 %v4882_v22  ;;  %v5746_v42 = vunpack.c.h.s8.bf16 %v4882_v22  ;;  %v4923_v22 = vld [vmem:[%s9271_s25 + $0xc28] sm:$0xff] }
 0x736   : > { %6957 = vmatpush1.bf16.msra.mxu0 %v5666_v19  ;;  %v5740_v19 = vunpack.c.l.s8.bf16 %v4884_v39 }
 0x737   : > { %7301 = vmatpush1.bf16.msra.mxu1 %v5668_v13  ;;  %6958 = vmatprep.subr.bf16.mxu0 %v5675_v17  ;;  %v5747_v13 = vunpack.c.h.s8.bf16 %v4883_v58  ;;  %v5749_v17 = vunpack.c.h.s8.bf16 %v4885_v36  ;;  %v4916_v58 = vld [vmem:[%s9271_s25 + $0xbf0] sm:$0xff] }
 0x738   : > { %7302 = vmatprep.subr.bf16.mxu1 %v5677_v41  ;;  %v4893_v41 = vld [vmem:[%s9271_s25 + $0xb38] sm:$0xff] }
 0x73a   : > { %6959 = vmatpush1.bf16.msra.mxu0 %v5674_v44  ;;  %v5748_v44 = vunpack.c.h.s8.bf16 %v4884_v39 }
 0x73b   : > { %7303 = vmatpush1.bf16.msra.mxu1 %v5676_v18  ;;  %6960 = vmatprep.subr.bf16.mxu0 %v5683_v45  ;;  %v5755_v18 = vunpack.c.l.s8.bf16 %v4891_v40  ;;  %v4890_v45 = vld [vmem:[%s9271_s25 + $0xb20] sm:$0xff] }
 0x73c   : > { %7304 = vmatprep.subr.bf16.mxu1 %v5685_v54  ;;  %v5757_v54 = vunpack.c.l.s8.bf16 %v4893_v41  ;;  %v5754_v49 = vunpack.c.l.s8.bf16 %v4890_v45  ;;  %v5762_v5 = vunpack.c.h.s8.bf16 %v4890_v45 }
 0x73e   : > { %6961 = vmatpush1.bf16.msra.mxu0 %v5682_v52  ;;  %v5756_v52 = vunpack.c.l.s8.bf16 %v4892_v60 }
 0x73f   : > { %7305 = vmatpush1.bf16.msra.mxu1 %v5684_v55  ;;  %6973 = vmatprep.subr.bf16.mxu0 %v5691_v62  ;;  %v5763_v55 = vunpack.c.h.s8.bf16 %v4891_v40  ;;  %v5765_v62 = vunpack.c.h.s8.bf16 %v4893_v41  ;;  %v4924_v40 = vld [vmem:[%s9271_s25 + $0xc30] sm:$0xff] }
 0x740   : > { %7317 = vmatprep.subr.bf16.mxu1 %v5693_v3  ;;  %v4901_v3 = vld [vmem:[%s9271_s25 + $0xb78] sm:$0xff] }
 0x741   : > { %6963 = vmatmul.mubr.bf16.vlgmr.msra.gmra.mrb[24].mxu0 %v9461_v47  ;;  %v5773_v11 = vunpack.c.l.s8.bf16 %v4901_v3 }
 0x742   : > { %7307 = vmatmul.mubr.bf16.vlgmr.msra.gmra.mrb[24].mxu1 %v9461_v47  ;;  %6974 = vmatpush1.bf16.msra.mxu0 %v5690_v6  ;;  %v5708_v47 = vunpack.c.l.s8.bf16 %v4868_v27  ;;  %v5764_v6 = vunpack.c.h.s8.bf16 %v4892_v60 }
 0x743   : > { %7005 = vmatprep.mubr.bf16.mxu0 %v9469_v4  ;;  %7318 = vmatpush1.bf16.msra.mxu1 %v5692_v8  ;;  %v5771_v8 = vunpack.c.l.s8.bf16 %v4899_v2 }
 0x744   : > { %7349 = vmatprep.mubr.bf16.mxu1 %v9469_v4  ;;  %6975 = vmatprep.subr.bf16.mxu0 %v5699_v9  ;;  %v5716_v4 = vunpack.c.h.s8.bf16 %v4868_v27  ;;  %v4898_v9 = vld [vmem:[%s9271_s25 + $0xb60] sm:$0xff] }
 0x745   : > { %7319 = vmatprep.subr.bf16.mxu1 %v5701_v43  ;;  %v4900_v43 = vld [vmem:[%s9271_s25 + $0xb70] sm:$0xff]  ;;  %v5770_v14 = vunpack.c.l.s8.bf16 %v4898_v9  ;;  %v5778_v27 = vunpack.c.h.s8.bf16 %v4898_v9  ;;  %v4941_v9 = vld [vmem:[%s9271_s25 + $0xcb8] sm:$0xff] }
 0x746   : > { %6976 = vmatpush1.bf16.msra.mxu0 %v5698_v20  ;;  %v5772_v20 = vunpack.c.l.s8.bf16 %v4900_v43 }
 0x747   : > { %7320 = vmatpush1.bf16.msra.mxu1 %v5700_v23  ;;  %6977 = vmatprep.subr.bf16.mxu0 %v5707_v24  ;;  %v5779_v23 = vunpack.c.h.s8.bf16 %v4899_v2  ;;  %v5781_v24 = vunpack.c.h.s8.bf16 %v4901_v3  ;;  %v4932_v2 = vld [vmem:[%s9271_s25 + $0xc70] sm:$0xff] }
 0x748   : > { %7321 = vmatprep.subr.bf16.mxu1 %v5709_v26  ;;  %v4909_v26 = vld [vmem:[%s9271_s25 + $0xbb8] sm:$0xff] }
 0x74a   : > { %6978 = vmatpush1.bf16.msra.mxu0 %v5706_v16  ;;  %v5780_v16 = vunpack.c.h.s8.bf16 %v4900_v43 }
 0x74b   : > { %7322 = vmatpush1.bf16.msra.mxu1 %v5708_v47  ;;  %6979 = vmatprep.subr.bf16.mxu0 %v5715_v28  ;;  %v5787_v47 = vunpack.c.l.s8.bf16 %v4907_v25  ;;  %v4906_v28 = vld [vmem:[%s9271_s25 + $0xba0] sm:$0xff] }
 0x74c   : > { %7323 = vmatprep.subr.bf16.mxu1 %v5717_v21  ;;  %v5789_v21 = vunpack.c.l.s8.bf16 %v4909_v26  ;;  %v5786_v30 = vunpack.c.l.s8.bf16 %v4906_v28  ;;  %v5794_v57 = vunpack.c.h.s8.bf16 %v4906_v28 }
 0x74e   : > { %6980 = vmatpush1.bf16.msra.mxu0 %v5714_v31  ;;  %v5788_v31 = vunpack.c.l.s8.bf16 %v4908_v29 }
 0x74f   : > { %7324 = vmatpush1.bf16.msra.mxu1 %v5716_v4  ;;  %6981 = vmatprep.subr.bf16.mxu0 %v5723_v48  ;;  %v5795_v4 = vunpack.c.h.s8.bf16 %v4907_v25  ;;  %v5797_v48 = vunpack.c.h.s8.bf16 %v4909_v26 }
 0x750   : > { %7325 = vmatprep.subr.bf16.mxu1 %v5725_v33  ;;  %v4917_v33 = vld [vmem:[%s9271_s25 + $0xbf8] sm:$0xff] }
 0x752   : > { %6982 = vmatpush1.bf16.msra.mxu0 %v5722_v15  ;;  %v5796_v15 = vunpack.c.h.s8.bf16 %v4908_v29 }
 0x753   : > { %7326 = vmatpush1.bf16.msra.mxu1 %v5724_v59  ;;  %6983 = vmatprep.subr.bf16.mxu0 %v5731_v34  ;;  %v5803_v59 = vunpack.c.l.s8.bf16 %v4915_v32  ;;  %v4914_v34 = vld [vmem:[%s9271_s25 + $0xbe0] sm:$0xff] }
 0x754   : > { %7327 = vmatprep.subr.bf16.mxu1 %v5733_v35  ;;  %v5805_v35 = vunpack.c.l.s8.bf16 %v4917_v33  ;;  %v5802_v36 = vunpack.c.l.s8.bf16 %v4914_v34  ;;  %v5810_v39 = vunpack.c.h.s8.bf16 %v4914_v34 }
 0x756   : > { %6984 = vmatpush1.bf16.msra.mxu0 %v5730_v12  ;;  %v5804_v12 = vunpack.c.l.s8.bf16 %v4916_v58 }
 0x757   : > { %7328 = vmatpush1.bf16.msra.mxu1 %v5732_v61  ;;  %6985 = vmatprep.subr.bf16.mxu0 %v5739_v37  ;;  %v5811_v61 = vunpack.c.h.s8.bf16 %v4915_v32  ;;  %v5813_v37 = vunpack.c.h.s8.bf16 %v4917_v33 }
 0x758   : > { %7329 = vmatprep.subr.bf16.mxu1 %v5741_v38  ;;  %v4925_v38 = vld [vmem:[%s9271_s25 + $0xc38] sm:$0xff] }
 0x759   : > { %v5829_v45 = vunpack.c.h.s8.bf16 %v4925_v38 }
 0x75a   : > { %6986 = vmatpush1.bf16.msra.mxu0 %v5738_v1  ;;  %v5812_v1 = vunpack.c.h.s8.bf16 %v4916_v58 }
 0x75b   : > { %7330 = vmatpush1.bf16.msra.mxu1 %v5740_v19  ;;  %6987 = vmatprep.subr.bf16.mxu0 %v5747_v13  ;;  %v5819_v19 = vunpack.c.l.s8.bf16 %v4923_v22  ;;  %v4922_v13 = vld [vmem:[%s9271_s25 + $0xc20] sm:$0xff] }
 0x75c   : > { %7331 = vmatprep.subr.bf16.mxu1 %v5749_v17  ;;  %v5821_v17 = vunpack.c.l.s8.bf16 %v4925_v38  ;;  %v5818_v41 = vunpack.c.l.s8.bf16 %v4922_v13  ;;  %v5826_v60 = vunpack.c.h.s8.bf16 %v4922_v13 }
 0x75e   : > { %6988 = vmatpush1.bf16.msra.mxu0 %v5746_v42  ;;  %v5820_v42 = vunpack.c.l.s8.bf16 %v4924_v40 }
 0x75f   : > { %7332 = vmatpush1.bf16.msra.mxu1 %v5748_v44  ;;  %6989 = vmatprep.subr.bf16.mxu0 %v5755_v18  ;;  %v5827_v44 = vunpack.c.h.s8.bf16 %v4923_v22  ;;  %v4931_v18 = vld [vmem:[%s9271_s25 + $0xc68] sm:$0xff] }
 0x760   : > { %7333 = vmatprep.subr.bf16.mxu1 %v5757_v54  ;;  %v4933_v54 = vld [vmem:[%s9271_s25 + $0xc78] sm:$0xff] }
 0x762   : > { %6990 = vmatpush1.bf16.msra.mxu0 %v5754_v49  ;;  %v5828_v49 = vunpack.c.h.s8.bf16 %v4924_v40 }
 0x763   : > { %7334 = vmatpush1.bf16.msra.mxu1 %v5756_v52  ;;  %6991 = vmatprep.subr.bf16.mxu0 %v5763_v55  ;;  %v5835_v52 = vunpack.c.l.s8.bf16 %v4931_v18  ;;  %v4930_v55 = vld [vmem:[%s9271_s25 + $0xc60] sm:$0xff] }
 0x764   : > { %7335 = vmatprep.subr.bf16.mxu1 %v5765_v62  ;;  %v5837_v62 = vunpack.c.l.s8.bf16 %v4933_v54  ;;  %v5834_v3 = vunpack.c.l.s8.bf16 %v4930_v55 }
 0x766   : > { %6992 = vmatpush1.bf16.msra.mxu0 %v5762_v5  ;;  %v5843_v5 = vunpack.c.h.s8.bf16 %v4931_v18 }
 0x767   : > { %7336 = vmatpush1.bf16.msra.mxu1 %v5764_v6  ;;  %6993 = vmatprep.subr.bf16.mxu0 %v5771_v8  ;;  %v5845_v6 = vunpack.c.h.s8.bf16 %v4933_v54  ;;  %v4939_v8 = vld [vmem:[%s9271_s25 + $0xca8] sm:$0xff] }
 0x768   : > { %7337 = vmatprep.subr.bf16.mxu1 %v5773_v11  ;;  %v5842_v11 = vunpack.c.h.s8.bf16 %v4930_v55  ;;  %v5851_v43 = vunpack.c.l.s8.bf16 %v4939_v8  ;;  %v5859_v26 = vunpack.c.h.s8.bf16 %v4939_v8 }
 0x76a   : > { %6994 = vmatpush1.bf16.msra.mxu0 %v5770_v14  ;;  %v4938_v14 = vld [vmem:[%s9271_s25 + $0xca0] sm:$0xff] }
 0x76b   : > { %7338 = vmatpush1.bf16.msra.mxu1 %v5772_v20  ;;  %6995 = vmatprep.subr.bf16.mxu0 %v5779_v23  ;;  %v5853_v20 = vunpack.c.l.s8.bf16 %v4941_v9  ;;  %v4940_v23 = vld [vmem:[%s9271_s25 + $0xcb0] sm:$0xff]  ;;  %v5858_v28 = vunpack.c.h.s8.bf16 %v4938_v14 }
 0x76c   : > { %7339 = vmatprep.subr.bf16.mxu1 %v5781_v24  ;;  %v5850_v24 = vunpack.c.l.s8.bf16 %v4938_v14  ;;  %v5852_v25 = vunpack.c.l.s8.bf16 %v4940_v23 }
 0x76e   : > { %6996 = vmatpush1.bf16.msra.mxu0 %v5778_v27  ;;  %v5861_v27 = vunpack.c.h.s8.bf16 %v4941_v9 }
 0x76f   : > { %7340 = vmatpush1.bf16.msra.mxu1 %v5780_v16  ;;  %6997 = vmatprep.subr.bf16.mxu0 %v5787_v47  ;;  %v4947_v16 = vld [vmem:[%s9271_s25 + $0xce8] sm:$0xff]  ;;  %v4949_v47 = vld [vmem:[%s9271_s25 + $0xcf8] sm:$0xff] }
 0x770   : > { %7341 = vmatprep.subr.bf16.mxu1 %v5789_v21  ;;  %v5860_v21 = vunpack.c.h.s8.bf16 %v4940_v23  ;;  %v5867_v29 = vunpack.c.l.s8.bf16 %v4947_v16  ;;  %v5875_v33 = vunpack.c.h.s8.bf16 %v4947_v16 }
 0x772   : > { %6998 = vmatpush1.bf16.msra.mxu0 %v5786_v30  ;;  %v4946_v30 = vld [vmem:[%s9271_s25 + $0xce0] sm:$0xff] }
 0x773   : > { %7342 = vmatpush1.bf16.msra.mxu1 %v5788_v31  ;;  %6999 = vmatprep.subr.bf16.mxu0 %v5795_v4  ;;  %v5869_v31 = vunpack.c.l.s8.bf16 %v4949_v47  ;;  %v4948_v4 = vld [vmem:[%s9271_s25 + $0xcf0] sm:$0xff]  ;;  %v5874_v34 = vunpack.c.h.s8.bf16 %v4946_v30 }
 0x774   : > { %7343 = vmatprep.subr.bf16.mxu1 %v5797_v48  ;;  %v5866_v48 = vunpack.c.l.s8.bf16 %v4946_v30  ;;  %v5868_v32 = vunpack.c.l.s8.bf16 %v4948_v4 }
 0x776   : > { %7000 = vmatpush1.bf16.msra.mxu0 %v5794_v57  ;;  %v5877_v57 = vunpack.c.h.s8.bf16 %v4949_v47 }
 0x777   : > { %7344 = vmatpush1.bf16.msra.mxu1 %v5796_v15  ;;  %7001 = vmatprep.subr.bf16.mxu0 %v5803_v59  ;;  %v4955_v15 = vld [vmem:[%s9271_s25 + $0xd28] sm:$0xff]  ;;  %v4957_v59 = vld [vmem:[%s9271_s25 + $0xd38] sm:$0xff] }
 0x778   : > { %7345 = vmatprep.subr.bf16.mxu1 %v5805_v35  ;;  %v5876_v35 = vunpack.c.h.s8.bf16 %v4948_v4  ;;  %v5883_v58 = vunpack.c.l.s8.bf16 %v4955_v15  ;;  %v5891_v38 = vunpack.c.h.s8.bf16 %v4955_v15 }
 0x77a   : > { %7002 = vmatpush1.bf16.msra.mxu0 %v5802_v36  ;;  %v4954_v36 = vld [vmem:[%s9271_s25 + $0xd20] sm:$0xff] }
 0x77b   : > { %7346 = vmatpush1.bf16.msra.mxu1 %v5804_v12  ;;  %7003 = vmatprep.subr.bf16.mxu0 %v5811_v61  ;;  %v5885_v12 = vunpack.c.l.s8.bf16 %v4957_v59  ;;  %v4956_v61 = vld [vmem:[%s9271_s25 + $0xd30] sm:$0xff]  ;;  %v5890_v13 = vunpack.c.h.s8.bf16 %v4954_v36 }
 0x77c   : > { %7347 = vmatprep.subr.bf16.mxu1 %v5813_v37  ;;  %v5882_v37 = vunpack.c.l.s8.bf16 %v4954_v36  ;;  %v5884_v22 = vunpack.c.l.s8.bf16 %v4956_v61 }
 0x77e   : > { %7004 = vmatpush1.bf16.msra.mxu0 %v5810_v39  ;;  %v5893_v39 = vunpack.c.h.s8.bf16 %v4957_v59 }
 0x77f   : > { %7348 = vmatpush1.bf16.msra.mxu1 %v5812_v1  ;;  %7016 = vmatprep.subr.bf16.mxu0 %v5819_v19  ;;  %v4963_v1 = vld [vmem:[%s9271_s25 + $0xd68] sm:$0xff]  ;;  %v4965_v19 = vld [vmem:[%s9271_s25 + $0xd78] sm:$0xff] }
 0x780   : > { %7360 = vmatprep.subr.bf16.mxu1 %v5821_v17  ;;  %v5892_v17 = vunpack.c.h.s8.bf16 %v4956_v61  ;;  %v5899_v40 = vunpack.c.l.s8.bf16 %v4963_v1  ;;  %v5907_v54 = vunpack.c.h.s8.bf16 %v4963_v1 }
 0x781   : > { %7006 = vmatmul.mubr.bf16.vlgmr.msra.gmra.mrb[24].mxu0 %v9464_v56 }
 0x782   : > { %7350 = vmatmul.mubr.bf16.vlgmr.msra.gmra.mrb[24].mxu1 %v9464_v56  ;;  %7017 = vmatpush1.bf16.msra.mxu0 %v5818_v41  ;;  %v5836_v56 = vunpack.c.l.s8.bf16 %v4932_v2  ;;  %v4962_v41 = vld [vmem:[%s9271_s25 + $0xd60] sm:$0xff] }
 0x783   : > { %7048 = vmatprep.mubr.bf16.mxu0 %v9554_v0  ;;  %7361 = vmatpush1.bf16.msra.mxu1 %v5820_v42  ;;  %v5901_v42 = vunpack.c.l.s8.bf16 %v4965_v19  ;;  %v5898_v18 = vunpack.c.l.s8.bf16 %v4962_v41  ;;  %v5906_v55 = vunpack.c.h.s8.bf16 %v4962_v41 }
 0x784   : > { %7392 = vmatprep.mubr.bf16.mxu1 %v9554_v0  ;;  %7018 = vmatprep.subr.bf16.mxu0 %v5827_v44  ;;  %v5844_v0 = vunpack.c.h.s8.bf16 %v4932_v2  ;;  %v4964_v44 = vld [vmem:[%s9271_s25 + $0xd70] sm:$0xff] }
 0x785   : > { %7362 = vmatprep.subr.bf16.mxu1 %v5829_v45  ;;  %v5900_v45 = vunpack.c.l.s8.bf16 %v4964_v44 }
 0x786   : > { %7019 = vmatpush1.bf16.msra.mxu0 %v5826_v60  ;;  %v5909_v60 = vunpack.c.h.s8.bf16 %v4965_v19 }
 0x787   : > { %7363 = vmatpush1.bf16.msra.mxu1 %v5828_v49  ;;  %7020 = vmatprep.subr.bf16.mxu0 %v5835_v52  ;;  %v4971_v49 = vld [vmem:[%s9271_s25 + $0xda8] sm:$0xff]  ;;  %v4973_v52 = vld [vmem:[%s9271_s25 + $0xdb8] sm:$0xff] }
 0x788   : > { %7364 = vmatprep.subr.bf16.mxu1 %v5837_v62  ;;  %v5908_v62 = vunpack.c.h.s8.bf16 %v4964_v44  ;;  %v5915_v2 = vunpack.c.l.s8.bf16 %v4971_v49  ;;  %v5923_v9 = vunpack.c.h.s8.bf16 %v4971_v49 }
 0x78a   : > { %7021 = vmatpush1.bf16.msra.mxu0 %v5834_v3  ;;  %v4970_v3 = vld [vmem:[%s9271_s25 + $0xda0] sm:$0xff] }
 0x78b   : > { %7365 = vmatpush1.bf16.msra.mxu1 %v5836_v56  ;;  %7022 = vmatprep.subr.bf16.mxu0 %v5843_v5  ;;  %v5917_v56 = vunpack.c.l.s8.bf16 %v4973_v52  ;;  %v4972_v5 = vld [vmem:[%s9271_s25 + $0xdb0] sm:$0xff]  ;;  %v5922_v14 = vunpack.c.h.s8.bf16 %v4970_v3 }
 0x78c   : > { %7366 = vmatprep.subr.bf16.mxu1 %v5845_v6  ;;  %v5914_v6 = vunpack.c.l.s8.bf16 %v4970_v3  ;;  %v5916_v8 = vunpack.c.l.s8.bf16 %v4972_v5 }
 0x78e   : > { %7023 = vmatpush1.bf16.msra.mxu0 %v5842_v11  ;;  %v5925_v11 = vunpack.c.h.s8.bf16 %v4973_v52  ;;  %v5011_v52 = vld [vmem:[%s9271_s25 + $0xee8] sm:$0xff] }
 0x78f   : > { %7367 = vmatpush1.bf16.msra.mxu1 %v5844_v0  ;;  %7024 = vmatprep.subr.bf16.mxu0 %v5851_v43  ;;  %v4979_v0 = vld [vmem:[%s9271_s25 + $0xde8] sm:$0xff]  ;;  %v4981_v43 = vld [vmem:[%s9271_s25 + $0xdf8] sm:$0xff]  ;;  %v5995_v3 = vunpack.c.l.s8.bf16 %v5011_v52 }
 0x790   : > { %7368 = vmatprep.subr.bf16.mxu1 %v5853_v20  ;;  %v5924_v20 = vunpack.c.h.s8.bf16 %v4972_v5  ;;  %v5931_v23 = vunpack.c.l.s8.bf16 %v4979_v0  ;;  %v5939_v47 = vunpack.c.h.s8.bf16 %v4979_v0 }
 0x792   : > { %7025 = vmatpush1.bf16.msra.mxu0 %v5850_v24  ;;  %v4978_v24 = vld [vmem:[%s9271_s25 + $0xde0] sm:$0xff] }
 0x793   : > { %7369 = vmatpush1.bf16.msra.mxu1 %v5852_v25  ;;  %7026 = vmatprep.subr.bf16.mxu0 %v5859_v26  ;;  %v5933_v25 = vunpack.c.l.s8.bf16 %v4981_v43  ;;  %v4980_v26 = vld [vmem:[%s9271_s25 + $0xdf0] sm:$0xff]  ;;  %v5938_v30 = vunpack.c.h.s8.bf16 %v4978_v24 }
 0x794   : > { %7370 = vmatprep.subr.bf16.mxu1 %v5861_v27  ;;  %v5930_v27 = vunpack.c.l.s8.bf16 %v4978_v24  ;;  %v5932_v16 = vunpack.c.l.s8.bf16 %v4980_v26 }
 0x796   : > { %7027 = vmatpush1.bf16.msra.mxu0 %v5858_v28  ;;  %v5941_v28 = vunpack.c.h.s8.bf16 %v4981_v43  ;;  %v5019_v43 = vld [vmem:[%s9271_s25 + $0xf28] sm:$0xff] }
 0x797   : > { %7371 = vmatpush1.bf16.msra.mxu1 %v5860_v21  ;;  %7028 = vmatprep.subr.bf16.mxu0 %v5867_v29  ;;  %v4987_v21 = vld [vmem:[%s9271_s25 + $0xe28] sm:$0xff]  ;;  %v4989_v29 = vld [vmem:[%s9271_s25 + $0xe38] sm:$0xff]  ;;  %v6011_v24 = vunpack.c.l.s8.bf16 %v5019_v43 }
 0x798   : > { %7372 = vmatprep.subr.bf16.mxu1 %v5869_v31  ;;  %v5940_v31 = vunpack.c.h.s8.bf16 %v4980_v26  ;;  %v5947_v4 = vunpack.c.l.s8.bf16 %v4987_v21  ;;  %v5955_v59 = vunpack.c.h.s8.bf16 %v4987_v21 }
 0x79a   : > { %7029 = vmatpush1.bf16.msra.mxu0 %v5866_v48  ;;  %v4986_v48 = vld [vmem:[%s9271_s25 + $0xe20] sm:$0xff] }
 0x79b   : > { %7373 = vmatpush1.bf16.msra.mxu1 %v5868_v32  ;;  %7030 = vmatprep.subr.bf16.mxu0 %v5875_v33  ;;  %v5949_v32 = vunpack.c.l.s8.bf16 %v4989_v29  ;;  %v4988_v33 = vld [vmem:[%s9271_s25 + $0xe30] sm:$0xff]  ;;  %v5954_v36 = vunpack.c.h.s8.bf16 %v4986_v48 }
 0x79c   : > { %7374 = vmatprep.subr.bf16.mxu1 %v5877_v57  ;;  %v5946_v57 = vunpack.c.l.s8.bf16 %v4986_v48  ;;  %v5948_v15 = vunpack.c.l.s8.bf16 %v4988_v33 }
 0x79e   : > { %7031 = vmatpush1.bf16.msra.mxu0 %v5874_v34  ;;  %v4995_v34 = vld [vmem:[%s9271_s25 + $0xe68] sm:$0xff] }
 0x79f   : > { %7375 = vmatpush1.bf16.msra.mxu1 %v5876_v35  ;;  %7032 = vmatprep.subr.bf16.mxu0 %v5883_v58  ;;  %v5957_v35 = vunpack.c.h.s8.bf16 %v4989_v29  ;;  %v4997_v58 = vld [vmem:[%s9271_s25 + $0xe78] sm:$0xff]  ;;  %v5963_v61 = vunpack.c.l.s8.bf16 %v4995_v34  ;;  %v5971_v1 = vunpack.c.h.s8.bf16 %v4995_v34  ;;  %v5027_v29 = vld [vmem:[%s9271_s25 + $0xf68] sm:$0xff] }
 0x7a0   : > { %7376 = vmatprep.subr.bf16.mxu1 %v5885_v12  ;;  %v5956_v12 = vunpack.c.h.s8.bf16 %v4988_v33  ;;  %v5973_v19 = vunpack.c.h.s8.bf16 %v4997_v58  ;;  %v6027_v48 = vunpack.c.l.s8.bf16 %v5027_v29  ;;  %v6035_v34 = vunpack.c.h.s8.bf16 %v5027_v29 }
 0x7a2   : > { %7033 = vmatpush1.bf16.msra.mxu0 %v5882_v37  ;;  %v4994_v37 = vld [vmem:[%s9271_s25 + $0xe60] sm:$0xff] }
 0x7a3   : > { %7377 = vmatpush1.bf16.msra.mxu1 %v5884_v22  ;;  %7034 = vmatprep.subr.bf16.mxu0 %v5891_v38  ;;  %v5965_v22 = vunpack.c.l.s8.bf16 %v4997_v58  ;;  %v4996_v38 = vld [vmem:[%s9271_s25 + $0xe70] sm:$0xff]  ;;  %v5035_v58 = vld [vmem:[%s9271_s25 + $0xfa8] sm:$0xff] }
 0x7a4   : > { %7378 = vmatprep.subr.bf16.mxu1 %v5893_v39  ;;  %v5962_v39 = vunpack.c.l.s8.bf16 %v4994_v37 }
 0x7a6   : > { %7035 = vmatpush1.bf16.msra.mxu0 %v5890_v13  ;;  %v5003_v13 = vld [vmem:[%s9271_s25 + $0xea8] sm:$0xff] }
 0x7a7   : > { %7379 = vmatpush1.bf16.msra.mxu1 %v5892_v17  ;;  %7036 = vmatprep.subr.bf16.mxu0 %v5899_v40  ;;  %v5005_v17 = vld [vmem:[%s9271_s25 + $0xeb8] sm:$0xff]  ;;  %v5970_v40 = vunpack.c.h.s8.bf16 %v4994_v37  ;;  %v5979_v41 = vunpack.c.l.s8.bf16 %v5003_v13  ;;  %v6043_v37 = vunpack.c.l.s8.bf16 %v5035_v58 }
 0x7a8   : > { %7380 = vmatprep.subr.bf16.mxu1 %v5901_v42  ;;  %v5002_v42 = vld [vmem:[%s9271_s25 + $0xea0] sm:$0xff]  ;;  %v5981_v44 = vunpack.c.l.s8.bf16 %v5005_v17  ;;  %v5989_v49 = vunpack.c.h.s8.bf16 %v5005_v17  ;;  %v5043_v17 = vld [vmem:[%s9271_s25 + $0xfe8] sm:$0xff] }
 0x7aa   : > { %7037 = vmatpush1.bf16.msra.mxu0 %v5898_v18  ;;  %v5004_v18 = vld [vmem:[%s9271_s25 + $0xeb0] sm:$0xff] }
 0x7ab   : > { %7381 = vmatpush1.bf16.msra.mxu1 %v5900_v45  ;;  %7038 = vmatprep.subr.bf16.mxu0 %v5907_v54  ;;  %v5978_v45 = vunpack.c.l.s8.bf16 %v5002_v42  ;;  %v5980_v54 = vunpack.c.l.s8.bf16 %v5004_v18 }
 0x7ac   : > { %7382 = vmatprep.subr.bf16.mxu1 %v5909_v60  ;;  %v5987_v60 = vunpack.c.h.s8.bf16 %v5003_v13 }
 0x7ae   : > { %7039 = vmatpush1.bf16.msra.mxu0 %v5906_v55  ;;  %v5013_v55 = vld [vmem:[%s9271_s25 + $0xef8] sm:$0xff] }
 0x7af   : > { %7383 = vmatpush1.bf16.msra.mxu1 %v5908_v62  ;;  %7040 = vmatprep.subr.bf16.mxu0 %v5915_v2  ;;  %v5986_v62 = vunpack.c.h.s8.bf16 %v5002_v42  ;;  %v5988_v2 = vunpack.c.h.s8.bf16 %v5004_v18  ;;  %v5997_v5 = vunpack.c.l.s8.bf16 %v5013_v55  ;;  %v6005_v0 = vunpack.c.h.s8.bf16 %v5013_v55 }
 0x7b0   : > { %7384 = vmatprep.subr.bf16.mxu1 %v5917_v56  ;;  %v5010_v56 = vld [vmem:[%s9271_s25 + $0xee0] sm:$0xff]  ;;  %v6059_v42 = vunpack.c.l.s8.bf16 %v5043_v17 }
 0x7b2   : > { %7041 = vmatpush1.bf16.msra.mxu0 %v5914_v6  ;;  %v5012_v6 = vld [vmem:[%s9271_s25 + $0xef0] sm:$0xff] }
 0x7b3   : > { %7385 = vmatpush1.bf16.msra.mxu1 %v5916_v8  ;;  %7042 = vmatprep.subr.bf16.mxu0 %v5923_v9  ;;  %v5994_v8 = vunpack.c.l.s8.bf16 %v5010_v56  ;;  %v5996_v9 = vunpack.c.l.s8.bf16 %v5012_v6 }
 0x7b4   : > { %7386 = vmatprep.subr.bf16.mxu1 %v5925_v11  ;;  %v6003_v11 = vunpack.c.h.s8.bf16 %v5011_v52 }
 0x7b6   : > { %7043 = vmatpush1.bf16.msra.mxu0 %v5922_v14  ;;  %v5021_v14 = vld [vmem:[%s9271_s25 + $0xf38] sm:$0xff] }
 0x7b7   : > { %7387 = vmatpush1.bf16.msra.mxu1 %v5924_v20  ;;  %7044 = vmatprep.subr.bf16.mxu0 %v5931_v23  ;;  %v6002_v20 = vunpack.c.h.s8.bf16 %v5010_v56  ;;  %v6004_v23 = vunpack.c.h.s8.bf16 %v5012_v6  ;;  %v6013_v26 = vunpack.c.l.s8.bf16 %v5021_v14  ;;  %v6021_v21 = vunpack.c.h.s8.bf16 %v5021_v14  ;;  %v8684_v6 = vld [vmem:[%s9281_s9] sm:$0xff] }
 0x7b8   : > { %7388 = vmatprep.subr.bf16.mxu1 %v5933_v25  ;;  %v5018_v25 = vld [vmem:[%s9271_s25 + $0xf20] sm:$0xff] }
 0x7ba   : > { %7045 = vmatpush1.bf16.msra.mxu0 %v5930_v27  ;;  %v5020_v27 = vld [vmem:[%s9271_s25 + $0xf30] sm:$0xff] }
 0x7bb   : > { %7389 = vmatpush1.bf16.msra.mxu1 %v5932_v16  ;;  %7046 = vmatprep.subr.bf16.mxu0 %v5939_v47  ;;  %v6010_v16 = vunpack.c.l.s8.bf16 %v5018_v25  ;;  %v6012_v47 = vunpack.c.l.s8.bf16 %v5020_v27 }
 0x7bc   : > { %7390 = vmatprep.subr.bf16.mxu1 %v5941_v28  ;;  %v6019_v28 = vunpack.c.h.s8.bf16 %v5019_v43  ;;  %v7529_v43 = vrot.slane %v8684_v6, %v9372_v51 }
 0x7be   : > { %7047 = vmatpush1.bf16.msra.mxu0 %v5938_v30  ;;  %v5029_v30 = vld [vmem:[%s9271_s25 + $0xf78] sm:$0xff] }
 0x7bf   : > { %7391 = vmatpush1.bf16.msra.mxu1 %v5940_v31  ;;  %7059 = vmatprep.subr.bf16.mxu0 %v5947_v4  ;;  %v6018_v31 = vunpack.c.h.s8.bf16 %v5018_v25  ;;  %v6020_v4 = vunpack.c.h.s8.bf16 %v5020_v27  ;;  %v6029_v33 = vunpack.c.l.s8.bf16 %v5029_v30 }
 0x7c0   : > { %7403 = vmatprep.subr.bf16.mxu1 %v5949_v32  ;;  %v5026_v32 = vld [vmem:[%s9271_s25 + $0xf60] sm:$0xff] }
 0x7c1   : > { %7049 = vmatmul.mubr.bf16.vlgmr.msra.gmra.mrb[24].mxu0 %v9549_v63 }
 0x7c2   : > { %7393 = vmatmul.mubr.bf16.vlgmr.msra.gmra.mrb[24].mxu1 %v9549_v63  ;;  %7060 = vmatpush1.bf16.msra.mxu0 %v5946_v57  ;;  %v5964_v63 = vunpack.c.l.s8.bf16 %v4996_v38  ;;  %v5028_v57 = vld [vmem:[%s9271_s25 + $0xf70] sm:$0xff] }
 0x7c3   : > { %7091 = vmatprep.mubr.bf16.mxu0 %v9557_v10  ;;  %7404 = vmatpush1.bf16.msra.mxu1 %v5948_v15  ;;  %v6026_v15 = vunpack.c.l.s8.bf16 %v5026_v32 }
 0x7c4   : > { %7435 = vmatprep.mubr.bf16.mxu1 %v9557_v10  ;;  %7061 = vmatprep.subr.bf16.mxu0 %v5955_v59  ;;  %v5972_v10 = vunpack.c.h.s8.bf16 %v4996_v38  ;;  %v6028_v59 = vunpack.c.l.s8.bf16 %v5028_v57 }
 0x7c5   : > { %7405 = vmatprep.subr.bf16.mxu1 %v5957_v35  ;;  %v6037_v35 = vunpack.c.h.s8.bf16 %v5029_v30 }
 0x7c6   : > { %7062 = vmatpush1.bf16.msra.mxu0 %v5954_v36  ;;  %v5037_v36 = vld [vmem:[%s9271_s25 + $0xfb8] sm:$0xff] }
 0x7c7   : > { %7406 = vmatpush1.bf16.msra.mxu1 %v5956_v12  ;;  %7063 = vmatprep.subr.bf16.mxu0 %v5963_v61  ;;  %v6034_v12 = vunpack.c.h.s8.bf16 %v5026_v32  ;;  %v6036_v61 = vunpack.c.h.s8.bf16 %v5028_v57  ;;  %v6045_v38 = vunpack.c.l.s8.bf16 %v5037_v36  ;;  %v6053_v13 = vunpack.c.h.s8.bf16 %v5037_v36  ;;  %v7644_v36 = vld [vmem:[%s9867_s27 + $0x8] sm:$0xff] (%p10158_p9) }
 0x7c8   : > { %7407 = vmatprep.subr.bf16.mxu1 %v5965_v22  ;;  %v5034_v22 = vld [vmem:[%s9271_s25 + $0xfa0] sm:$0xff]  ;;  %7645 = vst [vmem:[%s7629_s14 + $0x8] sm:$0xff] (%p10158_p9), %v7644_v36 }
 0x7ca   : > { %7064 = vmatpush1.bf16.msra.mxu0 %v5962_v39  ;;  %v5036_v39 = vld [vmem:[%s9271_s25 + $0xfb0] sm:$0xff] }
 0x7cb   : > { %7408 = vmatpush1.bf16.msra.mxu1 %v5964_v63  ;;  %7065 = vmatprep.subr.bf16.mxu0 %v5971_v1  ;;  %v6042_v63 = vunpack.c.l.s8.bf16 %v5034_v22  ;;  %v6044_v1 = vunpack.c.l.s8.bf16 %v5036_v39 }
 0x7cc   : > { %7409 = vmatprep.subr.bf16.mxu1 %v5973_v19  ;;  %v6051_v19 = vunpack.c.h.s8.bf16 %v5035_v58  ;;  %v7642_v58 = vld [vmem:[%s9867_s27] sm:$0xff] (%p10158_p9) }
 0x7cd   : > { %7643 = vst [vmem:[%s7629_s14] sm:$0xff] (%p10158_p9), %v7642_v58 }
 0x7ce   : > { %7066 = vmatpush1.bf16.msra.mxu0 %v5970_v40  ;;  %v5045_v40 = vld [vmem:[%s9271_s25 + $0xff8] sm:$0xff] }
 0x7cf   : > { %7410 = vmatpush1.bf16.msra.mxu1 %v5972_v10  ;;  %7067 = vmatprep.subr.bf16.mxu0 %v5979_v41  ;;  %v6050_v10 = vunpack.c.h.s8.bf16 %v5034_v22  ;;  %v6052_v41 = vunpack.c.h.s8.bf16 %v5036_v39  ;;  %v6061_v18 = vunpack.c.l.s8.bf16 %v5045_v40  ;;  %v6069_v52 = vunpack.c.h.s8.bf16 %v5045_v40  ;;  %v7652_v22 = vld [vmem:[%s9867_s27 + $0x28] sm:$0xff] (%p10158_p9) }
 0x7d0   : > { %7411 = vmatprep.subr.bf16.mxu1 %v5981_v44  ;;  %v5042_v44 = vld [vmem:[%s9271_s25 + $0xfe0] sm:$0xff]  ;;  %7653 = vst [vmem:[%s7629_s14 + $0x48] sm:$0xff] (%p10158_p9), %v7652_v22 }
 0x7d1   : > { %v6066_v55 = vunpack.c.h.s8.bf16 %v5042_v44 }
 0x7d2   : > { %7068 = vmatpush1.bf16.msra.mxu0 %v5978_v45  ;;  %v5044_v45 = vld [vmem:[%s9271_s25 + $0xff0] sm:$0xff] }
 0x7d3   : > { %7412 = vmatpush1.bf16.msra.mxu1 %v5980_v54  ;;  %7069 = vmatprep.subr.bf16.mxu0 %v5987_v60  ;;  %v6058_v54 = vunpack.c.l.s8.bf16 %v5042_v44  ;;  %v6060_v60 = vunpack.c.l.s8.bf16 %v5044_v45 }
 0x7d4   : > { %7413 = vmatprep.subr.bf16.mxu1 %v5989_v49  ;;  %v6067_v49 = vunpack.c.h.s8.bf16 %v5043_v17 }
 0x7d6   : > { %7070 = vmatpush1.bf16.msra.mxu0 %v5986_v62  ;;  %v6068_v62 = vunpack.c.h.s8.bf16 %v5044_v45 }
 0x7d7   : > { %7414 = vmatpush1.bf16.msra.mxu1 %v5988_v2  ;;  %7071 = vmatprep.subr.bf16.mxu0 %v5995_v3  ;;  %v8683_v2 = vld [vmem:[%s9278_s2] sm:$0xff] }
 0x7d8   : > { %7415 = vmatprep.subr.bf16.mxu1 %v5997_v5  ;;  %v7467_v3 = vrot.slane %v8683_v2, %v9366_v46  ;;  %v7475_v56 = vrot.slane %v8683_v2, %v9369_v50  ;;  %v7471_v5 = vrot.slane %v8683_v2, %v9372_v51 }
 0x7da   : > { %7072 = vmatpush1.bf16.msra.mxu0 %v5994_v8  ;;  %v7525_v8 = vrot.slane %v8684_v6, %v9366_v46 }
 0x7db   : > { %7416 = vmatpush1.bf16.msra.mxu1 %v5996_v9  ;;  %7073 = vmatprep.subr.bf16.mxu0 %v6003_v11  ;;  %v7479_v9 = vrot.slane %v8683_v2, %v9375_v53 }
 0x7dc   : > { %7417 = vmatprep.subr.bf16.mxu1 %v6005_v0  ;;  %v7533_v0 = vrot.slane %v8684_v6, %v9369_v50 }
 0x7de   : > { %7074 = vmatpush1.bf16.msra.mxu0 %v6002_v20 }
 0x7df   : > { %7418 = vmatpush1.bf16.msra.mxu1 %v6004_v23  ;;  %7075 = vmatprep.subr.bf16.mxu0 %v6011_v24  ;;  %v7537_v23 = vrot.slane %v8684_v6, %v9375_v53 }
 0x7e0   : > { %7419 = vmatprep.subr.bf16.mxu1 %v6013_v26 }
 0x7e2   : > { %7076 = vmatpush1.bf16.msra.mxu0 %v6010_v16 }
 0x7e3   : > { %7420 = vmatpush1.bf16.msra.mxu1 %v6012_v47  ;;  %7077 = vmatprep.subr.bf16.mxu0 %v6019_v28 }
 0x7e4   : > { %7421 = vmatprep.subr.bf16.mxu1 %v6021_v21 }
 0x7e6   : > { %7078 = vmatpush1.bf16.msra.mxu0 %v6018_v31 }
 0x7e7   : > { %7422 = vmatpush1.bf16.msra.mxu1 %v6020_v4  ;;  %7079 = vmatprep.subr.bf16.mxu0 %v6027_v48 }
 0x7e8   : > { %7423 = vmatprep.subr.bf16.mxu1 %v6029_v33 }
 0x7ea   : > { %7080 = vmatpush1.bf16.msra.mxu0 %v6026_v15 }
 0x7eb   : > { %7424 = vmatpush1.bf16.msra.mxu1 %v6028_v59  ;;  %7081 = vmatprep.subr.bf16.mxu0 %v6035_v34 }
 0x7ec   : > { %7425 = vmatprep.subr.bf16.mxu1 %v6037_v35 }
 0x7ee   : > { %7082 = vmatpush1.bf16.msra.mxu0 %v6034_v12 }
 0x7ef   : > { %7426 = vmatpush1.bf16.msra.mxu1 %v6036_v61  ;;  %7083 = vmatprep.subr.bf16.mxu0 %v6043_v37  ;;  %v7650_v37 = vld [vmem:[%s9867_s27 + $0x20] sm:$0xff] (%p10158_p9) }
 0x7f0   : > { %7427 = vmatprep.subr.bf16.mxu1 %v6045_v38  ;;  %7651 = vst [vmem:[%s7629_s14 + $0x40] sm:$0xff] (%p10158_p9), %v7650_v37 }
 0x7f2   : > { %7084 = vmatpush1.bf16.msra.mxu0 %v6042_v63 }
 0x7f3   : > { %7428 = vmatpush1.bf16.msra.mxu1 %v6044_v1  ;;  %7085 = vmatprep.subr.bf16.mxu0 %v6051_v19 }
 0x7f4   : > { %7429 = vmatprep.subr.bf16.mxu1 %v6053_v13 }
 0x7f6   : > { %7086 = vmatpush1.bf16.msra.mxu0 %v6050_v10 }
 0x7f7   : > { %7430 = vmatpush1.bf16.msra.mxu1 %v6052_v41  ;;  %7087 = vmatprep.subr.bf16.mxu0 %v6059_v42 }
 0x7f8   : > { %7431 = vmatprep.subr.bf16.mxu1 %v6061_v18 }
 0x7fa   : > { %7088 = vmatpush1.bf16.msra.mxu0 %v6058_v54 }
 0x7fb   : > { %7432 = vmatpush1.bf16.msra.mxu1 %v6060_v60  ;;  %7089 = vmatprep.subr.bf16.mxu0 %v6067_v49 }
 0x7fc   : > { %7433 = vmatprep.subr.bf16.mxu1 %v6069_v52 }
 0x7fe   : > { %7090 = vmatpush1.bf16.msra.mxu0 %v6066_v55 }
 0x7ff   : > { %7434 = vmatpush1.bf16.msra.mxu1 %v6068_v62 }
 0x801   : > { %7092 = vmatmul.mubr.bf16.vlgmr.msra.gmra.mrb[24].mxu0 %v9552_v7 }
 0x802   : > { %7436 = vmatmul.mubr.bf16.vlgmr.msra.gmra.mrb[24].mxu1 %v9552_v7 }
 0x8d4   : > { %v7093_v11 = vpop.f32.mrb[24].mxu0 }
 0x8d5   : > { %v7492_v14 = vmul.f32 %v7467_v3, %v7093_v11  ;;  %v7437_v20 = vpop.f32.mrb[24].mxu1  ;;  %v7095_v7 = vpop.f32.mrb[25].mxu0 }
 0x8d6   : > { %v7494_v24 = vmul.f32 %v7475_v56, %v7437_v20  ;;  %v7493_v25 = vmul.f32 %v7471_v5, %v7095_v7  ;;  %v7439_v26 = vpop.f32.mrb[25].mxu1  ;;  %v7097_v27 = vpop.f32.mrb[26].mxu0 }
 0x8d7   : > { %v7550_v16 = vadd.f32 %v7525_v8, %v7492_v14  ;;  %v7495_v47 = vmul.f32 %v7479_v9, %v7439_v26  ;;  %v7500_v28 = vmul.f32 %v7467_v3, %v7097_v27  ;;  %v7441_v46 = vpop.f32.mrb[26].mxu1  ;;  %v7099_v21 = vpop.f32.mrb[27].mxu0 }
 0x8d8   : > { %v7552_v29 = vadd.f32 %v7533_v0, %v7494_v24  ;;  %v7551_v50 = vadd.f32 %v7529_v43, %v7493_v25  ;;  %v7502_v51 = vmul.f32 %v7475_v56, %v7441_v46  ;;  %v7501_v30 = vmul.f32 %v7471_v5, %v7099_v21  ;;  %v7443_v31 = vpop.f32.mrb[27].mxu1 }
 0x8d9   : > { %v7553_v4 = vadd.f32 %v7537_v23, %v7495_v47  ;;  %v7558_v53 = vadd.f32 %v7525_v8, %v7500_v28  ;;  %v7503_v48 = vmul.f32 %v7479_v9, %v7443_v31  ;;  %7624 = sbr.rel (!%p10158_p9) target bundleno = 2280 (0x8e8), region = 76 }
 0x8da   : > { %v8381_v32 = vpack.c.bf16 %v7551_v50, %v7550_v16  ;;  %v7560_v33 = vadd.f32 %v7533_v0, %v7502_v51  ;;  %v7559_v57 = vadd.f32 %v7529_v43, %v7501_v30 }
 0x8db   : > { %v8382_v15 = vpack.c.bf16 %v7553_v4, %v7552_v29  ;;  %v7561_v59 = vadd.f32 %v7537_v23, %v7503_v48 }
 0x8dc   : > { %7612 = vst [vmem:[%s9867_s27 + $0x10] sm:$0xff] %v8381_v32  ;;  %v8385_v34 = vpack.c.bf16 %v7559_v57, %v7558_v53 }
 0x8dd   : > { %7613 = vst [vmem:[%s9867_s27 + $0x18] sm:$0xff] %v8382_v15  ;;  %v8386_v35 = vpack.c.bf16 %v7561_v59, %v7560_v33 }
 0x8de   : > { %7616 = vst [vmem:[%s9867_s27 + $0x30] sm:$0xff] %v8385_v34 }
 0x8df   : > { %7617 = vst [vmem:[%s9867_s27 + $0x38] sm:$0xff] %v8386_v35 }
 0x8e3   : > { %v7646_v12 = vld [vmem:[%s9867_s27 + $0x10] sm:$0xff] }
 0x8e4   : > { %v7648_v61 = vld [vmem:[%s9867_s27 + $0x18] sm:$0xff]  ;;  %7647 = vst [vmem:[%s7629_s14 + $0x10] sm:$0xff] %v7646_v12 }
 0x8e5   : > { %v7654_v38 = vld [vmem:[%s9867_s27 + $0x30] sm:$0xff]  ;;  %7649 = vst [vmem:[%s7629_s14 + $0x18] sm:$0xff] %v7648_v61 }
 0x8e6   : > { %v7656_v39 = vld [vmem:[%s9867_s27 + $0x38] sm:$0xff]  ;;  %7655 = vst [vmem:[%s7629_s14 + $0x50] sm:$0xff] %v7654_v38 }
 0x8e7   : > { %7657 = vst [vmem:[%s7629_s14 + $0x58] sm:$0xff] %v7656_v39 }
 0x8e8 PF: > { %s10162_s4 = sld [smem:[#allocation20_spill]]  ;;  %s10163_s24 = sld [smem:[#allocation17_spill]] }
 0x8e9   : > { %s10164_s2 = sld [smem:[#allocation25_spill]]  ;;  %s10165_s17 = sld [smem:[#allocation23_spill]] }
 0x8ea   : > { %s10166_s9 = sld [smem:[#allocation24_spill]]  ;;  %s10167_s25 = smov %s8917_s26 }
 0x8eb   : > { %s10169_s27 = smov %s8929_s29  ;;  %s10170_s28 = smov %s8933_s30 }
 0x8ee   : > { %s25_s8 = sadd.s32 1, %s10162_s4  }
 0x8ef   : > { %p22_p1 = scmp.ge.s32.totalorder %s25_s8, 8   ;;  %s10168_s26 = smov %s10164_s2 }
 0x8f0   : > { %s10171_s29 = smov %s10165_s17  ;;  %s10172_s30 = smov %s10166_s9 }
 0x8f1   :  { %24 = sbr.rel (!%p22_p1) target bundleno = 14 (0xe), region = 148 }
 0x8f8   :  { %7673 = vsyncpa [#allocation3], 1 }
 0x8f9   :  { %7675 = vsyncpa [#allocation3 + $0x1], 1 }
 0x8fa   :  { %7676 = vsyncpa [#allocation5], 1 }
 0x8fb   :  { %7677 = vsyncpa [#allocation8], 1 }
 0x8fc   :  { %7679 = vsyncpa [#allocation8 + $0x1], 1 }
 0x8fd   :  { %7680 = vsyncpa [#allocation11], 1 }
 0x8fe   :  { %7682 = vsyncpa [#allocation11 + $0x1], 1 }

</bundles_post_ra>
